<compile_context>
chip_gen: v5e
topology: v5e:2x2
jax: 0.10.0
libtpu: 0.0.40
codegen_flags: <defaults>
</compile_context>

<pallas_src>
import functools

import jax
import jax.numpy as jnp
from jax.experimental import pallas as pl
from jax.experimental.pallas import tpu as pltpu

EPS = 1e-8
NUM_SPKS = 2
_LANE = 128     # vreg lane width
_SUB = 8        # vreg sublane height
_CW = 512       # lane-chunk width per inner iteration (4 vregs / stream)
_LT_MAX = 4096  # max lane tile: 16*bt*lt = 8 MiB/step (f32) at bt=128
_BT_MAX = 128   # max sublane tile


def _round_up(x, m):
    return ((x + m - 1) // m) * m


def _fold_lanes(carry, term):
    """carry: (sh, 128) f32; term: (sh, w) f32 with w % 128 == 0 (static)."""
    for k in range(0, term.shape[-1], _LANE):
        carry = carry + term[:, k:k + _LANE]
    return carry


def _pit_sisnr_kernel(pred_ref, s1_ref, s2_ref, out_ref, acc_ref, *,
                      inv_length, lt, sh, need_mask, valid_len):
    """pred_ref: (2, bt, lt); s1_ref/s2_ref: (bt, lt); out_ref: (bt, 1) f32;
    acc_ref: (12, bt, 128) f32 lane-partial moment accumulators (persist across
    the L reduction grid axis).

    Moment slots: 0,1: sum p_s | 2,3: sum p_s^2 | 4,5: sum r_t | 6,7: sum r_t^2
                  8,9: sum p0*r_t | 10,11: sum p1*r_t
    """
    j = pl.program_id(1)
    bt = out_ref.shape[0]
    n_strips = max(1, bt // sh)
    p0_ref = pred_ref.at[0]
    p1_ref = pred_ref.at[1]

    @pl.when(j == 0)
    def _init():
        acc_ref[...] = jnp.zeros_like(acc_ref)

    chunk_offs = [(off, min(_CW, lt - off)) for off in range(0, lt, _CW)]
    if need_mask:
        lane_iota = jax.lax.broadcasted_iota(jnp.int32, (sh, _CW), 1)
        tile_base = j * lt

    def process_strip(row0):
        rows = pl.ds(row0, sh)
        zero = jnp.zeros((sh, _LANE), jnp.float32)
        accs = [zero] * 12
        for off, w in chunk_offs:
            cols = pl.ds(off, w)
            # one load per input vreg; it feeds every product/sum below
            p0 = p0_ref[rows, cols].astype(jnp.float32)
            p1 = p1_ref[rows, cols].astype(jnp.float32)
            r0 = s1_ref[rows, cols].astype(jnp.float32)
            r1 = s2_ref[rows, cols].astype(jnp.float32)
            if need_mask:
                thresh = valid_len - tile_base - off        # traced i32 scalar
                m = lane_iota[:, :w] < thresh
                p0 = jnp.where(m, p0, 0.0)
                p1 = jnp.where(m, p1, 0.0)
                r0 = jnp.where(m, r0, 0.0)
                r1 = jnp.where(m, r1, 0.0)
            terms = (p0, p1, p0 * p0, p1 * p1,
                     r0, r1, r0 * r0, r1 * r1,
                     p0 * r0, p0 * r1, p1 * r0, p1 * r1)
            for idx in range(12):
                accs[idx] = _fold_lanes(accs[idx], terms[idx])
        for idx in range(12):
            acc_ref[idx, rows, :] = acc_ref[idx, rows, :] + accs[idx]

    if n_strips == 1:
        process_strip(0)
    else:
        def strip_body(r, carry):
            process_strip(pl.multiple_of(r * _SUB, _SUB))
            return carry
        jax.lax.fori_loop(0, n_strips, strip_body, 0)

    @pl.when(j == pl.num_programs(1) - 1)
    def _finalize():
        def red(idx):
            return jnp.sum(acc_ref[idx], axis=-1, keepdims=True)   # (bt, 1)

        inv_len = jnp.float32(inv_length)
        sp = (red(0), red(1))
        spp = (red(2), red(3))
        sr = (red(4), red(5))
        srr = (red(6), red(7))
        spr = ((red(8), red(9)), (red(10), red(11)))

        # centered second moments: ||x - mean(x)||^2 = sum x^2 - (sum x)^2 / L
        pred_n2 = tuple(
            jnp.maximum(spp[s] - sp[s] * sp[s] * inv_len, 0.0) for s in range(NUM_SPKS))

        cols = []
        for t in range(NUM_SPKS):                       # reference index
            ref_n2 = jnp.maximum(srr[t] - sr[t] * sr[t] * inv_len, 0.0)
            inv_den = 1.0 / (ref_n2 + EPS)              # 1 / (||ref_mn||^2 + eps)
            col = None
            for s in range(NUM_SPKS):                   # prediction index (summed)
                dot = spr[s][t] - sp[s] * sr[t] * inv_len
                dot2 = dot * dot
                t_n2 = dot2 * ref_n2 * inv_den * inv_den             # ||t||^2
                e_n2 = jnp.maximum(
                    pred_n2[s] - 2.0 * dot2 * inv_den + t_n2, 0.0)   # ||pred_mn - t||^2
                ratio = jnp.sqrt(t_n2) / jnp.sqrt(e_n2)
                v = 20.0 * jnp.log10(ratio + 2.0 * EPS)              # eps + ratio + eps
                col = v if col is None else col + v
            cols.append(col)

        out_ref[...] = jnp.maximum(cols[0], cols[1]).astype(out_ref.dtype)


def pit_si_snr_loss(outputs, s1, s2):
    """outputs: (num_spks=2, B, L); s1, s2: (B, L).  Returns {'loss': scalar}."""
    num_spks, B, L = outputs.shape
    assert num_spks == NUM_SPKS
    assert s1.shape == (B, L) and s2.shape == (B, L)

    # Tiny-L only: zero-pad the lane dim up to one vreg width.  Zero samples are
    # moment-neutral because the kernel divides by the true L.
    if L < _LANE:
        pad = _LANE - L
        outputs = jnp.pad(outputs, ((0, 0), (0, 0), (0, pad)))
        s1 = jnp.pad(s1, ((0, 0), (0, pad)))
        s2 = jnp.pad(s2, ((0, 0), (0, pad)))
    lk = max(L, _LANE)

    # Lane (reduction) tile: largest aligned tile <= min(lk, 4096); the L tail is
    # handled with a cdiv grid + in-kernel masking, never a full-array pad copy.
    if lk >= _LT_MAX:
        lt = _LT_MAX
    elif lk >= _CW:
        lt = (lk // _CW) * _CW
    else:
        lt = (lk // _LANE) * _LANE
    n_l = pl.cdiv(lk, lt)
    need_mask = (lk % lt) != 0

    # Sublane (parallel) tile: multiple of 8; force >= 2 blocks when B >= 16 so the
    # "parallel" axis can shard across both v7x TensorCores.
    if B <= _SUB:
        bt = B
        sh = B
    else:
        bt = min(_BT_MAX, _round_up((B + 1) // 2, _SUB))
        sh = _SUB
    n_b = pl.cdiv(B, bt)
    # TODO(synk): for n_b == 1 on v7x (B < 16) a 2-way "parallel" split of the L
    # reduction (per-half moment outputs combined in the wrapper) would keep the
    # second TensorCore busy; not implemented here.

    # Double-buffered streamed inputs + lane-partial accumulator + headroom.
    window_bytes = 4 * bt * lt * jnp.dtype(outputs.dtype).itemsize
    vmem_limit = int(min(96 * 1024 * 1024,
                         max(32 * 1024 * 1024, 2 * window_bytes + (8 << 20))))

    kernel = functools.partial(
        _pit_sisnr_kernel,
        inv_length=1.0 / L, lt=lt, sh=sh, need_mask=need_mask, valid_len=L)

    max_sisnr = pl.pallas_call(
        kernel,
        out_shape=jax.ShapeDtypeStruct((B, 1), jnp.float32),
        grid_spec=pltpu.PrefetchScalarGridSpec(
            num_scalar_prefetch=0,
            grid=(n_b, n_l),
            in_specs=[
                pl.BlockSpec((NUM_SPKS, bt, lt), lambda i, j: (0, i, j)),
                pl.BlockSpec((bt, lt), lambda i, j: (i, j)),
                pl.BlockSpec((bt, lt), lambda i, j: (i, j)),
            ],
            out_specs=pl.BlockSpec((bt, 1), lambda i, j: (i, 0)),
            scratch_shapes=[pltpu.VMEM((12, bt, _LANE), jnp.float32)],
        ),
        compiler_params=pltpu.CompilerParams(
            dimension_semantics=("parallel", "arbitrary"),
            vmem_limit_bytes=vmem_limit,
        ),
    )(outputs, s1, s2)

    return {"loss": -jnp.mean(max_sisnr)}


def _reference_loss(outputs, s1, s2, eps=EPS):
    # Pure-JAX reference mirroring the PyTorch module exactly (two-pass, centered).
    def sisnr(pred, ref):
        pred = pred.astype(jnp.float32)
        ref = ref.astype(jnp.float32)
        pred_mn = pred - jnp.mean(pred, axis=-1, keepdims=True)
        ref_mn = ref - jnp.mean(ref, axis=-1, keepdims=True)
        dot = jnp.sum(pred_mn * ref_mn, axis=-1, keepdims=True)
        ref_norm = jnp.linalg.norm(ref_mn, axis=-1, keepdims=True)
        t = dot * ref_mn / (ref_norm ** 2 + eps)
        return 20.0 * jnp.log10(
            eps + jnp.linalg.norm(t, axis=-1) / jnp.linalg.norm(pred_mn - t, axis=-1) + eps)

    egs = jnp.stack([s1, s2])
    mat = jnp.stack(
        [jnp.stack([sisnr(outputs[s], egs[t]) for t in range(2)]) for s in range(2)])
    max_sisnr = jnp.max(jnp.sum(mat, axis=0), axis=0)
    return -jnp.mean(max_sisnr)


if __name__ == "__main__":
    # B=18 -> two B-blocks (16 + partial) and a 2-strip inner loop;
    # L=6000 -> two L-steps (4096 + masked tail, not a multiple of 128).
    B, L = 18, 6000
    key = jax.random.PRNGKey(0)
    ks = jax.random.split(key, 4)
    s1 = jax.random.normal(ks[0], (B, L), dtype=jnp.float32)
    s2 = jax.random.normal(ks[1], (B, L), dtype=jnp.float32)
    # Noisy, permuted estimates of the references so the PIT max is exercised.
    outputs = jnp.stack([
        s2 + 0.3 * jax.random.normal(ks[2], (B, L), dtype=jnp.float32),
        s1 + 0.3 * jax.random.normal(ks[3], (B, L), dtype=jnp.float32),
    ])

    result = pit_si_snr_loss(outputs, s1, s2)
    loss = jax.block_until_ready(result["loss"])

    ref = jax.block_until_ready(_reference_loss(outputs, s1, s2))
    assert jnp.allclose(loss, ref, rtol=1e-3, atol=1e-3), (loss, ref)

    print("KERNEL_OK")
</pallas_src>

<mosaic_0001>
module attributes {stable_mosaic.version = 11 : i64} {
  func.func @_pit_sisnr_kernel(%arg0: i32, %arg1: i32, %arg2: memref<2x16x4096xf32, #tpu.memory_space<vmem>>, %arg3: memref<16x4096xf32, #tpu.memory_space<vmem>>, %arg4: memref<16x4096xf32, #tpu.memory_space<vmem>>, %arg5: memref<16x1xf32, #tpu.memory_space<vmem>>, %arg6: memref<12x16x128xf32, #tpu.memory_space<vmem>>) attributes {dimension_semantics = [#tpu.dimension_semantics<parallel>, #tpu.dimension_semantics<arbitrary>], iteration_bounds = array<i64: 2, 2>, scalar_prefetch = 0 : i64, scratch_operands = 1 : i64, tpu.core_type = #tpu.core_type<tc>, window_params = [{transform_indices = @transform_0, window_bounds = array<i64: 2, 16, 4096>}, {transform_indices = @transform_1, window_bounds = array<i64: 16, 4096>}, {transform_indices = @transform_2, window_bounds = array<i64: 16, 4096>}, {transform_indices = @transform_3, window_bounds = array<i64: 16, 1>}]} {
    %c0_i32 = arith.constant 0 : i32
    %0 = arith.cmpi eq, %arg1, %c0_i32 : i32
    %1 = arith.extui %0 : i1 to i32
    %c0_i32_0 = arith.constant 0 : i32
    %2 = arith.cmpi ne, %1, %c0_i32_0 : i32
    scf.if %2 {
      %cst = arith.constant 0.000000e+00 : f32
      %9 = vector.broadcast %cst : f32 to vector<12x16x128xf32>
      %c0 = arith.constant 0 : index
      %c0_7 = arith.constant 0 : index
      %c0_8 = arith.constant 0 : index
      %10 = vector.load %arg6[%c0, %c0_7, %c0_8] : memref<12x16x128xf32, #tpu.memory_space<vmem>>, vector<12x16x128xf32>
      tpu.vector_store %arg6[%c0, %c0_7, %c0_8], %9 {strides = array<i32>} : memref<12x16x128xf32, #tpu.memory_space<vmem>>, vector<12x16x128xf32>,
    } else {
    }
    %3 = tpu.iota {dimensions = array<i32: 1>} : vector<8x512xi32>
    %c4096_i32 = arith.constant 4096 : i32
    %4 = arith.muli %arg1, %c4096_i32 : i32
    %c0_i32_1 = arith.constant 0 : i32
    %c1_i32 = arith.constant 1 : i32
    %c0_i32_2 = arith.constant 0 : i32
    %c2_i32 = arith.constant 2 : i32
    %5 = arith.addi %c0_i32_2, %c2_i32 : i32
    %c1_i32_3 = arith.constant 1 : i32
    scf.for %arg7 = %c0_i32_2 to %5 step %c1_i32_3  : i32 {
      %c8_i32 = arith.constant 8 : i32
      %9 = arith.muli %arg7, %c8_i32 : i32
      %10 = tpu.assume_multiple %9, 8 : i32
      %cst = arith.constant 0.000000e+00 : f32
      %11 = vector.broadcast %cst : f32 to vector<8x128xf32>
      %c0_i32_7 = arith.constant 0 : i32
      %c0_i32_8 = arith.constant 0 : i32
      %12 = tpu.memref_slice %arg2[%c0_i32_1, %c0_i32_7, %c0_i32_8] : memref<2x16x4096xf32, #tpu.memory_space<vmem>> -> memref<1x16x4096xf32, #tpu.memory_space<vmem>>
      %13 = tpu.memref_squeeze %12 : memref<1x16x4096xf32, #tpu.memory_space<vmem>> -> memref<16x4096xf32, #tpu.memory_space<vmem>>
      %14 = arith.index_cast %10 : i32 to index
      %c0 = arith.constant 0 : index
      %15 = vector.load %13[%14, %c0] : memref<16x4096xf32, #tpu.memory_space<vmem>>, vector<8x512xf32>
      %c0_i32_9 = arith.constant 0 : i32
      %c0_i32_10 = arith.constant 0 : i32
      %16 = tpu.memref_slice %arg2[%c1_i32, %c0_i32_9, %c0_i32_10] : memref<2x16x4096xf32, #tpu.memory_space<vmem>> -> memref<1x16x4096xf32, #tpu.memory_space<vmem>>
      %17 = tpu.memref_squeeze %16 : memref<1x16x4096xf32, #tpu.memory_space<vmem>> -> memref<16x4096xf32, #tpu.memory_space<vmem>>
      %18 = arith.index_cast %10 : i32 to index
      %c0_11 = arith.constant 0 : index
      %19 = vector.load %17[%18, %c0_11] : memref<16x4096xf32, #tpu.memory_space<vmem>>, vector<8x512xf32>
      %20 = arith.index_cast %10 : i32 to index
      %c0_12 = arith.constant 0 : index
      %21 = vector.load %arg3[%20, %c0_12] : memref<16x4096xf32, #tpu.memory_space<vmem>>, vector<8x512xf32>
      %22 = arith.index_cast %10 : i32 to index
      %c0_13 = arith.constant 0 : index
      %23 = vector.load %arg4[%22, %c0_13] : memref<16x4096xf32, #tpu.memory_space<vmem>>, vector<8x512xf32>
      %c6000_i32 = arith.constant 6000 : i32
      %24 = arith.subi %c6000_i32, %4 : i32
      %c0_i32_14 = arith.constant 0 : i32
      %25 = arith.subi %24, %c0_i32_14 : i32
      %26 = vector.broadcast %25 : i32 to vector<8x512xi32>
      %27 = arith.cmpi slt, %3, %26 : vector<8x512xi32>
      %cst_15 = arith.constant 0.000000e+00 : f32
      %28 = vector.broadcast %cst_15 : f32 to vector<8x512xf32>
      %29 = arith.select %27, %15, %28 : vector<8x512xi1>, vector<8x512xf32>
      %cst_16 = arith.constant 0.000000e+00 : f32
      %30 = vector.broadcast %cst_16 : f32 to vector<8x512xf32>
      %31 = arith.select %27, %19, %30 : vector<8x512xi1>, vector<8x512xf32>
      %cst_17 = arith.constant 0.000000e+00 : f32
      %32 = vector.broadcast %cst_17 : f32 to vector<8x512xf32>
      %33 = arith.select %27, %21, %32 : vector<8x512xi1>, vector<8x512xf32>
      %cst_18 = arith.constant 0.000000e+00 : f32
      %34 = vector.broadcast %cst_18 : f32 to vector<8x512xf32>
      %35 = arith.select %27, %23, %34 : vector<8x512xi1>, vector<8x512xf32>
      %36 = arith.mulf %29, %29 : vector<8x512xf32>
      %37 = arith.mulf %31, %31 : vector<8x512xf32>
      %38 = arith.mulf %33, %33 : vector<8x512xf32>
      %39 = arith.mulf %35, %35 : vector<8x512xf32>
      %40 = arith.mulf %29, %33 : vector<8x512xf32>
      %41 = arith.mulf %29, %35 : vector<8x512xf32>
      %42 = arith.mulf %31, %33 : vector<8x512xf32>
      %43 = arith.mulf %31, %35 : vector<8x512xf32>
      %44 = vector.extract_strided_slice %29 {offsets = [0, 0], sizes = [8, 128], strides = [1, 1]} : vector<8x512xf32> to vector<8x128xf32>
      %45 = arith.addf %11, %44 : vector<8x128xf32>
      %46 = vector.extract_strided_slice %29 {offsets = [0, 128], sizes = [8, 128], strides = [1, 1]} : vector<8x512xf32> to vector<8x128xf32>
      %47 = arith.addf %45, %46 : vector<8x128xf32>
      %48 = vector.extract_strided_slice %29 {offsets = [0, 256], sizes = [8, 128], strides = [1, 1]} : vector<8x512xf32> to vector<8x128xf32>
      %49 = arith.addf %47, %48 : vector<8x128xf32>
      %50 = vector.extract_strided_slice %29 {offsets = [0, 384], sizes = [8, 128], strides = [1, 1]} : vector<8x512xf32> to vector<8x128xf32>
      %51 = arith.addf %49, %50 : vector<8x128xf32>
      %52 = vector.extract_strided_slice %31 {offsets = [0, 0], sizes = [8, 128], strides = [1, 1]} : vector<8x512xf32> to vector<8x128xf32>
      %53 = arith.addf %11, %52 : vector<8x128xf32>
      %54 = vector.extract_strided_slice %31 {offsets = [0, 128], sizes = [8, 128], strides = [1, 1]} : vector<8x512xf32> to vector<8x128xf32>
      %55 = arith.addf %53, %54 : vector<8x128xf32>
      %56 = vector.extract_strided_slice %31 {offsets = [0, 256], sizes = [8, 128], strides = [1, 1]} : vector<8x512xf32> to vector<8x128xf32>
      %57 = arith.addf %55, %56 : vector<8x128xf32>
      %58 = vector.extract_strided_slice %31 {offsets = [0, 384], sizes = [8, 128], strides = [1, 1]} : vector<8x512xf32> to vector<8x128xf32>
      %59 = arith.addf %57, %58 : vector<8x128xf32>
      %60 = vector.extract_strided_slice %36 {offsets = [0, 0], sizes = [8, 128], strides = [1, 1]} : vector<8x512xf32> to vector<8x128xf32>
      %61 = arith.addf %11, %60 : vector<8x128xf32>
      %62 = vector.extract_strided_slice %36 {offsets = [0, 128], sizes = [8, 128], strides = [1, 1]} : vector<8x512xf32> to vector<8x128xf32>
      %63 = arith.addf %61, %62 : vector<8x128xf32>
      %64 = vector.extract_strided_slice %36 {offsets = [0, 256], sizes = [8, 128], strides = [1, 1]} : vector<8x512xf32> to vector<8x128xf32>
      %65 = arith.addf %63, %64 : vector<8x128xf32>
      %66 = vector.extract_strided_slice %36 {offsets = [0, 384], sizes = [8, 128], strides = [1, 1]} : vector<8x512xf32> to vector<8x128xf32>
      %67 = arith.addf %65, %66 : vector<8x128xf32>
      %68 = vector.extract_strided_slice %37 {offsets = [0, 0], sizes = [8, 128], strides = [1, 1]} : vector<8x512xf32> to vector<8x128xf32>
      %69 = arith.addf %11, %68 : vector<8x128xf32>
      %70 = vector.extract_strided_slice %37 {offsets = [0, 128], sizes = [8, 128], strides = [1, 1]} : vector<8x512xf32> to vector<8x128xf32>
      %71 = arith.addf %69, %70 : vector<8x128xf32>
      %72 = vector.extract_strided_slice %37 {offsets = [0, 256], sizes = [8, 128], strides = [1, 1]} : vector<8x512xf32> to vector<8x128xf32>
      %73 = arith.addf %71, %72 : vector<8x128xf32>
      %74 = vector.extract_strided_slice %37 {offsets = [0, 384], sizes = [8, 128], strides = [1, 1]} : vector<8x512xf32> to vector<8x128xf32>
      %75 = arith.addf %73, %74 : vector<8x128xf32>
      %76 = vector.extract_strided_slice %33 {offsets = [0, 0], sizes = [8, 128], strides = [1, 1]} : vector<8x512xf32> to vector<8x128xf32>
      %77 = arith.addf %11, %76 : vector<8x128xf32>
      %78 = vector.extract_strided_slice %33 {offsets = [0, 128], sizes = [8, 128], strides = [1, 1]} : vector<8x512xf32> to vector<8x128xf32>
      %79 = arith.addf %77, %78 : vector<8x128xf32>
      %80 = vector.extract_strided_slice %33 {offsets = [0, 256], sizes = [8, 128], strides = [1, 1]} : vector<8x512xf32> to vector<8x128xf32>
      %81 = arith.addf %79, %80 : vector<8x128xf32>
      %82 = vector.extract_strided_slice %33 {offsets = [0, 384], sizes = [8, 128], strides = [1, 1]} : vector<8x512xf32> to vector<8x128xf32>
      %83 = arith.addf %81, %82 : vector<8x128xf32>
      %84 = vector.extract_strided_slice %35 {offsets = [0, 0], sizes = [8, 128], strides = [1, 1]} : vector<8x512xf32> to vector<8x128xf32>
      %85 = arith.addf %11, %84 : vector<8x128xf32>
      %86 = vector.extract_strided_slice %35 {offsets = [0, 128], sizes = [8, 128], strides = [1, 1]} : vector<8x512xf32> to vector<8x128xf32>
      %87 = arith.addf %85, %86 : vector<8x128xf32>
      %88 = vector.extract_strided_slice %35 {offsets = [0, 256], sizes = [8, 128], strides = [1, 1]} : vector<8x512xf32> to vector<8x128xf32>
      %89 = arith.addf %87, %88 : vector<8x128xf32>
      %90 = vector.extract_strided_slice %35 {offsets = [0, 384], sizes = [8, 128], strides = [1, 1]} : vector<8x512xf32> to vector<8x128xf32>
      %91 = arith.addf %89, %90 : vector<8x128xf32>
      %92 = vector.extract_strided_slice %38 {offsets = [0, 0], sizes = [8, 128], strides = [1, 1]} : vector<8x512xf32> to vector<8x128xf32>
      %93 = arith.addf %11, %92 : vector<8x128xf32>
      %94 = vector.extract_strided_slice %38 {offsets = [0, 128], sizes = [8, 128], strides = [1, 1]} : vector<8x512xf32> to vector<8x128xf32>
      %95 = arith.addf %93, %94 : vector<8x128xf32>
      %96 = vector.extract_strided_slice %38 {offsets = [0, 256], sizes = [8, 128], strides = [1, 1]} : vector<8x512xf32> to vector<8x128xf32>
      %97 = arith.addf %95, %96 : vector<8x128xf32>
      %98 = vector.extract_strided_slice %38 {offsets = [0, 384], sizes = [8, 128], strides = [1, 1]} : vector<8x512xf32> to vector<8x128xf32>
      %99 = arith.addf %97, %98 : vector<8x128xf32>
      %100 = vector.extract_strided_slice %39 {offsets = [0, 0], sizes = [8, 128], strides = [1, 1]} : vector<8x512xf32> to vector<8x128xf32>
      %101 = arith.addf %11, %100 : vector<8x128xf32>
      %102 = vector.extract_strided_slice %39 {offsets = [0, 128], sizes = [8, 128], strides = [1, 1]} : vector<8x512xf32> to vector<8x128xf32>
      %103 = arith.addf %101, %102 : vector<8x128xf32>
      %104 = vector.extract_strided_slice %39 {offsets = [0, 256], sizes = [8, 128], strides = [1, 1]} : vector<8x512xf32> to vector<8x128xf32>
      %105 = arith.addf %103, %104 : vector<8x128xf32>
      %106 = vector.extract_strided_slice %39 {offsets = [0, 384], sizes = [8, 128], strides = [1, 1]} : vector<8x512xf32> to vector<8x128xf32>
      %107 = arith.addf %105, %106 : vector<8x128xf32>
      %108 = vector.extract_strided_slice %40 {offsets = [0, 0], sizes = [8, 128], strides = [1, 1]} : vector<8x512xf32> to vector<8x128xf32>
      %109 = arith.addf %11, %108 : vector<8x128xf32>
      %110 = vector.extract_strided_slice %40 {offsets = [0, 128], sizes = [8, 128], strides = [1, 1]} : vector<8x512xf32> to vector<8x128xf32>
      %111 = arith.addf %109, %110 : vector<8x128xf32>
      %112 = vector.extract_strided_slice %40 {offsets = [0, 256], sizes = [8, 128], strides = [1, 1]} : vector<8x512xf32> to vector<8x128xf32>
      %113 = arith.addf %111, %112 : vector<8x128xf32>
      %114 = vector.extract_strided_slice %40 {offsets = [0, 384], sizes = [8, 128], strides = [1, 1]} : vector<8x512xf32> to vector<8x128xf32>
      %115 = arith.addf %113, %114 : vector<8x128xf32>
      %116 = vector.extract_strided_slice %41 {offsets = [0, 0], sizes = [8, 128], strides = [1, 1]} : vector<8x512xf32> to vector<8x128xf32>
      %117 = arith.addf %11, %116 : vector<8x128xf32>
      %118 = vector.extract_strided_slice %41 {offsets = [0, 128], sizes = [8, 128], strides = [1, 1]} : vector<8x512xf32> to vector<8x128xf32>
      %119 = arith.addf %117, %118 : vector<8x128xf32>
      %120 = vector.extract_strided_slice %41 {offsets = [0, 256], sizes = [8, 128], strides = [1, 1]} : vector<8x512xf32> to vector<8x128xf32>
      %121 = arith.addf %119, %120 : vector<8x128xf32>
      %122 = vector.extract_strided_slice %41 {offsets = [0, 384], sizes = [8, 128], strides = [1, 1]} : vector<8x512xf32> to vector<8x128xf32>
      %123 = arith.addf %121, %122 : vector<8x128xf32>
      %124 = vector.extract_strided_slice %42 {offsets = [0, 0], sizes = [8, 128], strides = [1, 1]} : vector<8x512xf32> to vector<8x128xf32>
      %125 = arith.addf %11, %124 : vector<8x128xf32>
      %126 = vector.extract_strided_slice %42 {offsets = [0, 128], sizes = [8, 128], strides = [1, 1]} : vector<8x512xf32> to vector<8x128xf32>
      %127 = arith.addf %125, %126 : vector<8x128xf32>
      %128 = vector.extract_strided_slice %42 {offsets = [0, 256], sizes = [8, 128], strides = [1, 1]} : vector<8x512xf32> to vector<8x128xf32>
      %129 = arith.addf %127, %128 : vector<8x128xf32>
      %130 = vector.extract_strided_slice %42 {offsets = [0, 384], sizes = [8, 128], strides = [1, 1]} : vector<8x512xf32> to vector<8x128xf32>
      %131 = arith.addf %129, %130 : vector<8x128xf32>
      %132 = vector.extract_strided_slice %43 {offsets = [0, 0], sizes = [8, 128], strides = [1, 1]} : vector<8x512xf32> to vector<8x128xf32>
      %133 = arith.addf %11, %132 : vector<8x128xf32>
      %134 = vector.extract_strided_slice %43 {offsets = [0, 128], sizes = [8, 128], strides = [1, 1]} : vector<8x512xf32> to vector<8x128xf32>
      %135 = arith.addf %133, %134 : vector<8x128xf32>
      %136 = vector.extract_strided_slice %43 {offsets = [0, 256], sizes = [8, 128], strides = [1, 1]} : vector<8x512xf32> to vector<8x128xf32>
      %137 = arith.addf %135, %136 : vector<8x128xf32>
      %138 = vector.extract_strided_slice %43 {offsets = [0, 384], sizes = [8, 128], strides = [1, 1]} : vector<8x512xf32> to vector<8x128xf32>
      %139 = arith.addf %137, %138 : vector<8x128xf32>
      %c0_i32_19 = arith.constant 0 : i32
      %c0_i32_20 = arith.constant 0 : i32
      %140 = tpu.memref_slice %arg2[%c0_i32_1, %c0_i32_19, %c0_i32_20] : memref<2x16x4096xf32, #tpu.memory_space<vmem>> -> memref<1x16x4096xf32, #tpu.memory_space<vmem>>
      %141 = tpu.memref_squeeze %140 : memref<1x16x4096xf32, #tpu.memory_space<vmem>> -> memref<16x4096xf32, #tpu.memory_space<vmem>>
      %142 = arith.index_cast %10 : i32 to index
      %c512 = arith.constant 512 : index
      %143 = vector.load %141[%142, %c512] : memref<16x4096xf32, #tpu.memory_space<vmem>>, vector<8x512xf32>
      %c0_i32_21 = arith.constant 0 : i32
      %c0_i32_22 = arith.constant 0 : i32
      %144 = tpu.memref_slice %arg2[%c1_i32, %c0_i32_21, %c0_i32_22] : memref<2x16x4096xf32, #tpu.memory_space<vmem>> -> memref<1x16x4096xf32, #tpu.memory_space<vmem>>
      %145 = tpu.memref_squeeze %144 : memref<1x16x4096xf32, #tpu.memory_space<vmem>> -> memref<16x4096xf32, #tpu.memory_space<vmem>>
      %146 = arith.index_cast %10 : i32 to index
      %c512_23 = arith.constant 512 : index
      %147 = vector.load %145[%146, %c512_23] : memref<16x4096xf32, #tpu.memory_space<vmem>>, vector<8x512xf32>
      %148 = arith.index_cast %10 : i32 to index
      %c512_24 = arith.constant 512 : index
      %149 = vector.load %arg3[%148, %c512_24] : memref<16x4096xf32, #tpu.memory_space<vmem>>, vector<8x512xf32>
      %150 = arith.index_cast %10 : i32 to index
      %c512_25 = arith.constant 512 : index
      %151 = vector.load %arg4[%150, %c512_25] : memref<16x4096xf32, #tpu.memory_space<vmem>>, vector<8x512xf32>
      %c6000_i32_26 = arith.constant 6000 : i32
      %152 = arith.subi %c6000_i32_26, %4 : i32
      %c512_i32 = arith.constant 512 : i32
      %153 = arith.subi %152, %c512_i32 : i32
      %154 = vector.broadcast %153 : i32 to vector<8x512xi32>
      %155 = arith.cmpi slt, %3, %154 : vector<8x512xi32>
      %cst_27 = arith.constant 0.000000e+00 : f32
      %156 = vector.broadcast %cst_27 : f32 to vector<8x512xf32>
      %157 = arith.select %155, %143, %156 : vector<8x512xi1>, vector<8x512xf32>
      %cst_28 = arith.constant 0.000000e+00 : f32
      %158 = vector.broadcast %cst_28 : f32 to vector<8x512xf32>
      %159 = arith.select %155, %147, %158 : vector<8x512xi1>, vector<8x512xf32>
      %cst_29 = arith.constant 0.000000e+00 : f32
      %160 = vector.broadcast %cst_29 : f32 to vector<8x512xf32>
      %161 = arith.select %155, %149, %160 : vector<8x512xi1>, vector<8x512xf32>
      %cst_30 = arith.constant 0.000000e+00 : f32
      %162 = vector.broadcast %cst_30 : f32 to vector<8x512xf32>
      %163 = arith.select %155, %151, %162 : vector<8x512xi1>, vector<8x512xf32>
      %164 = arith.mulf %157, %157 : vector<8x512xf32>
      %165 = arith.mulf %159, %159 : vector<8x512xf32>
      %166 = arith.mulf %161, %161 : vector<8x512xf32>
      %167 = arith.mulf %163, %163 : vector<8x512xf32>
      %168 = arith.mulf %157, %161 : vector<8x512xf32>
      %169 = arith.mulf %157, %163 : vector<8x512xf32>
      %170 = arith.mulf %159, %161 : vector<8x512xf32>
      %171 = arith.mulf %159, %163 : vector<8x512xf32>
      %172 = vector.extract_strided_slice %157 {offsets = [0, 0], sizes = [8, 128], strides = [1, 1]} : vector<8x512xf32> to vector<8x128xf32>
      %173 = arith.addf %51, %172 : vector<8x128xf32>
      %174 = vector.extract_strided_slice %157 {offsets = [0, 128], sizes = [8, 128], strides = [1, 1]} : vector<8x512xf32> to vector<8x128xf32>
      %175 = arith.addf %173, %174 : vector<8x128xf32>
      %176 = vector.extract_strided_slice %157 {offsets = [0, 256], sizes = [8, 128], strides = [1, 1]} : vector<8x512xf32> to vector<8x128xf32>
      %177 = arith.addf %175, %176 : vector<8x128xf32>
      %178 = vector.extract_strided_slice %157 {offsets = [0, 384], sizes = [8, 128], strides = [1, 1]} : vector<8x512xf32> to vector<8x128xf32>
      %179 = arith.addf %177, %178 : vector<8x128xf32>
      %180 = vector.extract_strided_slice %159 {offsets = [0, 0], sizes = [8, 128], strides = [1, 1]} : vector<8x512xf32> to vector<8x128xf32>
      %181 = arith.addf %59, %180 : vector<8x128xf32>
      %182 = vector.extract_strided_slice %159 {offsets = [0, 128], sizes = [8, 128], strides = [1, 1]} : vector<8x512xf32> to vector<8x128xf32>
      %183 = arith.addf %181, %182 : vector<8x128xf32>
      %184 = vector.extract_strided_slice %159 {offsets = [0, 256], sizes = [8, 128], strides = [1, 1]} : vector<8x512xf32> to vector<8x128xf32>
      %185 = arith.addf %183, %184 : vector<8x128xf32>
      %186 = vector.extract_strided_slice %159 {offsets = [0, 384], sizes = [8, 128], strides = [1, 1]} : vector<8x512xf32> to vector<8x128xf32>
      %187 = arith.addf %185, %186 : vector<8x128xf32>
      %188 = vector.extract_strided_slice %164 {offsets = [0, 0], sizes = [8, 128], strides = [1, 1]} : vector<8x512xf32> to vector<8x128xf32>
      %189 = arith.addf %67, %188 : vector<8x128xf32>
      %190 = vector.extract_strided_slice %164 {offsets = [0, 128], sizes = [8, 128], strides = [1, 1]} : vector<8x512xf32> to vector<8x128xf32>
      %191 = arith.addf %189, %190 : vector<8x128xf32>
      %192 = vector.extract_strided_slice %164 {offsets = [0, 256], sizes = [8, 128], strides = [1, 1]} : vector<8x512xf32> to vector<8x128xf32>
      %193 = arith.addf %191, %192 : vector<8x128xf32>
      %194 = vector.extract_strided_slice %164 {offsets = [0, 384], sizes = [8, 128], strides = [1, 1]} : vector<8x512xf32> to vector<8x128xf32>
      %195 = arith.addf %193, %194 : vector<8x128xf32>
      %196 = vector.extract_strided_slice %165 {offsets = [0, 0], sizes = [8, 128], strides = [1, 1]} : vector<8x512xf32> to vector<8x128xf32>
      %197 = arith.addf %75, %196 : vector<8x128xf32>
      %198 = vector.extract_strided_slice %165 {offsets = [0, 128], sizes = [8, 128], strides = [1, 1]} : vector<8x512xf32> to vector<8x128xf32>
      %199 = arith.addf %197, %198 : vector<8x128xf32>
      %200 = vector.extract_strided_slice %165 {offsets = [0, 256], sizes = [8, 128], strides = [1, 1]} : vector<8x512xf32> to vector<8x128xf32>
      %201 = arith.addf %199, %200 : vector<8x128xf32>
      %202 = vector.extract_strided_slice %165 {offsets = [0, 384], sizes = [8, 128], strides = [1, 1]} : vector<8x512xf32> to vector<8x128xf32>
      %203 = arith.addf %201, %202 : vector<8x128xf32>
      %204 = vector.extract_strided_slice %161 {offsets = [0, 0], sizes = [8, 128], strides = [1, 1]} : vector<8x512xf32> to vector<8x128xf32>
      %205 = arith.addf %83, %204 : vector<8x128xf32>
      %206 = vector.extract_strided_slice %161 {offsets = [0, 128], sizes = [8, 128], strides = [1, 1]} : vector<8x512xf32> to vector<8x128xf32>
      %207 = arith.addf %205, %206 : vector<8x128xf32>
      %208 = vector.extract_strided_slice %161 {offsets = [0, 256], sizes = [8, 128], strides = [1, 1]} : vector<8x512xf32> to vector<8x128xf32>
      %209 = arith.addf %207, %208 : vector<8x128xf32>
      %210 = vector.extract_strided_slice %161 {offsets = [0, 384], sizes = [8, 128], strides = [1, 1]} : vector<8x512xf32> to vector<8x128xf32>
      %211 = arith.addf %209, %210 : vector<8x128xf32>
      %212 = vector.extract_strided_slice %163 {offsets = [0, 0], sizes = [8, 128], strides = [1, 1]} : vector<8x512xf32> to vector<8x128xf32>
      %213 = arith.addf %91, %212 : vector<8x128xf32>
      %214 = vector.extract_strided_slice %163 {offsets = [0, 128], sizes = [8, 128], strides = [1, 1]} : vector<8x512xf32> to vector<8x128xf32>
      %215 = arith.addf %213, %214 : vector<8x128xf32>
      %216 = vector.extract_strided_slice %163 {offsets = [0, 256], sizes = [8, 128], strides = [1, 1]} : vector<8x512xf32> to vector<8x128xf32>
      %217 = arith.addf %215, %216 : vector<8x128xf32>
      %218 = vector.extract_strided_slice %163 {offsets = [0, 384], sizes = [8, 128], strides = [1, 1]} : vector<8x512xf32> to vector<8x128xf32>
      %219 = arith.addf %217, %218 : vector<8x128xf32>
      %220 = vector.extract_strided_slice %166 {offsets = [0, 0], sizes = [8, 128], strides = [1, 1]} : vector<8x512xf32> to vector<8x128xf32>
      %221 = arith.addf %99, %220 : vector<8x128xf32>
      %222 = vector.extract_strided_slice %166 {offsets = [0, 128], sizes = [8, 128], strides = [1, 1]} : vector<8x512xf32> to vector<8x128xf32>
      %223 = arith.addf %221, %222 : vector<8x128xf32>
      %224 = vector.extract_strided_slice %166 {offsets = [0, 256], sizes = [8, 128], strides = [1, 1]} : vector<8x512xf32> to vector<8x128xf32>
      %225 = arith.addf %223, %224 : vector<8x128xf32>
      %226 = vector.extract_strided_slice %166 {offsets = [0, 384], sizes = [8, 128], strides = [1, 1]} : vector<8x512xf32> to vector<8x128xf32>
      %227 = arith.addf %225, %226 : vector<8x128xf32>
      %228 = vector.extract_strided_slice %167 {offsets = [0, 0], sizes = [8, 128], strides = [1, 1]} : vector<8x512xf32> to vector<8x128xf32>
      %229 = arith.addf %107, %228 : vector<8x128xf32>
      %230 = vector.extract_strided_slice %167 {offsets = [0, 128], sizes = [8, 128], strides = [1, 1]} : vector<8x512xf32> to vector<8x128xf32>
      %231 = arith.addf %229, %230 : vector<8x128xf32>
      %232 = vector.extract_strided_slice %167 {offsets = [0, 256], sizes = [8, 128], strides = [1, 1]} : vector<8x512xf32> to vector<8x128xf32>
      %233 = arith.addf %231, %232 : vector<8x128xf32>
      %234 = vector.extract_strided_slice %167 {offsets = [0, 384], sizes = [8, 128], strides = [1, 1]} : vector<8x512xf32> to vector<8x128xf32>
      %235 = arith.addf %233, %234 : vector<8x128xf32>
      %236 = vector.extract_strided_slice %168 {offsets = [0, 0], sizes = [8, 128], strides = [1, 1]} : vector<8x512xf32> to vector<8x128xf32>
      %237 = arith.addf %115, %236 : vector<8x128xf32>
      %238 = vector.extract_strided_slice %168 {offsets = [0, 128], sizes = [8, 128], strides = [1, 1]} : vector<8x512xf32> to vector<8x128xf32>
      %239 = arith.addf %237, %238 : vector<8x128xf32>
      %240 = vector.extract_strided_slice %168 {offsets = [0, 256], sizes = [8, 128], strides = [1, 1]} : vector<8x512xf32> to vector<8x128xf32>
      %241 = arith.addf %239, %240 : vector<8x128xf32>
      %242 = vector.extract_strided_slice %168 {offsets = [0, 384], sizes = [8, 128], strides = [1, 1]} : vector<8x512xf32> to vector<8x128xf32>
      %243 = arith.addf %241, %242 : vector<8x128xf32>
      %244 = vector.extract_strided_slice %169 {offsets = [0, 0], sizes = [8, 128], strides = [1, 1]} : vector<8x512xf32> to vector<8x128xf32>
      %245 = arith.addf %123, %244 : vector<8x128xf32>
      %246 = vector.extract_strided_slice %169 {offsets = [0, 128], sizes = [8, 128], strides = [1, 1]} : vector<8x512xf32> to vector<8x128xf32>
      %247 = arith.addf %245, %246 : vector<8x128xf32>
      %248 = vector.extract_strided_slice %169 {offsets = [0, 256], sizes = [8, 128], strides = [1, 1]} : vector<8x512xf32> to vector<8x128xf32>
      %249 = arith.addf %247, %248 : vector<8x128xf32>
      %250 = vector.extract_strided_slice %169 {offsets = [0, 384], sizes = [8, 128], strides = [1, 1]} : vector<8x512xf32> to vector<8x128xf32>
      %251 = arith.addf %249, %250 : vector<8x128xf32>
      %252 = vector.extract_strided_slice %170 {offsets = [0, 0], sizes = [8, 128], strides = [1, 1]} : vector<8x512xf32> to vector<8x128xf32>
      %253 = arith.addf %131, %252 : vector<8x128xf32>
      %254 = vector.extract_strided_slice %170 {offsets = [0, 128], sizes = [8, 128], strides = [1, 1]} : vector<8x512xf32> to vector<8x128xf32>
      %255 = arith.addf %253, %254 : vector<8x128xf32>
      %256 = vector.extract_strided_slice %170 {offsets = [0, 256], sizes = [8, 128], strides = [1, 1]} : vector<8x512xf32> to vector<8x128xf32>
      %257 = arith.addf %255, %256 : vector<8x128xf32>
      %258 = vector.extract_strided_slice %170 {offsets = [0, 384], sizes = [8, 128], strides = [1, 1]} : vector<8x512xf32> to vector<8x128xf32>
      %259 = arith.addf %257, %258 : vector<8x128xf32>
      %260 = vector.extract_strided_slice %171 {offsets = [0, 0], sizes = [8, 128], strides = [1, 1]} : vector<8x512xf32> to vector<8x128xf32>
      %261 = arith.addf %139, %260 : vector<8x128xf32>
      %262 = vector.extract_strided_slice %171 {offsets = [0, 128], sizes = [8, 128], strides = [1, 1]} : vector<8x512xf32> to vector<8x128xf32>
      %263 = arith.addf %261, %262 : vector<8x128xf32>
      %264 = vector.extract_strided_slice %171 {offsets = [0, 256], sizes = [8, 128], strides = [1, 1]} : vector<8x512xf32> to vector<8x128xf32>
      %265 = arith.addf %263, %264 : vector<8x128xf32>
      %266 = vector.extract_strided_slice %171 {offsets = [0, 384], sizes = [8, 128], strides = [1, 1]} : vector<8x512xf32> to vector<8x128xf32>
      %267 = arith.addf %265, %266 : vector<8x128xf32>
      %c0_i32_31 = arith.constant 0 : i32
      %c0_i32_32 = arith.constant 0 : i32
      %268 = tpu.memref_slice %arg2[%c0_i32_1, %c0_i32_31, %c0_i32_32] : memref<2x16x4096xf32, #tpu.memory_space<vmem>> -> memref<1x16x4096xf32, #tpu.memory_space<vmem>>
      %269 = tpu.memref_squeeze %268 : memref<1x16x4096xf32, #tpu.memory_space<vmem>> -> memref<16x4096xf32, #tpu.memory_space<vmem>>
      %270 = arith.index_cast %10 : i32 to index
      %c1024 = arith.constant 1024 : index
      %271 = vector.load %269[%270, %c1024] : memref<16x4096xf32, #tpu.memory_space<vmem>>, vector<8x512xf32>
      %c0_i32_33 = arith.constant 0 : i32
      %c0_i32_34 = arith.constant 0 : i32
      %272 = tpu.memref_slice %arg2[%c1_i32, %c0_i32_33, %c0_i32_34] : memref<2x16x4096xf32, #tpu.memory_space<vmem>> -> memref<1x16x4096xf32, #tpu.memory_space<vmem>>
      %273 = tpu.memref_squeeze %272 : memref<1x16x4096xf32, #tpu.memory_space<vmem>> -> memref<16x4096xf32, #tpu.memory_space<vmem>>
      %274 = arith.index_cast %10 : i32 to index
      %c1024_35 = arith.constant 1024 : index
      %275 = vector.load %273[%274, %c1024_35] : memref<16x4096xf32, #tpu.memory_space<vmem>>, vector<8x512xf32>
      %276 = arith.index_cast %10 : i32 to index
      %c1024_36 = arith.constant 1024 : index
      %277 = vector.load %arg3[%276, %c1024_36] : memref<16x4096xf32, #tpu.memory_space<vmem>>, vector<8x512xf32>
      %278 = arith.index_cast %10 : i32 to index
      %c1024_37 = arith.constant 1024 : index
      %279 = vector.load %arg4[%278, %c1024_37] : memref<16x4096xf32, #tpu.memory_space<vmem>>, vector<8x512xf32>
      %c6000_i32_38 = arith.constant 6000 : i32
      %280 = arith.subi %c6000_i32_38, %4 : i32
      %c1024_i32 = arith.constant 1024 : i32
      %281 = arith.subi %280, %c1024_i32 : i32
      %282 = vector.broadcast %281 : i32 to vector<8x512xi32>
      %283 = arith.cmpi slt, %3, %282 : vector<8x512xi32>
      %cst_39 = arith.constant 0.000000e+00 : f32
      %284 = vector.broadcast %cst_39 : f32 to vector<8x512xf32>
      %285 = arith.select %283, %271, %284 : vector<8x512xi1>, vector<8x512xf32>
      %cst_40 = arith.constant 0.000000e+00 : f32
      %286 = vector.broadcast %cst_40 : f32 to vector<8x512xf32>
      %287 = arith.select %283, %275, %286 : vector<8x512xi1>, vector<8x512xf32>
      %cst_41 = arith.constant 0.000000e+00 : f32
      %288 = vector.broadcast %cst_41 : f32 to vector<8x512xf32>
      %289 = arith.select %283, %277, %288 : vector<8x512xi1>, vector<8x512xf32>
      %cst_42 = arith.constant 0.000000e+00 : f32
      %290 = vector.broadcast %cst_42 : f32 to vector<8x512xf32>
      %291 = arith.select %283, %279, %290 : vector<8x512xi1>, vector<8x512xf32>
      %292 = arith.mulf %285, %285 : vector<8x512xf32>
      %293 = arith.mulf %287, %287 : vector<8x512xf32>
      %294 = arith.mulf %289, %289 : vector<8x512xf32>
      %295 = arith.mulf %291, %291 : vector<8x512xf32>
      %296 = arith.mulf %285, %289 : vector<8x512xf32>
      %297 = arith.mulf %285, %291 : vector<8x512xf32>
      %298 = arith.mulf %287, %289 : vector<8x512xf32>
      %299 = arith.mulf %287, %291 : vector<8x512xf32>
      %300 = vector.extract_strided_slice %285 {offsets = [0, 0], sizes = [8, 128], strides = [1, 1]} : vector<8x512xf32> to vector<8x128xf32>
      %301 = arith.addf %179, %300 : vector<8x128xf32>
      %302 = vector.extract_strided_slice %285 {offsets = [0, 128], sizes = [8, 128], strides = [1, 1]} : vector<8x512xf32> to vector<8x128xf32>
      %303 = arith.addf %301, %302 : vector<8x128xf32>
      %304 = vector.extract_strided_slice %285 {offsets = [0, 256], sizes = [8, 128], strides = [1, 1]} : vector<8x512xf32> to vector<8x128xf32>
      %305 = arith.addf %303, %304 : vector<8x128xf32>
      %306 = vector.extract_strided_slice %285 {offsets = [0, 384], sizes = [8, 128], strides = [1, 1]} : vector<8x512xf32> to vector<8x128xf32>
      %307 = arith.addf %305, %306 : vector<8x128xf32>
      %308 = vector.extract_strided_slice %287 {offsets = [0, 0], sizes = [8, 128], strides = [1, 1]} : vector<8x512xf32> to vector<8x128xf32>
      %309 = arith.addf %187, %308 : vector<8x128xf32>
      %310 = vector.extract_strided_slice %287 {offsets = [0, 128], sizes = [8, 128], strides = [1, 1]} : vector<8x512xf32> to vector<8x128xf32>
      %311 = arith.addf %309, %310 : vector<8x128xf32>
      %312 = vector.extract_strided_slice %287 {offsets = [0, 256], sizes = [8, 128], strides = [1, 1]} : vector<8x512xf32> to vector<8x128xf32>
      %313 = arith.addf %311, %312 : vector<8x128xf32>
      %314 = vector.extract_strided_slice %287 {offsets = [0, 384], sizes = [8, 128], strides = [1, 1]} : vector<8x512xf32> to vector<8x128xf32>
      %315 = arith.addf %313, %314 : vector<8x128xf32>
      %316 = vector.extract_strided_slice %292 {offsets = [0, 0], sizes = [8, 128], strides = [1, 1]} : vector<8x512xf32> to vector<8x128xf32>
      %317 = arith.addf %195, %316 : vector<8x128xf32>
      %318 = vector.extract_strided_slice %292 {offsets = [0, 128], sizes = [8, 128], strides = [1, 1]} : vector<8x512xf32> to vector<8x128xf32>
      %319 = arith.addf %317, %318 : vector<8x128xf32>
      %320 = vector.extract_strided_slice %292 {offsets = [0, 256], sizes = [8, 128], strides = [1, 1]} : vector<8x512xf32> to vector<8x128xf32>
      %321 = arith.addf %319, %320 : vector<8x128xf32>
      %322 = vector.extract_strided_slice %292 {offsets = [0, 384], sizes = [8, 128], strides = [1, 1]} : vector<8x512xf32> to vector<8x128xf32>
      %323 = arith.addf %321, %322 : vector<8x128xf32>
      %324 = vector.extract_strided_slice %293 {offsets = [0, 0], sizes = [8, 128], strides = [1, 1]} : vector<8x512xf32> to vector<8x128xf32>
      %325 = arith.addf %203, %324 : vector<8x128xf32>
      %326 = vector.extract_strided_slice %293 {offsets = [0, 128], sizes = [8, 128], strides = [1, 1]} : vector<8x512xf32> to vector<8x128xf32>
      %327 = arith.addf %325, %326 : vector<8x128xf32>
      %328 = vector.extract_strided_slice %293 {offsets = [0, 256], sizes = [8, 128], strides = [1, 1]} : vector<8x512xf32> to vector<8x128xf32>
      %329 = arith.addf %327, %328 : vector<8x128xf32>
      %330 = vector.extract_strided_slice %293 {offsets = [0, 384], sizes = [8, 128], strides = [1, 1]} : vector<8x512xf32> to vector<8x128xf32>
      %331 = arith.addf %329, %330 : vector<8x128xf32>
      %332 = vector.extract_strided_slice %289 {offsets = [0, 0], sizes = [8, 128], strides = [1, 1]} : vector<8x512xf32> to vector<8x128xf32>
      %333 = arith.addf %211, %332 : vector<8x128xf32>
      %334 = vector.extract_strided_slice %289 {offsets = [0, 128], sizes = [8, 128], strides = [1, 1]} : vector<8x512xf32> to vector<8x128xf32>
      %335 = arith.addf %333, %334 : vector<8x128xf32>
      %336 = vector.extract_strided_slice %289 {offsets = [0, 256], sizes = [8, 128], strides = [1, 1]} : vector<8x512xf32> to vector<8x128xf32>
      %337 = arith.addf %335, %336 : vector<8x128xf32>
      %338 = vector.extract_strided_slice %289 {offsets = [0, 384], sizes = [8, 128], strides = [1, 1]} : vector<8x512xf32> to vector<8x128xf32>
      %339 = arith.addf %337, %338 : vector<8x128xf32>
      %340 = vector.extract_strided_slice %291 {offsets = [0, 0], sizes = [8, 128], strides = [1, 1]} : vector<8x512xf32> to vector<8x128xf32>
      %341 = arith.addf %219, %340 : vector<8x128xf32>
      %342 = vector.extract_strided_slice %291 {offsets = [0, 128], sizes = [8, 128], strides = [1, 1]} : vector<8x512xf32> to vector<8x128xf32>
      %343 = arith.addf %341, %342 : vector<8x128xf32>
      %344 = vector.extract_strided_slice %291 {offsets = [0, 256], sizes = [8, 128], strides = [1, 1]} : vector<8x512xf32> to vector<8x128xf32>
      %345 = arith.addf %343, %344 : vector<8x128xf32>
      %346 = vector.extract_strided_slice %291 {offsets = [0, 384], sizes = [8, 128], strides = [1, 1]} : vector<8x512xf32> to vector<8x128xf32>
      %347 = arith.addf %345, %346 : vector<8x128xf32>
      %348 = vector.extract_strided_slice %294 {offsets = [0, 0], sizes = [8, 128], strides = [1, 1]} : vector<8x512xf32> to vector<8x128xf32>
      %349 = arith.addf %227, %348 : vector<8x128xf32>
      %350 = vector.extract_strided_slice %294 {offsets = [0, 128], sizes = [8, 128], strides = [1, 1]} : vector<8x512xf32> to vector<8x128xf32>
      %351 = arith.addf %349, %350 : vector<8x128xf32>
      %352 = vector.extract_strided_slice %294 {offsets = [0, 256], sizes = [8, 128], strides = [1, 1]} : vector<8x512xf32> to vector<8x128xf32>
      %353 = arith.addf %351, %352 : vector<8x128xf32>
      %354 = vector.extract_strided_slice %294 {offsets = [0, 384], sizes = [8, 128], strides = [1, 1]} : vector<8x512xf32> to vector<8x128xf32>
      %355 = arith.addf %353, %354 : vector<8x128xf32>
      %356 = vector.extract_strided_slice %295 {offsets = [0, 0], sizes = [8, 128], strides = [1, 1]} : vector<8x512xf32> to vector<8x128xf32>
      %357 = arith.addf %235, %356 : vector<8x128xf32>
      %358 = vector.extract_strided_slice %295 {offsets = [0, 128], sizes = [8, 128], strides = [1, 1]} : vector<8x512xf32> to vector<8x128xf32>
      %359 = arith.addf %357, %358 : vector<8x128xf32>
      %360 = vector.extract_strided_slice %295 {offsets = [0, 256], sizes = [8, 128], strides = [1, 1]} : vector<8x512xf32> to vector<8x128xf32>
      %361 = arith.addf %359, %360 : vector<8x128xf32>
      %362 = vector.extract_strided_slice %295 {offsets = [0, 384], sizes = [8, 128], strides = [1, 1]} : vector<8x512xf32> to vector<8x128xf32>
      %363 = arith.addf %361, %362 : vector<8x128xf32>
      %364 = vector.extract_strided_slice %296 {offsets = [0, 0], sizes = [8, 128], strides = [1, 1]} : vector<8x512xf32> to vector<8x128xf32>
      %365 = arith.addf %243, %364 : vector<8x128xf32>
      %366 = vector.extract_strided_slice %296 {offsets = [0, 128], sizes = [8, 128], strides = [1, 1]} : vector<8x512xf32> to vector<8x128xf32>
      %367 = arith.addf %365, %366 : vector<8x128xf32>
      %368 = vector.extract_strided_slice %296 {offsets = [0, 256], sizes = [8, 128], strides = [1, 1]} : vector<8x512xf32> to vector<8x128xf32>
      %369 = arith.addf %367, %368 : vector<8x128xf32>
      %370 = vector.extract_strided_slice %296 {offsets = [0, 384], sizes = [8, 128], strides = [1, 1]} : vector<8x512xf32> to vector<8x128xf32>
      %371 = arith.addf %369, %370 : vector<8x128xf32>
      %372 = vector.extract_strided_slice %297 {offsets = [0, 0], sizes = [8, 128], strides = [1, 1]} : vector<8x512xf32> to vector<8x128xf32>
      %373 = arith.addf %251, %372 : vector<8x128xf32>
      %374 = vector.extract_strided_slice %297 {offsets = [0, 128], sizes = [8, 128], strides = [1, 1]} : vector<8x512xf32> to vector<8x128xf32>
      %375 = arith.addf %373, %374 : vector<8x128xf32>
      %376 = vector.extract_strided_slice %297 {offsets = [0, 256], sizes = [8, 128], strides = [1, 1]} : vector<8x512xf32> to vector<8x128xf32>
      %377 = arith.addf %375, %376 : vector<8x128xf32>
      %378 = vector.extract_strided_slice %297 {offsets = [0, 384], sizes = [8, 128], strides = [1, 1]} : vector<8x512xf32> to vector<8x128xf32>
      %379 = arith.addf %377, %378 : vector<8x128xf32>
      %380 = vector.extract_strided_slice %298 {offsets = [0, 0], sizes = [8, 128], strides = [1, 1]} : vector<8x512xf32> to vector<8x128xf32>
      %381 = arith.addf %259, %380 : vector<8x128xf32>
      %382 = vector.extract_strided_slice %298 {offsets = [0, 128], sizes = [8, 128], strides = [1, 1]} : vector<8x512xf32> to vector<8x128xf32>
      %383 = arith.addf %381, %382 : vector<8x128xf32>
      %384 = vector.extract_strided_slice %298 {offsets = [0, 256], sizes = [8, 128], strides = [1, 1]} : vector<8x512xf32> to vector<8x128xf32>
      %385 = arith.addf %383, %384 : vector<8x128xf32>
      %386 = vector.extract_strided_slice %298 {offsets = [0, 384], sizes = [8, 128], strides = [1, 1]} : vector<8x512xf32> to vector<8x128xf32>
      %387 = arith.addf %385, %386 : vector<8x128xf32>
      %388 = vector.extract_strided_slice %299 {offsets = [0, 0], sizes = [8, 128], strides = [1, 1]} : vector<8x512xf32> to vector<8x128xf32>
      %389 = arith.addf %267, %388 : vector<8x128xf32>
      %390 = vector.extract_strided_slice %299 {offsets = [0, 128], sizes = [8, 128], strides = [1, 1]} : vector<8x512xf32> to vector<8x128xf32>
      %391 = arith.addf %389, %390 : vector<8x128xf32>
      %392 = vector.extract_strided_slice %299 {offsets = [0, 256], sizes = [8, 128], strides = [1, 1]} : vector<8x512xf32> to vector<8x128xf32>
      %393 = arith.addf %391, %392 : vector<8x128xf32>
      %394 = vector.extract_strided_slice %299 {offsets = [0, 384], sizes = [8, 128], strides = [1, 1]} : vector<8x512xf32> to vector<8x128xf32>
      %395 = arith.addf %393, %394 : vector<8x128xf32>
      %c0_i32_43 = arith.constant 0 : i32
      %c0_i32_44 = arith.constant 0 : i32
      %396 = tpu.memref_slice %arg2[%c0_i32_1, %c0_i32_43, %c0_i32_44] : memref<2x16x4096xf32, #tpu.memory_space<vmem>> -> memref<1x16x4096xf32, #tpu.memory_space<vmem>>
      %397 = tpu.memref_squeeze %396 : memref<1x16x4096xf32, #tpu.memory_space<vmem>> -> memref<16x4096xf32, #tpu.memory_space<vmem>>
      %398 = arith.index_cast %10 : i32 to index
      %c1536 = arith.constant 1536 : index
      %399 = vector.load %397[%398, %c1536] : memref<16x4096xf32, #tpu.memory_space<vmem>>, vector<8x512xf32>
      %c0_i32_45 = arith.constant 0 : i32
      %c0_i32_46 = arith.constant 0 : i32
      %400 = tpu.memref_slice %arg2[%c1_i32, %c0_i32_45, %c0_i32_46] : memref<2x16x4096xf32, #tpu.memory_space<vmem>> -> memref<1x16x4096xf32, #tpu.memory_space<vmem>>
      %401 = tpu.memref_squeeze %400 : memref<1x16x4096xf32, #tpu.memory_space<vmem>> -> memref<16x4096xf32, #tpu.memory_space<vmem>>
      %402 = arith.index_cast %10 : i32 to index
      %c1536_47 = arith.constant 1536 : index
      %403 = vector.load %401[%402, %c1536_47] : memref<16x4096xf32, #tpu.memory_space<vmem>>, vector<8x512xf32>
      %404 = arith.index_cast %10 : i32 to index
      %c1536_48 = arith.constant 1536 : index
      %405 = vector.load %arg3[%404, %c1536_48] : memref<16x4096xf32, #tpu.memory_space<vmem>>, vector<8x512xf32>
      %406 = arith.index_cast %10 : i32 to index
      %c1536_49 = arith.constant 1536 : index
      %407 = vector.load %arg4[%406, %c1536_49] : memref<16x4096xf32, #tpu.memory_space<vmem>>, vector<8x512xf32>
      %c6000_i32_50 = arith.constant 6000 : i32
      %408 = arith.subi %c6000_i32_50, %4 : i32
      %c1536_i32 = arith.constant 1536 : i32
      %409 = arith.subi %408, %c1536_i32 : i32
      %410 = vector.broadcast %409 : i32 to vector<8x512xi32>
      %411 = arith.cmpi slt, %3, %410 : vector<8x512xi32>
      %cst_51 = arith.constant 0.000000e+00 : f32
      %412 = vector.broadcast %cst_51 : f32 to vector<8x512xf32>
      %413 = arith.select %411, %399, %412 : vector<8x512xi1>, vector<8x512xf32>
      %cst_52 = arith.constant 0.000000e+00 : f32
      %414 = vector.broadcast %cst_52 : f32 to vector<8x512xf32>
      %415 = arith.select %411, %403, %414 : vector<8x512xi1>, vector<8x512xf32>
      %cst_53 = arith.constant 0.000000e+00 : f32
      %416 = vector.broadcast %cst_53 : f32 to vector<8x512xf32>
      %417 = arith.select %411, %405, %416 : vector<8x512xi1>, vector<8x512xf32>
      %cst_54 = arith.constant 0.000000e+00 : f32
      %418 = vector.broadcast %cst_54 : f32 to vector<8x512xf32>
      %419 = arith.select %411, %407, %418 : vector<8x512xi1>, vector<8x512xf32>
      %420 = arith.mulf %413, %413 : vector<8x512xf32>
      %421 = arith.mulf %415, %415 : vector<8x512xf32>
      %422 = arith.mulf %417, %417 : vector<8x512xf32>
      %423 = arith.mulf %419, %419 : vector<8x512xf32>
      %424 = arith.mulf %413, %417 : vector<8x512xf32>
      %425 = arith.mulf %413, %419 : vector<8x512xf32>
      %426 = arith.mulf %415, %417 : vector<8x512xf32>
      %427 = arith.mulf %415, %419 : vector<8x512xf32>
      %428 = vector.extract_strided_slice %413 {offsets = [0, 0], sizes = [8, 128], strides = [1, 1]} : vector<8x512xf32> to vector<8x128xf32>
      %429 = arith.addf %307, %428 : vector<8x128xf32>
      %430 = vector.extract_strided_slice %413 {offsets = [0, 128], sizes = [8, 128], strides = [1, 1]} : vector<8x512xf32> to vector<8x128xf32>
      %431 = arith.addf %429, %430 : vector<8x128xf32>
      %432 = vector.extract_strided_slice %413 {offsets = [0, 256], sizes = [8, 128], strides = [1, 1]} : vector<8x512xf32> to vector<8x128xf32>
      %433 = arith.addf %431, %432 : vector<8x128xf32>
      %434 = vector.extract_strided_slice %413 {offsets = [0, 384], sizes = [8, 128], strides = [1, 1]} : vector<8x512xf32> to vector<8x128xf32>
      %435 = arith.addf %433, %434 : vector<8x128xf32>
      %436 = vector.extract_strided_slice %415 {offsets = [0, 0], sizes = [8, 128], strides = [1, 1]} : vector<8x512xf32> to vector<8x128xf32>
      %437 = arith.addf %315, %436 : vector<8x128xf32>
      %438 = vector.extract_strided_slice %415 {offsets = [0, 128], sizes = [8, 128], strides = [1, 1]} : vector<8x512xf32> to vector<8x128xf32>
      %439 = arith.addf %437, %438 : vector<8x128xf32>
      %440 = vector.extract_strided_slice %415 {offsets = [0, 256], sizes = [8, 128], strides = [1, 1]} : vector<8x512xf32> to vector<8x128xf32>
      %441 = arith.addf %439, %440 : vector<8x128xf32>
      %442 = vector.extract_strided_slice %415 {offsets = [0, 384], sizes = [8, 128], strides = [1, 1]} : vector<8x512xf32> to vector<8x128xf32>
      %443 = arith.addf %441, %442 : vector<8x128xf32>
      %444 = vector.extract_strided_slice %420 {offsets = [0, 0], sizes = [8, 128], strides = [1, 1]} : vector<8x512xf32> to vector<8x128xf32>
      %445 = arith.addf %323, %444 : vector<8x128xf32>
      %446 = vector.extract_strided_slice %420 {offsets = [0, 128], sizes = [8, 128], strides = [1, 1]} : vector<8x512xf32> to vector<8x128xf32>
      %447 = arith.addf %445, %446 : vector<8x128xf32>
      %448 = vector.extract_strided_slice %420 {offsets = [0, 256], sizes = [8, 128], strides = [1, 1]} : vector<8x512xf32> to vector<8x128xf32>
      %449 = arith.addf %447, %448 : vector<8x128xf32>
      %450 = vector.extract_strided_slice %420 {offsets = [0, 384], sizes = [8, 128], strides = [1, 1]} : vector<8x512xf32> to vector<8x128xf32>
      %451 = arith.addf %449, %450 : vector<8x128xf32>
      %452 = vector.extract_strided_slice %421 {offsets = [0, 0], sizes = [8, 128], strides = [1, 1]} : vector<8x512xf32> to vector<8x128xf32>
      %453 = arith.addf %331, %452 : vector<8x128xf32>
      %454 = vector.extract_strided_slice %421 {offsets = [0, 128], sizes = [8, 128], strides = [1, 1]} : vector<8x512xf32> to vector<8x128xf32>
      %455 = arith.addf %453, %454 : vector<8x128xf32>
      %456 = vector.extract_strided_slice %421 {offsets = [0, 256], sizes = [8, 128], strides = [1, 1]} : vector<8x512xf32> to vector<8x128xf32>
      %457 = arith.addf %455, %456 : vector<8x128xf32>
      %458 = vector.extract_strided_slice %421 {offsets = [0, 384], sizes = [8, 128], strides = [1, 1]} : vector<8x512xf32> to vector<8x128xf32>
      %459 = arith.addf %457, %458 : vector<8x128xf32>
      %460 = vector.extract_strided_slice %417 {offsets = [0, 0], sizes = [8, 128], strides = [1, 1]} : vector<8x512xf32> to vector<8x128xf32>
      %461 = arith.addf %339, %460 : vector<8x128xf32>
      %462 = vector.extract_strided_slice %417 {offsets = [0, 128], sizes = [8, 128], strides = [1, 1]} : vector<8x512xf32> to vector<8x128xf32>
      %463 = arith.addf %461, %462 : vector<8x128xf32>
      %464 = vector.extract_strided_slice %417 {offsets = [0, 256], sizes = [8, 128], strides = [1, 1]} : vector<8x512xf32> to vector<8x128xf32>
      %465 = arith.addf %463, %464 : vector<8x128xf32>
      %466 = vector.extract_strided_slice %417 {offsets = [0, 384], sizes = [8, 128], strides = [1, 1]} : vector<8x512xf32> to vector<8x128xf32>
      %467 = arith.addf %465, %466 : vector<8x128xf32>
      %468 = vector.extract_strided_slice %419 {offsets = [0, 0], sizes = [8, 128], strides = [1, 1]} : vector<8x512xf32> to vector<8x128xf32>
      %469 = arith.addf %347, %468 : vector<8x128xf32>
      %470 = vector.extract_strided_slice %419 {offsets = [0, 128], sizes = [8, 128], strides = [1, 1]} : vector<8x512xf32> to vector<8x128xf32>
      %471 = arith.addf %469, %470 : vector<8x128xf32>
      %472 = vector.extract_strided_slice %419 {offsets = [0, 256], sizes = [8, 128], strides = [1, 1]} : vector<8x512xf32> to vector<8x128xf32>
      %473 = arith.addf %471, %472 : vector<8x128xf32>
      %474 = vector.extract_strided_slice %419 {offsets = [0, 384], sizes = [8, 128], strides = [1, 1]} : vector<8x512xf32> to vector<8x128xf32>
      %475 = arith.addf %473, %474 : vector<8x128xf32>
      %476 = vector.extract_strided_slice %422 {offsets = [0, 0], sizes = [8, 128], strides = [1, 1]} : vector<8x512xf32> to vector<8x128xf32>
      %477 = arith.addf %355, %476 : vector<8x128xf32>
      %478 = vector.extract_strided_slice %422 {offsets = [0, 128], sizes = [8, 128], strides = [1, 1]} : vector<8x512xf32> to vector<8x128xf32>
      %479 = arith.addf %477, %478 : vector<8x128xf32>
      %480 = vector.extract_strided_slice %422 {offsets = [0, 256], sizes = [8, 128], strides = [1, 1]} : vector<8x512xf32> to vector<8x128xf32>
      %481 = arith.addf %479, %480 : vector<8x128xf32>
      %482 = vector.extract_strided_slice %422 {offsets = [0, 384], sizes = [8, 128], strides = [1, 1]} : vector<8x512xf32> to vector<8x128xf32>
      %483 = arith.addf %481, %482 : vector<8x128xf32>
      %484 = vector.extract_strided_slice %423 {offsets = [0, 0], sizes = [8, 128], strides = [1, 1]} : vector<8x512xf32> to vector<8x128xf32>
      %485 = arith.addf %363, %484 : vector<8x128xf32>
      %486 = vector.extract_strided_slice %423 {offsets = [0, 128], sizes = [8, 128], strides = [1, 1]} : vector<8x512xf32> to vector<8x128xf32>
      %487 = arith.addf %485, %486 : vector<8x128xf32>
      %488 = vector.extract_strided_slice %423 {offsets = [0, 256], sizes = [8, 128], strides = [1, 1]} : vector<8x512xf32> to vector<8x128xf32>
      %489 = arith.addf %487, %488 : vector<8x128xf32>
      %490 = vector.extract_strided_slice %423 {offsets = [0, 384], sizes = [8, 128], strides = [1, 1]} : vector<8x512xf32> to vector<8x128xf32>
      %491 = arith.addf %489, %490 : vector<8x128xf32>
      %492 = vector.extract_strided_slice %424 {offsets = [0, 0], sizes = [8, 128], strides = [1, 1]} : vector<8x512xf32> to vector<8x128xf32>
      %493 = arith.addf %371, %492 : vector<8x128xf32>
      %494 = vector.extract_strided_slice %424 {offsets = [0, 128], sizes = [8, 128], strides = [1, 1]} : vector<8x512xf32> to vector<8x128xf32>
      %495 = arith.addf %493, %494 : vector<8x128xf32>
      %496 = vector.extract_strided_slice %424 {offsets = [0, 256], sizes = [8, 128], strides = [1, 1]} : vector<8x512xf32> to vector<8x128xf32>
      %497 = arith.addf %495, %496 : vector<8x128xf32>
      %498 = vector.extract_strided_slice %424 {offsets = [0, 384], sizes = [8, 128], strides = [1, 1]} : vector<8x512xf32> to vector<8x128xf32>
      %499 = arith.addf %497, %498 : vector<8x128xf32>
      %500 = vector.extract_strided_slice %425 {offsets = [0, 0], sizes = [8, 128], strides = [1, 1]} : vector<8x512xf32> to vector<8x128xf32>
      %501 = arith.addf %379, %500 : vector<8x128xf32>
      %502 = vector.extract_strided_slice %425 {offsets = [0, 128], sizes = [8, 128], strides = [1, 1]} : vector<8x512xf32> to vector<8x128xf32>
      %503 = arith.addf %501, %502 : vector<8x128xf32>
      %504 = vector.extract_strided_slice %425 {offsets = [0, 256], sizes = [8, 128], strides = [1, 1]} : vector<8x512xf32> to vector<8x128xf32>
      %505 = arith.addf %503, %504 : vector<8x128xf32>
      %506 = vector.extract_strided_slice %425 {offsets = [0, 384], sizes = [8, 128], strides = [1, 1]} : vector<8x512xf32> to vector<8x128xf32>
      %507 = arith.addf %505, %506 : vector<8x128xf32>
      %508 = vector.extract_strided_slice %426 {offsets = [0, 0], sizes = [8, 128], strides = [1, 1]} : vector<8x512xf32> to vector<8x128xf32>
      %509 = arith.addf %387, %508 : vector<8x128xf32>
      %510 = vector.extract_strided_slice %426 {offsets = [0, 128], sizes = [8, 128], strides = [1, 1]} : vector<8x512xf32> to vector<8x128xf32>
      %511 = arith.addf %509, %510 : vector<8x128xf32>
      %512 = vector.extract_strided_slice %426 {offsets = [0, 256], sizes = [8, 128], strides = [1, 1]} : vector<8x512xf32> to vector<8x128xf32>
      %513 = arith.addf %511, %512 : vector<8x128xf32>
      %514 = vector.extract_strided_slice %426 {offsets = [0, 384], sizes = [8, 128], strides = [1, 1]} : vector<8x512xf32> to vector<8x128xf32>
      %515 = arith.addf %513, %514 : vector<8x128xf32>
      %516 = vector.extract_strided_slice %427 {offsets = [0, 0], sizes = [8, 128], strides = [1, 1]} : vector<8x512xf32> to vector<8x128xf32>
      %517 = arith.addf %395, %516 : vector<8x128xf32>
      %518 = vector.extract_strided_slice %427 {offsets = [0, 128], sizes = [8, 128], strides = [1, 1]} : vector<8x512xf32> to vector<8x128xf32>
      %519 = arith.addf %517, %518 : vector<8x128xf32>
      %520 = vector.extract_strided_slice %427 {offsets = [0, 256], sizes = [8, 128], strides = [1, 1]} : vector<8x512xf32> to vector<8x128xf32>
      %521 = arith.addf %519, %520 : vector<8x128xf32>
      %522 = vector.extract_strided_slice %427 {offsets = [0, 384], sizes = [8, 128], strides = [1, 1]} : vector<8x512xf32> to vector<8x128xf32>
      %523 = arith.addf %521, %522 : vector<8x128xf32>
      %c0_i32_55 = arith.constant 0 : i32
      %c0_i32_56 = arith.constant 0 : i32
      %524 = tpu.memref_slice %arg2[%c0_i32_1, %c0_i32_55, %c0_i32_56] : memref<2x16x4096xf32, #tpu.memory_space<vmem>> -> memref<1x16x4096xf32, #tpu.memory_space<vmem>>
      %525 = tpu.memref_squeeze %524 : memref<1x16x4096xf32, #tpu.memory_space<vmem>> -> memref<16x4096xf32, #tpu.memory_space<vmem>>
      %526 = arith.index_cast %10 : i32 to index
      %c2048 = arith.constant 2048 : index
      %527 = vector.load %525[%526, %c2048] : memref<16x4096xf32, #tpu.memory_space<vmem>>, vector<8x512xf32>
      %c0_i32_57 = arith.constant 0 : i32
      %c0_i32_58 = arith.constant 0 : i32
      %528 = tpu.memref_slice %arg2[%c1_i32, %c0_i32_57, %c0_i32_58] : memref<2x16x4096xf32, #tpu.memory_space<vmem>> -> memref<1x16x4096xf32, #tpu.memory_space<vmem>>
      %529 = tpu.memref_squeeze %528 : memref<1x16x4096xf32, #tpu.memory_space<vmem>> -> memref<16x4096xf32, #tpu.memory_space<vmem>>
      %530 = arith.index_cast %10 : i32 to index
      %c2048_59 = arith.constant 2048 : index
      %531 = vector.load %529[%530, %c2048_59] : memref<16x4096xf32, #tpu.memory_space<vmem>>, vector<8x512xf32>
      %532 = arith.index_cast %10 : i32 to index
      %c2048_60 = arith.constant 2048 : index
      %533 = vector.load %arg3[%532, %c2048_60] : memref<16x4096xf32, #tpu.memory_space<vmem>>, vector<8x512xf32>
      %534 = arith.index_cast %10 : i32 to index
      %c2048_61 = arith.constant 2048 : index
      %535 = vector.load %arg4[%534, %c2048_61] : memref<16x4096xf32, #tpu.memory_space<vmem>>, vector<8x512xf32>
      %c6000_i32_62 = arith.constant 6000 : i32
      %536 = arith.subi %c6000_i32_62, %4 : i32
      %c2048_i32 = arith.constant 2048 : i32
      %537 = arith.subi %536, %c2048_i32 : i32
      %538 = vector.broadcast %537 : i32 to vector<8x512xi32>
      %539 = arith.cmpi slt, %3, %538 : vector<8x512xi32>
      %cst_63 = arith.constant 0.000000e+00 : f32
      %540 = vector.broadcast %cst_63 : f32 to vector<8x512xf32>
      %541 = arith.select %539, %527, %540 : vector<8x512xi1>, vector<8x512xf32>
      %cst_64 = arith.constant 0.000000e+00 : f32
      %542 = vector.broadcast %cst_64 : f32 to vector<8x512xf32>
      %543 = arith.select %539, %531, %542 : vector<8x512xi1>, vector<8x512xf32>
      %cst_65 = arith.constant 0.000000e+00 : f32
      %544 = vector.broadcast %cst_65 : f32 to vector<8x512xf32>
      %545 = arith.select %539, %533, %544 : vector<8x512xi1>, vector<8x512xf32>
      %cst_66 = arith.constant 0.000000e+00 : f32
      %546 = vector.broadcast %cst_66 : f32 to vector<8x512xf32>
      %547 = arith.select %539, %535, %546 : vector<8x512xi1>, vector<8x512xf32>
      %548 = arith.mulf %541, %541 : vector<8x512xf32>
      %549 = arith.mulf %543, %543 : vector<8x512xf32>
      %550 = arith.mulf %545, %545 : vector<8x512xf32>
      %551 = arith.mulf %547, %547 : vector<8x512xf32>
      %552 = arith.mulf %541, %545 : vector<8x512xf32>
      %553 = arith.mulf %541, %547 : vector<8x512xf32>
      %554 = arith.mulf %543, %545 : vector<8x512xf32>
      %555 = arith.mulf %543, %547 : vector<8x512xf32>
      %556 = vector.extract_strided_slice %541 {offsets = [0, 0], sizes = [8, 128], strides = [1, 1]} : vector<8x512xf32> to vector<8x128xf32>
      %557 = arith.addf %435, %556 : vector<8x128xf32>
      %558 = vector.extract_strided_slice %541 {offsets = [0, 128], sizes = [8, 128], strides = [1, 1]} : vector<8x512xf32> to vector<8x128xf32>
      %559 = arith.addf %557, %558 : vector<8x128xf32>
      %560 = vector.extract_strided_slice %541 {offsets = [0, 256], sizes = [8, 128], strides = [1, 1]} : vector<8x512xf32> to vector<8x128xf32>
      %561 = arith.addf %559, %560 : vector<8x128xf32>
      %562 = vector.extract_strided_slice %541 {offsets = [0, 384], sizes = [8, 128], strides = [1, 1]} : vector<8x512xf32> to vector<8x128xf32>
      %563 = arith.addf %561, %562 : vector<8x128xf32>
      %564 = vector.extract_strided_slice %543 {offsets = [0, 0], sizes = [8, 128], strides = [1, 1]} : vector<8x512xf32> to vector<8x128xf32>
      %565 = arith.addf %443, %564 : vector<8x128xf32>
      %566 = vector.extract_strided_slice %543 {offsets = [0, 128], sizes = [8, 128], strides = [1, 1]} : vector<8x512xf32> to vector<8x128xf32>
      %567 = arith.addf %565, %566 : vector<8x128xf32>
      %568 = vector.extract_strided_slice %543 {offsets = [0, 256], sizes = [8, 128], strides = [1, 1]} : vector<8x512xf32> to vector<8x128xf32>
      %569 = arith.addf %567, %568 : vector<8x128xf32>
      %570 = vector.extract_strided_slice %543 {offsets = [0, 384], sizes = [8, 128], strides = [1, 1]} : vector<8x512xf32> to vector<8x128xf32>
      %571 = arith.addf %569, %570 : vector<8x128xf32>
      %572 = vector.extract_strided_slice %548 {offsets = [0, 0], sizes = [8, 128], strides = [1, 1]} : vector<8x512xf32> to vector<8x128xf32>
      %573 = arith.addf %451, %572 : vector<8x128xf32>
      %574 = vector.extract_strided_slice %548 {offsets = [0, 128], sizes = [8, 128], strides = [1, 1]} : vector<8x512xf32> to vector<8x128xf32>
      %575 = arith.addf %573, %574 : vector<8x128xf32>
      %576 = vector.extract_strided_slice %548 {offsets = [0, 256], sizes = [8, 128], strides = [1, 1]} : vector<8x512xf32> to vector<8x128xf32>
      %577 = arith.addf %575, %576 : vector<8x128xf32>
      %578 = vector.extract_strided_slice %548 {offsets = [0, 384], sizes = [8, 128], strides = [1, 1]} : vector<8x512xf32> to vector<8x128xf32>
      %579 = arith.addf %577, %578 : vector<8x128xf32>
      %580 = vector.extract_strided_slice %549 {offsets = [0, 0], sizes = [8, 128], strides = [1, 1]} : vector<8x512xf32> to vector<8x128xf32>
      %581 = arith.addf %459, %580 : vector<8x128xf32>
      %582 = vector.extract_strided_slice %549 {offsets = [0, 128], sizes = [8, 128], strides = [1, 1]} : vector<8x512xf32> to vector<8x128xf32>
      %583 = arith.addf %581, %582 : vector<8x128xf32>
      %584 = vector.extract_strided_slice %549 {offsets = [0, 256], sizes = [8, 128], strides = [1, 1]} : vector<8x512xf32> to vector<8x128xf32>
      %585 = arith.addf %583, %584 : vector<8x128xf32>
      %586 = vector.extract_strided_slice %549 {offsets = [0, 384], sizes = [8, 128], strides = [1, 1]} : vector<8x512xf32> to vector<8x128xf32>
      %587 = arith.addf %585, %586 : vector<8x128xf32>
      %588 = vector.extract_strided_slice %545 {offsets = [0, 0], sizes = [8, 128], strides = [1, 1]} : vector<8x512xf32> to vector<8x128xf32>
      %589 = arith.addf %467, %588 : vector<8x128xf32>
      %590 = vector.extract_strided_slice %545 {offsets = [0, 128], sizes = [8, 128], strides = [1, 1]} : vector<8x512xf32> to vector<8x128xf32>
      %591 = arith.addf %589, %590 : vector<8x128xf32>
      %592 = vector.extract_strided_slice %545 {offsets = [0, 256], sizes = [8, 128], strides = [1, 1]} : vector<8x512xf32> to vector<8x128xf32>
      %593 = arith.addf %591, %592 : vector<8x128xf32>
      %594 = vector.extract_strided_slice %545 {offsets = [0, 384], sizes = [8, 128], strides = [1, 1]} : vector<8x512xf32> to vector<8x128xf32>
      %595 = arith.addf %593, %594 : vector<8x128xf32>
      %596 = vector.extract_strided_slice %547 {offsets = [0, 0], sizes = [8, 128], strides = [1, 1]} : vector<8x512xf32> to vector<8x128xf32>
      %597 = arith.addf %475, %596 : vector<8x128xf32>
      %598 = vector.extract_strided_slice %547 {offsets = [0, 128], sizes = [8, 128], strides = [1, 1]} : vector<8x512xf32> to vector<8x128xf32>
      %599 = arith.addf %597, %598 : vector<8x128xf32>
      %600 = vector.extract_strided_slice %547 {offsets = [0, 256], sizes = [8, 128], strides = [1, 1]} : vector<8x512xf32> to vector<8x128xf32>
      %601 = arith.addf %599, %600 : vector<8x128xf32>
      %602 = vector.extract_strided_slice %547 {offsets = [0, 384], sizes = [8, 128], strides = [1, 1]} : vector<8x512xf32> to vector<8x128xf32>
      %603 = arith.addf %601, %602 : vector<8x128xf32>
      %604 = vector.extract_strided_slice %550 {offsets = [0, 0], sizes = [8, 128], strides = [1, 1]} : vector<8x512xf32> to vector<8x128xf32>
      %605 = arith.addf %483, %604 : vector<8x128xf32>
      %606 = vector.extract_strided_slice %550 {offsets = [0, 128], sizes = [8, 128], strides = [1, 1]} : vector<8x512xf32> to vector<8x128xf32>
      %607 = arith.addf %605, %606 : vector<8x128xf32>
      %608 = vector.extract_strided_slice %550 {offsets = [0, 256], sizes = [8, 128], strides = [1, 1]} : vector<8x512xf32> to vector<8x128xf32>
      %609 = arith.addf %607, %608 : vector<8x128xf32>
      %610 = vector.extract_strided_slice %550 {offsets = [0, 384], sizes = [8, 128], strides = [1, 1]} : vector<8x512xf32> to vector<8x128xf32>
      %611 = arith.addf %609, %610 : vector<8x128xf32>
      %612 = vector.extract_strided_slice %551 {offsets = [0, 0], sizes = [8, 128], strides = [1, 1]} : vector<8x512xf32> to vector<8x128xf32>
      %613 = arith.addf %491, %612 : vector<8x128xf32>
      %614 = vector.extract_strided_slice %551 {offsets = [0, 128], sizes = [8, 128], strides = [1, 1]} : vector<8x512xf32> to vector<8x128xf32>
      %615 = arith.addf %613, %614 : vector<8x128xf32>
      %616 = vector.extract_strided_slice %551 {offsets = [0, 256], sizes = [8, 128], strides = [1, 1]} : vector<8x512xf32> to vector<8x128xf32>
      %617 = arith.addf %615, %616 : vector<8x128xf32>
      %618 = vector.extract_strided_slice %551 {offsets = [0, 384], sizes = [8, 128], strides = [1, 1]} : vector<8x512xf32> to vector<8x128xf32>
      %619 = arith.addf %617, %618 : vector<8x128xf32>
      %620 = vector.extract_strided_slice %552 {offsets = [0, 0], sizes = [8, 128], strides = [1, 1]} : vector<8x512xf32> to vector<8x128xf32>
      %621 = arith.addf %499, %620 : vector<8x128xf32>
      %622 = vector.extract_strided_slice %552 {offsets = [0, 128], sizes = [8, 128], strides = [1, 1]} : vector<8x512xf32> to vector<8x128xf32>
      %623 = arith.addf %621, %622 : vector<8x128xf32>
      %624 = vector.extract_strided_slice %552 {offsets = [0, 256], sizes = [8, 128], strides = [1, 1]} : vector<8x512xf32> to vector<8x128xf32>
      %625 = arith.addf %623, %624 : vector<8x128xf32>
      %626 = vector.extract_strided_slice %552 {offsets = [0, 384], sizes = [8, 128], strides = [1, 1]} : vector<8x512xf32> to vector<8x128xf32>
      %627 = arith.addf %625, %626 : vector<8x128xf32>
      %628 = vector.extract_strided_slice %553 {offsets = [0, 0], sizes = [8, 128], strides = [1, 1]} : vector<8x512xf32> to vector<8x128xf32>
      %629 = arith.addf %507, %628 : vector<8x128xf32>
      %630 = vector.extract_strided_slice %553 {offsets = [0, 128], sizes = [8, 128], strides = [1, 1]} : vector<8x512xf32> to vector<8x128xf32>
      %631 = arith.addf %629, %630 : vector<8x128xf32>
      %632 = vector.extract_strided_slice %553 {offsets = [0, 256], sizes = [8, 128], strides = [1, 1]} : vector<8x512xf32> to vector<8x128xf32>
      %633 = arith.addf %631, %632 : vector<8x128xf32>
      %634 = vector.extract_strided_slice %553 {offsets = [0, 384], sizes = [8, 128], strides = [1, 1]} : vector<8x512xf32> to vector<8x128xf32>
      %635 = arith.addf %633, %634 : vector<8x128xf32>
      %636 = vector.extract_strided_slice %554 {offsets = [0, 0], sizes = [8, 128], strides = [1, 1]} : vector<8x512xf32> to vector<8x128xf32>
      %637 = arith.addf %515, %636 : vector<8x128xf32>
      %638 = vector.extract_strided_slice %554 {offsets = [0, 128], sizes = [8, 128], strides = [1, 1]} : vector<8x512xf32> to vector<8x128xf32>
      %639 = arith.addf %637, %638 : vector<8x128xf32>
      %640 = vector.extract_strided_slice %554 {offsets = [0, 256], sizes = [8, 128], strides = [1, 1]} : vector<8x512xf32> to vector<8x128xf32>
      %641 = arith.addf %639, %640 : vector<8x128xf32>
      %642 = vector.extract_strided_slice %554 {offsets = [0, 384], sizes = [8, 128], strides = [1, 1]} : vector<8x512xf32> to vector<8x128xf32>
      %643 = arith.addf %641, %642 : vector<8x128xf32>
      %644 = vector.extract_strided_slice %555 {offsets = [0, 0], sizes = [8, 128], strides = [1, 1]} : vector<8x512xf32> to vector<8x128xf32>
      %645 = arith.addf %523, %644 : vector<8x128xf32>
      %646 = vector.extract_strided_slice %555 {offsets = [0, 128], sizes = [8, 128], strides = [1, 1]} : vector<8x512xf32> to vector<8x128xf32>
      %647 = arith.addf %645, %646 : vector<8x128xf32>
      %648 = vector.extract_strided_slice %555 {offsets = [0, 256], sizes = [8, 128], strides = [1, 1]} : vector<8x512xf32> to vector<8x128xf32>
      %649 = arith.addf %647, %648 : vector<8x128xf32>
      %650 = vector.extract_strided_slice %555 {offsets = [0, 384], sizes = [8, 128], strides = [1, 1]} : vector<8x512xf32> to vector<8x128xf32>
      %651 = arith.addf %649, %650 : vector<8x128xf32>
      %c0_i32_67 = arith.constant 0 : i32
      %c0_i32_68 = arith.constant 0 : i32
      %652 = tpu.memref_slice %arg2[%c0_i32_1, %c0_i32_67, %c0_i32_68] : memref<2x16x4096xf32, #tpu.memory_space<vmem>> -> memref<1x16x4096xf32, #tpu.memory_space<vmem>>
      %653 = tpu.memref_squeeze %652 : memref<1x16x4096xf32, #tpu.memory_space<vmem>> -> memref<16x4096xf32, #tpu.memory_space<vmem>>
      %654 = arith.index_cast %10 : i32 to index
      %c2560 = arith.constant 2560 : index
      %655 = vector.load %653[%654, %c2560] : memref<16x4096xf32, #tpu.memory_space<vmem>>, vector<8x512xf32>
      %c0_i32_69 = arith.constant 0 : i32
      %c0_i32_70 = arith.constant 0 : i32
      %656 = tpu.memref_slice %arg2[%c1_i32, %c0_i32_69, %c0_i32_70] : memref<2x16x4096xf32, #tpu.memory_space<vmem>> -> memref<1x16x4096xf32, #tpu.memory_space<vmem>>
      %657 = tpu.memref_squeeze %656 : memref<1x16x4096xf32, #tpu.memory_space<vmem>> -> memref<16x4096xf32, #tpu.memory_space<vmem>>
      %658 = arith.index_cast %10 : i32 to index
      %c2560_71 = arith.constant 2560 : index
      %659 = vector.load %657[%658, %c2560_71] : memref<16x4096xf32, #tpu.memory_space<vmem>>, vector<8x512xf32>
      %660 = arith.index_cast %10 : i32 to index
      %c2560_72 = arith.constant 2560 : index
      %661 = vector.load %arg3[%660, %c2560_72] : memref<16x4096xf32, #tpu.memory_space<vmem>>, vector<8x512xf32>
      %662 = arith.index_cast %10 : i32 to index
      %c2560_73 = arith.constant 2560 : index
      %663 = vector.load %arg4[%662, %c2560_73] : memref<16x4096xf32, #tpu.memory_space<vmem>>, vector<8x512xf32>
      %c6000_i32_74 = arith.constant 6000 : i32
      %664 = arith.subi %c6000_i32_74, %4 : i32
      %c2560_i32 = arith.constant 2560 : i32
      %665 = arith.subi %664, %c2560_i32 : i32
      %666 = vector.broadcast %665 : i32 to vector<8x512xi32>
      %667 = arith.cmpi slt, %3, %666 : vector<8x512xi32>
      %cst_75 = arith.constant 0.000000e+00 : f32
      %668 = vector.broadcast %cst_75 : f32 to vector<8x512xf32>
      %669 = arith.select %667, %655, %668 : vector<8x512xi1>, vector<8x512xf32>
      %cst_76 = arith.constant 0.000000e+00 : f32
      %670 = vector.broadcast %cst_76 : f32 to vector<8x512xf32>
      %671 = arith.select %667, %659, %670 : vector<8x512xi1>, vector<8x512xf32>
      %cst_77 = arith.constant 0.000000e+00 : f32
      %672 = vector.broadcast %cst_77 : f32 to vector<8x512xf32>
      %673 = arith.select %667, %661, %672 : vector<8x512xi1>, vector<8x512xf32>
      %cst_78 = arith.constant 0.000000e+00 : f32
      %674 = vector.broadcast %cst_78 : f32 to vector<8x512xf32>
      %675 = arith.select %667, %663, %674 : vector<8x512xi1>, vector<8x512xf32>
      %676 = arith.mulf %669, %669 : vector<8x512xf32>
      %677 = arith.mulf %671, %671 : vector<8x512xf32>
      %678 = arith.mulf %673, %673 : vector<8x512xf32>
      %679 = arith.mulf %675, %675 : vector<8x512xf32>
      %680 = arith.mulf %669, %673 : vector<8x512xf32>
      %681 = arith.mulf %669, %675 : vector<8x512xf32>
      %682 = arith.mulf %671, %673 : vector<8x512xf32>
      %683 = arith.mulf %671, %675 : vector<8x512xf32>
      %684 = vector.extract_strided_slice %669 {offsets = [0, 0], sizes = [8, 128], strides = [1, 1]} : vector<8x512xf32> to vector<8x128xf32>
      %685 = arith.addf %563, %684 : vector<8x128xf32>
      %686 = vector.extract_strided_slice %669 {offsets = [0, 128], sizes = [8, 128], strides = [1, 1]} : vector<8x512xf32> to vector<8x128xf32>
      %687 = arith.addf %685, %686 : vector<8x128xf32>
      %688 = vector.extract_strided_slice %669 {offsets = [0, 256], sizes = [8, 128], strides = [1, 1]} : vector<8x512xf32> to vector<8x128xf32>
      %689 = arith.addf %687, %688 : vector<8x128xf32>
      %690 = vector.extract_strided_slice %669 {offsets = [0, 384], sizes = [8, 128], strides = [1, 1]} : vector<8x512xf32> to vector<8x128xf32>
      %691 = arith.addf %689, %690 : vector<8x128xf32>
      %692 = vector.extract_strided_slice %671 {offsets = [0, 0], sizes = [8, 128], strides = [1, 1]} : vector<8x512xf32> to vector<8x128xf32>
      %693 = arith.addf %571, %692 : vector<8x128xf32>
      %694 = vector.extract_strided_slice %671 {offsets = [0, 128], sizes = [8, 128], strides = [1, 1]} : vector<8x512xf32> to vector<8x128xf32>
      %695 = arith.addf %693, %694 : vector<8x128xf32>
      %696 = vector.extract_strided_slice %671 {offsets = [0, 256], sizes = [8, 128], strides = [1, 1]} : vector<8x512xf32> to vector<8x128xf32>
      %697 = arith.addf %695, %696 : vector<8x128xf32>
      %698 = vector.extract_strided_slice %671 {offsets = [0, 384], sizes = [8, 128], strides = [1, 1]} : vector<8x512xf32> to vector<8x128xf32>
      %699 = arith.addf %697, %698 : vector<8x128xf32>
      %700 = vector.extract_strided_slice %676 {offsets = [0, 0], sizes = [8, 128], strides = [1, 1]} : vector<8x512xf32> to vector<8x128xf32>
      %701 = arith.addf %579, %700 : vector<8x128xf32>
      %702 = vector.extract_strided_slice %676 {offsets = [0, 128], sizes = [8, 128], strides = [1, 1]} : vector<8x512xf32> to vector<8x128xf32>
      %703 = arith.addf %701, %702 : vector<8x128xf32>
      %704 = vector.extract_strided_slice %676 {offsets = [0, 256], sizes = [8, 128], strides = [1, 1]} : vector<8x512xf32> to vector<8x128xf32>
      %705 = arith.addf %703, %704 : vector<8x128xf32>
      %706 = vector.extract_strided_slice %676 {offsets = [0, 384], sizes = [8, 128], strides = [1, 1]} : vector<8x512xf32> to vector<8x128xf32>
      %707 = arith.addf %705, %706 : vector<8x128xf32>
      %708 = vector.extract_strided_slice %677 {offsets = [0, 0], sizes = [8, 128], strides = [1, 1]} : vector<8x512xf32> to vector<8x128xf32>
      %709 = arith.addf %587, %708 : vector<8x128xf32>
      %710 = vector.extract_strided_slice %677 {offsets = [0, 128], sizes = [8, 128], strides = [1, 1]} : vector<8x512xf32> to vector<8x128xf32>
      %711 = arith.addf %709, %710 : vector<8x128xf32>
      %712 = vector.extract_strided_slice %677 {offsets = [0, 256], sizes = [8, 128], strides = [1, 1]} : vector<8x512xf32> to vector<8x128xf32>
      %713 = arith.addf %711, %712 : vector<8x128xf32>
      %714 = vector.extract_strided_slice %677 {offsets = [0, 384], sizes = [8, 128], strides = [1, 1]} : vector<8x512xf32> to vector<8x128xf32>
      %715 = arith.addf %713, %714 : vector<8x128xf32>
      %716 = vector.extract_strided_slice %673 {offsets = [0, 0], sizes = [8, 128], strides = [1, 1]} : vector<8x512xf32> to vector<8x128xf32>
      %717 = arith.addf %595, %716 : vector<8x128xf32>
      %718 = vector.extract_strided_slice %673 {offsets = [0, 128], sizes = [8, 128], strides = [1, 1]} : vector<8x512xf32> to vector<8x128xf32>
      %719 = arith.addf %717, %718 : vector<8x128xf32>
      %720 = vector.extract_strided_slice %673 {offsets = [0, 256], sizes = [8, 128], strides = [1, 1]} : vector<8x512xf32> to vector<8x128xf32>
      %721 = arith.addf %719, %720 : vector<8x128xf32>
      %722 = vector.extract_strided_slice %673 {offsets = [0, 384], sizes = [8, 128], strides = [1, 1]} : vector<8x512xf32> to vector<8x128xf32>
      %723 = arith.addf %721, %722 : vector<8x128xf32>
      %724 = vector.extract_strided_slice %675 {offsets = [0, 0], sizes = [8, 128], strides = [1, 1]} : vector<8x512xf32> to vector<8x128xf32>
      %725 = arith.addf %603, %724 : vector<8x128xf32>
      %726 = vector.extract_strided_slice %675 {offsets = [0, 128], sizes = [8, 128], strides = [1, 1]} : vector<8x512xf32> to vector<8x128xf32>
      %727 = arith.addf %725, %726 : vector<8x128xf32>
      %728 = vector.extract_strided_slice %675 {offsets = [0, 256], sizes = [8, 128], strides = [1, 1]} : vector<8x512xf32> to vector<8x128xf32>
      %729 = arith.addf %727, %728 : vector<8x128xf32>
      %730 = vector.extract_strided_slice %675 {offsets = [0, 384], sizes = [8, 128], strides = [1, 1]} : vector<8x512xf32> to vector<8x128xf32>
      %731 = arith.addf %729, %730 : vector<8x128xf32>
      %732 = vector.extract_strided_slice %678 {offsets = [0, 0], sizes = [8, 128], strides = [1, 1]} : vector<8x512xf32> to vector<8x128xf32>
      %733 = arith.addf %611, %732 : vector<8x128xf32>
      %734 = vector.extract_strided_slice %678 {offsets = [0, 128], sizes = [8, 128], strides = [1, 1]} : vector<8x512xf32> to vector<8x128xf32>
      %735 = arith.addf %733, %734 : vector<8x128xf32>
      %736 = vector.extract_strided_slice %678 {offsets = [0, 256], sizes = [8, 128], strides = [1, 1]} : vector<8x512xf32> to vector<8x128xf32>
      %737 = arith.addf %735, %736 : vector<8x128xf32>
      %738 = vector.extract_strided_slice %678 {offsets = [0, 384], sizes = [8, 128], strides = [1, 1]} : vector<8x512xf32> to vector<8x128xf32>
      %739 = arith.addf %737, %738 : vector<8x128xf32>
      %740 = vector.extract_strided_slice %679 {offsets = [0, 0], sizes = [8, 128], strides = [1, 1]} : vector<8x512xf32> to vector<8x128xf32>
      %741 = arith.addf %619, %740 : vector<8x128xf32>
      %742 = vector.extract_strided_slice %679 {offsets = [0, 128], sizes = [8, 128], strides = [1, 1]} : vector<8x512xf32> to vector<8x128xf32>
      %743 = arith.addf %741, %742 : vector<8x128xf32>
      %744 = vector.extract_strided_slice %679 {offsets = [0, 256], sizes = [8, 128], strides = [1, 1]} : vector<8x512xf32> to vector<8x128xf32>
      %745 = arith.addf %743, %744 : vector<8x128xf32>
      %746 = vector.extract_strided_slice %679 {offsets = [0, 384], sizes = [8, 128], strides = [1, 1]} : vector<8x512xf32> to vector<8x128xf32>
      %747 = arith.addf %745, %746 : vector<8x128xf32>
      %748 = vector.extract_strided_slice %680 {offsets = [0, 0], sizes = [8, 128], strides = [1, 1]} : vector<8x512xf32> to vector<8x128xf32>
      %749 = arith.addf %627, %748 : vector<8x128xf32>
      %750 = vector.extract_strided_slice %680 {offsets = [0, 128], sizes = [8, 128], strides = [1, 1]} : vector<8x512xf32> to vector<8x128xf32>
      %751 = arith.addf %749, %750 : vector<8x128xf32>
      %752 = vector.extract_strided_slice %680 {offsets = [0, 256], sizes = [8, 128], strides = [1, 1]} : vector<8x512xf32> to vector<8x128xf32>
      %753 = arith.addf %751, %752 : vector<8x128xf32>
      %754 = vector.extract_strided_slice %680 {offsets = [0, 384], sizes = [8, 128], strides = [1, 1]} : vector<8x512xf32> to vector<8x128xf32>
      %755 = arith.addf %753, %754 : vector<8x128xf32>
      %756 = vector.extract_strided_slice %681 {offsets = [0, 0], sizes = [8, 128], strides = [1, 1]} : vector<8x512xf32> to vector<8x128xf32>
      %757 = arith.addf %635, %756 : vector<8x128xf32>
      %758 = vector.extract_strided_slice %681 {offsets = [0, 128], sizes = [8, 128], strides = [1, 1]} : vector<8x512xf32> to vector<8x128xf32>
      %759 = arith.addf %757, %758 : vector<8x128xf32>
      %760 = vector.extract_strided_slice %681 {offsets = [0, 256], sizes = [8, 128], strides = [1, 1]} : vector<8x512xf32> to vector<8x128xf32>
      %761 = arith.addf %759, %760 : vector<8x128xf32>
      %762 = vector.extract_strided_slice %681 {offsets = [0, 384], sizes = [8, 128], strides = [1, 1]} : vector<8x512xf32> to vector<8x128xf32>
      %763 = arith.addf %761, %762 : vector<8x128xf32>
      %764 = vector.extract_strided_slice %682 {offsets = [0, 0], sizes = [8, 128], strides = [1, 1]} : vector<8x512xf32> to vector<8x128xf32>
      %765 = arith.addf %643, %764 : vector<8x128xf32>
      %766 = vector.extract_strided_slice %682 {offsets = [0, 128], sizes = [8, 128], strides = [1, 1]} : vector<8x512xf32> to vector<8x128xf32>
      %767 = arith.addf %765, %766 : vector<8x128xf32>
      %768 = vector.extract_strided_slice %682 {offsets = [0, 256], sizes = [8, 128], strides = [1, 1]} : vector<8x512xf32> to vector<8x128xf32>
      %769 = arith.addf %767, %768 : vector<8x128xf32>
      %770 = vector.extract_strided_slice %682 {offsets = [0, 384], sizes = [8, 128], strides = [1, 1]} : vector<8x512xf32> to vector<8x128xf32>
      %771 = arith.addf %769, %770 : vector<8x128xf32>
      %772 = vector.extract_strided_slice %683 {offsets = [0, 0], sizes = [8, 128], strides = [1, 1]} : vector<8x512xf32> to vector<8x128xf32>
      %773 = arith.addf %651, %772 : vector<8x128xf32>
      %774 = vector.extract_strided_slice %683 {offsets = [0, 128], sizes = [8, 128], strides = [1, 1]} : vector<8x512xf32> to vector<8x128xf32>
      %775 = arith.addf %773, %774 : vector<8x128xf32>
      %776 = vector.extract_strided_slice %683 {offsets = [0, 256], sizes = [8, 128], strides = [1, 1]} : vector<8x512xf32> to vector<8x128xf32>
      %777 = arith.addf %775, %776 : vector<8x128xf32>
      %778 = vector.extract_strided_slice %683 {offsets = [0, 384], sizes = [8, 128], strides = [1, 1]} : vector<8x512xf32> to vector<8x128xf32>
      %779 = arith.addf %777, %778 : vector<8x128xf32>
      %c0_i32_79 = arith.constant 0 : i32
      %c0_i32_80 = arith.constant 0 : i32
      %780 = tpu.memref_slice %arg2[%c0_i32_1, %c0_i32_79, %c0_i32_80] : memref<2x16x4096xf32, #tpu.memory_space<vmem>> -> memref<1x16x4096xf32, #tpu.memory_space<vmem>>
      %781 = tpu.memref_squeeze %780 : memref<1x16x4096xf32, #tpu.memory_space<vmem>> -> memref<16x4096xf32, #tpu.memory_space<vmem>>
      %782 = arith.index_cast %10 : i32 to index
      %c3072 = arith.constant 3072 : index
      %783 = vector.load %781[%782, %c3072] : memref<16x4096xf32, #tpu.memory_space<vmem>>, vector<8x512xf32>
      %c0_i32_81 = arith.constant 0 : i32
      %c0_i32_82 = arith.constant 0 : i32
      %784 = tpu.memref_slice %arg2[%c1_i32, %c0_i32_81, %c0_i32_82] : memref<2x16x4096xf32, #tpu.memory_space<vmem>> -> memref<1x16x4096xf32, #tpu.memory_space<vmem>>
      %785 = tpu.memref_squeeze %784 : memref<1x16x4096xf32, #tpu.memory_space<vmem>> -> memref<16x4096xf32, #tpu.memory_space<vmem>>
      %786 = arith.index_cast %10 : i32 to index
      %c3072_83 = arith.constant 3072 : index
      %787 = vector.load %785[%786, %c3072_83] : memref<16x4096xf32, #tpu.memory_space<vmem>>, vector<8x512xf32>
      %788 = arith.index_cast %10 : i32 to index
      %c3072_84 = arith.constant 3072 : index
      %789 = vector.load %arg3[%788, %c3072_84] : memref<16x4096xf32, #tpu.memory_space<vmem>>, vector<8x512xf32>
      %790 = arith.index_cast %10 : i32 to index
      %c3072_85 = arith.constant 3072 : index
      %791 = vector.load %arg4[%790, %c3072_85] : memref<16x4096xf32, #tpu.memory_space<vmem>>, vector<8x512xf32>
      %c6000_i32_86 = arith.constant 6000 : i32
      %792 = arith.subi %c6000_i32_86, %4 : i32
      %c3072_i32 = arith.constant 3072 : i32
      %793 = arith.subi %792, %c3072_i32 : i32
      %794 = vector.broadcast %793 : i32 to vector<8x512xi32>
      %795 = arith.cmpi slt, %3, %794 : vector<8x512xi32>
      %cst_87 = arith.constant 0.000000e+00 : f32
      %796 = vector.broadcast %cst_87 : f32 to vector<8x512xf32>
      %797 = arith.select %795, %783, %796 : vector<8x512xi1>, vector<8x512xf32>
      %cst_88 = arith.constant 0.000000e+00 : f32
      %798 = vector.broadcast %cst_88 : f32 to vector<8x512xf32>
      %799 = arith.select %795, %787, %798 : vector<8x512xi1>, vector<8x512xf32>
      %cst_89 = arith.constant 0.000000e+00 : f32
      %800 = vector.broadcast %cst_89 : f32 to vector<8x512xf32>
      %801 = arith.select %795, %789, %800 : vector<8x512xi1>, vector<8x512xf32>
      %cst_90 = arith.constant 0.000000e+00 : f32
      %802 = vector.broadcast %cst_90 : f32 to vector<8x512xf32>
      %803 = arith.select %795, %791, %802 : vector<8x512xi1>, vector<8x512xf32>
      %804 = arith.mulf %797, %797 : vector<8x512xf32>
      %805 = arith.mulf %799, %799 : vector<8x512xf32>
      %806 = arith.mulf %801, %801 : vector<8x512xf32>
      %807 = arith.mulf %803, %803 : vector<8x512xf32>
      %808 = arith.mulf %797, %801 : vector<8x512xf32>
      %809 = arith.mulf %797, %803 : vector<8x512xf32>
      %810 = arith.mulf %799, %801 : vector<8x512xf32>
      %811 = arith.mulf %799, %803 : vector<8x512xf32>
      %812 = vector.extract_strided_slice %797 {offsets = [0, 0], sizes = [8, 128], strides = [1, 1]} : vector<8x512xf32> to vector<8x128xf32>
      %813 = arith.addf %691, %812 : vector<8x128xf32>
      %814 = vector.extract_strided_slice %797 {offsets = [0, 128], sizes = [8, 128], strides = [1, 1]} : vector<8x512xf32> to vector<8x128xf32>
      %815 = arith.addf %813, %814 : vector<8x128xf32>
      %816 = vector.extract_strided_slice %797 {offsets = [0, 256], sizes = [8, 128], strides = [1, 1]} : vector<8x512xf32> to vector<8x128xf32>
      %817 = arith.addf %815, %816 : vector<8x128xf32>
      %818 = vector.extract_strided_slice %797 {offsets = [0, 384], sizes = [8, 128], strides = [1, 1]} : vector<8x512xf32> to vector<8x128xf32>
      %819 = arith.addf %817, %818 : vector<8x128xf32>
      %820 = vector.extract_strided_slice %799 {offsets = [0, 0], sizes = [8, 128], strides = [1, 1]} : vector<8x512xf32> to vector<8x128xf32>
      %821 = arith.addf %699, %820 : vector<8x128xf32>
      %822 = vector.extract_strided_slice %799 {offsets = [0, 128], sizes = [8, 128], strides = [1, 1]} : vector<8x512xf32> to vector<8x128xf32>
      %823 = arith.addf %821, %822 : vector<8x128xf32>
      %824 = vector.extract_strided_slice %799 {offsets = [0, 256], sizes = [8, 128], strides = [1, 1]} : vector<8x512xf32> to vector<8x128xf32>
      %825 = arith.addf %823, %824 : vector<8x128xf32>
      %826 = vector.extract_strided_slice %799 {offsets = [0, 384], sizes = [8, 128], strides = [1, 1]} : vector<8x512xf32> to vector<8x128xf32>
      %827 = arith.addf %825, %826 : vector<8x128xf32>
      %828 = vector.extract_strided_slice %804 {offsets = [0, 0], sizes = [8, 128], strides = [1, 1]} : vector<8x512xf32> to vector<8x128xf32>
      %829 = arith.addf %707, %828 : vector<8x128xf32>
      %830 = vector.extract_strided_slice %804 {offsets = [0, 128], sizes = [8, 128], strides = [1, 1]} : vector<8x512xf32> to vector<8x128xf32>
      %831 = arith.addf %829, %830 : vector<8x128xf32>
      %832 = vector.extract_strided_slice %804 {offsets = [0, 256], sizes = [8, 128], strides = [1, 1]} : vector<8x512xf32> to vector<8x128xf32>
      %833 = arith.addf %831, %832 : vector<8x128xf32>
      %834 = vector.extract_strided_slice %804 {offsets = [0, 384], sizes = [8, 128], strides = [1, 1]} : vector<8x512xf32> to vector<8x128xf32>
      %835 = arith.addf %833, %834 : vector<8x128xf32>
      %836 = vector.extract_strided_slice %805 {offsets = [0, 0], sizes = [8, 128], strides = [1, 1]} : vector<8x512xf32> to vector<8x128xf32>
      %837 = arith.addf %715, %836 : vector<8x128xf32>
      %838 = vector.extract_strided_slice %805 {offsets = [0, 128], sizes = [8, 128], strides = [1, 1]} : vector<8x512xf32> to vector<8x128xf32>
      %839 = arith.addf %837, %838 : vector<8x128xf32>
      %840 = vector.extract_strided_slice %805 {offsets = [0, 256], sizes = [8, 128], strides = [1, 1]} : vector<8x512xf32> to vector<8x128xf32>
      %841 = arith.addf %839, %840 : vector<8x128xf32>
      %842 = vector.extract_strided_slice %805 {offsets = [0, 384], sizes = [8, 128], strides = [1, 1]} : vector<8x512xf32> to vector<8x128xf32>
      %843 = arith.addf %841, %842 : vector<8x128xf32>
      %844 = vector.extract_strided_slice %801 {offsets = [0, 0], sizes = [8, 128], strides = [1, 1]} : vector<8x512xf32> to vector<8x128xf32>
      %845 = arith.addf %723, %844 : vector<8x128xf32>
      %846 = vector.extract_strided_slice %801 {offsets = [0, 128], sizes = [8, 128], strides = [1, 1]} : vector<8x512xf32> to vector<8x128xf32>
      %847 = arith.addf %845, %846 : vector<8x128xf32>
      %848 = vector.extract_strided_slice %801 {offsets = [0, 256], sizes = [8, 128], strides = [1, 1]} : vector<8x512xf32> to vector<8x128xf32>
      %849 = arith.addf %847, %848 : vector<8x128xf32>
      %850 = vector.extract_strided_slice %801 {offsets = [0, 384], sizes = [8, 128], strides = [1, 1]} : vector<8x512xf32> to vector<8x128xf32>
      %851 = arith.addf %849, %850 : vector<8x128xf32>
      %852 = vector.extract_strided_slice %803 {offsets = [0, 0], sizes = [8, 128], strides = [1, 1]} : vector<8x512xf32> to vector<8x128xf32>
      %853 = arith.addf %731, %852 : vector<8x128xf32>
      %854 = vector.extract_strided_slice %803 {offsets = [0, 128], sizes = [8, 128], strides = [1, 1]} : vector<8x512xf32> to vector<8x128xf32>
      %855 = arith.addf %853, %854 : vector<8x128xf32>
      %856 = vector.extract_strided_slice %803 {offsets = [0, 256], sizes = [8, 128], strides = [1, 1]} : vector<8x512xf32> to vector<8x128xf32>
      %857 = arith.addf %855, %856 : vector<8x128xf32>
      %858 = vector.extract_strided_slice %803 {offsets = [0, 384], sizes = [8, 128], strides = [1, 1]} : vector<8x512xf32> to vector<8x128xf32>
      %859 = arith.addf %857, %858 : vector<8x128xf32>
      %860 = vector.extract_strided_slice %806 {offsets = [0, 0], sizes = [8, 128], strides = [1, 1]} : vector<8x512xf32> to vector<8x128xf32>
      %861 = arith.addf %739, %860 : vector<8x128xf32>
      %862 = vector.extract_strided_slice %806 {offsets = [0, 128], sizes = [8, 128], strides = [1, 1]} : vector<8x512xf32> to vector<8x128xf32>
      %863 = arith.addf %861, %862 : vector<8x128xf32>
      %864 = vector.extract_strided_slice %806 {offsets = [0, 256], sizes = [8, 128], strides = [1, 1]} : vector<8x512xf32> to vector<8x128xf32>
      %865 = arith.addf %863, %864 : vector<8x128xf32>
      %866 = vector.extract_strided_slice %806 {offsets = [0, 384], sizes = [8, 128], strides = [1, 1]} : vector<8x512xf32> to vector<8x128xf32>
      %867 = arith.addf %865, %866 : vector<8x128xf32>
      %868 = vector.extract_strided_slice %807 {offsets = [0, 0], sizes = [8, 128], strides = [1, 1]} : vector<8x512xf32> to vector<8x128xf32>
      %869 = arith.addf %747, %868 : vector<8x128xf32>
      %870 = vector.extract_strided_slice %807 {offsets = [0, 128], sizes = [8, 128], strides = [1, 1]} : vector<8x512xf32> to vector<8x128xf32>
      %871 = arith.addf %869, %870 : vector<8x128xf32>
      %872 = vector.extract_strided_slice %807 {offsets = [0, 256], sizes = [8, 128], strides = [1, 1]} : vector<8x512xf32> to vector<8x128xf32>
      %873 = arith.addf %871, %872 : vector<8x128xf32>
      %874 = vector.extract_strided_slice %807 {offsets = [0, 384], sizes = [8, 128], strides = [1, 1]} : vector<8x512xf32> to vector<8x128xf32>
      %875 = arith.addf %873, %874 : vector<8x128xf32>
      %876 = vector.extract_strided_slice %808 {offsets = [0, 0], sizes = [8, 128], strides = [1, 1]} : vector<8x512xf32> to vector<8x128xf32>
      %877 = arith.addf %755, %876 : vector<8x128xf32>
      %878 = vector.extract_strided_slice %808 {offsets = [0, 128], sizes = [8, 128], strides = [1, 1]} : vector<8x512xf32> to vector<8x128xf32>
      %879 = arith.addf %877, %878 : vector<8x128xf32>
      %880 = vector.extract_strided_slice %808 {offsets = [0, 256], sizes = [8, 128], strides = [1, 1]} : vector<8x512xf32> to vector<8x128xf32>
      %881 = arith.addf %879, %880 : vector<8x128xf32>
      %882 = vector.extract_strided_slice %808 {offsets = [0, 384], sizes = [8, 128], strides = [1, 1]} : vector<8x512xf32> to vector<8x128xf32>
      %883 = arith.addf %881, %882 : vector<8x128xf32>
      %884 = vector.extract_strided_slice %809 {offsets = [0, 0], sizes = [8, 128], strides = [1, 1]} : vector<8x512xf32> to vector<8x128xf32>
      %885 = arith.addf %763, %884 : vector<8x128xf32>
      %886 = vector.extract_strided_slice %809 {offsets = [0, 128], sizes = [8, 128], strides = [1, 1]} : vector<8x512xf32> to vector<8x128xf32>
      %887 = arith.addf %885, %886 : vector<8x128xf32>
      %888 = vector.extract_strided_slice %809 {offsets = [0, 256], sizes = [8, 128], strides = [1, 1]} : vector<8x512xf32> to vector<8x128xf32>
      %889 = arith.addf %887, %888 : vector<8x128xf32>
      %890 = vector.extract_strided_slice %809 {offsets = [0, 384], sizes = [8, 128], strides = [1, 1]} : vector<8x512xf32> to vector<8x128xf32>
      %891 = arith.addf %889, %890 : vector<8x128xf32>
      %892 = vector.extract_strided_slice %810 {offsets = [0, 0], sizes = [8, 128], strides = [1, 1]} : vector<8x512xf32> to vector<8x128xf32>
      %893 = arith.addf %771, %892 : vector<8x128xf32>
      %894 = vector.extract_strided_slice %810 {offsets = [0, 128], sizes = [8, 128], strides = [1, 1]} : vector<8x512xf32> to vector<8x128xf32>
      %895 = arith.addf %893, %894 : vector<8x128xf32>
      %896 = vector.extract_strided_slice %810 {offsets = [0, 256], sizes = [8, 128], strides = [1, 1]} : vector<8x512xf32> to vector<8x128xf32>
      %897 = arith.addf %895, %896 : vector<8x128xf32>
      %898 = vector.extract_strided_slice %810 {offsets = [0, 384], sizes = [8, 128], strides = [1, 1]} : vector<8x512xf32> to vector<8x128xf32>
      %899 = arith.addf %897, %898 : vector<8x128xf32>
      %900 = vector.extract_strided_slice %811 {offsets = [0, 0], sizes = [8, 128], strides = [1, 1]} : vector<8x512xf32> to vector<8x128xf32>
      %901 = arith.addf %779, %900 : vector<8x128xf32>
      %902 = vector.extract_strided_slice %811 {offsets = [0, 128], sizes = [8, 128], strides = [1, 1]} : vector<8x512xf32> to vector<8x128xf32>
      %903 = arith.addf %901, %902 : vector<8x128xf32>
      %904 = vector.extract_strided_slice %811 {offsets = [0, 256], sizes = [8, 128], strides = [1, 1]} : vector<8x512xf32> to vector<8x128xf32>
      %905 = arith.addf %903, %904 : vector<8x128xf32>
      %906 = vector.extract_strided_slice %811 {offsets = [0, 384], sizes = [8, 128], strides = [1, 1]} : vector<8x512xf32> to vector<8x128xf32>
      %907 = arith.addf %905, %906 : vector<8x128xf32>
      %c0_i32_91 = arith.constant 0 : i32
      %c0_i32_92 = arith.constant 0 : i32
      %908 = tpu.memref_slice %arg2[%c0_i32_1, %c0_i32_91, %c0_i32_92] : memref<2x16x4096xf32, #tpu.memory_space<vmem>> -> memref<1x16x4096xf32, #tpu.memory_space<vmem>>
      %909 = tpu.memref_squeeze %908 : memref<1x16x4096xf32, #tpu.memory_space<vmem>> -> memref<16x4096xf32, #tpu.memory_space<vmem>>
      %910 = arith.index_cast %10 : i32 to index
      %c3584 = arith.constant 3584 : index
      %911 = vector.load %909[%910, %c3584] : memref<16x4096xf32, #tpu.memory_space<vmem>>, vector<8x512xf32>
      %c0_i32_93 = arith.constant 0 : i32
      %c0_i32_94 = arith.constant 0 : i32
      %912 = tpu.memref_slice %arg2[%c1_i32, %c0_i32_93, %c0_i32_94] : memref<2x16x4096xf32, #tpu.memory_space<vmem>> -> memref<1x16x4096xf32, #tpu.memory_space<vmem>>
      %913 = tpu.memref_squeeze %912 : memref<1x16x4096xf32, #tpu.memory_space<vmem>> -> memref<16x4096xf32, #tpu.memory_space<vmem>>
      %914 = arith.index_cast %10 : i32 to index
      %c3584_95 = arith.constant 3584 : index
      %915 = vector.load %913[%914, %c3584_95] : memref<16x4096xf32, #tpu.memory_space<vmem>>, vector<8x512xf32>
      %916 = arith.index_cast %10 : i32 to index
      %c3584_96 = arith.constant 3584 : index
      %917 = vector.load %arg3[%916, %c3584_96] : memref<16x4096xf32, #tpu.memory_space<vmem>>, vector<8x512xf32>
      %918 = arith.index_cast %10 : i32 to index
      %c3584_97 = arith.constant 3584 : index
      %919 = vector.load %arg4[%918, %c3584_97] : memref<16x4096xf32, #tpu.memory_space<vmem>>, vector<8x512xf32>
      %c6000_i32_98 = arith.constant 6000 : i32
      %920 = arith.subi %c6000_i32_98, %4 : i32
      %c3584_i32 = arith.constant 3584 : i32
      %921 = arith.subi %920, %c3584_i32 : i32
      %922 = vector.broadcast %921 : i32 to vector<8x512xi32>
      %923 = arith.cmpi slt, %3, %922 : vector<8x512xi32>
      %cst_99 = arith.constant 0.000000e+00 : f32
      %924 = vector.broadcast %cst_99 : f32 to vector<8x512xf32>
      %925 = arith.select %923, %911, %924 : vector<8x512xi1>, vector<8x512xf32>
      %cst_100 = arith.constant 0.000000e+00 : f32
      %926 = vector.broadcast %cst_100 : f32 to vector<8x512xf32>
      %927 = arith.select %923, %915, %926 : vector<8x512xi1>, vector<8x512xf32>
      %cst_101 = arith.constant 0.000000e+00 : f32
      %928 = vector.broadcast %cst_101 : f32 to vector<8x512xf32>
      %929 = arith.select %923, %917, %928 : vector<8x512xi1>, vector<8x512xf32>
      %cst_102 = arith.constant 0.000000e+00 : f32
      %930 = vector.broadcast %cst_102 : f32 to vector<8x512xf32>
      %931 = arith.select %923, %919, %930 : vector<8x512xi1>, vector<8x512xf32>
      %932 = arith.mulf %925, %925 : vector<8x512xf32>
      %933 = arith.mulf %927, %927 : vector<8x512xf32>
      %934 = arith.mulf %929, %929 : vector<8x512xf32>
      %935 = arith.mulf %931, %931 : vector<8x512xf32>
      %936 = arith.mulf %925, %929 : vector<8x512xf32>
      %937 = arith.mulf %925, %931 : vector<8x512xf32>
      %938 = arith.mulf %927, %929 : vector<8x512xf32>
      %939 = arith.mulf %927, %931 : vector<8x512xf32>
      %940 = vector.extract_strided_slice %925 {offsets = [0, 0], sizes = [8, 128], strides = [1, 1]} : vector<8x512xf32> to vector<8x128xf32>
      %941 = arith.addf %819, %940 : vector<8x128xf32>
      %942 = vector.extract_strided_slice %925 {offsets = [0, 128], sizes = [8, 128], strides = [1, 1]} : vector<8x512xf32> to vector<8x128xf32>
      %943 = arith.addf %941, %942 : vector<8x128xf32>
      %944 = vector.extract_strided_slice %925 {offsets = [0, 256], sizes = [8, 128], strides = [1, 1]} : vector<8x512xf32> to vector<8x128xf32>
      %945 = arith.addf %943, %944 : vector<8x128xf32>
      %946 = vector.extract_strided_slice %925 {offsets = [0, 384], sizes = [8, 128], strides = [1, 1]} : vector<8x512xf32> to vector<8x128xf32>
      %947 = arith.addf %945, %946 : vector<8x128xf32>
      %948 = vector.extract_strided_slice %927 {offsets = [0, 0], sizes = [8, 128], strides = [1, 1]} : vector<8x512xf32> to vector<8x128xf32>
      %949 = arith.addf %827, %948 : vector<8x128xf32>
      %950 = vector.extract_strided_slice %927 {offsets = [0, 128], sizes = [8, 128], strides = [1, 1]} : vector<8x512xf32> to vector<8x128xf32>
      %951 = arith.addf %949, %950 : vector<8x128xf32>
      %952 = vector.extract_strided_slice %927 {offsets = [0, 256], sizes = [8, 128], strides = [1, 1]} : vector<8x512xf32> to vector<8x128xf32>
      %953 = arith.addf %951, %952 : vector<8x128xf32>
      %954 = vector.extract_strided_slice %927 {offsets = [0, 384], sizes = [8, 128], strides = [1, 1]} : vector<8x512xf32> to vector<8x128xf32>
      %955 = arith.addf %953, %954 : vector<8x128xf32>
      %956 = vector.extract_strided_slice %932 {offsets = [0, 0], sizes = [8, 128], strides = [1, 1]} : vector<8x512xf32> to vector<8x128xf32>
      %957 = arith.addf %835, %956 : vector<8x128xf32>
      %958 = vector.extract_strided_slice %932 {offsets = [0, 128], sizes = [8, 128], strides = [1, 1]} : vector<8x512xf32> to vector<8x128xf32>
      %959 = arith.addf %957, %958 : vector<8x128xf32>
      %960 = vector.extract_strided_slice %932 {offsets = [0, 256], sizes = [8, 128], strides = [1, 1]} : vector<8x512xf32> to vector<8x128xf32>
      %961 = arith.addf %959, %960 : vector<8x128xf32>
      %962 = vector.extract_strided_slice %932 {offsets = [0, 384], sizes = [8, 128], strides = [1, 1]} : vector<8x512xf32> to vector<8x128xf32>
      %963 = arith.addf %961, %962 : vector<8x128xf32>
      %964 = vector.extract_strided_slice %933 {offsets = [0, 0], sizes = [8, 128], strides = [1, 1]} : vector<8x512xf32> to vector<8x128xf32>
      %965 = arith.addf %843, %964 : vector<8x128xf32>
      %966 = vector.extract_strided_slice %933 {offsets = [0, 128], sizes = [8, 128], strides = [1, 1]} : vector<8x512xf32> to vector<8x128xf32>
      %967 = arith.addf %965, %966 : vector<8x128xf32>
      %968 = vector.extract_strided_slice %933 {offsets = [0, 256], sizes = [8, 128], strides = [1, 1]} : vector<8x512xf32> to vector<8x128xf32>
      %969 = arith.addf %967, %968 : vector<8x128xf32>
      %970 = vector.extract_strided_slice %933 {offsets = [0, 384], sizes = [8, 128], strides = [1, 1]} : vector<8x512xf32> to vector<8x128xf32>
      %971 = arith.addf %969, %970 : vector<8x128xf32>
      %972 = vector.extract_strided_slice %929 {offsets = [0, 0], sizes = [8, 128], strides = [1, 1]} : vector<8x512xf32> to vector<8x128xf32>
      %973 = arith.addf %851, %972 : vector<8x128xf32>
      %974 = vector.extract_strided_slice %929 {offsets = [0, 128], sizes = [8, 128], strides = [1, 1]} : vector<8x512xf32> to vector<8x128xf32>
      %975 = arith.addf %973, %974 : vector<8x128xf32>
      %976 = vector.extract_strided_slice %929 {offsets = [0, 256], sizes = [8, 128], strides = [1, 1]} : vector<8x512xf32> to vector<8x128xf32>
      %977 = arith.addf %975, %976 : vector<8x128xf32>
      %978 = vector.extract_strided_slice %929 {offsets = [0, 384], sizes = [8, 128], strides = [1, 1]} : vector<8x512xf32> to vector<8x128xf32>
      %979 = arith.addf %977, %978 : vector<8x128xf32>
      %980 = vector.extract_strided_slice %931 {offsets = [0, 0], sizes = [8, 128], strides = [1, 1]} : vector<8x512xf32> to vector<8x128xf32>
      %981 = arith.addf %859, %980 : vector<8x128xf32>
      %982 = vector.extract_strided_slice %931 {offsets = [0, 128], sizes = [8, 128], strides = [1, 1]} : vector<8x512xf32> to vector<8x128xf32>
      %983 = arith.addf %981, %982 : vector<8x128xf32>
      %984 = vector.extract_strided_slice %931 {offsets = [0, 256], sizes = [8, 128], strides = [1, 1]} : vector<8x512xf32> to vector<8x128xf32>
      %985 = arith.addf %983, %984 : vector<8x128xf32>
      %986 = vector.extract_strided_slice %931 {offsets = [0, 384], sizes = [8, 128], strides = [1, 1]} : vector<8x512xf32> to vector<8x128xf32>
      %987 = arith.addf %985, %986 : vector<8x128xf32>
      %988 = vector.extract_strided_slice %934 {offsets = [0, 0], sizes = [8, 128], strides = [1, 1]} : vector<8x512xf32> to vector<8x128xf32>
      %989 = arith.addf %867, %988 : vector<8x128xf32>
      %990 = vector.extract_strided_slice %934 {offsets = [0, 128], sizes = [8, 128], strides = [1, 1]} : vector<8x512xf32> to vector<8x128xf32>
      %991 = arith.addf %989, %990 : vector<8x128xf32>
      %992 = vector.extract_strided_slice %934 {offsets = [0, 256], sizes = [8, 128], strides = [1, 1]} : vector<8x512xf32> to vector<8x128xf32>
      %993 = arith.addf %991, %992 : vector<8x128xf32>
      %994 = vector.extract_strided_slice %934 {offsets = [0, 384], sizes = [8, 128], strides = [1, 1]} : vector<8x512xf32> to vector<8x128xf32>
      %995 = arith.addf %993, %994 : vector<8x128xf32>
      %996 = vector.extract_strided_slice %935 {offsets = [0, 0], sizes = [8, 128], strides = [1, 1]} : vector<8x512xf32> to vector<8x128xf32>
      %997 = arith.addf %875, %996 : vector<8x128xf32>
      %998 = vector.extract_strided_slice %935 {offsets = [0, 128], sizes = [8, 128], strides = [1, 1]} : vector<8x512xf32> to vector<8x128xf32>
      %999 = arith.addf %997, %998 : vector<8x128xf32>
      %1000 = vector.extract_strided_slice %935 {offsets = [0, 256], sizes = [8, 128], strides = [1, 1]} : vector<8x512xf32> to vector<8x128xf32>
      %1001 = arith.addf %999, %1000 : vector<8x128xf32>
      %1002 = vector.extract_strided_slice %935 {offsets = [0, 384], sizes = [8, 128], strides = [1, 1]} : vector<8x512xf32> to vector<8x128xf32>
      %1003 = arith.addf %1001, %1002 : vector<8x128xf32>
      %1004 = vector.extract_strided_slice %936 {offsets = [0, 0], sizes = [8, 128], strides = [1, 1]} : vector<8x512xf32> to vector<8x128xf32>
      %1005 = arith.addf %883, %1004 : vector<8x128xf32>
      %1006 = vector.extract_strided_slice %936 {offsets = [0, 128], sizes = [8, 128], strides = [1, 1]} : vector<8x512xf32> to vector<8x128xf32>
      %1007 = arith.addf %1005, %1006 : vector<8x128xf32>
      %1008 = vector.extract_strided_slice %936 {offsets = [0, 256], sizes = [8, 128], strides = [1, 1]} : vector<8x512xf32> to vector<8x128xf32>
      %1009 = arith.addf %1007, %1008 : vector<8x128xf32>
      %1010 = vector.extract_strided_slice %936 {offsets = [0, 384], sizes = [8, 128], strides = [1, 1]} : vector<8x512xf32> to vector<8x128xf32>
      %1011 = arith.addf %1009, %1010 : vector<8x128xf32>
      %1012 = vector.extract_strided_slice %937 {offsets = [0, 0], sizes = [8, 128], strides = [1, 1]} : vector<8x512xf32> to vector<8x128xf32>
      %1013 = arith.addf %891, %1012 : vector<8x128xf32>
      %1014 = vector.extract_strided_slice %937 {offsets = [0, 128], sizes = [8, 128], strides = [1, 1]} : vector<8x512xf32> to vector<8x128xf32>
      %1015 = arith.addf %1013, %1014 : vector<8x128xf32>
      %1016 = vector.extract_strided_slice %937 {offsets = [0, 256], sizes = [8, 128], strides = [1, 1]} : vector<8x512xf32> to vector<8x128xf32>
      %1017 = arith.addf %1015, %1016 : vector<8x128xf32>
      %1018 = vector.extract_strided_slice %937 {offsets = [0, 384], sizes = [8, 128], strides = [1, 1]} : vector<8x512xf32> to vector<8x128xf32>
      %1019 = arith.addf %1017, %1018 : vector<8x128xf32>
      %1020 = vector.extract_strided_slice %938 {offsets = [0, 0], sizes = [8, 128], strides = [1, 1]} : vector<8x512xf32> to vector<8x128xf32>
      %1021 = arith.addf %899, %1020 : vector<8x128xf32>
      %1022 = vector.extract_strided_slice %938 {offsets = [0, 128], sizes = [8, 128], strides = [1, 1]} : vector<8x512xf32> to vector<8x128xf32>
      %1023 = arith.addf %1021, %1022 : vector<8x128xf32>
      %1024 = vector.extract_strided_slice %938 {offsets = [0, 256], sizes = [8, 128], strides = [1, 1]} : vector<8x512xf32> to vector<8x128xf32>
      %1025 = arith.addf %1023, %1024 : vector<8x128xf32>
      %1026 = vector.extract_strided_slice %938 {offsets = [0, 384], sizes = [8, 128], strides = [1, 1]} : vector<8x512xf32> to vector<8x128xf32>
      %1027 = arith.addf %1025, %1026 : vector<8x128xf32>
      %1028 = vector.extract_strided_slice %939 {offsets = [0, 0], sizes = [8, 128], strides = [1, 1]} : vector<8x512xf32> to vector<8x128xf32>
      %1029 = arith.addf %907, %1028 : vector<8x128xf32>
      %1030 = vector.extract_strided_slice %939 {offsets = [0, 128], sizes = [8, 128], strides = [1, 1]} : vector<8x512xf32> to vector<8x128xf32>
      %1031 = arith.addf %1029, %1030 : vector<8x128xf32>
      %1032 = vector.extract_strided_slice %939 {offsets = [0, 256], sizes = [8, 128], strides = [1, 1]} : vector<8x512xf32> to vector<8x128xf32>
      %1033 = arith.addf %1031, %1032 : vector<8x128xf32>
      %1034 = vector.extract_strided_slice %939 {offsets = [0, 384], sizes = [8, 128], strides = [1, 1]} : vector<8x512xf32> to vector<8x128xf32>
      %1035 = arith.addf %1033, %1034 : vector<8x128xf32>
      %c0_103 = arith.constant 0 : index
      %1036 = arith.index_cast %10 : i32 to index
      %c0_104 = arith.constant 0 : index
      %1037 = vector.load %arg6[%c0_103, %1036, %c0_104] : memref<12x16x128xf32, #tpu.memory_space<vmem>>, vector<1x8x128xf32>
      %1038 = vector.shape_cast %1037 : vector<1x8x128xf32> to vector<8x128xf32>
      %1039 = arith.addf %1038, %947 : vector<8x128xf32>
      %c0_105 = arith.constant 0 : index
      %1040 = arith.index_cast %10 : i32 to index
      %c0_106 = arith.constant 0 : index
      %1041 = vector.load %arg6[%c0_105, %1040, %c0_106] : memref<12x16x128xf32, #tpu.memory_space<vmem>>, vector<1x8x128xf32>
      %1042 = vector.shape_cast %1041 : vector<1x8x128xf32> to vector<8x128xf32>
      %1043 = vector.shape_cast %1039 : vector<8x128xf32> to vector<1x8x128xf32>
      tpu.vector_store %arg6[%c0_105, %1040, %c0_106], %1043 {strides = array<i32>} : memref<12x16x128xf32, #tpu.memory_space<vmem>>, vector<1x8x128xf32>,
      %c1 = arith.constant 1 : index
      %1044 = arith.index_cast %10 : i32 to index
      %c0_107 = arith.constant 0 : index
      %1045 = vector.load %arg6[%c1, %1044, %c0_107] : memref<12x16x128xf32, #tpu.memory_space<vmem>>, vector<1x8x128xf32>
      %1046 = vector.shape_cast %1045 : vector<1x8x128xf32> to vector<8x128xf32>
      %1047 = arith.addf %1046, %955 : vector<8x128xf32>
      %c1_108 = arith.constant 1 : index
      %1048 = arith.index_cast %10 : i32 to index
      %c0_109 = arith.constant 0 : index
      %1049 = vector.load %arg6[%c1_108, %1048, %c0_109] : memref<12x16x128xf32, #tpu.memory_space<vmem>>, vector<1x8x128xf32>
      %1050 = vector.shape_cast %1049 : vector<1x8x128xf32> to vector<8x128xf32>
      %1051 = vector.shape_cast %1047 : vector<8x128xf32> to vector<1x8x128xf32>
      tpu.vector_store %arg6[%c1_108, %1048, %c0_109], %1051 {strides = array<i32>} : memref<12x16x128xf32, #tpu.memory_space<vmem>>, vector<1x8x128xf32>,
      %c2 = arith.constant 2 : index
      %1052 = arith.index_cast %10 : i32 to index
      %c0_110 = arith.constant 0 : index
      %1053 = vector.load %arg6[%c2, %1052, %c0_110] : memref<12x16x128xf32, #tpu.memory_space<vmem>>, vector<1x8x128xf32>
      %1054 = vector.shape_cast %1053 : vector<1x8x128xf32> to vector<8x128xf32>
      %1055 = arith.addf %1054, %963 : vector<8x128xf32>
      %c2_111 = arith.constant 2 : index
      %1056 = arith.index_cast %10 : i32 to index
      %c0_112 = arith.constant 0 : index
      %1057 = vector.load %arg6[%c2_111, %1056, %c0_112] : memref<12x16x128xf32, #tpu.memory_space<vmem>>, vector<1x8x128xf32>
      %1058 = vector.shape_cast %1057 : vector<1x8x128xf32> to vector<8x128xf32>
      %1059 = vector.shape_cast %1055 : vector<8x128xf32> to vector<1x8x128xf32>
      tpu.vector_store %arg6[%c2_111, %1056, %c0_112], %1059 {strides = array<i32>} : memref<12x16x128xf32, #tpu.memory_space<vmem>>, vector<1x8x128xf32>,
      %c3 = arith.constant 3 : index
      %1060 = arith.index_cast %10 : i32 to index
      %c0_113 = arith.constant 0 : index
      %1061 = vector.load %arg6[%c3, %1060, %c0_113] : memref<12x16x128xf32, #tpu.memory_space<vmem>>, vector<1x8x128xf32>
      %1062 = vector.shape_cast %1061 : vector<1x8x128xf32> to vector<8x128xf32>
      %1063 = arith.addf %1062, %971 : vector<8x128xf32>
      %c3_114 = arith.constant 3 : index
      %1064 = arith.index_cast %10 : i32 to index
      %c0_115 = arith.constant 0 : index
      %1065 = vector.load %arg6[%c3_114, %1064, %c0_115] : memref<12x16x128xf32, #tpu.memory_space<vmem>>, vector<1x8x128xf32>
      %1066 = vector.shape_cast %1065 : vector<1x8x128xf32> to vector<8x128xf32>
      %1067 = vector.shape_cast %1063 : vector<8x128xf32> to vector<1x8x128xf32>
      tpu.vector_store %arg6[%c3_114, %1064, %c0_115], %1067 {strides = array<i32>} : memref<12x16x128xf32, #tpu.memory_space<vmem>>, vector<1x8x128xf32>,
      %c4 = arith.constant 4 : index
      %1068 = arith.index_cast %10 : i32 to index
      %c0_116 = arith.constant 0 : index
      %1069 = vector.load %arg6[%c4, %1068, %c0_116] : memref<12x16x128xf32, #tpu.memory_space<vmem>>, vector<1x8x128xf32>
      %1070 = vector.shape_cast %1069 : vector<1x8x128xf32> to vector<8x128xf32>
      %1071 = arith.addf %1070, %979 : vector<8x128xf32>
      %c4_117 = arith.constant 4 : index
      %1072 = arith.index_cast %10 : i32 to index
      %c0_118 = arith.constant 0 : index
      %1073 = vector.load %arg6[%c4_117, %1072, %c0_118] : memref<12x16x128xf32, #tpu.memory_space<vmem>>, vector<1x8x128xf32>
      %1074 = vector.shape_cast %1073 : vector<1x8x128xf32> to vector<8x128xf32>
      %1075 = vector.shape_cast %1071 : vector<8x128xf32> to vector<1x8x128xf32>
      tpu.vector_store %arg6[%c4_117, %1072, %c0_118], %1075 {strides = array<i32>} : memref<12x16x128xf32, #tpu.memory_space<vmem>>, vector<1x8x128xf32>,
      %c5 = arith.constant 5 : index
      %1076 = arith.index_cast %10 : i32 to index
      %c0_119 = arith.constant 0 : index
      %1077 = vector.load %arg6[%c5, %1076, %c0_119] : memref<12x16x128xf32, #tpu.memory_space<vmem>>, vector<1x8x128xf32>
      %1078 = vector.shape_cast %1077 : vector<1x8x128xf32> to vector<8x128xf32>
      %1079 = arith.addf %1078, %987 : vector<8x128xf32>
      %c5_120 = arith.constant 5 : index
      %1080 = arith.index_cast %10 : i32 to index
      %c0_121 = arith.constant 0 : index
      %1081 = vector.load %arg6[%c5_120, %1080, %c0_121] : memref<12x16x128xf32, #tpu.memory_space<vmem>>, vector<1x8x128xf32>
      %1082 = vector.shape_cast %1081 : vector<1x8x128xf32> to vector<8x128xf32>
      %1083 = vector.shape_cast %1079 : vector<8x128xf32> to vector<1x8x128xf32>
      tpu.vector_store %arg6[%c5_120, %1080, %c0_121], %1083 {strides = array<i32>} : memref<12x16x128xf32, #tpu.memory_space<vmem>>, vector<1x8x128xf32>,
      %c6 = arith.constant 6 : index
      %1084 = arith.index_cast %10 : i32 to index
      %c0_122 = arith.constant 0 : index
      %1085 = vector.load %arg6[%c6, %1084, %c0_122] : memref<12x16x128xf32, #tpu.memory_space<vmem>>, vector<1x8x128xf32>
      %1086 = vector.shape_cast %1085 : vector<1x8x128xf32> to vector<8x128xf32>
      %1087 = arith.addf %1086, %995 : vector<8x128xf32>
      %c6_123 = arith.constant 6 : index
      %1088 = arith.index_cast %10 : i32 to index
      %c0_124 = arith.constant 0 : index
      %1089 = vector.load %arg6[%c6_123, %1088, %c0_124] : memref<12x16x128xf32, #tpu.memory_space<vmem>>, vector<1x8x128xf32>
      %1090 = vector.shape_cast %1089 : vector<1x8x128xf32> to vector<8x128xf32>
      %1091 = vector.shape_cast %1087 : vector<8x128xf32> to vector<1x8x128xf32>
      tpu.vector_store %arg6[%c6_123, %1088, %c0_124], %1091 {strides = array<i32>} : memref<12x16x128xf32, #tpu.memory_space<vmem>>, vector<1x8x128xf32>,
      %c7 = arith.constant 7 : index
      %1092 = arith.index_cast %10 : i32 to index
      %c0_125 = arith.constant 0 : index
      %1093 = vector.load %arg6[%c7, %1092, %c0_125] : memref<12x16x128xf32, #tpu.memory_space<vmem>>, vector<1x8x128xf32>
      %1094 = vector.shape_cast %1093 : vector<1x8x128xf32> to vector<8x128xf32>
      %1095 = arith.addf %1094, %1003 : vector<8x128xf32>
      %c7_126 = arith.constant 7 : index
      %1096 = arith.index_cast %10 : i32 to index
      %c0_127 = arith.constant 0 : index
      %1097 = vector.load %arg6[%c7_126, %1096, %c0_127] : memref<12x16x128xf32, #tpu.memory_space<vmem>>, vector<1x8x128xf32>
      %1098 = vector.shape_cast %1097 : vector<1x8x128xf32> to vector<8x128xf32>
      %1099 = vector.shape_cast %1095 : vector<8x128xf32> to vector<1x8x128xf32>
      tpu.vector_store %arg6[%c7_126, %1096, %c0_127], %1099 {strides = array<i32>} : memref<12x16x128xf32, #tpu.memory_space<vmem>>, vector<1x8x128xf32>,
      %c8 = arith.constant 8 : index
      %1100 = arith.index_cast %10 : i32 to index
      %c0_128 = arith.constant 0 : index
      %1101 = vector.load %arg6[%c8, %1100, %c0_128] : memref<12x16x128xf32, #tpu.memory_space<vmem>>, vector<1x8x128xf32>
      %1102 = vector.shape_cast %1101 : vector<1x8x128xf32> to vector<8x128xf32>
      %1103 = arith.addf %1102, %1011 : vector<8x128xf32>
      %c8_129 = arith.constant 8 : index
      %1104 = arith.index_cast %10 : i32 to index
      %c0_130 = arith.constant 0 : index
      %1105 = vector.load %arg6[%c8_129, %1104, %c0_130] : memref<12x16x128xf32, #tpu.memory_space<vmem>>, vector<1x8x128xf32>
      %1106 = vector.shape_cast %1105 : vector<1x8x128xf32> to vector<8x128xf32>
      %1107 = vector.shape_cast %1103 : vector<8x128xf32> to vector<1x8x128xf32>
      tpu.vector_store %arg6[%c8_129, %1104, %c0_130], %1107 {strides = array<i32>} : memref<12x16x128xf32, #tpu.memory_space<vmem>>, vector<1x8x128xf32>,
      %c9 = arith.constant 9 : index
      %1108 = arith.index_cast %10 : i32 to index
      %c0_131 = arith.constant 0 : index
      %1109 = vector.load %arg6[%c9, %1108, %c0_131] : memref<12x16x128xf32, #tpu.memory_space<vmem>>, vector<1x8x128xf32>
      %1110 = vector.shape_cast %1109 : vector<1x8x128xf32> to vector<8x128xf32>
      %1111 = arith.addf %1110, %1019 : vector<8x128xf32>
      %c9_132 = arith.constant 9 : index
      %1112 = arith.index_cast %10 : i32 to index
      %c0_133 = arith.constant 0 : index
      %1113 = vector.load %arg6[%c9_132, %1112, %c0_133] : memref<12x16x128xf32, #tpu.memory_space<vmem>>, vector<1x8x128xf32>
      %1114 = vector.shape_cast %1113 : vector<1x8x128xf32> to vector<8x128xf32>
      %1115 = vector.shape_cast %1111 : vector<8x128xf32> to vector<1x8x128xf32>
      tpu.vector_store %arg6[%c9_132, %1112, %c0_133], %1115 {strides = array<i32>} : memref<12x16x128xf32, #tpu.memory_space<vmem>>, vector<1x8x128xf32>,
      %c10 = arith.constant 10 : index
      %1116 = arith.index_cast %10 : i32 to index
      %c0_134 = arith.constant 0 : index
      %1117 = vector.load %arg6[%c10, %1116, %c0_134] : memref<12x16x128xf32, #tpu.memory_space<vmem>>, vector<1x8x128xf32>
      %1118 = vector.shape_cast %1117 : vector<1x8x128xf32> to vector<8x128xf32>
      %1119 = arith.addf %1118, %1027 : vector<8x128xf32>
      %c10_135 = arith.constant 10 : index
      %1120 = arith.index_cast %10 : i32 to index
      %c0_136 = arith.constant 0 : index
      %1121 = vector.load %arg6[%c10_135, %1120, %c0_136] : memref<12x16x128xf32, #tpu.memory_space<vmem>>, vector<1x8x128xf32>
      %1122 = vector.shape_cast %1121 : vector<1x8x128xf32> to vector<8x128xf32>
      %1123 = vector.shape_cast %1119 : vector<8x128xf32> to vector<1x8x128xf32>
      tpu.vector_store %arg6[%c10_135, %1120, %c0_136], %1123 {strides = array<i32>} : memref<12x16x128xf32, #tpu.memory_space<vmem>>, vector<1x8x128xf32>,
      %c11 = arith.constant 11 : index
      %1124 = arith.index_cast %10 : i32 to index
      %c0_137 = arith.constant 0 : index
      %1125 = vector.load %arg6[%c11, %1124, %c0_137] : memref<12x16x128xf32, #tpu.memory_space<vmem>>, vector<1x8x128xf32>
      %1126 = vector.shape_cast %1125 : vector<1x8x128xf32> to vector<8x128xf32>
      %1127 = arith.addf %1126, %1035 : vector<8x128xf32>
      %c11_138 = arith.constant 11 : index
      %1128 = arith.index_cast %10 : i32 to index
      %c0_139 = arith.constant 0 : index
      %1129 = vector.load %arg6[%c11_138, %1128, %c0_139] : memref<12x16x128xf32, #tpu.memory_space<vmem>>, vector<1x8x128xf32>
      %1130 = vector.shape_cast %1129 : vector<1x8x128xf32> to vector<8x128xf32>
      %1131 = vector.shape_cast %1127 : vector<8x128xf32> to vector<1x8x128xf32>
      tpu.vector_store %arg6[%c11_138, %1128, %c0_139], %1131 {strides = array<i32>} : memref<12x16x128xf32, #tpu.memory_space<vmem>>, vector<1x8x128xf32>,
    }
    %c2_i32_4 = arith.constant 2 : i32
    %c1_i32_5 = arith.constant 1 : i32
    %6 = arith.cmpi eq, %arg1, %c1_i32_5 : i32
    %7 = arith.extui %6 : i1 to i32
    %c0_i32_6 = arith.constant 0 : i32
    %8 = arith.cmpi ne, %7, %c0_i32_6 : i32
    scf.if %8 {
      %c0 = arith.constant 0 : index
      %c0_7 = arith.constant 0 : index
      %c0_8 = arith.constant 0 : index
      %9 = vector.load %arg6[%c0, %c0_7, %c0_8] : memref<12x16x128xf32, #tpu.memory_space<vmem>>, vector<1x16x128xf32>
      %10 = vector.shape_cast %9 : vector<1x16x128xf32> to vector<16x128xf32>
      %cst = arith.constant dense<0.000000e+00> : vector<16xf32>
      %11 = vector.multi_reduction <add>, %10, %cst [1] : vector<16x128xf32> to vector<16xf32>
      %12 = vector.shape_cast %11 : vector<16xf32> to vector<16x1xf32>
      %c1 = arith.constant 1 : index
      %c0_9 = arith.constant 0 : index
      %c0_10 = arith.constant 0 : index
      %13 = vector.load %arg6[%c1, %c0_9, %c0_10] : memref<12x16x128xf32, #tpu.memory_space<vmem>>, vector<1x16x128xf32>
      %14 = vector.shape_cast %13 : vector<1x16x128xf32> to vector<16x128xf32>
      %cst_11 = arith.constant dense<0.000000e+00> : vector<16xf32>
      %15 = vector.multi_reduction <add>, %14, %cst_11 [1] : vector<16x128xf32> to vector<16xf32>
      %16 = vector.shape_cast %15 : vector<16xf32> to vector<16x1xf32>
      %c2 = arith.constant 2 : index
      %c0_12 = arith.constant 0 : index
      %c0_13 = arith.constant 0 : index
      %17 = vector.load %arg6[%c2, %c0_12, %c0_13] : memref<12x16x128xf32, #tpu.memory_space<vmem>>, vector<1x16x128xf32>
      %18 = vector.shape_cast %17 : vector<1x16x128xf32> to vector<16x128xf32>
      %cst_14 = arith.constant dense<0.000000e+00> : vector<16xf32>
      %19 = vector.multi_reduction <add>, %18, %cst_14 [1] : vector<16x128xf32> to vector<16xf32>
      %20 = vector.shape_cast %19 : vector<16xf32> to vector<16x1xf32>
      %c3 = arith.constant 3 : index
      %c0_15 = arith.constant 0 : index
      %c0_16 = arith.constant 0 : index
      %21 = vector.load %arg6[%c3, %c0_15, %c0_16] : memref<12x16x128xf32, #tpu.memory_space<vmem>>, vector<1x16x128xf32>
      %22 = vector.shape_cast %21 : vector<1x16x128xf32> to vector<16x128xf32>
      %cst_17 = arith.constant dense<0.000000e+00> : vector<16xf32>
      %23 = vector.multi_reduction <add>, %22, %cst_17 [1] : vector<16x128xf32> to vector<16xf32>
      %24 = vector.shape_cast %23 : vector<16xf32> to vector<16x1xf32>
      %c4 = arith.constant 4 : index
      %c0_18 = arith.constant 0 : index
      %c0_19 = arith.constant 0 : index
      %25 = vector.load %arg6[%c4, %c0_18, %c0_19] : memref<12x16x128xf32, #tpu.memory_space<vmem>>, vector<1x16x128xf32>
      %26 = vector.shape_cast %25 : vector<1x16x128xf32> to vector<16x128xf32>
      %cst_20 = arith.constant dense<0.000000e+00> : vector<16xf32>
      %27 = vector.multi_reduction <add>, %26, %cst_20 [1] : vector<16x128xf32> to vector<16xf32>
      %28 = vector.shape_cast %27 : vector<16xf32> to vector<16x1xf32>
      %c5 = arith.constant 5 : index
      %c0_21 = arith.constant 0 : index
      %c0_22 = arith.constant 0 : index
      %29 = vector.load %arg6[%c5, %c0_21, %c0_22] : memref<12x16x128xf32, #tpu.memory_space<vmem>>, vector<1x16x128xf32>
      %30 = vector.shape_cast %29 : vector<1x16x128xf32> to vector<16x128xf32>
      %cst_23 = arith.constant dense<0.000000e+00> : vector<16xf32>
      %31 = vector.multi_reduction <add>, %30, %cst_23 [1] : vector<16x128xf32> to vector<16xf32>
      %32 = vector.shape_cast %31 : vector<16xf32> to vector<16x1xf32>
      %c6 = arith.constant 6 : index
      %c0_24 = arith.constant 0 : index
      %c0_25 = arith.constant 0 : index
      %33 = vector.load %arg6[%c6, %c0_24, %c0_25] : memref<12x16x128xf32, #tpu.memory_space<vmem>>, vector<1x16x128xf32>
      %34 = vector.shape_cast %33 : vector<1x16x128xf32> to vector<16x128xf32>
      %cst_26 = arith.constant dense<0.000000e+00> : vector<16xf32>
      %35 = vector.multi_reduction <add>, %34, %cst_26 [1] : vector<16x128xf32> to vector<16xf32>
      %36 = vector.shape_cast %35 : vector<16xf32> to vector<16x1xf32>
      %c7 = arith.constant 7 : index
      %c0_27 = arith.constant 0 : index
      %c0_28 = arith.constant 0 : index
      %37 = vector.load %arg6[%c7, %c0_27, %c0_28] : memref<12x16x128xf32, #tpu.memory_space<vmem>>, vector<1x16x128xf32>
      %38 = vector.shape_cast %37 : vector<1x16x128xf32> to vector<16x128xf32>
      %cst_29 = arith.constant dense<0.000000e+00> : vector<16xf32>
      %39 = vector.multi_reduction <add>, %38, %cst_29 [1] : vector<16x128xf32> to vector<16xf32>
      %40 = vector.shape_cast %39 : vector<16xf32> to vector<16x1xf32>
      %c8 = arith.constant 8 : index
      %c0_30 = arith.constant 0 : index
      %c0_31 = arith.constant 0 : index
      %41 = vector.load %arg6[%c8, %c0_30, %c0_31] : memref<12x16x128xf32, #tpu.memory_space<vmem>>, vector<1x16x128xf32>
      %42 = vector.shape_cast %41 : vector<1x16x128xf32> to vector<16x128xf32>
      %cst_32 = arith.constant dense<0.000000e+00> : vector<16xf32>
      %43 = vector.multi_reduction <add>, %42, %cst_32 [1] : vector<16x128xf32> to vector<16xf32>
      %44 = vector.shape_cast %43 : vector<16xf32> to vector<16x1xf32>
      %c9 = arith.constant 9 : index
      %c0_33 = arith.constant 0 : index
      %c0_34 = arith.constant 0 : index
      %45 = vector.load %arg6[%c9, %c0_33, %c0_34] : memref<12x16x128xf32, #tpu.memory_space<vmem>>, vector<1x16x128xf32>
      %46 = vector.shape_cast %45 : vector<1x16x128xf32> to vector<16x128xf32>
      %cst_35 = arith.constant dense<0.000000e+00> : vector<16xf32>
      %47 = vector.multi_reduction <add>, %46, %cst_35 [1] : vector<16x128xf32> to vector<16xf32>
      %48 = vector.shape_cast %47 : vector<16xf32> to vector<16x1xf32>
      %c10 = arith.constant 10 : index
      %c0_36 = arith.constant 0 : index
      %c0_37 = arith.constant 0 : index
      %49 = vector.load %arg6[%c10, %c0_36, %c0_37] : memref<12x16x128xf32, #tpu.memory_space<vmem>>, vector<1x16x128xf32>
      %50 = vector.shape_cast %49 : vector<1x16x128xf32> to vector<16x128xf32>
      %cst_38 = arith.constant dense<0.000000e+00> : vector<16xf32>
      %51 = vector.multi_reduction <add>, %50, %cst_38 [1] : vector<16x128xf32> to vector<16xf32>
      %52 = vector.shape_cast %51 : vector<16xf32> to vector<16x1xf32>
      %c11 = arith.constant 11 : index
      %c0_39 = arith.constant 0 : index
      %c0_40 = arith.constant 0 : index
      %53 = vector.load %arg6[%c11, %c0_39, %c0_40] : memref<12x16x128xf32, #tpu.memory_space<vmem>>, vector<1x16x128xf32>
      %54 = vector.shape_cast %53 : vector<1x16x128xf32> to vector<16x128xf32>
      %cst_41 = arith.constant dense<0.000000e+00> : vector<16xf32>
      %55 = vector.multi_reduction <add>, %54, %cst_41 [1] : vector<16x128xf32> to vector<16xf32>
      %56 = vector.shape_cast %55 : vector<16xf32> to vector<16x1xf32>
      %57 = arith.mulf %12, %12 : vector<16x1xf32>
      %cst_42 = arith.constant 1.66666665E-4 : f32
      %58 = vector.broadcast %cst_42 : f32 to vector<16x1xf32>
      %59 = arith.mulf %57, %58 : vector<16x1xf32>
      %60 = arith.subf %20, %59 : vector<16x1xf32>
      %cst_43 = arith.constant 0.000000e+00 : f32
      %61 = vector.broadcast %cst_43 : f32 to vector<16x1xf32>
      %62 = arith.maximumf %60, %61 : vector<16x1xf32>
      %63 = arith.mulf %16, %16 : vector<16x1xf32>
      %cst_44 = arith.constant 1.66666665E-4 : f32
      %64 = vector.broadcast %cst_44 : f32 to vector<16x1xf32>
      %65 = arith.mulf %63, %64 : vector<16x1xf32>
      %66 = arith.subf %24, %65 : vector<16x1xf32>
      %cst_45 = arith.constant 0.000000e+00 : f32
      %67 = vector.broadcast %cst_45 : f32 to vector<16x1xf32>
      %68 = arith.maximumf %66, %67 : vector<16x1xf32>
      %69 = arith.mulf %28, %28 : vector<16x1xf32>
      %cst_46 = arith.constant 1.66666665E-4 : f32
      %70 = vector.broadcast %cst_46 : f32 to vector<16x1xf32>
      %71 = arith.mulf %69, %70 : vector<16x1xf32>
      %72 = arith.subf %36, %71 : vector<16x1xf32>
      %cst_47 = arith.constant 0.000000e+00 : f32
      %73 = vector.broadcast %cst_47 : f32 to vector<16x1xf32>
      %74 = arith.maximumf %72, %73 : vector<16x1xf32>
      %cst_48 = arith.constant 9.99999993E-9 : f32
      %75 = vector.broadcast %cst_48 : f32 to vector<16x1xf32>
      %76 = arith.addf %74, %75 : vector<16x1xf32>
      %cst_49 = arith.constant 1.000000e+00 : f32
      %77 = vector.broadcast %cst_49 : f32 to vector<16x1xf32>
      %78 = arith.divf %77, %76 : vector<16x1xf32>
      %79 = arith.mulf %12, %28 : vector<16x1xf32>
      %cst_50 = arith.constant 1.66666665E-4 : f32
      %80 = vector.broadcast %cst_50 : f32 to vector<16x1xf32>
      %81 = arith.mulf %79, %80 : vector<16x1xf32>
      %82 = arith.subf %44, %81 : vector<16x1xf32>
      %83 = arith.mulf %82, %82 : vector<16x1xf32>
      %84 = arith.mulf %83, %74 : vector<16x1xf32>
      %85 = arith.mulf %84, %78 : vector<16x1xf32>
      %86 = arith.mulf %85, %78 : vector<16x1xf32>
      %cst_51 = arith.constant 2.000000e+00 : f32
      %87 = vector.broadcast %cst_51 : f32 to vector<16x1xf32>
      %88 = arith.mulf %87, %83 : vector<16x1xf32>
      %89 = arith.mulf %88, %78 : vector<16x1xf32>
      %90 = arith.subf %62, %89 : vector<16x1xf32>
      %91 = arith.addf %90, %86 : vector<16x1xf32>
      %cst_52 = arith.constant 0.000000e+00 : f32
      %92 = vector.broadcast %cst_52 : f32 to vector<16x1xf32>
      %93 = arith.maximumf %91, %92 : vector<16x1xf32>
      %94 = math.sqrt %86 : vector<16x1xf32>
      %95 = math.sqrt %93 : vector<16x1xf32>
      %96 = arith.divf %94, %95 : vector<16x1xf32>
      %cst_53 = arith.constant 2.000000e-08 : f32
      %97 = vector.broadcast %cst_53 : f32 to vector<16x1xf32>
      %98 = arith.addf %96, %97 : vector<16x1xf32>
      %99 = math.log %98 : vector<16x1xf32>
      %cst_54 = arith.constant 0.434294492 : f32
      %100 = vector.broadcast %cst_54 : f32 to vector<16x1xf32>
      %101 = arith.mulf %99, %100 : vector<16x1xf32>
      %cst_55 = arith.constant 2.000000e+01 : f32
      %102 = vector.broadcast %cst_55 : f32 to vector<16x1xf32>
      %103 = arith.mulf %102, %101 : vector<16x1xf32>
      %104 = arith.mulf %16, %28 : vector<16x1xf32>
      %cst_56 = arith.constant 1.66666665E-4 : f32
      %105 = vector.broadcast %cst_56 : f32 to vector<16x1xf32>
      %106 = arith.mulf %104, %105 : vector<16x1xf32>
      %107 = arith.subf %52, %106 : vector<16x1xf32>
      %108 = arith.mulf %107, %107 : vector<16x1xf32>
      %109 = arith.mulf %108, %74 : vector<16x1xf32>
      %110 = arith.mulf %109, %78 : vector<16x1xf32>
      %111 = arith.mulf %110, %78 : vector<16x1xf32>
      %cst_57 = arith.constant 2.000000e+00 : f32
      %112 = vector.broadcast %cst_57 : f32 to vector<16x1xf32>
      %113 = arith.mulf %112, %108 : vector<16x1xf32>
      %114 = arith.mulf %113, %78 : vector<16x1xf32>
      %115 = arith.subf %68, %114 : vector<16x1xf32>
      %116 = arith.addf %115, %111 : vector<16x1xf32>
      %cst_58 = arith.constant 0.000000e+00 : f32
      %117 = vector.broadcast %cst_58 : f32 to vector<16x1xf32>
      %118 = arith.maximumf %116, %117 : vector<16x1xf32>
      %119 = math.sqrt %111 : vector<16x1xf32>
      %120 = math.sqrt %118 : vector<16x1xf32>
      %121 = arith.divf %119, %120 : vector<16x1xf32>
      %cst_59 = arith.constant 2.000000e-08 : f32
      %122 = vector.broadcast %cst_59 : f32 to vector<16x1xf32>
      %123 = arith.addf %121, %122 : vector<16x1xf32>
      %124 = math.log %123 : vector<16x1xf32>
      %cst_60 = arith.constant 0.434294492 : f32
      %125 = vector.broadcast %cst_60 : f32 to vector<16x1xf32>
      %126 = arith.mulf %124, %125 : vector<16x1xf32>
      %cst_61 = arith.constant 2.000000e+01 : f32
      %127 = vector.broadcast %cst_61 : f32 to vector<16x1xf32>
      %128 = arith.mulf %127, %126 : vector<16x1xf32>
      %129 = arith.addf %103, %128 : vector<16x1xf32>
      %130 = arith.mulf %32, %32 : vector<16x1xf32>
      %cst_62 = arith.constant 1.66666665E-4 : f32
      %131 = vector.broadcast %cst_62 : f32 to vector<16x1xf32>
      %132 = arith.mulf %130, %131 : vector<16x1xf32>
      %133 = arith.subf %40, %132 : vector<16x1xf32>
      %cst_63 = arith.constant 0.000000e+00 : f32
      %134 = vector.broadcast %cst_63 : f32 to vector<16x1xf32>
      %135 = arith.maximumf %133, %134 : vector<16x1xf32>
      %cst_64 = arith.constant 9.99999993E-9 : f32
      %136 = vector.broadcast %cst_64 : f32 to vector<16x1xf32>
      %137 = arith.addf %135, %136 : vector<16x1xf32>
      %cst_65 = arith.constant 1.000000e+00 : f32
      %138 = vector.broadcast %cst_65 : f32 to vector<16x1xf32>
      %139 = arith.divf %138, %137 : vector<16x1xf32>
      %140 = arith.mulf %12, %32 : vector<16x1xf32>
      %cst_66 = arith.constant 1.66666665E-4 : f32
      %141 = vector.broadcast %cst_66 : f32 to vector<16x1xf32>
      %142 = arith.mulf %140, %141 : vector<16x1xf32>
      %143 = arith.subf %48, %142 : vector<16x1xf32>
      %144 = arith.mulf %143, %143 : vector<16x1xf32>
      %145 = arith.mulf %144, %135 : vector<16x1xf32>
      %146 = arith.mulf %145, %139 : vector<16x1xf32>
      %147 = arith.mulf %146, %139 : vector<16x1xf32>
      %cst_67 = arith.constant 2.000000e+00 : f32
      %148 = vector.broadcast %cst_67 : f32 to vector<16x1xf32>
      %149 = arith.mulf %148, %144 : vector<16x1xf32>
      %150 = arith.mulf %149, %139 : vector<16x1xf32>
      %151 = arith.subf %62, %150 : vector<16x1xf32>
      %152 = arith.addf %151, %147 : vector<16x1xf32>
      %cst_68 = arith.constant 0.000000e+00 : f32
      %153 = vector.broadcast %cst_68 : f32 to vector<16x1xf32>
      %154 = arith.maximumf %152, %153 : vector<16x1xf32>
      %155 = math.sqrt %147 : vector<16x1xf32>
      %156 = math.sqrt %154 : vector<16x1xf32>
      %157 = arith.divf %155, %156 : vector<16x1xf32>
      %cst_69 = arith.constant 2.000000e-08 : f32
      %158 = vector.broadcast %cst_69 : f32 to vector<16x1xf32>
      %159 = arith.addf %157, %158 : vector<16x1xf32>
      %160 = math.log %159 : vector<16x1xf32>
      %cst_70 = arith.constant 0.434294492 : f32
      %161 = vector.broadcast %cst_70 : f32 to vector<16x1xf32>
      %162 = arith.mulf %160, %161 : vector<16x1xf32>
      %cst_71 = arith.constant 2.000000e+01 : f32
      %163 = vector.broadcast %cst_71 : f32 to vector<16x1xf32>
      %164 = arith.mulf %163, %162 : vector<16x1xf32>
      %165 = arith.mulf %16, %32 : vector<16x1xf32>
      %cst_72 = arith.constant 1.66666665E-4 : f32
      %166 = vector.broadcast %cst_72 : f32 to vector<16x1xf32>
      %167 = arith.mulf %165, %166 : vector<16x1xf32>
      %168 = arith.subf %56, %167 : vector<16x1xf32>
      %169 = arith.mulf %168, %168 : vector<16x1xf32>
      %170 = arith.mulf %169, %135 : vector<16x1xf32>
      %171 = arith.mulf %170, %139 : vector<16x1xf32>
      %172 = arith.mulf %171, %139 : vector<16x1xf32>
      %cst_73 = arith.constant 2.000000e+00 : f32
      %173 = vector.broadcast %cst_73 : f32 to vector<16x1xf32>
      %174 = arith.mulf %173, %169 : vector<16x1xf32>
      %175 = arith.mulf %174, %139 : vector<16x1xf32>
      %176 = arith.subf %68, %175 : vector<16x1xf32>
      %177 = arith.addf %176, %172 : vector<16x1xf32>
      %cst_74 = arith.constant 0.000000e+00 : f32
      %178 = vector.broadcast %cst_74 : f32 to vector<16x1xf32>
      %179 = arith.maximumf %177, %178 : vector<16x1xf32>
      %180 = math.sqrt %172 : vector<16x1xf32>
      %181 = math.sqrt %179 : vector<16x1xf32>
      %182 = arith.divf %180, %181 : vector<16x1xf32>
      %cst_75 = arith.constant 2.000000e-08 : f32
      %183 = vector.broadcast %cst_75 : f32 to vector<16x1xf32>
      %184 = arith.addf %182, %183 : vector<16x1xf32>
      %185 = math.log %184 : vector<16x1xf32>
      %cst_76 = arith.constant 0.434294492 : f32
      %186 = vector.broadcast %cst_76 : f32 to vector<16x1xf32>
      %187 = arith.mulf %185, %186 : vector<16x1xf32>
      %cst_77 = arith.constant 2.000000e+01 : f32
      %188 = vector.broadcast %cst_77 : f32 to vector<16x1xf32>
      %189 = arith.mulf %188, %187 : vector<16x1xf32>
      %190 = arith.addf %164, %189 : vector<16x1xf32>
      %191 = arith.maximumf %129, %190 : vector<16x1xf32>
      %c0_78 = arith.constant 0 : index
      %c0_79 = arith.constant 0 : index
      %192 = vector.load %arg5[%c0_78, %c0_79] : memref<16x1xf32, #tpu.memory_space<vmem>>, vector<16x1xf32>
      tpu.vector_store %arg5[%c0_78, %c0_79], %191 {strides = array<i32>} : memref<16x1xf32, #tpu.memory_space<vmem>>, vector<16x1xf32>,
    } else {
    }
    return
  }
  func.func @transform_0(%arg0: i32, %arg1: i32) -> (i32, i32, i32) {
    %c0_i32 = arith.constant 0 : i32
    %c0_i32_0 = arith.constant 0 : i32
    return %c0_i32, %arg0, %arg1 : i32, i32, i32
  }
  func.func @transform_1(%arg0: i32, %arg1: i32) -> (i32, i32) {
    %c0_i32 = arith.constant 0 : i32
    return %arg0, %arg1 : i32, i32
  }
  func.func @transform_2(%arg0: i32, %arg1: i32) -> (i32, i32) {
    %c0_i32 = arith.constant 0 : i32
    return %arg0, %arg1 : i32, i32
  }
  func.func @transform_3(%arg0: i32, %arg1: i32) -> (i32, i32) {
    %c0_i32 = arith.constant 0 : i32
    %c0_i32_0 = arith.constant 0 : i32
    return %arg0, %c0_i32 : i32, i32
  }
}

</mosaic_0001>

<bundles_post_ra>
// kernel: tpu_custom_call.1
= control target key start
LH: loop header
LB: loop body
LE: loop exit
PB: predicated region body
PF: predicated region fallthrough
CT: control target
= control target key end

     0   :  { %s11406_s0 = inlined_call_operand.vmem [shape: f32[2,18,6000], index: 0, kind: input, shape index: {}]   ;;  %s11407_s1 = inlined_call_operand.vmem [shape: f32[18,6000], index: 1, kind: input, shape index: {}]   ;;  %s11408_s2 = inlined_call_operand.vmem [shape: f32[18,6000], index: 2, kind: input, shape index: {}]   ;;  %s11409_s3 = inlined_call_operand.vmem [shape: f32[18,1], index: 3, kind: output, shape index: {}]  }
   0x1   :  { %11441 = sst [smem:[#allocation30_spill]] %s11406_s0 }
   0x2   :  { %11442 = sst [smem:[#allocation31_spill]] %s11408_s2 }
   0x3   :  { %11443 = sst [smem:[#allocation32_spill]] %s11409_s3 }
   0x4   :  { %s7529_s12 = smov 0   ;;  %s7531_s13 = smov 0  }
   0x5   :  { %s7533_s14 = smov 0   ;;  %s7535_s15 = smov 0  }
   0x6   :  { %s7537_s16 = smov 0   ;;  %s7539_s17 = smov 0  }
   0x7   :  { %s7541_s18 = smov 0   ;;  %s7543_s19 = smov 0  }
   0x8   :  { %s7545_s20 = smov 0  }
   0x9 LB: > { %11444 = sst [smem:[#allocation7_spill]] %s6880_s12  ;;  %s22_s21 = sadd.s32 1, %s6904_s18  ;;  %s6912_s20 = sphi %s7545_s20, %s13_s20   ;;  %s6908_s19 = sphi %s7543_s19, %s11676_s19   ;;  %s6904_s18 = sphi %s7541_s18, %s11675_s18   ;;  %s6900_s17 = sphi %s7539_s17, %s11674_s17   ;;  %s6896_s16 = sphi %s7537_s16, %s11673_s16   ;;  %s6892_s15 = sphi %s7535_s15, %s11672_s15   ;;  %s6888_s14 = sphi %s7533_s14, %s11671_s14   ;;  %s6884_s13 = sphi %s7531_s13, %s11667_s13   ;;  %s6880_s12 = sphi %s7529_s12, %s11666_s12  }
   0xa   : > { %11445 = sst [smem:[#allocation8_spill]] %s6884_s13  ;;  %p23_p0 = scmp.ge.s32.totalorder %s22_s21, 2 }
   0xb   : > { %11446 = sst [smem:[#allocation9_spill]] %s6888_s14  ;;  %s25_s22 = sadd.s32 1, %s6908_s19 }
   0xc   : > { %11447 = sst [smem:[#allocation10_spill]] %s6896_s16  ;;  %p41_p1 = scmp.ne.s32.totalorder %s6892_s15, %s6888_s14 }
   0xd   : > { %11448 = sst [smem:[#allocation11_spill]] %s6900_s17  ;;  %s11678_s21 = smov (%p23_p0, %s22_s21), 0 }
   0xe   : > { %11449 = sst [smem:[#allocation12_spill]] %s6912_s20  ;;  %s11680_s22 = smov (!%p23_p0, %s25_s22), %s6908_s19 }
   0xf   : > { %11450 = sst [smem:[#allocation13_spill]] %s11678_s21  ;;  %s4605_s23 = sadd.s32 4294967295, %s6912_s20  }
  0x10   : > { %p42_p2 = scmp.eq.s32.totalorder %s6912_s20, 0  ;;  %p27_p3 = scmp.ge.s32.totalorder %s11680_s22, 2 }
  0x11   : > { %s30_s24 = ssub.s32 %s6904_s18, %s11678_s21  ;;  %p126_p5 = scmp.ne.s32.totalorder %s6884_s13, %s6880_s12 }
  0x12   : > { %p7585_p4 = por %p42_p2, %p41_p1  ;;  %s11682_s22 = smov (%p27_p3, %s11680_s22), 0 }
  0x13   : > { %11452 = sst [smem:[#allocation14_spill]] %s11682_s22  ;;  %s34_s26 = sadd.s32 1, %s6892_s15 }
  0x14   : > { %p127_p6 = scmp.eq.s32.totalorder %s4605_s23, 3  ;;  %s29_s27 = ssub.s32 %s6908_s19, %s11682_s22 }
  0x15   : > { %s116_s28 = sadd.s32 1, %s6884_s13  ;;  %s31_s29 = sor.u32 %s30_s24, %s29_s27 }
  0x16   : > { %p114_p7 = scmp.eq.s32.totalorder %s29_s27, 0  ;;  %p32_p8 = scmp.eq.s32.totalorder %s31_s29, 0 }
  0x17   : > { %p7597_p9 = por %p127_p6, %p126_p5  ;;  %p4608_p10 = scmp.ge.s32.totalorder %s6912_s20, 4 }
  0x18   : > { %s7602_s4 = scalar_select %p114_p7, %s6884_s13, %s116_s28  }
  0x19   : > { %s11453_s30 = scalar_select %p7597_p9, 1, 0 }
  0x1a   : > { %11455 = sst [smem:[#allocation16_spill]] %s7602_s4  ;;  %149 = sbr.rel (%p4608_p10) target bundleno = 859 (0x35b), region = 16 }
  0x1b   : > { %11454 = sst [smem:[#allocation15_spill]] %s11453_s30 }
  0x1c   : > { %s7605_s5 = scalar_select %p32_p8, %s6892_s15, %s34_s26  }
  0x1e   : > { %11456 = sst [smem:[#allocation17_spill]] %s7605_s5 }
  0x1f   : > { %152 = sbr.rel (!%p7585_p4) target bundleno = 307 (0x133), region = 20  ;;  %s154_s6 = sand.u32 (%p7585_p4), 1, %s6892_s15  }
  0x20   : > { %s4610_s7 = sshll.u32 (%p7585_p4), %s6908_s19, 1  ;;  %s4609_s8 = sshll.u32 (%p7585_p4), %s154_s6, 10 }
  0x21   : > { %s4611_s9 = sshll.u32 (%p7585_p4), %s6904_s18, 5  ;;  %s159_s10 = ssub.s32 (%p7585_p4), 3, %s4610_s7 }
  0x22   : > { %p160_p11 = scmp.lt.s32.totalorder (%p7585_p4), %s159_s10, 2  ;;  %s163_s11 = ssub.s32 (%p7585_p4), 47, %s4611_s9 }
  0x23   : > { %p164_p12 = scmp.lt.s32.totalorder (%p7585_p4), %s163_s11, 32  ;;  %s4924_s23 = smul.u32 (%p7585_p4), 94, %s6908_s19 }
  0x24   : > { %s11684_s10 = smov (!%p160_p11, %s159_s10), 2  ;;  %s11457_s0 = sld [smem:[#allocation30_spill]] }
  0x25   : > { %s11686_s11 = smov (!%p164_p12, %s163_s11), 32  ;;  %s4612_s24 = sshll.u32 %s11684_s10, 4 }
  0x26   : > { %s169_s26 = sadd.s32 %s4924_s23, %s4611_s9  ;;  %s166_s27 = smul.u32 %s4612_s24, %s11686_s11 }
  0x27   : > { %s4615_s28 = sshll.u32 %s169_s26, 3  ;;  %s7622_s6 = sshll.u32 %s11686_s11, 3 }
  0x28   : > { %s7624_s7 = scalar_lea.vmem [#allocation3], %s4609_s8   ;;  %p4617_p13 = scmp.eq.s32.totalorder %s166_s27, 0 }
  0x29   : > { %p176_p0 = scmp.lt.u32.totalorder (!%p4617_p13), %s7622_s6, 8 }
  0x2a   : > { %s7620_s21 = scalar_lea.vmem %s11457_s0, %s4615_s28   ;;  %175 = sbr.rel (%p4617_p13) target bundleno = 307 (0x133), region = 24 }
  0x2f   : > { %179 = sbr.rel (%p176_p0) target bundleno = 271 (0x10f), region = 28  ;;  %s7628_s5 = sand.u32 (!%p176_p0), 7, %s7622_s6  }
  0x30   : > { %p238_p1 = scmp.eq.s32.totalorder (!%p176_p0), %s7628_s5, 0  ;;  %p4618_p2 = scmp.ne.s32.totalorder (!%p176_p0), %s7628_s5, 0 }
  0x34   : > { %241 = sbr.rel (%p4618_p2) target bundleno = 145 (0x91), region = 50  ;;  %s11412_s22 = sshrl.u32 (!%p4618_p2), %s7622_s6, 3 }
  0x35   : > { %s7634_s9 = sshrl.u32 (!%p4618_p2), %s11684_s10, 1  ;;  %s7638_s8 = sshrl.u32 (!%p4618_p2), %s11412_s22, 3 }
  0x36   : > { %s7642_s11 = smul.u32 (!%p4618_p2), %s7638_s8, %s7634_s9 }
  0x38   : > { %p4619_p3 = scmp.le.s32.totalorder (!%p4618_p2), %s7642_s11, 0 }
  0x39   : > { %s11458_s23 = smov (!%p4619_p3), %s7624_s7  ;;  %s11459_s24 = smov (!%p4619_p3), %s7620_s21 }
  0x3a   : > { %4060 = sbr.rel (%p4619_p3) target bundleno = 96 (0x60), region = 552  ;;  %s7651_s26 = smov (!%p4619_p3), 0  }
  0x3b   : > { %s7653_s27 = smov (!%p4619_p3), 0   ;;  %s7655_s28 = smov (!%p4619_p3), 0  }
  0x3f LB: >> { %v256_v0 = vld [vmem:[%s6920_s24] sm:$0xff]  ;;  %v258_v1 = vld [vmem:[%s6920_s24 + $0x8] sm:$0xff]  ;;  %v260_v2 = vld [vmem:[%s6920_s24 + $0x10] sm:$0xff]  ;;  %s320_s29 = sadd.s32 1, %s6924_s26  ;;  %s323_s22 = sadd.s32 1, %s6928_s27  ;;  %s6932_s28 = sphi %s7655_s28, %s249_s28   ;;  %s6928_s27 = sphi %s7653_s27, %s11463_s27   ;;  %s6924_s26 = sphi %s7651_s26, %s11462_s26   ;;  %s6920_s24 = sphi %s11459_s24, %s11461_s24   ;;  %s6916_s23 = sphi %s11458_s23, %s11460_s23  }
  0x40   : >> { %257 = vst [vmem:[%s6916_s23] sm:$0xff] %v256_v0  ;;  %v262_v3 = vld [vmem:[%s6920_s24 + $0x18] sm:$0xff]  ;;  %p321_p5 = scmp.ge.s32.totalorder %s320_s29, %s7638_s8  ;;  %v264_v4 = vld [vmem:[%s6920_s24 + $0x20] sm:$0xff]  ;;  %v266_v5 = vld [vmem:[%s6920_s24 + $0x28] sm:$0xff]  ;;  %s249_s28 = sadd.s32 1, %s6932_s28  }
  0x41   : >> { %259 = vst [vmem:[%s6916_s23 + $0x8] sm:$0xff] %v258_v1  ;;  %v268_v6 = vld [vmem:[%s6920_s24 + $0x30] sm:$0xff]  ;;  %v270_v7 = vld [vmem:[%s6920_s24 + $0x38] sm:$0xff]  ;;  %v274_v9 = vld [vmem:[%s6920_s24 + $0x180] sm:$0xff]  ;;  %p248_p7 = scmp.ge.s32.totalorder %s249_s28, %s7642_s11 }
  0x42   : >> { %261 = vst [vmem:[%s6916_s23 + $0x10] sm:$0xff] %v260_v2  ;;  %s11688_s29 = smov (%p321_p5, %s320_s29), 0  ;;  %s11690_s22 = smov (!%p321_p5, %s323_s22), %s6928_s27  ;;  %v272_v8 = vld [vmem:[%s6920_s24 + $0x178] sm:$0xff]  ;;  %v276_v10 = vld [vmem:[%s6920_s24 + $0x188] sm:$0xff]  ;;  %v278_v11 = vld [vmem:[%s6920_s24 + $0x190] sm:$0xff] }
  0x43   : >> { %263 = vst [vmem:[%s6916_s23 + $0x18] sm:$0xff] %v262_v3  ;;  %p325_p6 = scmp.ge.s32.totalorder %s11690_s22, %s7634_s9  ;;  %s4620_s26 = sshll.u32 %s11688_s29, 6  ;;  %v280_v12 = vld [vmem:[%s6920_s24 + $0x198] sm:$0xff]  ;;  %v282_v13 = vld [vmem:[%s6920_s24 + $0x1a0] sm:$0xff]  ;;  %v284_v14 = vld [vmem:[%s6920_s24 + $0x1a8] sm:$0xff] }
  0x44   : >> { %265 = vst [vmem:[%s6916_s23 + $0x20] sm:$0xff] %v264_v4  ;;  %v286_v15 = vld [vmem:[%s6920_s24 + $0x1b0] sm:$0xff]  ;;  %v288_v16 = vld [vmem:[%s6920_s24 + $0x468] sm:$0xff]  ;;  %v292_v18 = vld [vmem:[%s6920_s24 + $0x478] sm:$0xff] }
  0x45   : >> { %267 = vst [vmem:[%s6916_s23 + $0x28] sm:$0xff] %v266_v5  ;;  %s11692_s22 = smov (%p325_p6, %s11690_s22), 0  ;;  %v290_v17 = vld [vmem:[%s6920_s24 + $0x470] sm:$0xff]  ;;  %v294_v19 = vld [vmem:[%s6920_s24 + $0x480] sm:$0xff]  ;;  %v296_v20 = vld [vmem:[%s6920_s24 + $0x488] sm:$0xff] }
  0x46   : >> { %269 = vst [vmem:[%s6916_s23 + $0x30] sm:$0xff] %v268_v6  ;;  %s327_s27 = smul.u32 752, %s11692_s22  ;;  %s4621_s0 = sshll.u32 %s11692_s22, 9  ;;  %v298_v21 = vld [vmem:[%s6920_s24 + $0x490] sm:$0xff]  ;;  %v300_v22 = vld [vmem:[%s6920_s24 + $0x498] sm:$0xff]  ;;  %v302_v23 = vld [vmem:[%s6920_s24 + $0x4a0] sm:$0xff] }
  0x47   : >> { %271 = vst [vmem:[%s6916_s23 + $0x38] sm:$0xff] %v270_v7  ;;  %s7702_s4 = sadd.s32 %s4621_s0, %s4620_s26  ;;  %v304_v24 = vld [vmem:[%s6920_s24 + $0x5e0] sm:$0xff]  ;;  %v306_v25 = vld [vmem:[%s6920_s24 + $0x5e8] sm:$0xff]  ;;  %v308_v26 = vld [vmem:[%s6920_s24 + $0x5f0] sm:$0xff] }
  0x48   : >> { %273 = vst [vmem:[%s6916_s23 + $0x100] sm:$0xff] %v272_v8  ;;  %s7706_s13 = sadd.s32 %s4620_s26, %s327_s27  ;;  %s334_s3 = scalar_lea.vmem %s7624_s7, %s7702_s4 [#allocation3]   ;;  %v310_v27 = vld [vmem:[%s6920_s24 + $0x5f8] sm:$0xff]  ;;  %v312_v28 = vld [vmem:[%s6920_s24 + $0x600] sm:$0xff]  ;;  %v314_v29 = vld [vmem:[%s6920_s24 + $0x608] sm:$0xff] }
  0x49   : >> { %275 = vst [vmem:[%s6916_s23 + $0x108] sm:$0xff] %v274_v9  ;;  %s333_s17 = scalar_lea.vmem %s7620_s21, %s7706_s13   ;;  %v316_v30 = vld [vmem:[%s6920_s24 + $0x610] sm:$0xff]  ;;  %v318_v31 = vld [vmem:[%s6920_s24 + $0x618] sm:$0xff]  ;;  %s11462_s26 = smov %s11688_s29 }
  0x4a   : >> { %277 = vst [vmem:[%s6916_s23 + $0x110] sm:$0xff] %v276_v10  ;;  %s11461_s24 = smov %s333_s17  ;;  %s11463_s27 = smov %s11692_s22 }
  0x4b   : >> { %279 = vst [vmem:[%s6916_s23 + $0x118] sm:$0xff] %v278_v11 }
  0x4c   : >> { %281 = vst [vmem:[%s6916_s23 + $0x120] sm:$0xff] %v280_v12 }
  0x4d   : >> { %283 = vst [vmem:[%s6916_s23 + $0x128] sm:$0xff] %v282_v13 }
  0x4e   : >> { %285 = vst [vmem:[%s6916_s23 + $0x130] sm:$0xff] %v284_v14 }
  0x4f   : >> { %287 = vst [vmem:[%s6916_s23 + $0x138] sm:$0xff] %v286_v15 }
  0x50   : >> { %289 = vst [vmem:[%s6916_s23 + $0x200] sm:$0xff] %v288_v16 }
  0x51   : >> { %291 = vst [vmem:[%s6916_s23 + $0x208] sm:$0xff] %v290_v17 }
  0x52   : >> { %293 = vst [vmem:[%s6916_s23 + $0x210] sm:$0xff] %v292_v18 }
  0x53   : >> { %295 = vst [vmem:[%s6916_s23 + $0x218] sm:$0xff] %v294_v19 }
  0x54   : >> { %297 = vst [vmem:[%s6916_s23 + $0x220] sm:$0xff] %v296_v20 }
  0x55   : >> { %299 = vst [vmem:[%s6916_s23 + $0x228] sm:$0xff] %v298_v21 }
  0x56   : >> { %301 = vst [vmem:[%s6916_s23 + $0x230] sm:$0xff] %v300_v22 }
  0x57   : >> { %303 = vst [vmem:[%s6916_s23 + $0x238] sm:$0xff] %v302_v23 }
  0x58   : >> { %305 = vst [vmem:[%s6916_s23 + $0x300] sm:$0xff] %v304_v24 }
  0x59   : >> { %307 = vst [vmem:[%s6916_s23 + $0x308] sm:$0xff] %v306_v25 }
  0x5a   : >> { %309 = vst [vmem:[%s6916_s23 + $0x310] sm:$0xff] %v308_v26 }
  0x5b   : >> { %311 = vst [vmem:[%s6916_s23 + $0x318] sm:$0xff] %v310_v27  ;;  %251 = sbr.rel (!%p248_p7) target bundleno = 63 (0x3f), region = 558 }
  0x5c   : >> { %313 = vst [vmem:[%s6916_s23 + $0x320] sm:$0xff] %v312_v28 }
  0x5d   : >> { %315 = vst [vmem:[%s6916_s23 + $0x328] sm:$0xff] %v314_v29 }
  0x5e   : >> { %317 = vst [vmem:[%s6916_s23 + $0x330] sm:$0xff] %v316_v30 }
  0x5f   : >> { %319 = vst [vmem:[%s6916_s23 + $0x338] sm:$0xff] %v318_v31  ;;  %s11460_s23 = smov %s334_s3 }
  0x60 PF: > { %s11415_s0 = sand.u32 1, %s11684_s10   ;;  %s4624_s3 = smul.u32 752, %s7634_s9 }
  0x61   : > { %s4894_s13 = sshll.u32 %s7634_s9, 9  ;;  %s7775_s17 = smul.u32 %s11415_s0, %s7638_s8 }
  0x62   : > { %s7778_s4 = scalar_lea.vmem %s7620_s21, %s4624_s3   ;;  %s7781_s22 = scalar_lea.vmem %s7624_s7, %s4894_s13 [#allocation3]  }
  0x63   : > { %p4626_p8 = scmp.le.s32.totalorder %s7775_s17, 0 }
  0x64   : > { %s11464_s11 = smov (!%p4626_p8), %s7781_s22  ;;  %s11465_s23 = smov (!%p4626_p8), %s7778_s4 }
  0x65   : > { %4077 = sbr.rel (%p4626_p8) target bundleno = 123 (0x7b), region = 563  ;;  %s7790_s24 = smov (!%p4626_p8), 0  }
  0x66   : > { %s7792_s28 = smov (!%p4626_p8), 0   ;;  %s7794_s9 = smov (!%p4626_p8), 0  }
  0x6a LB: >> { %v354_v32 = vld [vmem:[%s6940_s23] sm:$0xff]  ;;  %v356_v33 = vld [vmem:[%s6940_s23 + $0x8] sm:$0xff]  ;;  %v358_v34 = vld [vmem:[%s6940_s23 + $0x10] sm:$0xff]  ;;  %s386_s29 = sadd.s32 1, %s6944_s24  ;;  %s389_s26 = sadd.s32 1, %s6948_s28  ;;  %s6952_s9 = sphi %s7794_s9, %s347_s9   ;;  %s6948_s28 = sphi %s7792_s28, %s11469_s28   ;;  %s6944_s24 = sphi %s7790_s24, %s11468_s24   ;;  %s6940_s23 = sphi %s11465_s23, %s399_s23   ;;  %s6936_s11 = sphi %s11464_s11, %s11467_s11  }
  0x6b   : >> { %355 = vst [vmem:[%s6936_s11] sm:$0xff] %v354_v32  ;;  %v360_v35 = vld [vmem:[%s6940_s23 + $0x18] sm:$0xff]  ;;  %p387_p10 = scmp.ge.s32.totalorder %s386_s29, %s7638_s8  ;;  %v362_v36 = vld [vmem:[%s6940_s23 + $0x20] sm:$0xff]  ;;  %v364_v37 = vld [vmem:[%s6940_s23 + $0x28] sm:$0xff]  ;;  %s11466_s0 = sand.u32 1, %s11684_s10  }
  0x6c   : >> { %357 = vst [vmem:[%s6936_s11 + $0x8] sm:$0xff] %v356_v33  ;;  %v366_v38 = vld [vmem:[%s6940_s23 + $0x30] sm:$0xff]  ;;  %v368_v39 = vld [vmem:[%s6940_s23 + $0x38] sm:$0xff]  ;;  %v370_v40 = vld [vmem:[%s6940_s23 + $0x468] sm:$0xff]  ;;  %s347_s9 = sadd.s32 1, %s6952_s9  }
  0x6d   : >> { %359 = vst [vmem:[%s6936_s11 + $0x10] sm:$0xff] %v358_v34  ;;  %s11694_s29 = smov (%p387_p10, %s386_s29), 0  ;;  %s11696_s26 = smov (!%p387_p10, %s389_s26), %s6948_s28  ;;  %v372_v41 = vld [vmem:[%s6940_s23 + $0x470] sm:$0xff]  ;;  %v374_v42 = vld [vmem:[%s6940_s23 + $0x478] sm:$0xff]  ;;  %v376_v43 = vld [vmem:[%s6940_s23 + $0x480] sm:$0xff] }
  0x6e   : >> { %361 = vst [vmem:[%s6936_s11 + $0x18] sm:$0xff] %v360_v35  ;;  %p391_p11 = scmp.ge.s32.totalorder %s11696_s26, %s11466_s0  ;;  %s4627_s27 = sshll.u32 %s11694_s29, 6  ;;  %v378_v44 = vld [vmem:[%s6940_s23 + $0x488] sm:$0xff]  ;;  %v380_v45 = vld [vmem:[%s6940_s23 + $0x490] sm:$0xff]  ;;  %v382_v46 = vld [vmem:[%s6940_s23 + $0x498] sm:$0xff] }
  0x6f   : >> { %363 = vst [vmem:[%s6936_s11 + $0x20] sm:$0xff] %v362_v36  ;;  %v384_v47 = vld [vmem:[%s6940_s23 + $0x4a0] sm:$0xff]  ;;  %p346_p12 = scmp.ge.s32.totalorder %s347_s9, %s7775_s17 }
  0x70   : >> { %365 = vst [vmem:[%s6936_s11 + $0x28] sm:$0xff] %v364_v37  ;;  %s11698_s26 = smov (%p391_p11, %s11696_s26), 0 }
  0x71   : >> { %367 = vst [vmem:[%s6936_s11 + $0x30] sm:$0xff] %v366_v38  ;;  %s393_s3 = smul.u32 376, %s11698_s26  ;;  %s4628_s13 = sshll.u32 %s11698_s26, 8 }
  0x72   : >> { %369 = vst [vmem:[%s6936_s11 + $0x38] sm:$0xff] %v368_v39  ;;  %s398_s24 = sadd.s32 %s4628_s13, %s4627_s27 }
  0x73   : >> { %371 = vst [vmem:[%s6936_s11 + $0x200] sm:$0xff] %v370_v40  ;;  %s395_s28 = sadd.s32 %s4627_s27, %s393_s3  ;;  %s400_s0 = scalar_lea.vmem %s7781_s22, %s398_s24 [#allocation3]  }
  0x74   : >> { %373 = vst [vmem:[%s6936_s11 + $0x208] sm:$0xff] %v372_v41  ;;  %s399_s23 = scalar_lea.vmem %s7778_s4, %s395_s28   ;;  %s11468_s24 = smov %s11694_s29 }
  0x75   : >> { %375 = vst [vmem:[%s6936_s11 + $0x210] sm:$0xff] %v374_v42  ;;  %s11469_s28 = smov %s11698_s26 }
  0x76   : >> { %377 = vst [vmem:[%s6936_s11 + $0x218] sm:$0xff] %v376_v43  ;;  %349 = sbr.rel (!%p346_p12) target bundleno = 106 (0x6a), region = 569 }
  0x77   : >> { %379 = vst [vmem:[%s6936_s11 + $0x220] sm:$0xff] %v378_v44 }
  0x78   : >> { %381 = vst [vmem:[%s6936_s11 + $0x228] sm:$0xff] %v380_v45 }
  0x79   : >> { %383 = vst [vmem:[%s6936_s11 + $0x230] sm:$0xff] %v382_v46 }
  0x7a   : >> { %385 = vst [vmem:[%s6936_s11 + $0x238] sm:$0xff] %v384_v47  ;;  %s11467_s11 = smov %s400_s0 }
  0x7b PF: > { %s11470_s27 = sshrl.u32 %s7622_s6, 3  ;;  %s4895_s0 = sshll.u32 %s7638_s8, 6 }
  0x7c   : > { %s7862_s3 = sand.u32 7, %s11470_s27   ;;  %s7866_s13 = scalar_lea.vmem %s7620_s21, %s4895_s0  }
  0x7d   : > { %s7869_s30 = scalar_lea.vmem %s7624_s7, %s4895_s0 [#allocation3]   ;;  %s7873_s29 = smul.u32 %s7862_s3, %s11684_s10 }
  0x7f   : > { %p4633_p13 = scmp.le.s32.totalorder %s7873_s29, 0 }
  0x80   : > { %s11471_s17 = smov (!%p4633_p13), %s7869_s30  ;;  %s11472_s4 = smov (!%p4633_p13), %s7866_s13 }
  0x81   : > { %4094 = sbr.rel (%p4633_p13) target bundleno = 145 (0x91), region = 574  ;;  %s7882_s22 = smov (!%p4633_p13), 0  }
  0x82   : > { %s7884_s11 = smov (!%p4633_p13), 0   ;;  %s7886_s8 = smov (!%p4633_p13), 0  }
  0x86 LB: >> { %v419_v48 = vld [vmem:[%s6960_s4] sm:$0xff]  ;;  %v421_v49 = vld [vmem:[%s6960_s4 + $0x468] sm:$0xff]  ;;  %s423_s23 = sadd.s32 1, %s6964_s22  ;;  %s426_s9 = sadd.s32 1, %s6968_s11  ;;  %s6972_s8 = sphi %s7886_s8, %s412_s8   ;;  %s6968_s11 = sphi %s7884_s11, %s11474_s11   ;;  %s6964_s22 = sphi %s7882_s22, %s11473_s22   ;;  %s6960_s4 = sphi %s11472_s4, %s436_s4   ;;  %s6956_s17 = sphi %s11471_s17, %s437_s17  }
  0x87   : >> { %420 = vst [vmem:[%s6956_s17] sm:$0xff] %v419_v48  ;;  %p424_p0 = scmp.ge.s32.totalorder %s423_s23, %s7862_s3  ;;  %s412_s8 = sadd.s32 1, %s6972_s8  }
  0x88   : >> { %422 = vst [vmem:[%s6956_s17 + $0x200] sm:$0xff] %v421_v49  ;;  %p411_p3 = scmp.ge.s32.totalorder %s412_s8, %s7873_s29 }
  0x89   : >> { %s11700_s23 = smov (%p424_p0, %s423_s23), 0  ;;  %s11702_s9 = smov (!%p424_p0, %s426_s9), %s6968_s11 }
  0x8a   : >> { %p428_p2 = scmp.ge.s32.totalorder %s11702_s9, %s11684_s10  ;;  %s4634_s26 = sshll.u32 %s11700_s23, 3 }
  0x8b   : >> { %s11473_s22 = smov %s11700_s23 }
  0x8c   : >> { %s11704_s9 = smov (%p428_p2, %s11702_s9), 0  ;;  %414 = sbr.rel (!%p411_p3) target bundleno = 134 (0x86), region = 580 }
  0x8d   : >> { %s430_s24 = smul.u32 376, %s11704_s9  ;;  %s4635_s28 = sshll.u32 %s11704_s9, 8 }
  0x8e   : >> { %s435_s27 = sadd.s32 %s4635_s28, %s4634_s26  ;;  %s11474_s11 = smov %s11704_s9 }
  0x8f   : >> { %s432_s0 = sadd.s32 %s4634_s26, %s430_s24  ;;  %s437_s17 = scalar_lea.vmem %s7869_s30, %s435_s27 [#allocation3]  }
  0x90   : >> { %s436_s4 = scalar_lea.vmem %s7866_s13, %s432_s0  }
  0x91 PF: > { %440 = sbr.rel (%p238_p1) target bundleno = 271 (0x10f), region = 75  ;;  %s442_s26 = ssub.s32 (!%p238_p1), %s7622_s6, %s7628_s5 }
  0x92   : > { %s11417_s24 = sshrl.u32 (!%p238_p1), %s7622_s6, 3  ;;  %s7914_s23 = scalar_lea.vmem (!%p238_p1), %s7620_s21, %s442_s26  }
  0x93   : > { %s7917_s9 = scalar_lea.vmem (!%p238_p1), %s7624_s7, %s442_s26 [#allocation3]   ;;  %s7920_s8 = sshrl.u32 (!%p238_p1), %s11684_s10, 1 }
  0x94   : > { %s7924_s30 = sshrl.u32 (!%p238_p1), %s11417_s24, 3 }
  0x95   : > { %s7928_s3 = smul.u32 (!%p238_p1), %s7924_s30, %s7920_s8 }
  0x97   : > { %p4637_p1 = scmp.le.s32.totalorder %s7928_s3, 0 }
  0x98   : > { %s11475_s13 = smov (!%p4637_p1), %s7624_s7  ;;  %s11476_s29 = smov (!%p4637_p1), %s7620_s21 }
  0x99   : > { %4111 = sbr.rel (%p4637_p1) target bundleno = 191 (0xbf), region = 585  ;;  %s7937_s17 = smov (!%p4637_p1), 0  }
  0x9a   : > { %s7939_s4 = smov (!%p4637_p1), 0   ;;  %s7941_s22 = smov (!%p4637_p1), 0  }
  0x9e LB: >> { %v460_v50 = vld [vmem:[%s6980_s29] sm:$0xff]  ;;  %v462_v51 = vld [vmem:[%s6980_s29 + $0x8] sm:$0xff]  ;;  %v464_v52 = vld [vmem:[%s6980_s29 + $0x10] sm:$0xff]  ;;  %s524_s11 = sadd.s32 1, %s6984_s17  ;;  %s527_s28 = sadd.s32 1, %s6988_s4  ;;  %s6992_s22 = sphi %s7941_s22, %s453_s22   ;;  %s6988_s4 = sphi %s7939_s4, %s11480_s4   ;;  %s6984_s17 = sphi %s7937_s17, %s11479_s17   ;;  %s6980_s29 = sphi %s11476_s29, %s11478_s29   ;;  %s6976_s13 = sphi %s11475_s13, %s11477_s13  }
  0x9f   : >> { %461 = vst [vmem:[%s6976_s13] sm:$0xff] %v460_v50  ;;  %v466_v53 = vld [vmem:[%s6980_s29 + $0x18] sm:$0xff]  ;;  %p525_p5 = scmp.ge.s32.totalorder %s524_s11, %s7924_s30  ;;  %v468_v54 = vld [vmem:[%s6980_s29 + $0x20] sm:$0xff]  ;;  %v470_v55 = vld [vmem:[%s6980_s29 + $0x28] sm:$0xff]  ;;  %s453_s22 = sadd.s32 1, %s6992_s22  }
  0xa0   : >> { %463 = vst [vmem:[%s6976_s13 + $0x8] sm:$0xff] %v462_v51  ;;  %v472_v56 = vld [vmem:[%s6980_s29 + $0x30] sm:$0xff]  ;;  %v474_v57 = vld [vmem:[%s6980_s29 + $0x38] sm:$0xff]  ;;  %v478_v59 = vld [vmem:[%s6980_s29 + $0x180] sm:$0xff]  ;;  %p452_p7 = scmp.ge.s32.totalorder %s453_s22, %s7928_s3 }
  0xa1   : >> { %465 = vst [vmem:[%s6976_s13 + $0x10] sm:$0xff] %v464_v52  ;;  %s11706_s11 = smov (%p525_p5, %s524_s11), 0  ;;  %s11708_s28 = smov (!%p525_p5, %s527_s28), %s6988_s4  ;;  %v476_v58 = vld [vmem:[%s6980_s29 + $0x178] sm:$0xff]  ;;  %v480_v60 = vld [vmem:[%s6980_s29 + $0x188] sm:$0xff]  ;;  %v482_v61 = vld [vmem:[%s6980_s29 + $0x190] sm:$0xff] }
  0xa2   : >> { %467 = vst [vmem:[%s6976_s13 + $0x18] sm:$0xff] %v466_v53  ;;  %p529_p6 = scmp.ge.s32.totalorder %s11708_s28, %s7920_s8  ;;  %s4638_s27 = sshll.u32 %s11706_s11, 6  ;;  %v484_v62 = vld [vmem:[%s6980_s29 + $0x198] sm:$0xff]  ;;  %v486_v63 = vld [vmem:[%s6980_s29 + $0x1a0] sm:$0xff]  ;;  %v488_v0 = vld [vmem:[%s6980_s29 + $0x1a8] sm:$0xff] }
  0xa3   : >> { %469 = vst [vmem:[%s6976_s13 + $0x20] sm:$0xff] %v468_v54  ;;  %v490_v1 = vld [vmem:[%s6980_s29 + $0x1b0] sm:$0xff]  ;;  %v492_v2 = vld [vmem:[%s6980_s29 + $0x468] sm:$0xff]  ;;  %v496_v4 = vld [vmem:[%s6980_s29 + $0x478] sm:$0xff] }
  0xa4   : >> { %471 = vst [vmem:[%s6976_s13 + $0x28] sm:$0xff] %v470_v55  ;;  %s11710_s28 = smov (%p529_p6, %s11708_s28), 0  ;;  %v494_v3 = vld [vmem:[%s6980_s29 + $0x470] sm:$0xff]  ;;  %v498_v5 = vld [vmem:[%s6980_s29 + $0x480] sm:$0xff]  ;;  %v500_v6 = vld [vmem:[%s6980_s29 + $0x488] sm:$0xff] }
  0xa5   : >> { %473 = vst [vmem:[%s6976_s13 + $0x30] sm:$0xff] %v472_v56  ;;  %s531_s0 = smul.u32 752, %s11710_s28  ;;  %s4639_s26 = sshll.u32 %s11710_s28, 9  ;;  %v502_v7 = vld [vmem:[%s6980_s29 + $0x490] sm:$0xff]  ;;  %v504_v8 = vld [vmem:[%s6980_s29 + $0x498] sm:$0xff]  ;;  %v506_v9 = vld [vmem:[%s6980_s29 + $0x4a0] sm:$0xff] }
  0xa6   : >> { %475 = vst [vmem:[%s6976_s13 + $0x38] sm:$0xff] %v474_v57  ;;  %s7988_s17 = sadd.s32 %s4639_s26, %s4638_s27  ;;  %v508_v10 = vld [vmem:[%s6980_s29 + $0x5e0] sm:$0xff]  ;;  %v510_v11 = vld [vmem:[%s6980_s29 + $0x5e8] sm:$0xff]  ;;  %v512_v12 = vld [vmem:[%s6980_s29 + $0x5f0] sm:$0xff] }
  0xa7   : >> { %477 = vst [vmem:[%s6976_s13 + $0x100] sm:$0xff] %v476_v58  ;;  %s7992_s4 = sadd.s32 %s4638_s27, %s531_s0  ;;  %s538_s24 = scalar_lea.vmem %s7624_s7, %s7988_s17 [#allocation3]   ;;  %v514_v13 = vld [vmem:[%s6980_s29 + $0x5f8] sm:$0xff]  ;;  %v516_v14 = vld [vmem:[%s6980_s29 + $0x600] sm:$0xff]  ;;  %v518_v15 = vld [vmem:[%s6980_s29 + $0x608] sm:$0xff] }
  0xa8   : >> { %479 = vst [vmem:[%s6976_s13 + $0x108] sm:$0xff] %v478_v59  ;;  %s537_s16 = scalar_lea.vmem %s7620_s21, %s7992_s4   ;;  %v520_v16 = vld [vmem:[%s6980_s29 + $0x610] sm:$0xff]  ;;  %v522_v17 = vld [vmem:[%s6980_s29 + $0x618] sm:$0xff]  ;;  %s11479_s17 = smov %s11706_s11 }
  0xa9   : >> { %481 = vst [vmem:[%s6976_s13 + $0x110] sm:$0xff] %v480_v60  ;;  %s11478_s29 = smov %s537_s16  ;;  %s11480_s4 = smov %s11710_s28 }
  0xaa   : >> { %483 = vst [vmem:[%s6976_s13 + $0x118] sm:$0xff] %v482_v61 }
  0xab   : >> { %485 = vst [vmem:[%s6976_s13 + $0x120] sm:$0xff] %v484_v62 }
  0xac   : >> { %487 = vst [vmem:[%s6976_s13 + $0x128] sm:$0xff] %v486_v63 }
  0xad   : >> { %489 = vst [vmem:[%s6976_s13 + $0x130] sm:$0xff] %v488_v0 }
  0xae   : >> { %491 = vst [vmem:[%s6976_s13 + $0x138] sm:$0xff] %v490_v1 }
  0xaf   : >> { %493 = vst [vmem:[%s6976_s13 + $0x200] sm:$0xff] %v492_v2 }
  0xb0   : >> { %495 = vst [vmem:[%s6976_s13 + $0x208] sm:$0xff] %v494_v3 }
  0xb1   : >> { %497 = vst [vmem:[%s6976_s13 + $0x210] sm:$0xff] %v496_v4 }
  0xb2   : >> { %499 = vst [vmem:[%s6976_s13 + $0x218] sm:$0xff] %v498_v5 }
  0xb3   : >> { %501 = vst [vmem:[%s6976_s13 + $0x220] sm:$0xff] %v500_v6 }
  0xb4   : >> { %503 = vst [vmem:[%s6976_s13 + $0x228] sm:$0xff] %v502_v7 }
  0xb5   : >> { %505 = vst [vmem:[%s6976_s13 + $0x230] sm:$0xff] %v504_v8 }
  0xb6   : >> { %507 = vst [vmem:[%s6976_s13 + $0x238] sm:$0xff] %v506_v9 }
  0xb7   : >> { %509 = vst [vmem:[%s6976_s13 + $0x300] sm:$0xff] %v508_v10 }
  0xb8   : >> { %511 = vst [vmem:[%s6976_s13 + $0x308] sm:$0xff] %v510_v11 }
  0xb9   : >> { %513 = vst [vmem:[%s6976_s13 + $0x310] sm:$0xff] %v512_v12 }
  0xba   : >> { %515 = vst [vmem:[%s6976_s13 + $0x318] sm:$0xff] %v514_v13  ;;  %455 = sbr.rel (!%p452_p7) target bundleno = 158 (0x9e), region = 591 }
  0xbb   : >> { %517 = vst [vmem:[%s6976_s13 + $0x320] sm:$0xff] %v516_v14 }
  0xbc   : >> { %519 = vst [vmem:[%s6976_s13 + $0x328] sm:$0xff] %v518_v15 }
  0xbd   : >> { %521 = vst [vmem:[%s6976_s13 + $0x330] sm:$0xff] %v520_v16 }
  0xbe   : >> { %523 = vst [vmem:[%s6976_s13 + $0x338] sm:$0xff] %v522_v17  ;;  %s11477_s13 = smov %s538_s24 }
  0xbf PF: > { %s8056_s24 = sand.u32 1, %s11684_s10   ;;  %s11419_s16 = smul.u32 752, %s7920_s8 }
  0xc0   : > { %s11418_s27 = sshll.u32 %s7920_s8, 9  ;;  %s8062_s11 = smul.u32 %s8056_s24, %s7924_s30 }
  0xc1   : > { %s8067_s28 = scalar_lea.vmem %s7620_s21, %s11419_s16   ;;  %s8072_s3 = scalar_lea.vmem %s7624_s7, %s11418_s27 [#allocation3]  }
  0xc2   : > { %p4644_p8 = scmp.le.s32.totalorder %s8062_s11, 0 }
  0xc3   : > { %s11481_s13 = smov (!%p4644_p8), %s8072_s3  ;;  %s11482_s29 = smov (!%p4644_p8), %s8067_s28 }
  0xc4   : > { %4128 = sbr.rel (%p4644_p8) target bundleno = 218 (0xda), region = 596  ;;  %s8081_s22 = smov (!%p4644_p8), 0  }
  0xc5   : > { %s8083_s0 = smov (!%p4644_p8), 0   ;;  %s8085_s26 = smov (!%p4644_p8), 0  }
  0xc9 LB: >> { %v558_v18 = vld [vmem:[%s7000_s29] sm:$0xff]  ;;  %v560_v19 = vld [vmem:[%s7000_s29 + $0x8] sm:$0xff]  ;;  %v562_v20 = vld [vmem:[%s7000_s29 + $0x10] sm:$0xff]  ;;  %s590_s17 = sadd.s32 1, %s7004_s22  ;;  %s593_s4 = sadd.s32 1, %s7008_s0  ;;  %s7012_s26 = sphi %s8085_s26, %s551_s26   ;;  %s7008_s0 = sphi %s8083_s0, %s11485_s0   ;;  %s7004_s22 = sphi %s8081_s22, %s11484_s22   ;;  %s7000_s29 = sphi %s11482_s29, %s603_s29   ;;  %s6996_s13 = sphi %s11481_s13, %s11483_s13  }
  0xca   : >> { %559 = vst [vmem:[%s6996_s13] sm:$0xff] %v558_v18  ;;  %v564_v21 = vld [vmem:[%s7000_s29 + $0x18] sm:$0xff]  ;;  %p591_p10 = scmp.ge.s32.totalorder %s590_s17, %s7924_s30  ;;  %v566_v22 = vld [vmem:[%s7000_s29 + $0x20] sm:$0xff]  ;;  %v568_v23 = vld [vmem:[%s7000_s29 + $0x28] sm:$0xff]  ;;  %s551_s26 = sadd.s32 1, %s7012_s26  }
  0xcb   : >> { %561 = vst [vmem:[%s6996_s13 + $0x8] sm:$0xff] %v560_v19  ;;  %v570_v24 = vld [vmem:[%s7000_s29 + $0x30] sm:$0xff]  ;;  %v572_v25 = vld [vmem:[%s7000_s29 + $0x38] sm:$0xff]  ;;  %v574_v26 = vld [vmem:[%s7000_s29 + $0x468] sm:$0xff]  ;;  %p550_p12 = scmp.ge.s32.totalorder %s551_s26, %s8062_s11 }
  0xcc   : >> { %563 = vst [vmem:[%s6996_s13 + $0x10] sm:$0xff] %v562_v20  ;;  %s11712_s17 = smov (%p591_p10, %s590_s17), 0  ;;  %s11714_s4 = smov (!%p591_p10, %s593_s4), %s7008_s0  ;;  %v576_v27 = vld [vmem:[%s7000_s29 + $0x470] sm:$0xff]  ;;  %v578_v28 = vld [vmem:[%s7000_s29 + $0x478] sm:$0xff]  ;;  %v580_v29 = vld [vmem:[%s7000_s29 + $0x480] sm:$0xff] }
  0xcd   : >> { %565 = vst [vmem:[%s6996_s13 + $0x18] sm:$0xff] %v564_v21  ;;  %p595_p11 = scmp.ge.s32.totalorder %s11714_s4, %s8056_s24  ;;  %s4645_s22 = sshll.u32 %s11712_s17, 6  ;;  %v582_v30 = vld [vmem:[%s7000_s29 + $0x488] sm:$0xff]  ;;  %v584_v31 = vld [vmem:[%s7000_s29 + $0x490] sm:$0xff]  ;;  %v586_v32 = vld [vmem:[%s7000_s29 + $0x498] sm:$0xff] }
  0xce   : >> { %567 = vst [vmem:[%s6996_s13 + $0x20] sm:$0xff] %v566_v22  ;;  %v588_v33 = vld [vmem:[%s7000_s29 + $0x4a0] sm:$0xff] }
  0xcf   : >> { %569 = vst [vmem:[%s6996_s13 + $0x28] sm:$0xff] %v568_v23  ;;  %s11716_s4 = smov (%p595_p11, %s11714_s4), 0 }
  0xd0   : >> { %571 = vst [vmem:[%s6996_s13 + $0x30] sm:$0xff] %v570_v24  ;;  %s597_s0 = smul.u32 376, %s11716_s4  ;;  %s4646_s27 = sshll.u32 %s11716_s4, 8 }
  0xd1   : >> { %573 = vst [vmem:[%s6996_s13 + $0x38] sm:$0xff] %v572_v25  ;;  %s602_s16 = sadd.s32 %s4646_s27, %s4645_s22 }
  0xd2   : >> { %575 = vst [vmem:[%s6996_s13 + $0x200] sm:$0xff] %v574_v26  ;;  %s599_s12 = sadd.s32 %s4645_s22, %s597_s0  ;;  %s604_s14 = scalar_lea.vmem %s8072_s3, %s602_s16 [#allocation3]  }
  0xd3   : >> { %577 = vst [vmem:[%s6996_s13 + $0x208] sm:$0xff] %v576_v27  ;;  %s603_s29 = scalar_lea.vmem %s8067_s28, %s599_s12   ;;  %s11484_s22 = smov %s11712_s17 }
  0xd4   : >> { %579 = vst [vmem:[%s6996_s13 + $0x210] sm:$0xff] %v578_v28  ;;  %s11485_s0 = smov %s11716_s4 }
  0xd5   : >> { %581 = vst [vmem:[%s6996_s13 + $0x218] sm:$0xff] %v580_v29  ;;  %553 = sbr.rel (!%p550_p12) target bundleno = 201 (0xc9), region = 602 }
  0xd6   : >> { %583 = vst [vmem:[%s6996_s13 + $0x220] sm:$0xff] %v582_v30 }
  0xd7   : >> { %585 = vst [vmem:[%s6996_s13 + $0x228] sm:$0xff] %v584_v31 }
  0xd8   : >> { %587 = vst [vmem:[%s6996_s13 + $0x230] sm:$0xff] %v586_v32 }
  0xd9   : >> { %589 = vst [vmem:[%s6996_s13 + $0x238] sm:$0xff] %v588_v33  ;;  %s11483_s13 = smov %s604_s14 }
  0xda PF: > { %s11486_s12 = sshrl.u32 %s7622_s6, 3  ;;  %s4898_s14 = sshll.u32 %s7924_s30, 6 }
  0xdb   : > { %s8152_s16 = sand.u32 7, %s11486_s12   ;;  %s8156_s27 = scalar_lea.vmem %s7620_s21, %s4898_s14  }
  0xdc   : > { %s8159_s20 = scalar_lea.vmem %s7624_s7, %s4898_s14 [#allocation3]   ;;  %s8163_s17 = smul.u32 %s8152_s16, %s11684_s10 }
  0xde   : > { %p4651_p13 = scmp.le.s32.totalorder %s8163_s17, 0 }
  0xdf   : > { %s11487_s11 = smov (!%p4651_p13), %s8159_s20  ;;  %s11488_s28 = smov (!%p4651_p13), %s8156_s27 }
  0xe0   : > { %4145 = sbr.rel (%p4651_p13) target bundleno = 240 (0xf0), region = 607  ;;  %s8172_s3 = smov (!%p4651_p13), 0  }
  0xe1   : > { %s8174_s13 = smov (!%p4651_p13), 0   ;;  %s8176_s30 = smov (!%p4651_p13), 0  }
  0xe5 LB: >> { %v623_v34 = vld [vmem:[%s7020_s28] sm:$0xff]  ;;  %v625_v35 = vld [vmem:[%s7020_s28 + $0x468] sm:$0xff]  ;;  %s627_s29 = sadd.s32 1, %s7024_s3  ;;  %s630_s26 = sadd.s32 1, %s7028_s13  ;;  %s7032_s30 = sphi %s8176_s30, %s616_s30   ;;  %s7028_s13 = sphi %s8174_s13, %s11490_s13   ;;  %s7024_s3 = sphi %s8172_s3, %s11489_s3   ;;  %s7020_s28 = sphi %s11488_s28, %s640_s28   ;;  %s7016_s11 = sphi %s11487_s11, %s641_s11  }
  0xe6   : >> { %624 = vst [vmem:[%s7016_s11] sm:$0xff] %v623_v34  ;;  %p628_p0 = scmp.ge.s32.totalorder %s627_s29, %s8152_s16  ;;  %s616_s30 = sadd.s32 1, %s7032_s30  }
  0xe7   : >> { %626 = vst [vmem:[%s7016_s11 + $0x200] sm:$0xff] %v625_v35  ;;  %p615_p3 = scmp.ge.s32.totalorder %s616_s30, %s8163_s17 }
  0xe8   : >> { %s11718_s29 = smov (%p628_p0, %s627_s29), 0  ;;  %s11720_s26 = smov (!%p628_p0, %s630_s26), %s7028_s13 }
  0xe9   : >> { %p632_p2 = scmp.ge.s32.totalorder %s11720_s26, %s11684_s10  ;;  %s4652_s4 = sshll.u32 %s11718_s29, 3 }
  0xea   : >> { %s11489_s3 = smov %s11718_s29 }
  0xeb   : >> { %s11722_s26 = smov (%p632_p2, %s11720_s26), 0  ;;  %618 = sbr.rel (!%p615_p3) target bundleno = 229 (0xe5), region = 613 }
  0xec   : >> { %s634_s22 = smul.u32 376, %s11722_s26  ;;  %s4653_s0 = sshll.u32 %s11722_s26, 8 }
  0xed   : >> { %s639_s12 = sadd.s32 %s4653_s0, %s4652_s4  ;;  %s11490_s13 = smov %s11722_s26 }
  0xee   : >> { %s636_s14 = sadd.s32 %s4652_s4, %s634_s22  ;;  %s641_s11 = scalar_lea.vmem %s8159_s20, %s639_s12 [#allocation3]  }
  0xef   : >> { %s640_s28 = scalar_lea.vmem %s8156_s27, %s636_s14  }
  0xf0 PF: > { %s7502_s2 = smov 1   ;;  %p4656_p1 = scmp.le.s32.totalorder %s7920_s8, 0 }
  0xf1   : > { %s642_s4 = sshll.u32 %s7502_s2, %s7628_s5  ;;  %s11491_s0 = smov (!%p4656_p1), %s7917_s9 }
  0xf2   : > { %s8199_s22 = sadd.s32 4294967295, %s642_s4  ;;  %4161 = sbr.rel (%p4656_p1) target bundleno = 255 (0xff), region = 618 }
  0xf3   : > { %s11492_s29 = smov (!%p4656_p1), %s7914_s23  ;;  %s8208_s12 = smov (!%p4656_p1), 0  }
  0xf4   : > { %s8210_s26 = smov (!%p4656_p1), 0  }
  0xf7 LB: >> { %v654_v36 = vld [vmem:[%s7040_s29] sm:%s8199_s22]  ;;  %v656_v37 = vld [vmem:[%s7040_s29 + $0x178] sm:%s8199_s22]  ;;  %s662_s2 = sadd.s32 1, %s7044_s12  ;;  %s648_s26 = sadd.s32 1, %s7048_s26   ;;  %s7048_s26 = sphi %s8210_s26, %s648_s26   ;;  %s7044_s12 = sphi %s8208_s12, %s11493_s12   ;;  %s7040_s29 = sphi %s11492_s29, %s667_s29   ;;  %s7036_s0 = sphi %s11491_s0, %s668_s0  }
  0xf8   : >> { %655 = vst [vmem:[%s7036_s0] sm:%s8199_s22] %v654_v36  ;;  %v658_v38 = vld [vmem:[%s7040_s29 + $0x468] sm:%s8199_s22]  ;;  %p663_p5 = scmp.ge.s32.totalorder %s662_s2, %s7920_s8  ;;  %p647_p6 = scmp.ge.s32.totalorder %s648_s26, %s7920_s8 }
  0xf9   : >> { %657 = vst [vmem:[%s7036_s0 + $0x100] sm:%s8199_s22] %v656_v37  ;;  %v660_v39 = vld [vmem:[%s7040_s29 + $0x5e0] sm:%s8199_s22] }
  0xfa   : >> { %659 = vst [vmem:[%s7036_s0 + $0x200] sm:%s8199_s22] %v658_v38  ;;  %s11724_s2 = smov (%p663_p5, %s662_s2), 0  ;;  %650 = sbr.rel (!%p647_p6) target bundleno = 247 (0xf7), region = 624 }
  0xfb   : >> { %661 = vst [vmem:[%s7036_s0 + $0x300] sm:%s8199_s22] %v660_v39  ;;  %s665_s20 = smul.u32 752, %s11724_s2  ;;  %s4657_s5 = sshll.u32 %s11724_s2, 9 }
  0xfc   : >> { %s668_s0 = scalar_lea.vmem %s7917_s9, %s4657_s5 [#allocation3]   ;;  %s11493_s12 = smov %s11724_s2 }
  0xfd   : >> { %s667_s29 = scalar_lea.vmem %s7914_s23, %s665_s20  }
  0xff PF: > { %s11494_s16 = smul.u32 752, %s7920_s8  ;;  %s11495_s17 = sshll.u32 %s7920_s8, 9 }
 0x100   : > { %s8244_s11 = scalar_lea.vmem %s7917_s9, %s11495_s17 [#allocation3]   ;;  %p4661_p7 = scmp.le.s32.totalorder %s8056_s24, 0 }
 0x101   : > { %s8239_s27 = scalar_lea.vmem %s7914_s23, %s11494_s16   ;;  %s7050_s28 = smov (!%p4661_p7), %s8244_s11  }
 0x102   : > { %4175 = sbr.rel (%p4661_p7) target bundleno = 271 (0x10f), region = 629  ;;  %s7054_s3 = smov (!%p4661_p7), %s8239_s27  }
 0x103   : > { %s7058_s13 = smov (!%p4661_p7), 0   ;;  %s7062_s30 = smov (!%p4661_p7), 0  }
 0x107 LB: >> { %v685_v40 = vld [vmem:[%s7056_s3] sm:%s8199_s22]  ;;  %v687_v41 = vld [vmem:[%s7056_s3 + $0x468] sm:%s8199_s22]  ;;  %s689_s23 = sadd.s32 1, %s7060_s13  ;;  %s679_s30 = sadd.s32 1, %s7064_s30   ;;  %s7064_s30 = sphi %s7062_s30, %s679_s30   ;;  %s7060_s13 = sphi %s7058_s13, %s7059_s13   ;;  %s7056_s3 = sphi %s7054_s3, %s694_s3   ;;  %s7052_s28 = sphi %s7050_s28, %s695_s28  }
 0x108   : >> { %686 = vst [vmem:[%s7052_s28] sm:%s8199_s22] %v685_v40  ;;  %p690_p8 = scmp.ge.s32.totalorder %s689_s23, %s8056_s24  ;;  %p678_p10 = scmp.ge.s32.totalorder %s679_s30, %s8056_s24 }
 0x109   : >> { %688 = vst [vmem:[%s7052_s28 + $0x200] sm:%s8199_s22] %v687_v41 }
 0x10a   : >> { %s11726_s23 = smov (%p690_p8, %s689_s23), 0  ;;  %681 = sbr.rel (!%p678_p10) target bundleno = 263 (0x107), region = 635 }
 0x10b   : >> { %s692_s9 = smul.u32 376, %s11726_s23  ;;  %s4662_s8 = sshll.u32 %s11726_s23, 8 }
 0x10c   : >> { %s695_s28 = scalar_lea.vmem %s8244_s11, %s4662_s8 [#allocation3]   ;;  %s7059_s13 = smov %s11726_s23  }
 0x10d   : >> { %s694_s3 = scalar_lea.vmem %s8239_s27, %s692_s9  }
 0x10f PF: > { %p4663_p11 = scmp.ge.u32.totalorder %s7622_s6, 8 }
 0x110   : > { %s8259_s14 = sshrl.u32 (!%p4663_p11), %s11684_s10, 1  ;;  %s7503_s4 = smov (!%p4663_p11), 1  }
 0x111   : > { %182 = sbr.rel (%p4663_p11) target bundleno = 307 (0x133), region = 32  ;;  %s183_s0 = sshll.u32 (!%p4663_p11), %s7503_s4, %s7622_s6 }
 0x112   : > { %s8262_s29 = sadd.s32 (!%p4663_p11), 4294967295, %s183_s0  ;;  %p4665_p12 = scmp.le.s32.totalorder (!%p4663_p11), %s8259_s14, 0 }
 0x116   : > { %4189 = sbr.rel (%p4665_p12) target bundleno = 291 (0x123), region = 640  ;;  %s11496_s24 = smov (!%p4665_p12), %s7624_s7 }
 0x117   : > { %s11497_s22 = smov (!%p4665_p12), %s7620_s21  ;;  %s8271_s12 = smov (!%p4665_p12), 0  }
 0x118   : > { %s8273_s26 = smov (!%p4665_p12), 0  }
 0x11b LB: >> { %v195_v42 = vld [vmem:[%s7072_s22] sm:%s8262_s29]  ;;  %v197_v43 = vld [vmem:[%s7072_s22 + $0x178] sm:%s8262_s29]  ;;  %s203_s6 = sadd.s32 1, %s7076_s12  ;;  %s189_s26 = sadd.s32 1, %s7080_s26   ;;  %s7080_s26 = sphi %s8273_s26, %s189_s26   ;;  %s7076_s12 = sphi %s8271_s12, %s11498_s12   ;;  %s7072_s22 = sphi %s11497_s22, %s208_s22   ;;  %s7068_s24 = sphi %s11496_s24, %s209_s24  }
 0x11c   : >> { %196 = vst [vmem:[%s7068_s24] sm:%s8262_s29] %v195_v42  ;;  %v199_v44 = vld [vmem:[%s7072_s22 + $0x468] sm:%s8262_s29]  ;;  %p204_p13 = scmp.ge.s32.totalorder %s203_s6, %s8259_s14  ;;  %p188_p0 = scmp.ge.s32.totalorder %s189_s26, %s8259_s14 }
 0x11d   : >> { %198 = vst [vmem:[%s7068_s24 + $0x100] sm:%s8262_s29] %v197_v43  ;;  %v201_v45 = vld [vmem:[%s7072_s22 + $0x5e0] sm:%s8262_s29] }
 0x11e   : >> { %200 = vst [vmem:[%s7068_s24 + $0x200] sm:%s8262_s29] %v199_v44  ;;  %s11728_s6 = smov (%p204_p13, %s203_s6), 0  ;;  %191 = sbr.rel (!%p188_p0) target bundleno = 283 (0x11b), region = 646 }
 0x11f   : >> { %202 = vst [vmem:[%s7068_s24 + $0x300] sm:%s8262_s29] %v201_v45  ;;  %s206_s2 = smul.u32 752, %s11728_s6  ;;  %s4666_s20 = sshll.u32 %s11728_s6, 9 }
 0x120   : >> { %s209_s24 = scalar_lea.vmem %s7624_s7, %s4666_s20 [#allocation3]   ;;  %s11498_s12 = smov %s11728_s6 }
 0x121   : >> { %s208_s22 = scalar_lea.vmem %s7620_s21, %s206_s2  }
 0x123 PF: > { %s8300_s5 = sand.u32 1, %s11684_s10   ;;  %s4668_s16 = smul.u32 752, %s8259_s14 }
 0x124   : > { %s4901_s27 = sshll.u32 %s8259_s14, 9  ;;  %p4670_p2 = scmp.le.s32.totalorder %s8300_s5, 0 }
 0x125   : > { %s8305_s17 = scalar_lea.vmem %s7620_s21, %s4668_s16   ;;  %s8308_s11 = scalar_lea.vmem %s7624_s7, %s4901_s27 [#allocation3]  }
 0x126   : > { %4203 = sbr.rel (%p4670_p2) target bundleno = 307 (0x133), region = 651  ;;  %s7082_s28 = smov (!%p4670_p2), %s8308_s11  }
 0x127   : > { %s7086_s3 = smov (!%p4670_p2), %s8305_s17   ;;  %s7090_s13 = smov (!%p4670_p2), 0  }
 0x128   : > { %s7094_s30 = smov (!%p4670_p2), 0  }
 0x12b LB: >> { %v226_v46 = vld [vmem:[%s7088_s3] sm:%s8262_s29]  ;;  %v228_v47 = vld [vmem:[%s7088_s3 + $0x468] sm:%s8262_s29]  ;;  %s230_s21 = sadd.s32 1, %s7092_s13  ;;  %s220_s30 = sadd.s32 1, %s7096_s30   ;;  %s7096_s30 = sphi %s7094_s30, %s220_s30   ;;  %s7092_s13 = sphi %s7090_s13, %s7091_s13   ;;  %s7088_s3 = sphi %s7086_s3, %s235_s3   ;;  %s7084_s28 = sphi %s7082_s28, %s236_s28  }
 0x12c   : >> { %227 = vst [vmem:[%s7084_s28] sm:%s8262_s29] %v226_v46  ;;  %p231_p3 = scmp.ge.s32.totalorder %s230_s21, %s8300_s5  ;;  %p219_p1 = scmp.ge.s32.totalorder %s220_s30, %s8300_s5 }
 0x12d   : >> { %229 = vst [vmem:[%s7084_s28 + $0x200] sm:%s8262_s29] %v228_v47 }
 0x12e   : >> { %s11730_s21 = smov (%p231_p3, %s230_s21), 0  ;;  %222 = sbr.rel (!%p219_p1) target bundleno = 299 (0x12b), region = 657 }
 0x12f   : >> { %s233_s10 = smul.u32 376, %s11730_s21  ;;  %s4671_s7 = sshll.u32 %s11730_s21, 8 }
 0x130   : >> { %s236_s28 = scalar_lea.vmem %s8308_s11, %s4671_s7 [#allocation3]   ;;  %s7091_s13 = smov %s11730_s21  }
 0x131   : >> { %s235_s3 = scalar_lea.vmem %s8305_s17, %s233_s10  }
 0x133 PF: > { %699 = sbr.rel (!%p7585_p4) target bundleno = 583 (0x247), region = 114  ;;  %s701_s23 = sand.u32 (%p7585_p4), 1, %s6892_s15  }
 0x134   : > { %s4673_s9 = sshll.u32 (%p7585_p4), %s6908_s19, 1  ;;  %s4672_s8 = sshll.u32 (%p7585_p4), %s701_s23, 9 }
 0x135   : > { %s4674_s14 = sshll.u32 (%p7585_p4), %s6904_s18, 5  ;;  %s706_s4 = ssub.s32 (%p7585_p4), 3, %s4673_s9 }
 0x136   : > { %p707_p5 = scmp.lt.s32.totalorder (%p7585_p4), %s706_s4, 2  ;;  %s710_s0 = ssub.s32 (%p7585_p4), 47, %s4674_s14 }
 0x137   : > { %p711_p6 = scmp.lt.s32.totalorder (%p7585_p4), %s710_s0, 32  ;;  %s4925_s24 = smul.u32 (%p7585_p4), 94, %s6908_s19 }
 0x138   : > { %s11732_s4 = smov (!%p707_p5, %s706_s4), 2  ;;  %s8337_s16 = scalar_lea.vmem [#allocation4], %s4672_s8  }
 0x139   : > { %s11734_s0 = smov (!%p711_p6, %s710_s0), 32  ;;  %s4675_s29 = sshll.u32 %s11732_s4, 3 }
 0x13a   : > { %s716_s22 = sadd.s32 %s4925_s24, %s4674_s14  ;;  %s713_s12 = smul.u32 %s4675_s29, %s11734_s0 }
 0x13b   : > { %s4678_s26 = sshll.u32 %s716_s22, 3  ;;  %s8335_s5 = sshll.u32 %s11734_s0, 3 }
 0x13c   : > { %s8333_s20 = scalar_lea.vmem %s11407_s1, %s4678_s26   ;;  %p4680_p7 = scmp.eq.s32.totalorder %s713_s12, 0 }
 0x13d   : > { %p723_p8 = scmp.lt.u32.totalorder (!%p4680_p7), %s8335_s5, 8 }
 0x13e   : > { %722 = sbr.rel (%p4680_p7) target bundleno = 583 (0x247), region = 118 }
 0x143   : > { %726 = sbr.rel (%p723_p8) target bundleno = 547 (0x223), region = 122  ;;  %s8341_s27 = sand.u32 (!%p723_p8), 7, %s8335_s5  }
 0x144   : > { %p779_p10 = scmp.eq.s32.totalorder (!%p723_p8), %s8341_s27, 0  ;;  %p4681_p11 = scmp.ne.s32.totalorder (!%p723_p8), %s8341_s27, 0 }
 0x148   : > { %782 = sbr.rel (%p4681_p11) target bundleno = 421 (0x1a5), region = 144  ;;  %s783_s17 = sshrl.u32 (!%p4681_p11), %s8335_s5, 3 }
 0x149   : > { %s8347_s11 = sshrl.u32 (!%p4681_p11), %s11732_s4, 1  ;;  %s8351_s28 = sshrl.u32 (!%p4681_p11), %s783_s17, 4 }
 0x14a   : > { %s8355_s3 = smul.u32 (!%p4681_p11), %s8351_s28, %s8347_s11 }
 0x14c   : > { %p4682_p12 = scmp.le.s32.totalorder (!%p4681_p11), %s8355_s3, 0 }
 0x14d   : > { %s11499_s13 = smov (!%p4682_p12), %s8337_s16  ;;  %s11500_s30 = smov (!%p4682_p12), %s8333_s20 }
 0x14e   : > { %4218 = sbr.rel (%p4682_p12) target bundleno = 372 (0x174), region = 662  ;;  %s8364_s21 = smov (!%p4682_p12), 0  }
 0x14f   : > { %s8366_s10 = smov (!%p4682_p12), 0   ;;  %s8368_s7 = smov (!%p4682_p12), 0  }
 0x153 LB: >> { %v797_v48 = vld [vmem:[%s7104_s30] sm:$0xff]  ;;  %v799_v49 = vld [vmem:[%s7104_s30 + $0x8] sm:$0xff]  ;;  %v801_v50 = vld [vmem:[%s7104_s30 + $0x10] sm:$0xff]  ;;  %s861_s23 = sadd.s32 1, %s7108_s21  ;;  %s864_s9 = sadd.s32 1, %s7112_s10  ;;  %s7116_s7 = sphi %s8368_s7, %s790_s7   ;;  %s7112_s10 = sphi %s8366_s10, %s11504_s10   ;;  %s7108_s21 = sphi %s8364_s21, %s11503_s21   ;;  %s7104_s30 = sphi %s11500_s30, %s11502_s30   ;;  %s7100_s13 = sphi %s11499_s13, %s11501_s13  }
 0x154   : >> { %798 = vst [vmem:[%s7100_s13] sm:$0xff] %v797_v48  ;;  %v803_v51 = vld [vmem:[%s7104_s30 + $0x18] sm:$0xff]  ;;  %p862_p13 = scmp.ge.s32.totalorder %s861_s23, %s8351_s28  ;;  %v805_v52 = vld [vmem:[%s7104_s30 + $0x20] sm:$0xff]  ;;  %v807_v53 = vld [vmem:[%s7104_s30 + $0x28] sm:$0xff]  ;;  %s790_s7 = sadd.s32 1, %s7116_s7  }
 0x155   : >> { %800 = vst [vmem:[%s7100_s13 + $0x8] sm:$0xff] %v799_v49  ;;  %v809_v54 = vld [vmem:[%s7104_s30 + $0x30] sm:$0xff]  ;;  %v811_v55 = vld [vmem:[%s7104_s30 + $0x38] sm:$0xff]  ;;  %v813_v56 = vld [vmem:[%s7104_s30 + $0x40] sm:$0xff]  ;;  %p789_p2 = scmp.ge.s32.totalorder %s790_s7, %s8355_s3 }
 0x156   : >> { %802 = vst [vmem:[%s7100_s13 + $0x10] sm:$0xff] %v801_v50  ;;  %s11736_s23 = smov (%p862_p13, %s861_s23), 0  ;;  %s11738_s9 = smov (!%p862_p13, %s864_s9), %s7112_s10  ;;  %v815_v57 = vld [vmem:[%s7104_s30 + $0x48] sm:$0xff]  ;;  %v817_v58 = vld [vmem:[%s7104_s30 + $0x50] sm:$0xff]  ;;  %v819_v59 = vld [vmem:[%s7104_s30 + $0x58] sm:$0xff] }
 0x157   : >> { %804 = vst [vmem:[%s7100_s13 + $0x18] sm:$0xff] %v803_v51  ;;  %p866_p0 = scmp.ge.s32.totalorder %s11738_s9, %s8347_s11  ;;  %s4683_s8 = sshll.u32 %s11736_s23, 7  ;;  %v821_v60 = vld [vmem:[%s7104_s30 + $0x60] sm:$0xff]  ;;  %v823_v61 = vld [vmem:[%s7104_s30 + $0x68] sm:$0xff]  ;;  %v825_v62 = vld [vmem:[%s7104_s30 + $0x70] sm:$0xff] }
 0x158   : >> { %806 = vst [vmem:[%s7100_s13 + $0x20] sm:$0xff] %v805_v52  ;;  %v827_v63 = vld [vmem:[%s7104_s30 + $0x78] sm:$0xff]  ;;  %v831_v1 = vld [vmem:[%s7104_s30 + $0x180] sm:$0xff]  ;;  %v833_v2 = vld [vmem:[%s7104_s30 + $0x188] sm:$0xff]  ;;  %s11503_s21 = smov %s11736_s23 }
 0x159   : >> { %808 = vst [vmem:[%s7100_s13 + $0x28] sm:$0xff] %v807_v53  ;;  %s11740_s9 = smov (%p866_p0, %s11738_s9), 0  ;;  %v829_v0 = vld [vmem:[%s7104_s30 + $0x178] sm:$0xff]  ;;  %v835_v3 = vld [vmem:[%s7104_s30 + $0x190] sm:$0xff]  ;;  %v839_v5 = vld [vmem:[%s7104_s30 + $0x1a0] sm:$0xff] }
 0x15a   : >> { %810 = vst [vmem:[%s7100_s13 + $0x30] sm:$0xff] %v809_v54  ;;  %s868_s14 = smul.u32 752, %s11740_s9  ;;  %s4684_s0 = sshll.u32 %s11740_s9, 9  ;;  %v837_v4 = vld [vmem:[%s7104_s30 + $0x198] sm:$0xff]  ;;  %v841_v6 = vld [vmem:[%s7104_s30 + $0x1a8] sm:$0xff]  ;;  %v843_v7 = vld [vmem:[%s7104_s30 + $0x1b0] sm:$0xff] }
 0x15b   : >> { %812 = vst [vmem:[%s7100_s13 + $0x38] sm:$0xff] %v811_v55  ;;  %s8415_s24 = sadd.s32 %s4684_s0, %s4683_s8  ;;  %v845_v8 = vld [vmem:[%s7104_s30 + $0x1b8] sm:$0xff]  ;;  %v847_v9 = vld [vmem:[%s7104_s30 + $0x1c0] sm:$0xff]  ;;  %v849_v10 = vld [vmem:[%s7104_s30 + $0x1c8] sm:$0xff]  ;;  %s11504_s10 = smov %s11740_s9 }
 0x15c   : >> { %814 = vst [vmem:[%s7100_s13 + $0x40] sm:$0xff] %v813_v56  ;;  %s8419_s29 = sadd.s32 %s4683_s8, %s868_s14  ;;  %s875_s22 = scalar_lea.vmem %s8337_s16, %s8415_s24 [#allocation4]   ;;  %v851_v11 = vld [vmem:[%s7104_s30 + $0x1d0] sm:$0xff]  ;;  %v853_v12 = vld [vmem:[%s7104_s30 + $0x1d8] sm:$0xff]  ;;  %v855_v13 = vld [vmem:[%s7104_s30 + $0x1e0] sm:$0xff] }
 0x15d   : >> { %816 = vst [vmem:[%s7100_s13 + $0x48] sm:$0xff] %v815_v57  ;;  %s874_s12 = scalar_lea.vmem %s8333_s20, %s8419_s29   ;;  %v857_v14 = vld [vmem:[%s7104_s30 + $0x1e8] sm:$0xff]  ;;  %v859_v15 = vld [vmem:[%s7104_s30 + $0x1f0] sm:$0xff] }
 0x15e   : >> { %818 = vst [vmem:[%s7100_s13 + $0x50] sm:$0xff] %v817_v58  ;;  %s11502_s30 = smov %s874_s12 }
 0x15f   : >> { %820 = vst [vmem:[%s7100_s13 + $0x58] sm:$0xff] %v819_v59 }
 0x160   : >> { %822 = vst [vmem:[%s7100_s13 + $0x60] sm:$0xff] %v821_v60 }
 0x161   : >> { %824 = vst [vmem:[%s7100_s13 + $0x68] sm:$0xff] %v823_v61 }
 0x162   : >> { %826 = vst [vmem:[%s7100_s13 + $0x70] sm:$0xff] %v825_v62 }
 0x163   : >> { %828 = vst [vmem:[%s7100_s13 + $0x78] sm:$0xff] %v827_v63 }
 0x164   : >> { %830 = vst [vmem:[%s7100_s13 + $0x100] sm:$0xff] %v829_v0 }
 0x165   : >> { %832 = vst [vmem:[%s7100_s13 + $0x108] sm:$0xff] %v831_v1 }
 0x166   : >> { %834 = vst [vmem:[%s7100_s13 + $0x110] sm:$0xff] %v833_v2 }
 0x167   : >> { %836 = vst [vmem:[%s7100_s13 + $0x118] sm:$0xff] %v835_v3 }
 0x168   : >> { %838 = vst [vmem:[%s7100_s13 + $0x120] sm:$0xff] %v837_v4 }
 0x169   : >> { %840 = vst [vmem:[%s7100_s13 + $0x128] sm:$0xff] %v839_v5 }
 0x16a   : >> { %842 = vst [vmem:[%s7100_s13 + $0x130] sm:$0xff] %v841_v6 }
 0x16b   : >> { %844 = vst [vmem:[%s7100_s13 + $0x138] sm:$0xff] %v843_v7 }
 0x16c   : >> { %846 = vst [vmem:[%s7100_s13 + $0x140] sm:$0xff] %v845_v8 }
 0x16d   : >> { %848 = vst [vmem:[%s7100_s13 + $0x148] sm:$0xff] %v847_v9 }
 0x16e   : >> { %850 = vst [vmem:[%s7100_s13 + $0x150] sm:$0xff] %v849_v10 }
 0x16f   : >> { %852 = vst [vmem:[%s7100_s13 + $0x158] sm:$0xff] %v851_v11  ;;  %792 = sbr.rel (!%p789_p2) target bundleno = 339 (0x153), region = 668 }
 0x170   : >> { %854 = vst [vmem:[%s7100_s13 + $0x160] sm:$0xff] %v853_v12 }
 0x171   : >> { %856 = vst [vmem:[%s7100_s13 + $0x168] sm:$0xff] %v855_v13 }
 0x172   : >> { %858 = vst [vmem:[%s7100_s13 + $0x170] sm:$0xff] %v857_v14 }
 0x173   : >> { %860 = vst [vmem:[%s7100_s13 + $0x178] sm:$0xff] %v859_v15  ;;  %s11501_s13 = smov %s875_s22 }
 0x174 PF: > { %s878_s26 = sand.u32 1, %s11732_s4   ;;  %s4687_s6 = smul.u32 752, %s8347_s11 }
 0x175   : > { %s4902_s2 = sshll.u32 %s8347_s11, 9  ;;  %s8488_s8 = smul.u32 %s878_s26, %s8351_s28 }
 0x176   : > { %s8491_s23 = scalar_lea.vmem %s8333_s20, %s4687_s6   ;;  %s8494_s9 = scalar_lea.vmem %s8337_s16, %s4902_s2 [#allocation4]  }
 0x177   : > { %p4689_p3 = scmp.le.s32.totalorder %s8488_s8, 0 }
 0x178   : > { %s11505_s3 = smov (!%p4689_p3), %s8494_s9  ;;  %s11506_s13 = smov (!%p4689_p3), %s8491_s23 }
 0x179   : > { %4235 = sbr.rel (%p4689_p3) target bundleno = 399 (0x18f), region = 673  ;;  %s8503_s30 = smov (!%p4689_p3), 0  }
 0x17a   : > { %s8505_s21 = smov (!%p4689_p3), 0   ;;  %s8507_s11 = smov (!%p4689_p3), 0  }
 0x17e LB: >> { %v895_v16 = vld [vmem:[%s7124_s13] sm:$0xff]  ;;  %v897_v17 = vld [vmem:[%s7124_s13 + $0x8] sm:$0xff]  ;;  %v899_v18 = vld [vmem:[%s7124_s13 + $0x10] sm:$0xff]  ;;  %s927_s10 = sadd.s32 1, %s7128_s30  ;;  %s930_s7 = sadd.s32 1, %s7132_s21  ;;  %s7136_s11 = sphi %s8507_s11, %s888_s11   ;;  %s7132_s21 = sphi %s8505_s21, %s11509_s21   ;;  %s7128_s30 = sphi %s8503_s30, %s11508_s30   ;;  %s7124_s13 = sphi %s11506_s13, %s940_s13   ;;  %s7120_s3 = sphi %s11505_s3, %s11507_s3  }
 0x17f   : >> { %896 = vst [vmem:[%s7120_s3] sm:$0xff] %v895_v16  ;;  %v901_v19 = vld [vmem:[%s7124_s13 + $0x18] sm:$0xff]  ;;  %p928_p1 = scmp.ge.s32.totalorder %s927_s10, %s8351_s28  ;;  %v903_v20 = vld [vmem:[%s7124_s13 + $0x20] sm:$0xff]  ;;  %v905_v21 = vld [vmem:[%s7124_s13 + $0x28] sm:$0xff]  ;;  %s888_s11 = sadd.s32 1, %s7136_s11  }
 0x180   : >> { %898 = vst [vmem:[%s7120_s3 + $0x8] sm:$0xff] %v897_v17  ;;  %v907_v22 = vld [vmem:[%s7124_s13 + $0x30] sm:$0xff]  ;;  %v909_v23 = vld [vmem:[%s7124_s13 + $0x38] sm:$0xff]  ;;  %v911_v24 = vld [vmem:[%s7124_s13 + $0x40] sm:$0xff]  ;;  %p887_p6 = scmp.ge.s32.totalorder %s888_s11, %s8488_s8 }
 0x181   : >> { %900 = vst [vmem:[%s7120_s3 + $0x10] sm:$0xff] %v899_v18  ;;  %s11742_s10 = smov (%p928_p1, %s927_s10), 0  ;;  %s11744_s7 = smov (!%p928_p1, %s930_s7), %s7132_s21  ;;  %v913_v25 = vld [vmem:[%s7124_s13 + $0x48] sm:$0xff]  ;;  %v915_v26 = vld [vmem:[%s7124_s13 + $0x50] sm:$0xff]  ;;  %v917_v27 = vld [vmem:[%s7124_s13 + $0x58] sm:$0xff] }
 0x182   : >> { %902 = vst [vmem:[%s7120_s3 + $0x18] sm:$0xff] %v901_v19  ;;  %p932_p5 = scmp.ge.s32.totalorder %s11744_s7, %s878_s26  ;;  %s4690_s14 = sshll.u32 %s11742_s10, 7  ;;  %v919_v28 = vld [vmem:[%s7124_s13 + $0x60] sm:$0xff]  ;;  %v921_v29 = vld [vmem:[%s7124_s13 + $0x68] sm:$0xff]  ;;  %v923_v30 = vld [vmem:[%s7124_s13 + $0x70] sm:$0xff] }
 0x183   : >> { %904 = vst [vmem:[%s7120_s3 + $0x20] sm:$0xff] %v903_v20  ;;  %v925_v31 = vld [vmem:[%s7124_s13 + $0x78] sm:$0xff]  ;;  %s11508_s30 = smov %s11742_s10 }
 0x184   : >> { %906 = vst [vmem:[%s7120_s3 + $0x28] sm:$0xff] %v905_v21  ;;  %s11746_s7 = smov (%p932_p5, %s11744_s7), 0 }
 0x185   : >> { %908 = vst [vmem:[%s7120_s3 + $0x30] sm:$0xff] %v907_v22  ;;  %s934_s0 = smul.u32 376, %s11746_s7  ;;  %s4691_s24 = sshll.u32 %s11746_s7, 8 }
 0x186   : >> { %910 = vst [vmem:[%s7120_s3 + $0x38] sm:$0xff] %v909_v23  ;;  %s939_s29 = sadd.s32 %s4691_s24, %s4690_s14  ;;  %s11509_s21 = smov %s11746_s7 }
 0x187   : >> { %912 = vst [vmem:[%s7120_s3 + $0x40] sm:$0xff] %v911_v24  ;;  %s936_s22 = sadd.s32 %s4690_s14, %s934_s0  ;;  %s941_s12 = scalar_lea.vmem %s8494_s9, %s939_s29 [#allocation4]  }
 0x188   : >> { %914 = vst [vmem:[%s7120_s3 + $0x48] sm:$0xff] %v913_v25  ;;  %s940_s13 = scalar_lea.vmem %s8491_s23, %s936_s22  }
 0x189   : >> { %916 = vst [vmem:[%s7120_s3 + $0x50] sm:$0xff] %v915_v26 }
 0x18a   : >> { %918 = vst [vmem:[%s7120_s3 + $0x58] sm:$0xff] %v917_v27  ;;  %890 = sbr.rel (!%p887_p6) target bundleno = 382 (0x17e), region = 679 }
 0x18b   : >> { %920 = vst [vmem:[%s7120_s3 + $0x60] sm:$0xff] %v919_v28 }
 0x18c   : >> { %922 = vst [vmem:[%s7120_s3 + $0x68] sm:$0xff] %v921_v29 }
 0x18d   : >> { %924 = vst [vmem:[%s7120_s3 + $0x70] sm:$0xff] %v923_v30 }
 0x18e   : >> { %926 = vst [vmem:[%s7120_s3 + $0x78] sm:$0xff] %v925_v31  ;;  %s11507_s3 = smov %s941_s12 }
 0x18f PF: > { %s8575_s6 = sand.u32 15, %s783_s17   ;;  %s4903_s2 = sshll.u32 %s8351_s28, 7 }
 0x190   : > { %s8579_s14 = scalar_lea.vmem %s8333_s20, %s4903_s2   ;;  %s8582_s0 = scalar_lea.vmem %s8337_s16, %s4903_s2 [#allocation4]  }
 0x191   : > { %s8586_s10 = smul.u32 %s8575_s6, %s11732_s4 }
 0x193   : > { %p4696_p7 = scmp.le.s32.totalorder %s8586_s10, 0 }
 0x194   : > { %s11510_s26 = smov (!%p4696_p7), %s8582_s0  ;;  %s11511_s8 = smov (!%p4696_p7), %s8579_s14 }
 0x195   : > { %4252 = sbr.rel (%p4696_p7) target bundleno = 421 (0x1a5), region = 684  ;;  %s8595_s23 = smov (!%p4696_p7), 0  }
 0x196   : > { %s8597_s17 = smov (!%p4696_p7), 0   ;;  %s8599_s28 = smov (!%p4696_p7), 0  }
 0x19a LB: >> { %v960_v32 = vld [vmem:[%s7144_s8] sm:$0xff]  ;;  %s962_s9 = sadd.s32 1, %s7148_s23  ;;  %s965_s3 = sadd.s32 1, %s7152_s17  ;;  %s7156_s28 = sphi %s8599_s28, %s953_s28   ;;  %s7152_s17 = sphi %s8597_s17, %s11513_s17   ;;  %s7148_s23 = sphi %s8595_s23, %s11512_s23   ;;  %s7144_s8 = sphi %s11511_s8, %s975_s8   ;;  %s7140_s26 = sphi %s11510_s26, %s976_s26  }
 0x19b   : >> { %961 = vst [vmem:[%s7140_s26] sm:$0xff] %v960_v32  ;;  %p963_p8 = scmp.ge.s32.totalorder %s962_s9, %s8575_s6  ;;  %s953_s28 = sadd.s32 1, %s7156_s28  }
 0x19c   : >> { %p952_p12 = scmp.ge.s32.totalorder %s953_s28, %s8586_s10 }
 0x19d   : >> { %s11748_s9 = smov (%p963_p8, %s962_s9), 0  ;;  %s11750_s3 = smov (!%p963_p8, %s965_s3), %s7152_s17 }
 0x19e   : >> { %p967_p11 = scmp.ge.s32.totalorder %s11750_s3, %s11732_s4  ;;  %s4697_s13 = sshll.u32 %s11748_s9, 3 }
 0x19f   : >> { %s11512_s23 = smov %s11748_s9 }
 0x1a0   : >> { %s11752_s3 = smov (%p967_p11, %s11750_s3), 0  ;;  %955 = sbr.rel (!%p952_p12) target bundleno = 410 (0x19a), region = 690 }
 0x1a1   : >> { %s969_s30 = smul.u32 376, %s11752_s3  ;;  %s4698_s21 = sshll.u32 %s11752_s3, 8 }
 0x1a2   : >> { %s974_s11 = sadd.s32 %s4698_s21, %s4697_s13  ;;  %s11513_s17 = smov %s11752_s3 }
 0x1a3   : >> { %s971_s7 = sadd.s32 %s4697_s13, %s969_s30  ;;  %s976_s26 = scalar_lea.vmem %s8582_s0, %s974_s11 [#allocation4]  }
 0x1a4   : >> { %s975_s8 = scalar_lea.vmem %s8579_s14, %s971_s7  }
 0x1a5 PF: > { %979 = sbr.rel (%p779_p10) target bundleno = 547 (0x223), region = 169  ;;  %s981_s24 = ssub.s32 (!%p779_p10), %s8335_s5, %s8341_s27 }
 0x1a6   : > { %s985_s29 = sshrl.u32 (!%p779_p10), %s8335_s5, 3  ;;  %s8627_s22 = scalar_lea.vmem (!%p779_p10), %s8333_s20, %s981_s24  }
 0x1a7   : > { %s8630_s12 = scalar_lea.vmem (!%p779_p10), %s8337_s16, %s981_s24 [#allocation4]   ;;  %s8633_s2 = sshrl.u32 (!%p779_p10), %s11732_s4, 1 }
 0x1a8   : > { %s8637_s6 = sshrl.u32 (!%p779_p10), %s985_s29, 4 }
 0x1a9   : > { %s8641_s14 = smul.u32 (!%p779_p10), %s8637_s6, %s8633_s2 }
 0x1ab   : > { %p4700_p10 = scmp.le.s32.totalorder %s8641_s14, 0 }
 0x1ac   : > { %s11514_s0 = smov (!%p4700_p10), %s8337_s16  ;;  %s11515_s10 = smov (!%p4700_p10), %s8333_s20 }
 0x1ad   : > { %4269 = sbr.rel (%p4700_p10) target bundleno = 467 (0x1d3), region = 695  ;;  %s8650_s26 = smov (!%p4700_p10), 0  }
 0x1ae   : > { %s8652_s8 = smov (!%p4700_p10), 0   ;;  %s8654_s23 = smov (!%p4700_p10), 0  }
 0x1b2 LB: >> { %v999_v33 = vld [vmem:[%s7164_s10] sm:$0xff]  ;;  %v1001_v34 = vld [vmem:[%s7164_s10 + $0x8] sm:$0xff]  ;;  %v1003_v35 = vld [vmem:[%s7164_s10 + $0x10] sm:$0xff]  ;;  %s1063_s17 = sadd.s32 1, %s7168_s26  ;;  %s1066_s28 = sadd.s32 1, %s7172_s8  ;;  %s7176_s23 = sphi %s8654_s23, %s992_s23   ;;  %s7172_s8 = sphi %s8652_s8, %s11519_s8   ;;  %s7168_s26 = sphi %s8650_s26, %s11518_s26   ;;  %s7164_s10 = sphi %s11515_s10, %s11517_s10   ;;  %s7160_s0 = sphi %s11514_s0, %s11516_s0  }
 0x1b3   : >> { %1000 = vst [vmem:[%s7160_s0] sm:$0xff] %v999_v33  ;;  %v1005_v36 = vld [vmem:[%s7164_s10 + $0x18] sm:$0xff]  ;;  %p1064_p13 = scmp.ge.s32.totalorder %s1063_s17, %s8637_s6  ;;  %v1007_v37 = vld [vmem:[%s7164_s10 + $0x20] sm:$0xff]  ;;  %v1009_v38 = vld [vmem:[%s7164_s10 + $0x28] sm:$0xff]  ;;  %s992_s23 = sadd.s32 1, %s7176_s23  }
 0x1b4   : >> { %1002 = vst [vmem:[%s7160_s0 + $0x8] sm:$0xff] %v1001_v34  ;;  %v1011_v39 = vld [vmem:[%s7164_s10 + $0x30] sm:$0xff]  ;;  %v1013_v40 = vld [vmem:[%s7164_s10 + $0x38] sm:$0xff]  ;;  %v1015_v41 = vld [vmem:[%s7164_s10 + $0x40] sm:$0xff]  ;;  %p991_p2 = scmp.ge.s32.totalorder %s992_s23, %s8641_s14 }
 0x1b5   : >> { %1004 = vst [vmem:[%s7160_s0 + $0x10] sm:$0xff] %v1003_v35  ;;  %s11754_s17 = smov (%p1064_p13, %s1063_s17), 0  ;;  %s11756_s28 = smov (!%p1064_p13, %s1066_s28), %s7172_s8  ;;  %v1017_v42 = vld [vmem:[%s7164_s10 + $0x48] sm:$0xff]  ;;  %v1019_v43 = vld [vmem:[%s7164_s10 + $0x50] sm:$0xff]  ;;  %v1021_v44 = vld [vmem:[%s7164_s10 + $0x58] sm:$0xff] }
 0x1b6   : >> { %1006 = vst [vmem:[%s7160_s0 + $0x18] sm:$0xff] %v1005_v36  ;;  %p1068_p0 = scmp.ge.s32.totalorder %s11756_s28, %s8633_s2  ;;  %s4701_s9 = sshll.u32 %s11754_s17, 7  ;;  %v1023_v45 = vld [vmem:[%s7164_s10 + $0x60] sm:$0xff]  ;;  %v1025_v46 = vld [vmem:[%s7164_s10 + $0x68] sm:$0xff]  ;;  %v1027_v47 = vld [vmem:[%s7164_s10 + $0x70] sm:$0xff] }
 0x1b7   : >> { %1008 = vst [vmem:[%s7160_s0 + $0x20] sm:$0xff] %v1007_v37  ;;  %v1029_v48 = vld [vmem:[%s7164_s10 + $0x78] sm:$0xff]  ;;  %v1033_v50 = vld [vmem:[%s7164_s10 + $0x180] sm:$0xff]  ;;  %v1035_v51 = vld [vmem:[%s7164_s10 + $0x188] sm:$0xff]  ;;  %s11518_s26 = smov %s11754_s17 }
 0x1b8   : >> { %1010 = vst [vmem:[%s7160_s0 + $0x28] sm:$0xff] %v1009_v38  ;;  %s11758_s28 = smov (%p1068_p0, %s11756_s28), 0  ;;  %v1031_v49 = vld [vmem:[%s7164_s10 + $0x178] sm:$0xff]  ;;  %v1037_v52 = vld [vmem:[%s7164_s10 + $0x190] sm:$0xff]  ;;  %v1041_v54 = vld [vmem:[%s7164_s10 + $0x1a0] sm:$0xff] }
 0x1b9   : >> { %1012 = vst [vmem:[%s7160_s0 + $0x30] sm:$0xff] %v1011_v39  ;;  %s1070_s3 = smul.u32 752, %s11758_s28  ;;  %s4702_s13 = sshll.u32 %s11758_s28, 9  ;;  %v1039_v53 = vld [vmem:[%s7164_s10 + $0x198] sm:$0xff]  ;;  %v1043_v55 = vld [vmem:[%s7164_s10 + $0x1a8] sm:$0xff]  ;;  %v1045_v56 = vld [vmem:[%s7164_s10 + $0x1b0] sm:$0xff] }
 0x1ba   : >> { %1014 = vst [vmem:[%s7160_s0 + $0x38] sm:$0xff] %v1013_v40  ;;  %s8701_s30 = sadd.s32 %s4702_s13, %s4701_s9  ;;  %v1047_v57 = vld [vmem:[%s7164_s10 + $0x1b8] sm:$0xff]  ;;  %v1049_v58 = vld [vmem:[%s7164_s10 + $0x1c0] sm:$0xff]  ;;  %v1051_v59 = vld [vmem:[%s7164_s10 + $0x1c8] sm:$0xff]  ;;  %s11519_s8 = smov %s11758_s28 }
 0x1bb   : >> { %1016 = vst [vmem:[%s7160_s0 + $0x40] sm:$0xff] %v1015_v41  ;;  %s8705_s21 = sadd.s32 %s4701_s9, %s1070_s3  ;;  %s1077_s11 = scalar_lea.vmem %s8337_s16, %s8701_s30 [#allocation4]   ;;  %v1053_v60 = vld [vmem:[%s7164_s10 + $0x1d0] sm:$0xff]  ;;  %v1055_v61 = vld [vmem:[%s7164_s10 + $0x1d8] sm:$0xff]  ;;  %v1057_v62 = vld [vmem:[%s7164_s10 + $0x1e0] sm:$0xff] }
 0x1bc   : >> { %1018 = vst [vmem:[%s7160_s0 + $0x48] sm:$0xff] %v1017_v42  ;;  %s1076_s7 = scalar_lea.vmem %s8333_s20, %s8705_s21   ;;  %v1059_v63 = vld [vmem:[%s7164_s10 + $0x1e8] sm:$0xff]  ;;  %v1061_v0 = vld [vmem:[%s7164_s10 + $0x1f0] sm:$0xff] }
 0x1bd   : >> { %1020 = vst [vmem:[%s7160_s0 + $0x50] sm:$0xff] %v1019_v43  ;;  %s11517_s10 = smov %s1076_s7 }
 0x1be   : >> { %1022 = vst [vmem:[%s7160_s0 + $0x58] sm:$0xff] %v1021_v44 }
 0x1bf   : >> { %1024 = vst [vmem:[%s7160_s0 + $0x60] sm:$0xff] %v1023_v45 }
 0x1c0   : >> { %1026 = vst [vmem:[%s7160_s0 + $0x68] sm:$0xff] %v1025_v46 }
 0x1c1   : >> { %1028 = vst [vmem:[%s7160_s0 + $0x70] sm:$0xff] %v1027_v47 }
 0x1c2   : >> { %1030 = vst [vmem:[%s7160_s0 + $0x78] sm:$0xff] %v1029_v48 }
 0x1c3   : >> { %1032 = vst [vmem:[%s7160_s0 + $0x100] sm:$0xff] %v1031_v49 }
 0x1c4   : >> { %1034 = vst [vmem:[%s7160_s0 + $0x108] sm:$0xff] %v1033_v50 }
 0x1c5   : >> { %1036 = vst [vmem:[%s7160_s0 + $0x110] sm:$0xff] %v1035_v51 }
 0x1c6   : >> { %1038 = vst [vmem:[%s7160_s0 + $0x118] sm:$0xff] %v1037_v52 }
 0x1c7   : >> { %1040 = vst [vmem:[%s7160_s0 + $0x120] sm:$0xff] %v1039_v53 }
 0x1c8   : >> { %1042 = vst [vmem:[%s7160_s0 + $0x128] sm:$0xff] %v1041_v54 }
 0x1c9   : >> { %1044 = vst [vmem:[%s7160_s0 + $0x130] sm:$0xff] %v1043_v55 }
 0x1ca   : >> { %1046 = vst [vmem:[%s7160_s0 + $0x138] sm:$0xff] %v1045_v56 }
 0x1cb   : >> { %1048 = vst [vmem:[%s7160_s0 + $0x140] sm:$0xff] %v1047_v57 }
 0x1cc   : >> { %1050 = vst [vmem:[%s7160_s0 + $0x148] sm:$0xff] %v1049_v58 }
 0x1cd   : >> { %1052 = vst [vmem:[%s7160_s0 + $0x150] sm:$0xff] %v1051_v59 }
 0x1ce   : >> { %1054 = vst [vmem:[%s7160_s0 + $0x158] sm:$0xff] %v1053_v60  ;;  %994 = sbr.rel (!%p991_p2) target bundleno = 434 (0x1b2), region = 701 }
 0x1cf   : >> { %1056 = vst [vmem:[%s7160_s0 + $0x160] sm:$0xff] %v1055_v61 }
 0x1d0   : >> { %1058 = vst [vmem:[%s7160_s0 + $0x168] sm:$0xff] %v1057_v62 }
 0x1d1   : >> { %1060 = vst [vmem:[%s7160_s0 + $0x170] sm:$0xff] %v1059_v63 }
 0x1d2   : >> { %1062 = vst [vmem:[%s7160_s0 + $0x178] sm:$0xff] %v1061_v0  ;;  %s11516_s0 = smov %s1077_s11 }
 0x1d3 PF: > { %s8769_s24 = sand.u32 1, %s11732_s4   ;;  %s11425_s9 = smul.u32 752, %s8633_s2 }
 0x1d4   : > { %s11424_s3 = sshll.u32 %s8633_s2, 9  ;;  %s8775_s17 = smul.u32 %s8769_s24, %s8637_s6 }
 0x1d5   : > { %s8780_s28 = scalar_lea.vmem %s8333_s20, %s11425_s9   ;;  %s8785_s14 = scalar_lea.vmem %s8337_s16, %s11424_s3 [#allocation4]  }
 0x1d6   : > { %p4707_p3 = scmp.le.s32.totalorder %s8775_s17, 0 }
 0x1d7   : > { %s11520_s0 = smov (!%p4707_p3), %s8785_s14  ;;  %s11521_s10 = smov (!%p4707_p3), %s8780_s28 }
 0x1d8   : > { %4286 = sbr.rel (%p4707_p3) target bundleno = 494 (0x1ee), region = 706  ;;  %s8794_s26 = smov (!%p4707_p3), 0  }
 0x1d9   : > { %s8796_s8 = smov (!%p4707_p3), 0   ;;  %s8798_s23 = smov (!%p4707_p3), 0  }
 0x1dd LB: >> { %v1097_v1 = vld [vmem:[%s7184_s10] sm:$0xff]  ;;  %v1099_v2 = vld [vmem:[%s7184_s10 + $0x8] sm:$0xff]  ;;  %v1101_v3 = vld [vmem:[%s7184_s10 + $0x10] sm:$0xff]  ;;  %s1129_s13 = sadd.s32 1, %s7188_s26  ;;  %s1132_s30 = sadd.s32 1, %s7192_s8  ;;  %s7196_s23 = sphi %s8798_s23, %s1090_s23   ;;  %s7192_s8 = sphi %s8796_s8, %s11524_s8   ;;  %s7188_s26 = sphi %s8794_s26, %s11523_s26   ;;  %s7184_s10 = sphi %s11521_s10, %s1142_s10   ;;  %s7180_s0 = sphi %s11520_s0, %s11522_s0  }
 0x1de   : >> { %1098 = vst [vmem:[%s7180_s0] sm:$0xff] %v1097_v1  ;;  %v1103_v4 = vld [vmem:[%s7184_s10 + $0x18] sm:$0xff]  ;;  %p1130_p1 = scmp.ge.s32.totalorder %s1129_s13, %s8637_s6  ;;  %v1105_v5 = vld [vmem:[%s7184_s10 + $0x20] sm:$0xff]  ;;  %v1107_v6 = vld [vmem:[%s7184_s10 + $0x28] sm:$0xff]  ;;  %s1090_s23 = sadd.s32 1, %s7196_s23  }
 0x1df   : >> { %1100 = vst [vmem:[%s7180_s0 + $0x8] sm:$0xff] %v1099_v2  ;;  %v1109_v7 = vld [vmem:[%s7184_s10 + $0x30] sm:$0xff]  ;;  %v1111_v8 = vld [vmem:[%s7184_s10 + $0x38] sm:$0xff]  ;;  %v1113_v9 = vld [vmem:[%s7184_s10 + $0x40] sm:$0xff]  ;;  %p1089_p6 = scmp.ge.s32.totalorder %s1090_s23, %s8775_s17 }
 0x1e0   : >> { %1102 = vst [vmem:[%s7180_s0 + $0x10] sm:$0xff] %v1101_v3  ;;  %s11760_s13 = smov (%p1130_p1, %s1129_s13), 0  ;;  %s11762_s30 = smov (!%p1130_p1, %s1132_s30), %s7192_s8  ;;  %v1115_v10 = vld [vmem:[%s7184_s10 + $0x48] sm:$0xff]  ;;  %v1117_v11 = vld [vmem:[%s7184_s10 + $0x50] sm:$0xff]  ;;  %v1119_v12 = vld [vmem:[%s7184_s10 + $0x58] sm:$0xff] }
 0x1e1   : >> { %1104 = vst [vmem:[%s7180_s0 + $0x18] sm:$0xff] %v1103_v4  ;;  %p1134_p5 = scmp.ge.s32.totalorder %s11762_s30, %s8769_s24  ;;  %s4708_s21 = sshll.u32 %s11760_s13, 7  ;;  %v1121_v13 = vld [vmem:[%s7184_s10 + $0x60] sm:$0xff]  ;;  %v1123_v14 = vld [vmem:[%s7184_s10 + $0x68] sm:$0xff]  ;;  %v1125_v15 = vld [vmem:[%s7184_s10 + $0x70] sm:$0xff] }
 0x1e2   : >> { %1106 = vst [vmem:[%s7180_s0 + $0x20] sm:$0xff] %v1105_v5  ;;  %v1127_v16 = vld [vmem:[%s7184_s10 + $0x78] sm:$0xff] }
 0x1e3   : >> { %1108 = vst [vmem:[%s7180_s0 + $0x28] sm:$0xff] %v1107_v6  ;;  %s11764_s30 = smov (%p1134_p5, %s11762_s30), 0 }
 0x1e4   : >> { %1110 = vst [vmem:[%s7180_s0 + $0x30] sm:$0xff] %v1109_v7  ;;  %s1136_s11 = smul.u32 376, %s11764_s30  ;;  %s4709_s7 = sshll.u32 %s11764_s30, 8 }
 0x1e5   : >> { %1112 = vst [vmem:[%s7180_s0 + $0x38] sm:$0xff] %v1111_v8  ;;  %s1141_s26 = sadd.s32 %s4709_s7, %s4708_s21 }
 0x1e6   : >> { %1114 = vst [vmem:[%s7180_s0 + $0x40] sm:$0xff] %v1113_v9  ;;  %s1138_s8 = sadd.s32 %s4708_s21, %s1136_s11  ;;  %s1143_s3 = scalar_lea.vmem %s8785_s14, %s1141_s26 [#allocation4]  }
 0x1e7   : >> { %1116 = vst [vmem:[%s7180_s0 + $0x48] sm:$0xff] %v1115_v10  ;;  %s1142_s10 = scalar_lea.vmem %s8780_s28, %s1138_s8   ;;  %s11523_s26 = smov %s11760_s13 }
 0x1e8   : >> { %1118 = vst [vmem:[%s7180_s0 + $0x50] sm:$0xff] %v1117_v11  ;;  %s11524_s8 = smov %s11764_s30 }
 0x1e9   : >> { %1120 = vst [vmem:[%s7180_s0 + $0x58] sm:$0xff] %v1119_v12  ;;  %1092 = sbr.rel (!%p1089_p6) target bundleno = 477 (0x1dd), region = 712 }
 0x1ea   : >> { %1122 = vst [vmem:[%s7180_s0 + $0x60] sm:$0xff] %v1121_v13 }
 0x1eb   : >> { %1124 = vst [vmem:[%s7180_s0 + $0x68] sm:$0xff] %v1123_v14 }
 0x1ec   : >> { %1126 = vst [vmem:[%s7180_s0 + $0x70] sm:$0xff] %v1125_v15 }
 0x1ed   : >> { %1128 = vst [vmem:[%s7180_s0 + $0x78] sm:$0xff] %v1127_v16  ;;  %s11522_s0 = smov %s1143_s3 }
 0x1ee PF: > { %s8865_s21 = sand.u32 15, %s985_s29   ;;  %s4906_s3 = sshll.u32 %s8637_s6, 7 }
 0x1ef   : > { %s8869_s11 = scalar_lea.vmem %s8333_s20, %s4906_s3   ;;  %s8872_s7 = scalar_lea.vmem %s8337_s16, %s4906_s3 [#allocation4]  }
 0x1f0   : > { %s8876_s13 = smul.u32 %s8865_s21, %s11732_s4 }
 0x1f2   : > { %p4714_p7 = scmp.le.s32.totalorder %s8876_s13, 0 }
 0x1f3   : > { %s11525_s17 = smov (!%p4714_p7), %s8872_s7  ;;  %s11526_s28 = smov (!%p4714_p7), %s8869_s11 }
 0x1f4   : > { %4303 = sbr.rel (%p4714_p7) target bundleno = 516 (0x204), region = 717  ;;  %s8885_s14 = smov (!%p4714_p7), 0  }
 0x1f5   : > { %s8887_s29 = smov (!%p4714_p7), 0   ;;  %s8889_s6 = smov (!%p4714_p7), 0  }
 0x1f9 LB: >> { %v1162_v17 = vld [vmem:[%s7204_s28] sm:$0xff]  ;;  %s1164_s0 = sadd.s32 1, %s7208_s14  ;;  %s1167_s10 = sadd.s32 1, %s7212_s29  ;;  %s7216_s6 = sphi %s8889_s6, %s1155_s6   ;;  %s7212_s29 = sphi %s8887_s29, %s11528_s29   ;;  %s7208_s14 = sphi %s8885_s14, %s11527_s14   ;;  %s7204_s28 = sphi %s11526_s28, %s1177_s28   ;;  %s7200_s17 = sphi %s11525_s17, %s1178_s17  }
 0x1fa   : >> { %1163 = vst [vmem:[%s7200_s17] sm:$0xff] %v1162_v17  ;;  %p1165_p8 = scmp.ge.s32.totalorder %s1164_s0, %s8865_s21  ;;  %s1155_s6 = sadd.s32 1, %s7216_s6  }
 0x1fb   : >> { %p1154_p12 = scmp.ge.s32.totalorder %s1155_s6, %s8876_s13 }
 0x1fc   : >> { %s11766_s0 = smov (%p1165_p8, %s1164_s0), 0  ;;  %s11768_s10 = smov (!%p1165_p8, %s1167_s10), %s7212_s29 }
 0x1fd   : >> { %p1169_p11 = scmp.ge.s32.totalorder %s11768_s10, %s11732_s4  ;;  %s4715_s23 = sshll.u32 %s11766_s0, 3 }
 0x1fe   : >> { %s11527_s14 = smov %s11766_s0 }
 0x1ff   : >> { %s11770_s10 = smov (%p1169_p11, %s11768_s10), 0  ;;  %1157 = sbr.rel (!%p1154_p12) target bundleno = 505 (0x1f9), region = 723 }
 0x200   : >> { %s1171_s30 = smul.u32 376, %s11770_s10  ;;  %s4716_s26 = sshll.u32 %s11770_s10, 8 }
 0x201   : >> { %s1176_s8 = sadd.s32 %s4716_s26, %s4715_s23  ;;  %s11528_s29 = smov %s11770_s10 }
 0x202   : >> { %s1173_s3 = sadd.s32 %s4715_s23, %s1171_s30  ;;  %s1178_s17 = scalar_lea.vmem %s8872_s7, %s1176_s8 [#allocation4]  }
 0x203   : >> { %s1177_s28 = scalar_lea.vmem %s8869_s11, %s1173_s3  }
 0x204 PF: > { %s7504_s9 = smov 1   ;;  %p4719_p10 = scmp.le.s32.totalorder %s8633_s2, 0 }
 0x205   : > { %s1179_s23 = sshll.u32 %s7504_s9, %s8341_s27  ;;  %s7218_s26 = smov (!%p4719_p10), %s8630_s12  }
 0x206   : > { %s8912_s30 = sadd.s32 4294967295, %s1179_s23  ;;  %4319 = sbr.rel (%p4719_p10) target bundleno = 531 (0x213), region = 728 }
 0x207   : > { %s7222_s8 = smov (!%p4719_p10), %s8627_s22   ;;  %s7226_s3 = smov (!%p4719_p10), 0  }
 0x208   : > { %s7230_s0 = smov (!%p4719_p10), 0  }
 0x20b LB: >> { %v1191_v18 = vld [vmem:[%s7224_s8] sm:%s8912_s30]  ;;  %v1193_v19 = vld [vmem:[%s7224_s8 + $0x178] sm:%s8912_s30]  ;;  %s1195_s27 = sadd.s32 1, %s7228_s3  ;;  %s1185_s0 = sadd.s32 1, %s7232_s0   ;;  %s7232_s0 = sphi %s7230_s0, %s1185_s0   ;;  %s7228_s3 = sphi %s7226_s3, %s7227_s3   ;;  %s7224_s8 = sphi %s7222_s8, %s1200_s8   ;;  %s7220_s26 = sphi %s7218_s26, %s1201_s26  }
 0x20c   : >> { %1192 = vst [vmem:[%s7220_s26] sm:%s8912_s30] %v1191_v18  ;;  %p1196_p13 = scmp.ge.s32.totalorder %s1195_s27, %s8633_s2  ;;  %p1184_p0 = scmp.ge.s32.totalorder %s1185_s0, %s8633_s2 }
 0x20d   : >> { %1194 = vst [vmem:[%s7220_s26 + $0x100] sm:%s8912_s30] %v1193_v19 }
 0x20e   : >> { %s11772_s27 = smov (%p1196_p13, %s1195_s27), 0  ;;  %1187 = sbr.rel (!%p1184_p0) target bundleno = 523 (0x20b), region = 734 }
 0x20f   : >> { %s1198_s9 = smul.u32 752, %s11772_s27  ;;  %s4720_s21 = sshll.u32 %s11772_s27, 9 }
 0x210   : >> { %s1201_s26 = scalar_lea.vmem %s8630_s12, %s4720_s21 [#allocation4]   ;;  %s7227_s3 = smov %s11772_s27  }
 0x211   : >> { %s1200_s8 = scalar_lea.vmem %s8627_s22, %s1198_s9  }
 0x213 PF: > { %s11529_s11 = smul.u32 752, %s8633_s2  ;;  %s11530_s13 = sshll.u32 %s8633_s2, 9 }
 0x214   : > { %s1208_s17 = scalar_lea.vmem %s8630_s12, %s11530_s13 [#allocation4]   ;;  %p4724_p2 = scmp.le.s32.totalorder %s8769_s24, 0 }
 0x215   : > { %s1206_s7 = scalar_lea.vmem %s8627_s22, %s11529_s11   ;;  %s7234_s28 = smov (!%p4724_p2), %s1208_s17  }
 0x216   : > { %4333 = sbr.rel (%p4724_p2) target bundleno = 547 (0x223), region = 739  ;;  %s7238_s14 = smov (!%p4724_p2), %s1206_s7  }
 0x217   : > { %s7242_s29 = smov (!%p4724_p2), 0   ;;  %s7246_s6 = smov (!%p4724_p2), 0  }
 0x21b LB: >> { %v1218_v20 = vld [vmem:[%s7240_s14] sm:%s8912_s30]  ;;  %s1220_s22 = sadd.s32 1, %s7244_s29  ;;  %s1212_s6 = sadd.s32 1, %s7248_s6   ;;  %s7248_s6 = sphi %s7246_s6, %s1212_s6   ;;  %s7244_s29 = sphi %s7242_s29, %s7243_s29   ;;  %s7240_s14 = sphi %s7238_s14, %s1225_s14   ;;  %s7236_s28 = sphi %s7234_s28, %s1226_s28  }
 0x21c   : >> { %1219 = vst [vmem:[%s7236_s28] sm:%s8912_s30] %v1218_v20  ;;  %p1221_p3 = scmp.ge.s32.totalorder %s1220_s22, %s8769_s24  ;;  %p1211_p1 = scmp.ge.s32.totalorder %s1212_s6, %s8769_s24 }
 0x21e   : >> { %s11774_s22 = smov (%p1221_p3, %s1220_s22), 0  ;;  %1214 = sbr.rel (!%p1211_p1) target bundleno = 539 (0x21b), region = 745 }
 0x21f   : >> { %s1223_s12 = smul.u32 376, %s11774_s22  ;;  %s4725_s2 = sshll.u32 %s11774_s22, 8 }
 0x220   : >> { %s1226_s28 = scalar_lea.vmem %s1208_s17, %s4725_s2 [#allocation4]   ;;  %s7243_s29 = smov %s11774_s22  }
 0x221   : >> { %s1225_s14 = scalar_lea.vmem %s1206_s7, %s1223_s12  }
 0x223 PF: > { %p4726_p5 = scmp.ge.u32.totalorder %s8335_s5, 8 }
 0x224   : > { %s8938_s10 = sshrl.u32 (!%p4726_p5), %s11732_s4, 1  ;;  %s7505_s23 = smov (!%p4726_p5), 1  }
 0x225   : > { %729 = sbr.rel (%p4726_p5) target bundleno = 583 (0x247), region = 126  ;;  %s730_s26 = sshll.u32 (!%p4726_p5), %s7505_s23, %s8335_s5 }
 0x226   : > { %s8941_s8 = sadd.s32 (!%p4726_p5), 4294967295, %s730_s26  ;;  %p4728_p6 = scmp.le.s32.totalorder (!%p4726_p5), %s8938_s10, 0 }
 0x22a   : > { %4347 = sbr.rel (%p4728_p6) target bundleno = 567 (0x237), region = 750  ;;  %s7250_s3 = smov (!%p4728_p6), %s8337_s16  }
 0x22b   : > { %s7254_s24 = smov (!%p4728_p6), %s8333_s20   ;;  %s7258_s30 = smov (!%p4728_p6), 0  }
 0x22c   : > { %s7262_s0 = smov (!%p4728_p6), 0  }
 0x22f LB: >> { %v742_v21 = vld [vmem:[%s7256_s24] sm:%s8941_s8]  ;;  %v744_v22 = vld [vmem:[%s7256_s24 + $0x178] sm:%s8941_s8]  ;;  %s746_s5 = sadd.s32 1, %s7260_s30  ;;  %s736_s0 = sadd.s32 1, %s7264_s0   ;;  %s7264_s0 = sphi %s7262_s0, %s736_s0   ;;  %s7260_s30 = sphi %s7258_s30, %s7259_s30   ;;  %s7256_s24 = sphi %s7254_s24, %s751_s24   ;;  %s7252_s3 = sphi %s7250_s3, %s752_s3  }
 0x230   : >> { %743 = vst [vmem:[%s7252_s3] sm:%s8941_s8] %v742_v21  ;;  %p747_p7 = scmp.ge.s32.totalorder %s746_s5, %s8938_s10  ;;  %p735_p8 = scmp.ge.s32.totalorder %s736_s0, %s8938_s10 }
 0x231   : >> { %745 = vst [vmem:[%s7252_s3 + $0x100] sm:%s8941_s8] %v744_v22 }
 0x232   : >> { %s11776_s5 = smov (%p747_p7, %s746_s5), 0  ;;  %738 = sbr.rel (!%p735_p8) target bundleno = 559 (0x22f), region = 756 }
 0x233   : >> { %s749_s27 = smul.u32 752, %s11776_s5  ;;  %s4729_s9 = sshll.u32 %s11776_s5, 9 }
 0x234   : >> { %s752_s3 = scalar_lea.vmem %s8337_s16, %s4729_s9 [#allocation4]   ;;  %s7259_s30 = smov %s11776_s5  }
 0x235   : >> { %s751_s24 = scalar_lea.vmem %s8333_s20, %s749_s27  }
 0x237 PF: > { %s8955_s21 = sand.u32 1, %s11732_s4   ;;  %s4731_s11 = smul.u32 752, %s8938_s10 }
 0x238   : > { %s4909_s7 = sshll.u32 %s8938_s10, 9  ;;  %p4733_p11 = scmp.le.s32.totalorder %s8955_s21, 0 }
 0x239   : > { %s757_s13 = scalar_lea.vmem %s8333_s20, %s4731_s11   ;;  %s759_s17 = scalar_lea.vmem %s8337_s16, %s4909_s7 [#allocation4]  }
 0x23a   : > { %4361 = sbr.rel (%p4733_p11) target bundleno = 583 (0x247), region = 761  ;;  %s7266_s28 = smov (!%p4733_p11), %s759_s17  }
 0x23b   : > { %s7270_s14 = smov (!%p4733_p11), %s757_s13   ;;  %s7274_s29 = smov (!%p4733_p11), 0  }
 0x23c   : > { %s7278_s6 = smov (!%p4733_p11), 0  }
 0x23f LB: >> { %v769_v23 = vld [vmem:[%s7272_s14] sm:%s8941_s8]  ;;  %s771_s4 = sadd.s32 1, %s7276_s29  ;;  %s763_s6 = sadd.s32 1, %s7280_s6   ;;  %s7280_s6 = sphi %s7278_s6, %s763_s6   ;;  %s7276_s29 = sphi %s7274_s29, %s7275_s29   ;;  %s7272_s14 = sphi %s7270_s14, %s776_s14   ;;  %s7268_s28 = sphi %s7266_s28, %s777_s28  }
 0x240   : >> { %770 = vst [vmem:[%s7268_s28] sm:%s8941_s8] %v769_v23  ;;  %p772_p12 = scmp.ge.s32.totalorder %s771_s4, %s8955_s21  ;;  %p762_p10 = scmp.ge.s32.totalorder %s763_s6, %s8955_s21 }
 0x242   : >> { %s11778_s4 = smov (%p772_p12, %s771_s4), 0  ;;  %765 = sbr.rel (!%p762_p10) target bundleno = 575 (0x23f), region = 767 }
 0x243   : >> { %s774_s20 = smul.u32 376, %s11778_s4  ;;  %s4734_s16 = sshll.u32 %s11778_s4, 8 }
 0x244   : >> { %s777_s28 = scalar_lea.vmem %s759_s17, %s4734_s16 [#allocation4]   ;;  %s7275_s29 = smov %s11778_s4  }
 0x245   : >> { %s776_s14 = scalar_lea.vmem %s757_s13, %s774_s20  }
 0x247 PF: > { %1230 = sbr.rel (!%p7585_p4) target bundleno = 859 (0x35b), region = 208  ;;  %s1232_s22 = sand.u32 (%p7585_p4), 1, %s6892_s15  }
 0x248   : > { %s4736_s12 = sshll.u32 (%p7585_p4), %s6908_s19, 1  ;;  %s4735_s2 = sshll.u32 (%p7585_p4), %s1232_s22, 9 }
 0x249   : > { %s4737_s10 = sshll.u32 (%p7585_p4), %s6904_s18, 5  ;;  %s1237_s23 = ssub.s32 (%p7585_p4), 3, %s4736_s12 }
 0x24a   : > { %p1238_p13 = scmp.lt.s32.totalorder (%p7585_p4), %s1237_s23, 2  ;;  %s1241_s26 = ssub.s32 (%p7585_p4), 47, %s4737_s10 }
 0x24b   : > { %p1242_p0 = scmp.lt.s32.totalorder (%p7585_p4), %s1241_s26, 32  ;;  %s4926_s3 = smul.u32 (%p7585_p4), 94, %s6908_s19 }
 0x24c   : > { %s11780_s23 = smov (!%p1238_p13, %s1237_s23), 2  ;;  %s11531_s27 = sld [smem:[#allocation31_spill]] }
 0x24d   : > { %s11782_s26 = smov (!%p1242_p0, %s1241_s26), 32  ;;  %s4738_s8 = sshll.u32 %s11780_s23, 3 }
 0x24e   : > { %s1247_s25 = sadd.s32 %s4926_s3, %s4737_s10  ;;  %s1244_s24 = smul.u32 %s4738_s8, %s11782_s26 }
 0x24f   : > { %s4741_s30 = sshll.u32 %s1247_s25, 3  ;;  %s8980_s21 = sshll.u32 %s11782_s26, 3 }
 0x250   : > { %s8982_s11 = scalar_lea.vmem [#allocation5], %s4735_s2   ;;  %p4743_p4 = scmp.eq.s32.totalorder %s1244_s24, 0 }
 0x251   : > { %p1254_p2 = scmp.lt.u32.totalorder (!%p4743_p4), %s8980_s21, 8 }
 0x252   : > { %s8978_s9 = scalar_lea.vmem %s11531_s27, %s4741_s30   ;;  %1253 = sbr.rel (%p4743_p4) target bundleno = 859 (0x35b), region = 212 }
 0x257   : > { %1257 = sbr.rel (%p1254_p2) target bundleno = 823 (0x337), region = 216  ;;  %s8986_s7 = sand.u32 (!%p1254_p2), 7, %s8980_s21  }
 0x258   : > { %p1310_p3 = scmp.eq.s32.totalorder (!%p1254_p2), %s8986_s7, 0  ;;  %p4744_p1 = scmp.ne.s32.totalorder (!%p1254_p2), %s8986_s7, 0 }
 0x25c   : > { %1313 = sbr.rel (%p4744_p1) target bundleno = 697 (0x2b9), region = 238  ;;  %s1314_s13 = sshrl.u32 (!%p4744_p1), %s8980_s21, 3 }
 0x25d   : > { %s8992_s17 = sshrl.u32 (!%p4744_p1), %s11780_s23, 1  ;;  %s8996_s28 = sshrl.u32 (!%p4744_p1), %s1314_s13, 4 }
 0x25e   : > { %s9000_s14 = smul.u32 (!%p4744_p1), %s8996_s28, %s8992_s17 }
 0x260   : > { %p4745_p5 = scmp.le.s32.totalorder (!%p4744_p1), %s9000_s14, 0 }
 0x261   : > { %s11532_s29 = smov (!%p4745_p5), %s8982_s11  ;;  %s11533_s6 = smov (!%p4745_p5), %s8978_s9 }
 0x262   : > { %4376 = sbr.rel (%p4745_p5) target bundleno = 648 (0x288), region = 772  ;;  %s9009_s4 = smov (!%p4745_p5), 0  }
 0x263   : > { %s9011_s20 = smov (!%p4745_p5), 0   ;;  %s9013_s16 = smov (!%p4745_p5), 0  }
 0x267 LB: >> { %v1328_v24 = vld [vmem:[%s7288_s6] sm:$0xff]  ;;  %v1330_v25 = vld [vmem:[%s7288_s6 + $0x8] sm:$0xff]  ;;  %v1332_v26 = vld [vmem:[%s7288_s6 + $0x10] sm:$0xff]  ;;  %s1392_s22 = sadd.s32 1, %s7292_s4  ;;  %s1395_s12 = sadd.s32 1, %s7296_s20  ;;  %s7300_s16 = sphi %s9013_s16, %s1321_s16   ;;  %s7296_s20 = sphi %s9011_s20, %s11537_s20   ;;  %s7292_s4 = sphi %s9009_s4, %s11536_s4   ;;  %s7288_s6 = sphi %s11533_s6, %s11535_s6   ;;  %s7284_s29 = sphi %s11532_s29, %s11534_s29  }
 0x268   : >> { %1329 = vst [vmem:[%s7284_s29] sm:$0xff] %v1328_v24  ;;  %v1334_v27 = vld [vmem:[%s7288_s6 + $0x18] sm:$0xff]  ;;  %p1393_p6 = scmp.ge.s32.totalorder %s1392_s22, %s8996_s28  ;;  %v1336_v28 = vld [vmem:[%s7288_s6 + $0x20] sm:$0xff]  ;;  %v1338_v29 = vld [vmem:[%s7288_s6 + $0x28] sm:$0xff]  ;;  %s1321_s16 = sadd.s32 1, %s7300_s16  }
 0x269   : >> { %1331 = vst [vmem:[%s7284_s29 + $0x8] sm:$0xff] %v1330_v25  ;;  %v1340_v30 = vld [vmem:[%s7288_s6 + $0x30] sm:$0xff]  ;;  %v1342_v31 = vld [vmem:[%s7288_s6 + $0x38] sm:$0xff]  ;;  %v1344_v32 = vld [vmem:[%s7288_s6 + $0x40] sm:$0xff]  ;;  %p1320_p8 = scmp.ge.s32.totalorder %s1321_s16, %s9000_s14 }
 0x26a   : >> { %1333 = vst [vmem:[%s7284_s29 + $0x10] sm:$0xff] %v1332_v26  ;;  %s11784_s22 = smov (%p1393_p6, %s1392_s22), 0  ;;  %s11786_s12 = smov (!%p1393_p6, %s1395_s12), %s7296_s20  ;;  %v1346_v33 = vld [vmem:[%s7288_s6 + $0x48] sm:$0xff]  ;;  %v1348_v34 = vld [vmem:[%s7288_s6 + $0x50] sm:$0xff]  ;;  %v1350_v35 = vld [vmem:[%s7288_s6 + $0x58] sm:$0xff] }
 0x26b   : >> { %1335 = vst [vmem:[%s7284_s29 + $0x18] sm:$0xff] %v1334_v27  ;;  %p1397_p7 = scmp.ge.s32.totalorder %s11786_s12, %s8992_s17  ;;  %s4746_s2 = sshll.u32 %s11784_s22, 7  ;;  %v1352_v36 = vld [vmem:[%s7288_s6 + $0x60] sm:$0xff]  ;;  %v1354_v37 = vld [vmem:[%s7288_s6 + $0x68] sm:$0xff]  ;;  %v1356_v38 = vld [vmem:[%s7288_s6 + $0x70] sm:$0xff] }
 0x26c   : >> { %1337 = vst [vmem:[%s7284_s29 + $0x20] sm:$0xff] %v1336_v28  ;;  %v1358_v39 = vld [vmem:[%s7288_s6 + $0x78] sm:$0xff]  ;;  %v1362_v41 = vld [vmem:[%s7288_s6 + $0x180] sm:$0xff]  ;;  %v1364_v42 = vld [vmem:[%s7288_s6 + $0x188] sm:$0xff]  ;;  %s11536_s4 = smov %s11784_s22 }
 0x26d   : >> { %1339 = vst [vmem:[%s7284_s29 + $0x28] sm:$0xff] %v1338_v29  ;;  %s11788_s12 = smov (%p1397_p7, %s11786_s12), 0  ;;  %v1360_v40 = vld [vmem:[%s7288_s6 + $0x178] sm:$0xff]  ;;  %v1366_v43 = vld [vmem:[%s7288_s6 + $0x190] sm:$0xff]  ;;  %v1370_v45 = vld [vmem:[%s7288_s6 + $0x1a0] sm:$0xff] }
 0x26e   : >> { %1341 = vst [vmem:[%s7284_s29 + $0x30] sm:$0xff] %v1340_v30  ;;  %s1399_s10 = smul.u32 752, %s11788_s12  ;;  %s4747_s26 = sshll.u32 %s11788_s12, 9  ;;  %v1368_v44 = vld [vmem:[%s7288_s6 + $0x198] sm:$0xff]  ;;  %v1372_v46 = vld [vmem:[%s7288_s6 + $0x1a8] sm:$0xff]  ;;  %v1374_v47 = vld [vmem:[%s7288_s6 + $0x1b0] sm:$0xff] }
 0x26f   : >> { %1343 = vst [vmem:[%s7284_s29 + $0x38] sm:$0xff] %v1342_v31  ;;  %s9060_s3 = sadd.s32 %s4747_s26, %s4746_s2  ;;  %v1376_v48 = vld [vmem:[%s7288_s6 + $0x1b8] sm:$0xff]  ;;  %v1378_v49 = vld [vmem:[%s7288_s6 + $0x1c0] sm:$0xff]  ;;  %v1380_v50 = vld [vmem:[%s7288_s6 + $0x1c8] sm:$0xff]  ;;  %s11537_s20 = smov %s11788_s12 }
 0x270   : >> { %1345 = vst [vmem:[%s7284_s29 + $0x40] sm:$0xff] %v1344_v32  ;;  %s9064_s8 = sadd.s32 %s4746_s2, %s1399_s10  ;;  %s1406_s25 = scalar_lea.vmem %s8982_s11, %s9060_s3 [#allocation5]   ;;  %v1382_v51 = vld [vmem:[%s7288_s6 + $0x1d0] sm:$0xff]  ;;  %v1384_v52 = vld [vmem:[%s7288_s6 + $0x1d8] sm:$0xff]  ;;  %v1386_v53 = vld [vmem:[%s7288_s6 + $0x1e0] sm:$0xff] }
 0x271   : >> { %1347 = vst [vmem:[%s7284_s29 + $0x48] sm:$0xff] %v1346_v33  ;;  %s1405_s24 = scalar_lea.vmem %s8978_s9, %s9064_s8   ;;  %v1388_v54 = vld [vmem:[%s7288_s6 + $0x1e8] sm:$0xff]  ;;  %v1390_v55 = vld [vmem:[%s7288_s6 + $0x1f0] sm:$0xff] }
 0x272   : >> { %1349 = vst [vmem:[%s7284_s29 + $0x50] sm:$0xff] %v1348_v34  ;;  %s11535_s6 = smov %s1405_s24 }
 0x273   : >> { %1351 = vst [vmem:[%s7284_s29 + $0x58] sm:$0xff] %v1350_v35 }
 0x274   : >> { %1353 = vst [vmem:[%s7284_s29 + $0x60] sm:$0xff] %v1352_v36 }
 0x275   : >> { %1355 = vst [vmem:[%s7284_s29 + $0x68] sm:$0xff] %v1354_v37 }
 0x276   : >> { %1357 = vst [vmem:[%s7284_s29 + $0x70] sm:$0xff] %v1356_v38 }
 0x277   : >> { %1359 = vst [vmem:[%s7284_s29 + $0x78] sm:$0xff] %v1358_v39 }
 0x278   : >> { %1361 = vst [vmem:[%s7284_s29 + $0x100] sm:$0xff] %v1360_v40 }
 0x279   : >> { %1363 = vst [vmem:[%s7284_s29 + $0x108] sm:$0xff] %v1362_v41 }
 0x27a   : >> { %1365 = vst [vmem:[%s7284_s29 + $0x110] sm:$0xff] %v1364_v42 }
 0x27b   : >> { %1367 = vst [vmem:[%s7284_s29 + $0x118] sm:$0xff] %v1366_v43 }
 0x27c   : >> { %1369 = vst [vmem:[%s7284_s29 + $0x120] sm:$0xff] %v1368_v44 }
 0x27d   : >> { %1371 = vst [vmem:[%s7284_s29 + $0x128] sm:$0xff] %v1370_v45 }
 0x27e   : >> { %1373 = vst [vmem:[%s7284_s29 + $0x130] sm:$0xff] %v1372_v46 }
 0x27f   : >> { %1375 = vst [vmem:[%s7284_s29 + $0x138] sm:$0xff] %v1374_v47 }
 0x280   : >> { %1377 = vst [vmem:[%s7284_s29 + $0x140] sm:$0xff] %v1376_v48 }
 0x281   : >> { %1379 = vst [vmem:[%s7284_s29 + $0x148] sm:$0xff] %v1378_v49 }
 0x282   : >> { %1381 = vst [vmem:[%s7284_s29 + $0x150] sm:$0xff] %v1380_v50 }
 0x283   : >> { %1383 = vst [vmem:[%s7284_s29 + $0x158] sm:$0xff] %v1382_v51  ;;  %1323 = sbr.rel (!%p1320_p8) target bundleno = 615 (0x267), region = 778 }
 0x284   : >> { %1385 = vst [vmem:[%s7284_s29 + $0x160] sm:$0xff] %v1384_v52 }
 0x285   : >> { %1387 = vst [vmem:[%s7284_s29 + $0x168] sm:$0xff] %v1386_v53 }
 0x286   : >> { %1389 = vst [vmem:[%s7284_s29 + $0x170] sm:$0xff] %v1388_v54 }
 0x287   : >> { %1391 = vst [vmem:[%s7284_s29 + $0x178] sm:$0xff] %v1390_v55  ;;  %s11534_s29 = smov %s1406_s25 }
 0x288 PF: > { %s1409_s30 = sand.u32 1, %s11780_s23   ;;  %s4750_s0 = smul.u32 752, %s8992_s17 }
 0x289   : > { %s4910_s5 = sshll.u32 %s8992_s17, 9  ;;  %s9133_s27 = smul.u32 %s1409_s30, %s8996_s28 }
 0x28a   : > { %s9136_s22 = scalar_lea.vmem %s8978_s9, %s4750_s0   ;;  %s9139_s12 = scalar_lea.vmem %s8982_s11, %s4910_s5 [#allocation5]  }
 0x28b   : > { %p4752_p11 = scmp.le.s32.totalorder %s9133_s27, 0 }
 0x28c   : > { %s11538_s14 = smov (!%p4752_p11), %s9139_s12  ;;  %s11539_s29 = smov (!%p4752_p11), %s9136_s22 }
 0x28d   : > { %4393 = sbr.rel (%p4752_p11) target bundleno = 675 (0x2a3), region = 783  ;;  %s9148_s6 = smov (!%p4752_p11), 0  }
 0x28e   : > { %s9150_s4 = smov (!%p4752_p11), 0   ;;  %s9152_s17 = smov (!%p4752_p11), 0  }
 0x292 LB: >> { %v1426_v56 = vld [vmem:[%s7308_s29] sm:$0xff]  ;;  %v1428_v57 = vld [vmem:[%s7308_s29 + $0x8] sm:$0xff]  ;;  %v1430_v58 = vld [vmem:[%s7308_s29 + $0x10] sm:$0xff]  ;;  %s1458_s20 = sadd.s32 1, %s7312_s6  ;;  %s1461_s16 = sadd.s32 1, %s7316_s4  ;;  %s7320_s17 = sphi %s9152_s17, %s1419_s17   ;;  %s7316_s4 = sphi %s9150_s4, %s11542_s4   ;;  %s7312_s6 = sphi %s9148_s6, %s11541_s6   ;;  %s7308_s29 = sphi %s11539_s29, %s1471_s29   ;;  %s7304_s14 = sphi %s11538_s14, %s11540_s14  }
 0x293   : >> { %1427 = vst [vmem:[%s7304_s14] sm:$0xff] %v1426_v56  ;;  %v1432_v59 = vld [vmem:[%s7308_s29 + $0x18] sm:$0xff]  ;;  %p1459_p12 = scmp.ge.s32.totalorder %s1458_s20, %s8996_s28  ;;  %v1434_v60 = vld [vmem:[%s7308_s29 + $0x20] sm:$0xff]  ;;  %v1436_v61 = vld [vmem:[%s7308_s29 + $0x28] sm:$0xff]  ;;  %s1419_s17 = sadd.s32 1, %s7320_s17  }
 0x294   : >> { %1429 = vst [vmem:[%s7304_s14 + $0x8] sm:$0xff] %v1428_v57  ;;  %v1438_v62 = vld [vmem:[%s7308_s29 + $0x30] sm:$0xff]  ;;  %v1440_v63 = vld [vmem:[%s7308_s29 + $0x38] sm:$0xff]  ;;  %v1442_v0 = vld [vmem:[%s7308_s29 + $0x40] sm:$0xff]  ;;  %p1418_p13 = scmp.ge.s32.totalorder %s1419_s17, %s9133_s27 }
 0x295   : >> { %1431 = vst [vmem:[%s7304_s14 + $0x10] sm:$0xff] %v1430_v58  ;;  %s11790_s20 = smov (%p1459_p12, %s1458_s20), 0  ;;  %s11792_s16 = smov (!%p1459_p12, %s1461_s16), %s7316_s4  ;;  %v1444_v1 = vld [vmem:[%s7308_s29 + $0x48] sm:$0xff]  ;;  %v1446_v2 = vld [vmem:[%s7308_s29 + $0x50] sm:$0xff]  ;;  %v1448_v3 = vld [vmem:[%s7308_s29 + $0x58] sm:$0xff] }
 0x296   : >> { %1433 = vst [vmem:[%s7304_s14 + $0x18] sm:$0xff] %v1432_v59  ;;  %p1463_p10 = scmp.ge.s32.totalorder %s11792_s16, %s1409_s30  ;;  %s4753_s2 = sshll.u32 %s11790_s20, 7  ;;  %v1450_v4 = vld [vmem:[%s7308_s29 + $0x60] sm:$0xff]  ;;  %v1452_v5 = vld [vmem:[%s7308_s29 + $0x68] sm:$0xff]  ;;  %v1454_v6 = vld [vmem:[%s7308_s29 + $0x70] sm:$0xff] }
 0x297   : >> { %1435 = vst [vmem:[%s7304_s14 + $0x20] sm:$0xff] %v1434_v60  ;;  %v1456_v7 = vld [vmem:[%s7308_s29 + $0x78] sm:$0xff]  ;;  %s11541_s6 = smov %s11790_s20 }
 0x298   : >> { %1437 = vst [vmem:[%s7304_s14 + $0x28] sm:$0xff] %v1436_v61  ;;  %s11794_s16 = smov (%p1463_p10, %s11792_s16), 0 }
 0x299   : >> { %1439 = vst [vmem:[%s7304_s14 + $0x30] sm:$0xff] %v1438_v62  ;;  %s1465_s10 = smul.u32 376, %s11794_s16  ;;  %s4754_s26 = sshll.u32 %s11794_s16, 8 }
 0x29a   : >> { %1441 = vst [vmem:[%s7304_s14 + $0x38] sm:$0xff] %v1440_v63  ;;  %s1470_s3 = sadd.s32 %s4754_s26, %s4753_s2  ;;  %s11542_s4 = smov %s11794_s16 }
 0x29b   : >> { %1443 = vst [vmem:[%s7304_s14 + $0x40] sm:$0xff] %v1442_v0  ;;  %s1467_s8 = sadd.s32 %s4753_s2, %s1465_s10  ;;  %s1472_s25 = scalar_lea.vmem %s9139_s12, %s1470_s3 [#allocation5]  }
 0x29c   : >> { %1445 = vst [vmem:[%s7304_s14 + $0x48] sm:$0xff] %v1444_v1  ;;  %s1471_s29 = scalar_lea.vmem %s9136_s22, %s1467_s8  }
 0x29d   : >> { %1447 = vst [vmem:[%s7304_s14 + $0x50] sm:$0xff] %v1446_v2 }
 0x29e   : >> { %1449 = vst [vmem:[%s7304_s14 + $0x58] sm:$0xff] %v1448_v3  ;;  %1421 = sbr.rel (!%p1418_p13) target bundleno = 658 (0x292), region = 789 }
 0x29f   : >> { %1451 = vst [vmem:[%s7304_s14 + $0x60] sm:$0xff] %v1450_v4 }
 0x2a0   : >> { %1453 = vst [vmem:[%s7304_s14 + $0x68] sm:$0xff] %v1452_v5 }
 0x2a1   : >> { %1455 = vst [vmem:[%s7304_s14 + $0x70] sm:$0xff] %v1454_v6 }
 0x2a2   : >> { %1457 = vst [vmem:[%s7304_s14 + $0x78] sm:$0xff] %v1456_v7  ;;  %s11540_s14 = smov %s1472_s25 }
 0x2a3 PF: > { %s9220_s24 = sand.u32 15, %s1314_s13   ;;  %s4911_s0 = sshll.u32 %s8996_s28, 7 }
 0x2a4   : > { %s9224_s5 = scalar_lea.vmem %s8978_s9, %s4911_s0   ;;  %s9227_s2 = scalar_lea.vmem %s8982_s11, %s4911_s0 [#allocation5]  }
 0x2a5   : > { %s9231_s20 = smul.u32 %s9220_s24, %s11780_s23 }
 0x2a7   : > { %p4759_p0 = scmp.le.s32.totalorder %s9231_s20, 0 }
 0x2a8   : > { %s11543_s30 = smov (!%p4759_p0), %s9227_s2  ;;  %s11544_s27 = smov (!%p4759_p0), %s9224_s5 }
 0x2a9   : > { %4410 = sbr.rel (%p4759_p0) target bundleno = 697 (0x2b9), region = 794  ;;  %s9240_s22 = smov (!%p4759_p0), 0  }
 0x2aa   : > { %s9242_s13 = smov (!%p4759_p0), 0   ;;  %s9244_s28 = smov (!%p4759_p0), 0  }
 0x2ae LB: >> { %v1491_v8 = vld [vmem:[%s7328_s27] sm:$0xff]  ;;  %s1493_s12 = sadd.s32 1, %s7332_s22  ;;  %s1496_s14 = sadd.s32 1, %s7336_s13  ;;  %s7340_s28 = sphi %s9244_s28, %s1484_s28   ;;  %s7336_s13 = sphi %s9242_s13, %s11546_s13   ;;  %s7332_s22 = sphi %s9240_s22, %s11545_s22   ;;  %s7328_s27 = sphi %s11544_s27, %s1506_s27   ;;  %s7324_s30 = sphi %s11543_s30, %s1507_s30  }
 0x2af   : >> { %1492 = vst [vmem:[%s7324_s30] sm:$0xff] %v1491_v8  ;;  %p1494_p4 = scmp.ge.s32.totalorder %s1493_s12, %s9220_s24  ;;  %s1484_s28 = sadd.s32 1, %s7340_s28  }
 0x2b0   : >> { %p1483_p1 = scmp.ge.s32.totalorder %s1484_s28, %s9231_s20 }
 0x2b1   : >> { %s11796_s12 = smov (%p1494_p4, %s1493_s12), 0  ;;  %s11798_s14 = smov (!%p1494_p4, %s1496_s14), %s7336_s13 }
 0x2b2   : >> { %p1498_p2 = scmp.ge.s32.totalorder %s11798_s14, %s11780_s23  ;;  %s4760_s29 = sshll.u32 %s11796_s12, 3 }
 0x2b3   : >> { %s11545_s22 = smov %s11796_s12 }
 0x2b4   : >> { %s11800_s14 = smov (%p1498_p2, %s11798_s14), 0  ;;  %1486 = sbr.rel (!%p1483_p1) target bundleno = 686 (0x2ae), region = 800 }
 0x2b5   : >> { %s1500_s6 = smul.u32 376, %s11800_s14  ;;  %s4761_s4 = sshll.u32 %s11800_s14, 8 }
 0x2b6   : >> { %s1505_s17 = sadd.s32 %s4761_s4, %s4760_s29  ;;  %s11546_s13 = smov %s11800_s14 }
 0x2b7   : >> { %s1502_s16 = sadd.s32 %s4760_s29, %s1500_s6  ;;  %s1507_s30 = scalar_lea.vmem %s9227_s2, %s1505_s17 [#allocation5]  }
 0x2b8   : >> { %s1506_s27 = scalar_lea.vmem %s9224_s5, %s1502_s16  }
 0x2b9 PF: > { %1510 = sbr.rel (%p1310_p3) target bundleno = 823 (0x337), region = 263  ;;  %s1512_s10 = ssub.s32 (!%p1310_p3), %s8980_s21, %s8986_s7 }
 0x2ba   : > { %s1516_s26 = sshrl.u32 (!%p1310_p3), %s8980_s21, 3  ;;  %s9272_s3 = scalar_lea.vmem (!%p1310_p3), %s8978_s9, %s1512_s10  }
 0x2bb   : > { %s9275_s8 = scalar_lea.vmem (!%p1310_p3), %s8982_s11, %s1512_s10 [#allocation5]   ;;  %s9278_s25 = sshrl.u32 (!%p1310_p3), %s11780_s23, 1 }
 0x2bc   : > { %s9282_s24 = sshrl.u32 (!%p1310_p3), %s1516_s26, 4 }
 0x2bd   : > { %s9286_s0 = smul.u32 (!%p1310_p3), %s9282_s24, %s9278_s25 }
 0x2bf   : > { %p4763_p3 = scmp.le.s32.totalorder %s9286_s0, 0 }
 0x2c0   : > { %s11547_s5 = smov (!%p4763_p3), %s8982_s11  ;;  %s11548_s2 = smov (!%p4763_p3), %s8978_s9 }
 0x2c1   : > { %4427 = sbr.rel (%p4763_p3) target bundleno = 743 (0x2e7), region = 805  ;;  %s9295_s20 = smov (!%p4763_p3), 0  }
 0x2c2   : > { %s9297_s30 = smov (!%p4763_p3), 0   ;;  %s9299_s27 = smov (!%p4763_p3), 0  }
 0x2c6 LB: >> { %v1530_v9 = vld [vmem:[%s7348_s2] sm:$0xff]  ;;  %v1532_v10 = vld [vmem:[%s7348_s2 + $0x8] sm:$0xff]  ;;  %v1534_v11 = vld [vmem:[%s7348_s2 + $0x10] sm:$0xff]  ;;  %s1594_s22 = sadd.s32 1, %s7352_s20  ;;  %s1597_s13 = sadd.s32 1, %s7356_s30  ;;  %s7360_s27 = sphi %s9299_s27, %s1523_s27   ;;  %s7356_s30 = sphi %s9297_s30, %s11552_s30   ;;  %s7352_s20 = sphi %s9295_s20, %s11551_s20   ;;  %s7348_s2 = sphi %s11548_s2, %s11550_s2   ;;  %s7344_s5 = sphi %s11547_s5, %s11549_s5  }
 0x2c7   : >> { %1531 = vst [vmem:[%s7344_s5] sm:$0xff] %v1530_v9  ;;  %v1536_v12 = vld [vmem:[%s7348_s2 + $0x18] sm:$0xff]  ;;  %p1595_p5 = scmp.ge.s32.totalorder %s1594_s22, %s9282_s24  ;;  %v1538_v13 = vld [vmem:[%s7348_s2 + $0x20] sm:$0xff]  ;;  %v1540_v14 = vld [vmem:[%s7348_s2 + $0x28] sm:$0xff]  ;;  %s1523_s27 = sadd.s32 1, %s7360_s27  }
 0x2c8   : >> { %1533 = vst [vmem:[%s7344_s5 + $0x8] sm:$0xff] %v1532_v10  ;;  %v1542_v15 = vld [vmem:[%s7348_s2 + $0x30] sm:$0xff]  ;;  %v1544_v16 = vld [vmem:[%s7348_s2 + $0x38] sm:$0xff]  ;;  %v1546_v17 = vld [vmem:[%s7348_s2 + $0x40] sm:$0xff]  ;;  %p1522_p7 = scmp.ge.s32.totalorder %s1523_s27, %s9286_s0 }
 0x2c9   : >> { %1535 = vst [vmem:[%s7344_s5 + $0x10] sm:$0xff] %v1534_v11  ;;  %s11802_s22 = smov (%p1595_p5, %s1594_s22), 0  ;;  %s11804_s13 = smov (!%p1595_p5, %s1597_s13), %s7356_s30  ;;  %v1548_v18 = vld [vmem:[%s7348_s2 + $0x48] sm:$0xff]  ;;  %v1550_v19 = vld [vmem:[%s7348_s2 + $0x50] sm:$0xff]  ;;  %v1552_v20 = vld [vmem:[%s7348_s2 + $0x58] sm:$0xff] }
 0x2ca   : >> { %1537 = vst [vmem:[%s7344_s5 + $0x18] sm:$0xff] %v1536_v12  ;;  %p1599_p6 = scmp.ge.s32.totalorder %s11804_s13, %s9278_s25  ;;  %s4764_s28 = sshll.u32 %s11802_s22, 7  ;;  %v1554_v21 = vld [vmem:[%s7348_s2 + $0x60] sm:$0xff]  ;;  %v1556_v22 = vld [vmem:[%s7348_s2 + $0x68] sm:$0xff]  ;;  %v1558_v23 = vld [vmem:[%s7348_s2 + $0x70] sm:$0xff] }
 0x2cb   : >> { %1539 = vst [vmem:[%s7344_s5 + $0x20] sm:$0xff] %v1538_v13  ;;  %v1560_v24 = vld [vmem:[%s7348_s2 + $0x78] sm:$0xff]  ;;  %v1564_v26 = vld [vmem:[%s7348_s2 + $0x180] sm:$0xff]  ;;  %v1566_v27 = vld [vmem:[%s7348_s2 + $0x188] sm:$0xff]  ;;  %s11551_s20 = smov %s11802_s22 }
 0x2cc   : >> { %1541 = vst [vmem:[%s7344_s5 + $0x28] sm:$0xff] %v1540_v14  ;;  %s11806_s13 = smov (%p1599_p6, %s11804_s13), 0  ;;  %v1562_v25 = vld [vmem:[%s7348_s2 + $0x178] sm:$0xff]  ;;  %v1568_v28 = vld [vmem:[%s7348_s2 + $0x190] sm:$0xff]  ;;  %v1572_v30 = vld [vmem:[%s7348_s2 + $0x1a0] sm:$0xff] }
 0x2cd   : >> { %1543 = vst [vmem:[%s7344_s5 + $0x30] sm:$0xff] %v1542_v15  ;;  %s1601_s12 = smul.u32 752, %s11806_s13  ;;  %s4765_s14 = sshll.u32 %s11806_s13, 9  ;;  %v1570_v29 = vld [vmem:[%s7348_s2 + $0x198] sm:$0xff]  ;;  %v1574_v31 = vld [vmem:[%s7348_s2 + $0x1a8] sm:$0xff]  ;;  %v1576_v32 = vld [vmem:[%s7348_s2 + $0x1b0] sm:$0xff] }
 0x2ce   : >> { %1545 = vst [vmem:[%s7344_s5 + $0x38] sm:$0xff] %v1544_v16  ;;  %s9346_s29 = sadd.s32 %s4765_s14, %s4764_s28  ;;  %v1578_v33 = vld [vmem:[%s7348_s2 + $0x1b8] sm:$0xff]  ;;  %v1580_v34 = vld [vmem:[%s7348_s2 + $0x1c0] sm:$0xff]  ;;  %v1582_v35 = vld [vmem:[%s7348_s2 + $0x1c8] sm:$0xff]  ;;  %s11552_s30 = smov %s11806_s13 }
 0x2cf   : >> { %1547 = vst [vmem:[%s7344_s5 + $0x40] sm:$0xff] %v1546_v17  ;;  %s9350_s6 = sadd.s32 %s4764_s28, %s1601_s12  ;;  %s1608_s4 = scalar_lea.vmem %s8982_s11, %s9346_s29 [#allocation5]   ;;  %v1584_v36 = vld [vmem:[%s7348_s2 + $0x1d0] sm:$0xff]  ;;  %v1586_v37 = vld [vmem:[%s7348_s2 + $0x1d8] sm:$0xff]  ;;  %v1588_v38 = vld [vmem:[%s7348_s2 + $0x1e0] sm:$0xff] }
 0x2d0   : >> { %1549 = vst [vmem:[%s7344_s5 + $0x48] sm:$0xff] %v1548_v18  ;;  %s1607_s17 = scalar_lea.vmem %s8978_s9, %s9350_s6   ;;  %v1590_v39 = vld [vmem:[%s7348_s2 + $0x1e8] sm:$0xff]  ;;  %v1592_v40 = vld [vmem:[%s7348_s2 + $0x1f0] sm:$0xff] }
 0x2d1   : >> { %1551 = vst [vmem:[%s7344_s5 + $0x50] sm:$0xff] %v1550_v19  ;;  %s11550_s2 = smov %s1607_s17 }
 0x2d2   : >> { %1553 = vst [vmem:[%s7344_s5 + $0x58] sm:$0xff] %v1552_v20 }
 0x2d3   : >> { %1555 = vst [vmem:[%s7344_s5 + $0x60] sm:$0xff] %v1554_v21 }
 0x2d4   : >> { %1557 = vst [vmem:[%s7344_s5 + $0x68] sm:$0xff] %v1556_v22 }
 0x2d5   : >> { %1559 = vst [vmem:[%s7344_s5 + $0x70] sm:$0xff] %v1558_v23 }
 0x2d6   : >> { %1561 = vst [vmem:[%s7344_s5 + $0x78] sm:$0xff] %v1560_v24 }
 0x2d7   : >> { %1563 = vst [vmem:[%s7344_s5 + $0x100] sm:$0xff] %v1562_v25 }
 0x2d8   : >> { %1565 = vst [vmem:[%s7344_s5 + $0x108] sm:$0xff] %v1564_v26 }
 0x2d9   : >> { %1567 = vst [vmem:[%s7344_s5 + $0x110] sm:$0xff] %v1566_v27 }
 0x2da   : >> { %1569 = vst [vmem:[%s7344_s5 + $0x118] sm:$0xff] %v1568_v28 }
 0x2db   : >> { %1571 = vst [vmem:[%s7344_s5 + $0x120] sm:$0xff] %v1570_v29 }
 0x2dc   : >> { %1573 = vst [vmem:[%s7344_s5 + $0x128] sm:$0xff] %v1572_v30 }
 0x2dd   : >> { %1575 = vst [vmem:[%s7344_s5 + $0x130] sm:$0xff] %v1574_v31 }
 0x2de   : >> { %1577 = vst [vmem:[%s7344_s5 + $0x138] sm:$0xff] %v1576_v32 }
 0x2df   : >> { %1579 = vst [vmem:[%s7344_s5 + $0x140] sm:$0xff] %v1578_v33 }
 0x2e0   : >> { %1581 = vst [vmem:[%s7344_s5 + $0x148] sm:$0xff] %v1580_v34 }
 0x2e1   : >> { %1583 = vst [vmem:[%s7344_s5 + $0x150] sm:$0xff] %v1582_v35 }
 0x2e2   : >> { %1585 = vst [vmem:[%s7344_s5 + $0x158] sm:$0xff] %v1584_v36  ;;  %1525 = sbr.rel (!%p1522_p7) target bundleno = 710 (0x2c6), region = 811 }
 0x2e3   : >> { %1587 = vst [vmem:[%s7344_s5 + $0x160] sm:$0xff] %v1586_v37 }
 0x2e4   : >> { %1589 = vst [vmem:[%s7344_s5 + $0x168] sm:$0xff] %v1588_v38 }
 0x2e5   : >> { %1591 = vst [vmem:[%s7344_s5 + $0x170] sm:$0xff] %v1590_v39 }
 0x2e6   : >> { %1593 = vst [vmem:[%s7344_s5 + $0x178] sm:$0xff] %v1592_v40  ;;  %s11549_s5 = smov %s1608_s4 }
 0x2e7 PF: > { %s9414_s16 = sand.u32 1, %s11780_s23   ;;  %s4768_s10 = smul.u32 752, %s9278_s25 }
 0x2e8   : > { %s11426_s28 = sshll.u32 %s9278_s25, 9  ;;  %s9420_s22 = smul.u32 %s9414_s16, %s9282_s24 }
 0x2e9   : > { %s9425_s13 = scalar_lea.vmem %s8978_s9, %s4768_s10   ;;  %s9430_s0 = scalar_lea.vmem %s8982_s11, %s11426_s28 [#allocation5]  }
 0x2ea   : > { %p4770_p8 = scmp.le.s32.totalorder %s9420_s22, 0 }
 0x2eb   : > { %s11553_s5 = smov (!%p4770_p8), %s9430_s0  ;;  %s11554_s2 = smov (!%p4770_p8), %s9425_s13 }
 0x2ec   : > { %4444 = sbr.rel (%p4770_p8) target bundleno = 770 (0x302), region = 816  ;;  %s9439_s20 = smov (!%p4770_p8), 0  }
 0x2ed   : > { %s9441_s30 = smov (!%p4770_p8), 0   ;;  %s9443_s27 = smov (!%p4770_p8), 0  }
 0x2f1 LB: >> { %v1628_v41 = vld [vmem:[%s7368_s2] sm:$0xff]  ;;  %v1630_v42 = vld [vmem:[%s7368_s2 + $0x8] sm:$0xff]  ;;  %v1632_v43 = vld [vmem:[%s7368_s2 + $0x10] sm:$0xff]  ;;  %s1660_s12 = sadd.s32 1, %s7372_s20  ;;  %s1663_s14 = sadd.s32 1, %s7376_s30  ;;  %s7380_s27 = sphi %s9443_s27, %s1621_s27   ;;  %s7376_s30 = sphi %s9441_s30, %s11557_s30   ;;  %s7372_s20 = sphi %s9439_s20, %s11556_s20   ;;  %s7368_s2 = sphi %s11554_s2, %s1673_s2   ;;  %s7364_s5 = sphi %s11553_s5, %s11555_s5  }
 0x2f2   : >> { %1629 = vst [vmem:[%s7364_s5] sm:$0xff] %v1628_v41  ;;  %v1634_v44 = vld [vmem:[%s7368_s2 + $0x18] sm:$0xff]  ;;  %p1661_p11 = scmp.ge.s32.totalorder %s1660_s12, %s9282_s24  ;;  %v1636_v45 = vld [vmem:[%s7368_s2 + $0x20] sm:$0xff]  ;;  %v1638_v46 = vld [vmem:[%s7368_s2 + $0x28] sm:$0xff]  ;;  %s1621_s27 = sadd.s32 1, %s7380_s27  }
 0x2f3   : >> { %1631 = vst [vmem:[%s7364_s5 + $0x8] sm:$0xff] %v1630_v42  ;;  %v1640_v47 = vld [vmem:[%s7368_s2 + $0x30] sm:$0xff]  ;;  %v1642_v48 = vld [vmem:[%s7368_s2 + $0x38] sm:$0xff]  ;;  %v1644_v49 = vld [vmem:[%s7368_s2 + $0x40] sm:$0xff]  ;;  %p1620_p10 = scmp.ge.s32.totalorder %s1621_s27, %s9420_s22 }
 0x2f4   : >> { %1633 = vst [vmem:[%s7364_s5 + $0x10] sm:$0xff] %v1632_v43  ;;  %s11808_s12 = smov (%p1661_p11, %s1660_s12), 0  ;;  %s11810_s14 = smov (!%p1661_p11, %s1663_s14), %s7376_s30  ;;  %v1646_v50 = vld [vmem:[%s7368_s2 + $0x48] sm:$0xff]  ;;  %v1648_v51 = vld [vmem:[%s7368_s2 + $0x50] sm:$0xff]  ;;  %v1650_v52 = vld [vmem:[%s7368_s2 + $0x58] sm:$0xff] }
 0x2f5   : >> { %1635 = vst [vmem:[%s7364_s5 + $0x18] sm:$0xff] %v1634_v44  ;;  %p1665_p12 = scmp.ge.s32.totalorder %s11810_s14, %s9414_s16  ;;  %s4771_s29 = sshll.u32 %s11808_s12, 7  ;;  %v1652_v53 = vld [vmem:[%s7368_s2 + $0x60] sm:$0xff]  ;;  %v1654_v54 = vld [vmem:[%s7368_s2 + $0x68] sm:$0xff]  ;;  %v1656_v55 = vld [vmem:[%s7368_s2 + $0x70] sm:$0xff] }
 0x2f6   : >> { %1637 = vst [vmem:[%s7364_s5 + $0x20] sm:$0xff] %v1636_v45  ;;  %v1658_v56 = vld [vmem:[%s7368_s2 + $0x78] sm:$0xff] }
 0x2f7   : >> { %1639 = vst [vmem:[%s7364_s5 + $0x28] sm:$0xff] %v1638_v46  ;;  %s11812_s14 = smov (%p1665_p12, %s11810_s14), 0 }
 0x2f8   : >> { %1641 = vst [vmem:[%s7364_s5 + $0x30] sm:$0xff] %v1640_v47  ;;  %s1667_s6 = smul.u32 376, %s11812_s14  ;;  %s4772_s4 = sshll.u32 %s11812_s14, 8 }
 0x2f9   : >> { %1643 = vst [vmem:[%s7364_s5 + $0x38] sm:$0xff] %v1642_v48  ;;  %s1672_s17 = sadd.s32 %s4772_s4, %s4771_s29 }
 0x2fa   : >> { %1645 = vst [vmem:[%s7364_s5 + $0x40] sm:$0xff] %v1644_v49  ;;  %s1669_s20 = sadd.s32 %s4771_s29, %s1667_s6  ;;  %s1674_s30 = scalar_lea.vmem %s9430_s0, %s1672_s17 [#allocation5]  }
 0x2fb   : >> { %1647 = vst [vmem:[%s7364_s5 + $0x48] sm:$0xff] %v1646_v50  ;;  %s1673_s2 = scalar_lea.vmem %s9425_s13, %s1669_s20   ;;  %s11556_s20 = smov %s11808_s12 }
 0x2fc   : >> { %1649 = vst [vmem:[%s7364_s5 + $0x50] sm:$0xff] %v1648_v51 }
 0x2fd   : >> { %1651 = vst [vmem:[%s7364_s5 + $0x58] sm:$0xff] %v1650_v52  ;;  %1623 = sbr.rel (!%p1620_p10) target bundleno = 753 (0x2f1), region = 822 }
 0x2fe   : >> { %1653 = vst [vmem:[%s7364_s5 + $0x60] sm:$0xff] %v1652_v53 }
 0x2ff   : >> { %1655 = vst [vmem:[%s7364_s5 + $0x68] sm:$0xff] %v1654_v54 }
 0x300   : >> { %1657 = vst [vmem:[%s7364_s5 + $0x70] sm:$0xff] %v1656_v55 }
 0x301   : >> { %1659 = vst [vmem:[%s7364_s5 + $0x78] sm:$0xff] %v1658_v56  ;;  %s11555_s5 = smov %s1674_s30  ;;  %s11557_s30 = smov %s11812_s14 }
 0x302 PF: > { %s9510_s29 = sand.u32 15, %s1516_s26   ;;  %s4914_s6 = sshll.u32 %s9282_s24, 7 }
 0x303   : > { %s9514_s4 = scalar_lea.vmem %s8978_s9, %s4914_s6   ;;  %s9517_s17 = scalar_lea.vmem %s8982_s11, %s4914_s6 [#allocation5]  }
 0x304   : > { %s9521_s12 = smul.u32 %s9510_s29, %s11780_s23 }
 0x306   : > { %p4777_p13 = scmp.le.s32.totalorder %s9521_s12, 0 }
 0x307   : > { %s11558_s22 = smov (!%p4777_p13), %s9517_s17  ;;  %s11559_s13 = smov (!%p4777_p13), %s9514_s4 }
 0x308   : > { %4461 = sbr.rel (%p4777_p13) target bundleno = 792 (0x318), region = 827  ;;  %s9530_s0 = smov (!%p4777_p13), 0  }
 0x309   : > { %s9532_s26 = smov (!%p4777_p13), 0   ;;  %s9534_s24 = smov (!%p4777_p13), 0  }
 0x30d LB: >> { %v1693_v57 = vld [vmem:[%s7388_s13] sm:$0xff]  ;;  %s1695_s5 = sadd.s32 1, %s7392_s0  ;;  %s1698_s2 = sadd.s32 1, %s7396_s26  ;;  %s7400_s24 = sphi %s9534_s24, %s1686_s24   ;;  %s7396_s26 = sphi %s9532_s26, %s11561_s26   ;;  %s7392_s0 = sphi %s9530_s0, %s11560_s0   ;;  %s7388_s13 = sphi %s11559_s13, %s1708_s13   ;;  %s7384_s22 = sphi %s11558_s22, %s1709_s22  }
 0x30e   : >> { %1694 = vst [vmem:[%s7384_s22] sm:$0xff] %v1693_v57  ;;  %p1696_p0 = scmp.ge.s32.totalorder %s1695_s5, %s9510_s29  ;;  %s1686_s24 = sadd.s32 1, %s7400_s24  }
 0x30f   : >> { %p1685_p2 = scmp.ge.s32.totalorder %s1686_s24, %s9521_s12 }
 0x310   : >> { %s11814_s5 = smov (%p1696_p0, %s1695_s5), 0  ;;  %s11816_s2 = smov (!%p1696_p0, %s1698_s2), %s7396_s26 }
 0x311   : >> { %p1700_p4 = scmp.ge.s32.totalorder %s11816_s2, %s11780_s23  ;;  %s4778_s27 = sshll.u32 %s11814_s5, 3 }
 0x312   : >> { %s11560_s0 = smov %s11814_s5 }
 0x313   : >> { %s11818_s2 = smov (%p1700_p4, %s11816_s2), 0  ;;  %1688 = sbr.rel (!%p1685_p2) target bundleno = 781 (0x30d), region = 833 }
 0x314   : >> { %s1702_s14 = smul.u32 376, %s11818_s2  ;;  %s4779_s20 = sshll.u32 %s11818_s2, 8 }
 0x315   : >> { %s1707_s30 = sadd.s32 %s4779_s20, %s4778_s27  ;;  %s11561_s26 = smov %s11818_s2 }
 0x316   : >> { %s1704_s6 = sadd.s32 %s4778_s27, %s1702_s14  ;;  %s1709_s22 = scalar_lea.vmem %s9517_s17, %s1707_s30 [#allocation5]  }
 0x317   : >> { %s1708_s13 = scalar_lea.vmem %s9514_s4, %s1704_s6  }
 0x318 PF: > { %s7506_s28 = smov 1   ;;  %p4782_p1 = scmp.le.s32.totalorder %s9278_s25, 0 }
 0x319   : > { %s1710_s27 = sshll.u32 %s7506_s28, %s8986_s7  ;;  %s7402_s20 = smov (!%p4782_p1), %s9275_s8  }
 0x31a   : > { %s9557_s14 = sadd.s32 4294967295, %s1710_s27  ;;  %4477 = sbr.rel (%p4782_p1) target bundleno = 807 (0x327), region = 838 }
 0x31b   : > { %s7406_s30 = smov (!%p4782_p1), %s9272_s3   ;;  %s7410_s6 = smov (!%p4782_p1), 0  }
 0x31c   : > { %s7414_s5 = smov (!%p4782_p1), 0  }
 0x31f LB: >> { %v1722_v58 = vld [vmem:[%s7408_s30] sm:%s9557_s14]  ;;  %v1724_v59 = vld [vmem:[%s7408_s30 + $0x178] sm:%s9557_s14]  ;;  %s1726_s7 = sadd.s32 1, %s7412_s6  ;;  %s1716_s5 = sadd.s32 1, %s7416_s5   ;;  %s7416_s5 = sphi %s7414_s5, %s1716_s5   ;;  %s7412_s6 = sphi %s7410_s6, %s7411_s6   ;;  %s7408_s30 = sphi %s7406_s30, %s1731_s30   ;;  %s7404_s20 = sphi %s7402_s20, %s1732_s20  }
 0x320   : >> { %1723 = vst [vmem:[%s7404_s20] sm:%s9557_s14] %v1722_v58  ;;  %p1727_p3 = scmp.ge.s32.totalorder %s1726_s7, %s9278_s25  ;;  %p1715_p5 = scmp.ge.s32.totalorder %s1716_s5, %s9278_s25 }
 0x321   : >> { %1725 = vst [vmem:[%s7404_s20 + $0x100] sm:%s9557_s14] %v1724_v59 }
 0x322   : >> { %s11820_s7 = smov (%p1727_p3, %s1726_s7), 0  ;;  %1718 = sbr.rel (!%p1715_p5) target bundleno = 799 (0x31f), region = 844 }
 0x323   : >> { %s1729_s28 = smul.u32 752, %s11820_s7  ;;  %s4783_s29 = sshll.u32 %s11820_s7, 9 }
 0x324   : >> { %s1732_s20 = scalar_lea.vmem %s9275_s8, %s4783_s29 [#allocation5]   ;;  %s7411_s6 = smov %s11820_s7  }
 0x325   : >> { %s1731_s30 = scalar_lea.vmem %s9272_s3, %s1729_s28  }
 0x327 PF: > { %s1737_s4 = scalar_lea.vmem %s9272_s3, %s4768_s10   ;;  %s11562_s17 = sshll.u32 %s9278_s25, 9 }
 0x328   : > { %s1739_s12 = scalar_lea.vmem %s9275_s8, %s11562_s17 [#allocation5]   ;;  %p4787_p6 = scmp.le.s32.totalorder %s9414_s16, 0 }
 0x329   : > { %s7418_s22 = smov (!%p4787_p6), %s1739_s12   ;;  %s7422_s13 = smov (!%p4787_p6), %s1737_s4  }
 0x32a   : > { %4491 = sbr.rel (%p4787_p6) target bundleno = 823 (0x337), region = 849  ;;  %s7426_s0 = smov (!%p4787_p6), 0  }
 0x32b   : > { %s7430_s26 = smov (!%p4787_p6), 0  }
 0x32f LB: >> { %v1749_v60 = vld [vmem:[%s7424_s13] sm:%s9557_s14]  ;;  %s1751_s3 = sadd.s32 1, %s7428_s0  ;;  %s1743_s26 = sadd.s32 1, %s7432_s26   ;;  %s7432_s26 = sphi %s7430_s26, %s1743_s26   ;;  %s7428_s0 = sphi %s7426_s0, %s7427_s0   ;;  %s7424_s13 = sphi %s7422_s13, %s1756_s13   ;;  %s7420_s22 = sphi %s7418_s22, %s1757_s22  }
 0x330   : >> { %1750 = vst [vmem:[%s7420_s22] sm:%s9557_s14] %v1749_v60  ;;  %p1752_p7 = scmp.ge.s32.totalorder %s1751_s3, %s9414_s16  ;;  %p1742_p8 = scmp.ge.s32.totalorder %s1743_s26, %s9414_s16 }
 0x332   : >> { %s11822_s3 = smov (%p1752_p7, %s1751_s3), 0  ;;  %1745 = sbr.rel (!%p1742_p8) target bundleno = 815 (0x32f), region = 855 }
 0x333   : >> { %s1754_s8 = smul.u32 376, %s11822_s3  ;;  %s4788_s25 = sshll.u32 %s11822_s3, 8 }
 0x334   : >> { %s1757_s22 = scalar_lea.vmem %s1739_s12, %s4788_s25 [#allocation5]   ;;  %s7427_s0 = smov %s11822_s3  }
 0x335   : >> { %s1756_s13 = scalar_lea.vmem %s1737_s4, %s1754_s8  }
 0x337 PF: > { %p4789_p11 = scmp.ge.u32.totalorder %s8980_s21, 8 }
 0x338   : > { %s9583_s10 = sshrl.u32 (!%p4789_p11), %s11780_s23, 1  ;;  %s7507_s24 = smov (!%p4789_p11), 1  }
 0x339   : > { %1260 = sbr.rel (%p4789_p11) target bundleno = 859 (0x35b), region = 220  ;;  %s1261_s2 = sshll.u32 (!%p4789_p11), %s7507_s24, %s8980_s21 }
 0x33a   : > { %s9586_s27 = sadd.s32 (!%p4789_p11), 4294967295, %s1261_s2  ;;  %p4791_p12 = scmp.le.s32.totalorder (!%p4789_p11), %s9583_s10, 0 }
 0x33e   : > { %4505 = sbr.rel (%p4791_p12) target bundleno = 843 (0x34b), region = 860  ;;  %s7434_s20 = smov (!%p4791_p12), %s8982_s11  }
 0x33f   : > { %s7438_s16 = smov (!%p4791_p12), %s8978_s9   ;;  %s7442_s14 = smov (!%p4791_p12), 0  }
 0x340   : > { %s7446_s30 = smov (!%p4791_p12), 0  }
 0x343 LB: >> { %v1273_v61 = vld [vmem:[%s7440_s16] sm:%s9586_s27]  ;;  %v1275_v62 = vld [vmem:[%s7440_s16 + $0x178] sm:%s9586_s27]  ;;  %s1277_s21 = sadd.s32 1, %s7444_s14  ;;  %s1267_s30 = sadd.s32 1, %s7448_s30   ;;  %s7448_s30 = sphi %s7446_s30, %s1267_s30   ;;  %s7444_s14 = sphi %s7442_s14, %s7443_s14   ;;  %s7440_s16 = sphi %s7438_s16, %s1282_s16   ;;  %s7436_s20 = sphi %s7434_s20, %s1283_s20  }
 0x344   : >> { %1274 = vst [vmem:[%s7436_s20] sm:%s9586_s27] %v1273_v61  ;;  %p1278_p10 = scmp.ge.s32.totalorder %s1277_s21, %s9583_s10  ;;  %p1266_p13 = scmp.ge.s32.totalorder %s1267_s30, %s9583_s10 }
 0x345   : >> { %1276 = vst [vmem:[%s7436_s20 + $0x100] sm:%s9586_s27] %v1275_v62 }
 0x346   : >> { %s11824_s21 = smov (%p1278_p10, %s1277_s21), 0  ;;  %1269 = sbr.rel (!%p1266_p13) target bundleno = 835 (0x343), region = 866 }
 0x347   : >> { %s1280_s6 = smul.u32 752, %s11824_s21  ;;  %s4792_s5 = sshll.u32 %s11824_s21, 9 }
 0x348   : >> { %s1283_s20 = scalar_lea.vmem %s8982_s11, %s4792_s5 [#allocation5]   ;;  %s7443_s14 = smov %s11824_s21  }
 0x349   : >> { %s1282_s16 = scalar_lea.vmem %s8978_s9, %s1280_s6  }
 0x34b PF: > { %s9600_s7 = sand.u32 1, %s11780_s23   ;;  %s4794_s28 = smul.u32 752, %s9583_s10 }
 0x34c   : > { %s4917_s29 = sshll.u32 %s9583_s10, 9  ;;  %p4796_p0 = scmp.le.s32.totalorder %s9600_s7, 0 }
 0x34d   : > { %s1288_s4 = scalar_lea.vmem %s8978_s9, %s4794_s28   ;;  %s1290_s17 = scalar_lea.vmem %s8982_s11, %s4917_s29 [#allocation5]  }
 0x34e   : > { %4519 = sbr.rel (%p4796_p0) target bundleno = 859 (0x35b), region = 871  ;;  %s7450_s12 = smov (!%p4796_p0), %s1290_s17  }
 0x34f   : > { %s7454_s22 = smov (!%p4796_p0), %s1288_s4   ;;  %s7458_s13 = smov (!%p4796_p0), 0  }
 0x350   : > { %s7462_s0 = smov (!%p4796_p0), 0  }
 0x353 LB: >> { %v1300_v63 = vld [vmem:[%s7456_s22] sm:%s9586_s27]  ;;  %s1302_s23 = sadd.s32 1, %s7460_s13  ;;  %s1294_s0 = sadd.s32 1, %s7464_s0   ;;  %s7464_s0 = sphi %s7462_s0, %s1294_s0   ;;  %s7460_s13 = sphi %s7458_s13, %s7459_s13   ;;  %s7456_s22 = sphi %s7454_s22, %s1307_s22   ;;  %s7452_s12 = sphi %s7450_s12, %s1308_s12  }
 0x354   : >> { %1301 = vst [vmem:[%s7452_s12] sm:%s9586_s27] %v1300_v63  ;;  %p1303_p4 = scmp.ge.s32.totalorder %s1302_s23, %s9600_s7  ;;  %p1293_p2 = scmp.ge.s32.totalorder %s1294_s0, %s9600_s7 }
 0x356   : >> { %s11826_s23 = smov (%p1303_p4, %s1302_s23), 0  ;;  %1296 = sbr.rel (!%p1293_p2) target bundleno = 851 (0x353), region = 877 }
 0x357   : >> { %s1305_s9 = smul.u32 376, %s11826_s23  ;;  %s4797_s11 = sshll.u32 %s11826_s23, 8 }
 0x358   : >> { %s1308_s12 = scalar_lea.vmem %s1290_s17, %s4797_s11 [#allocation5]   ;;  %s7459_s13 = smov %s11826_s23  }
 0x359   : >> { %s1307_s22 = scalar_lea.vmem %s1288_s4, %s1305_s9  }
 0x35b PF: > { %s11563_s26 = sld [smem:[#allocation12_spill]] }
 0x361   : > { %p4798_p1 = scmp.ge.s32.totalorder %s11563_s26, 1  ;;  %p1760_p3 = scmp.lt.s32.totalorder %s11563_s26, 5 }
 0x363   : > { %p1761_p5 = pnand %p4798_p1, %p1760_p3 }
 0x365   : > { %1764 = sbr.rel (%p1761_p5) target bundleno = 1485 (0x5cd), region = 302 }
 0x36a   : > { %s11564_s3 = sld [smem:[#allocation9_spill]] }
 0x36b   : > { %s11565_s8 = sld [smem:[#allocation7_spill]] }
 0x36c   : > { %s11566_s21 = sld [smem:[#allocation10_spill]] }
 0x370   : > { %s1767_s25 = sand.u32 1, %s11564_s3  }
 0x371   : > { %s1808_s10 = sand.u32 1, %s11565_s8   ;;  %s9615_s24 = sshll.u32 %s1767_s25, 10 }
 0x372   : > { %s9617_s2 = sshll.u32 %s1767_s25, 9  ;;  %s4802_s27 = sshll.u32 %s1808_s10, 4 }
 0x373   : > { %s1769_s20 = scalar_lea.vmem [#allocation3], %s9615_s24  ;;  %s1776_s16 = scalar_lea.vmem [#allocation4], %s9617_s2 }
 0x374   : > { %s1783_s14 = scalar_lea.vmem [#allocation5], %s9617_s2  ;;  %s9622_s30 = scalar_lea.vmem [#allocation6], %s4802_s27  }
 0x375   : > { %p4803_p6 = scmp.ne.s32.totalorder %s11566_s21, 0 }
 0x377   : > { %1849 = sbr.rel (%p4803_p6) target bundleno = 917 (0x395), region = 318 }
 0x37c   : > { %v7508_v0 = vmov 0.0  }
 0x37d   : > { %1850 = vst [vmem:[#allocation2] sm:$0xff] %v7508_v0 }
 0x37e   : > { %1851 = vst [vmem:[#allocation2 + $0x8] sm:$0xff] %v7508_v0 }
 0x37f   : > { %1852 = vst [vmem:[#allocation2 + $0x10] sm:$0xff] %v7508_v0 }
 0x380   : > { %1853 = vst [vmem:[#allocation2 + $0x18] sm:$0xff] %v7508_v0 }
 0x381   : > { %1854 = vst [vmem:[#allocation2 + $0x20] sm:$0xff] %v7508_v0 }
 0x382   : > { %1855 = vst [vmem:[#allocation2 + $0x28] sm:$0xff] %v7508_v0 }
 0x383   : > { %1856 = vst [vmem:[#allocation2 + $0x30] sm:$0xff] %v7508_v0 }
 0x384   : > { %1857 = vst [vmem:[#allocation2 + $0x38] sm:$0xff] %v7508_v0 }
 0x385   : > { %1858 = vst [vmem:[#allocation2 + $0x40] sm:$0xff] %v7508_v0 }
 0x386   : > { %1859 = vst [vmem:[#allocation2 + $0x48] sm:$0xff] %v7508_v0 }
 0x387   : > { %1860 = vst [vmem:[#allocation2 + $0x50] sm:$0xff] %v7508_v0 }
 0x388   : > { %1861 = vst [vmem:[#allocation2 + $0x58] sm:$0xff] %v7508_v0 }
 0x389   : > { %1862 = vst [vmem:[#allocation2 + $0x60] sm:$0xff] %v7508_v0 }
 0x38a   : > { %1863 = vst [vmem:[#allocation2 + $0x68] sm:$0xff] %v7508_v0 }
 0x38b   : > { %1864 = vst [vmem:[#allocation2 + $0x70] sm:$0xff] %v7508_v0 }
 0x38c   : > { %1865 = vst [vmem:[#allocation2 + $0x78] sm:$0xff] %v7508_v0 }
 0x38d   : > { %1866 = vst [vmem:[#allocation2 + $0x80] sm:$0xff] %v7508_v0 }
 0x38e   : > { %1867 = vst [vmem:[#allocation2 + $0x88] sm:$0xff] %v7508_v0 }
 0x38f   : > { %1868 = vst [vmem:[#allocation2 + $0x90] sm:$0xff] %v7508_v0 }
 0x390   : > { %1869 = vst [vmem:[#allocation2 + $0x98] sm:$0xff] %v7508_v0 }
 0x391   : > { %1870 = vst [vmem:[#allocation2 + $0xa0] sm:$0xff] %v7508_v0 }
 0x392   : > { %1871 = vst [vmem:[#allocation2 + $0xa8] sm:$0xff] %v7508_v0 }
 0x393   : > { %1872 = vst [vmem:[#allocation2 + $0xb0] sm:$0xff] %v7508_v0 }
 0x394   : > { %1873 = vst [vmem:[#allocation2 + $0xb8] sm:$0xff] %v7508_v0 }
 0x395 PF: > { %v1874_v1 = vlaneseq  ;;  %s11567_s6 = sld [smem:[#allocation10_spill]]  ;;  %s9639_s7 = smov 0  }
 0x397   : > { %v9628_v2 = vand.u32 127, %v1874_v1 }
 0x399   : > { %11568 = vst [vmem:[#allocation18_spill] sm:$0xff] %v9628_v2  ;;  %v9631_v3 = vadd.s32 128, %v9628_v2  ;;  %v9634_v4 = vadd.s32 256, %v9628_v2  ;;  %v9637_v5 = vadd.s32 384, %v9628_v2 }
 0x39b   : > { %s9626_s5 = sshll.u32 %s11567_s6, 12  ;;  %11569 = vst [vmem:[#allocation19_spill] sm:$0xff] %v9631_v3 }
 0x39c   : > { %11570 = vst [vmem:[#allocation20_spill] sm:$0xff] %v9634_v4 }
 0x39d   : > { %11571 = vst [vmem:[#allocation21_spill] sm:$0xff] %v9637_v5 }
 0x39e LB: >> { %s1915_s28 = ssub.s32 6000, %s9626_s5  ;;  %s4805_s29 = sshll.u32 %s7468_s7, 3  ;;  %s7468_s7 = sphi %s9639_s7, %s1885_s7  }
 0x39f   : >> { %s1887_s4 = sshra.s32 %s4805_s29, 3  ;;  %v1916_v6 = vstv %s1915_s28  ;;  %s2033_s0 = ssub.s32 5488, %s9626_s5 }
 0x3a0   : >> { %v11572_v2 = vld [vmem:[#allocation18_spill] sm:$0xff]  ;;  %s4918_s17 = sshll.u32 %s1887_s4, 8  ;;  %v9694_v28 = vstv %s2033_s0  ;;  %s2151_s23 = ssub.s32 4976, %s9626_s5 }
 0x3a1   : >> { %s9650_s12 = scalar_lea.vmem %s1769_s20, %s4918_s17 [#allocation3]  ;;  %s9655_s22 = scalar_lea.vmem %s1776_s16, %s4918_s17 [#allocation4]  ;;  %vm1917_vm0 = vcmp.lt.s32.totalorder %v11572_v2, %v1916_v6  ;;  %vm2035_vm4 = vcmp.lt.s32.totalorder %v11572_v2, %v9694_v28 }
 0x3a2   : >> { %v11573_v3 = vld [vmem:[#allocation19_spill] sm:$0xff]  ;;  %v1892_v7 = vld [vmem:[%s9650_s12] sm:$0xff]  ;;  %v1894_v9 = vld [vmem:[%s9650_s12 + $0x10] sm:$0xff]  ;;  %s9667_s13 = scalar_lea.vmem %s1783_s14, %s4918_s17 [#allocation5]  ;;  %s2269_s9 = ssub.s32 4464, %s9626_s5 }
 0x3a3   : >> { %v11574_v4 = vld [vmem:[#allocation20_spill] sm:$0xff]  ;;  %v1893_v8 = vld [vmem:[%s9650_s12 + $0x8] sm:$0xff]  ;;  %vm1918_vm1 = vcmp.lt.s32.totalorder %v11573_v3, %v1916_v6  ;;  %v1895_v10 = vld [vmem:[%s9650_s12 + $0x18] sm:$0xff]  ;;  %v1921_v16 = vsel %vm1917_vm0, %v1892_v7, 0.0  ;;  %vm2036_vm5 = vcmp.lt.s32.totalorder %v11573_v3, %v9694_v28  ;;  %s2387_s11 = ssub.s32 3952, %s9626_s5  ;;  %s2505_s26 = ssub.s32 3440, %s9626_s5 }
 0x3a4   : >> { %v11575_v5 = vld [vmem:[#allocation21_spill] sm:$0xff]  ;;  %vm1919_vm2 = vcmp.lt.s32.totalorder %v11574_v4, %v1916_v6  ;;  %v4809_v11 = vld [vmem:[%s9650_s12 + $0x200] sm:$0xff]  ;;  %v4810_v12 = vld [vmem:[%s9650_s12 + $0x208] sm:$0xff]  ;;  %v1922_v20 = vsel %vm1918_vm1, %v1893_v8, 0.0  ;;  %v1937_v33 = vmul.f32 %v1921_v16, %v1921_v16  ;;  %vm2037_vm6 = vcmp.lt.s32.totalorder %v11574_v4, %v9694_v28  ;;  %s2623_s3 = ssub.s32 2928, %s9626_s5  ;;  %s2741_s8 = ssub.s32 2416, %s9626_s5 }
 0x3a5   : >> { %vm1920_vm3 = vcmp.lt.s32.totalorder %v11575_v5, %v1916_v6  ;;  %v4811_v13 = vld [vmem:[%s9650_s12 + $0x210] sm:$0xff]  ;;  %v4812_v14 = vld [vmem:[%s9650_s12 + $0x218] sm:$0xff]  ;;  %v1905_v15 = vld [vmem:[%s9655_s22] sm:$0xff]  ;;  %v1923_v21 = vsel %vm1919_vm2, %v1894_v9, 0.0  ;;  %v1925_v26 = vsel %vm1917_vm0, %v4809_v11, 0.0  ;;  %v1926_v27 = vsel %vm1918_vm1, %v4810_v12, 0.0 }
 0x3a6   : >> { %v1906_v17 = vld [vmem:[%s9655_s22 + $0x8] sm:$0xff]  ;;  %v1907_v18 = vld [vmem:[%s9655_s22 + $0x10] sm:$0xff]  ;;  %v1908_v19 = vld [vmem:[%s9655_s22 + $0x18] sm:$0xff]  ;;  %v9688_v25 = vsel %vm1920_vm3, %v1895_v10, 0.0  ;;  %v1927_v30 = vsel %vm1919_vm2, %v4811_v13, 0.0  ;;  %v9701_v31 = vsel %vm1920_vm3, %v4812_v14, 0.0  ;;  %v1938_v37 = vmul.f32 %v1922_v20, %v1922_v20 }
 0x3a7   : >> { %v1911_v22 = vld [vmem:[%s9667_s13] sm:$0xff]  ;;  %v1912_v23 = vld [vmem:[%s9667_s13 + $0x8] sm:$0xff]  ;;  %v1913_v24 = vld [vmem:[%s9667_s13 + $0x10] sm:$0xff]  ;;  %v1929_v32 = vsel %vm1917_vm0, %v1905_v15, 0.0  ;;  %v1930_v34 = vsel %vm1918_vm1, %v1906_v17, 0.0  ;;  %v1931_v35 = vsel %vm1919_vm2, %v1907_v18, 0.0  ;;  %v1939_v41 = vmul.f32 %v1923_v21, %v1923_v21 }
 0x3a8   : >> { %v1914_v29 = vld [vmem:[%s9667_s13 + $0x18] sm:$0xff]  ;;  %v9711_v36 = vsel %vm1920_vm3, %v1908_v19, 0.0  ;;  %v1933_v38 = vsel %vm1917_vm0, %v1911_v22, 0.0  ;;  %v1934_v39 = vsel %vm1918_vm1, %v1912_v23, 0.0  ;;  %v1935_v40 = vsel %vm1919_vm2, %v1913_v24, 0.0  ;;  %s10717_s25 = scalar_lea.vmem [#allocation2], %s4805_s29 }
 0x3a9   : >> { %v9721_v42 = vsel %vm1920_vm3, %v1914_v29, 0.0  ;;  %v1940_v43 = vmul.f32 %v9688_v25, %v9688_v25  ;;  %v1941_v44 = vmul.f32 %v1925_v26, %v1925_v26  ;;  %v1942_v45 = vmul.f32 %v1926_v27, %v1926_v27  ;;  %s1885_s7 = sadd.s32 1, %s7468_s7  }
 0x3aa   : >> { %v1943_v46 = vmul.f32 %v1927_v30, %v1927_v30  ;;  %v1944_v47 = vmul.f32 %v9701_v31, %v9701_v31  ;;  %v1945_v48 = vmul.f32 %v1929_v32, %v1929_v32  ;;  %v1946_v49 = vmul.f32 %v1930_v34, %v1930_v34  ;;  %p1882_p7 = scmp.ge.s32.totalorder %s1885_s7, 2  }
 0x3ab   : >> { %v1947_v50 = vmul.f32 %v1931_v35, %v1931_v35  ;;  %v9729_v51 = vmul.f32 %v9711_v36, %v9711_v36  ;;  %v1949_v52 = vmul.f32 %v1933_v38, %v1933_v38  ;;  %v1950_v53 = vmul.f32 %v1934_v39, %v1934_v39  ;;  %s11647_s10 = sld [smem:[#allocation10_spill]] (%p1882_p7) }
 0x3ac   : >> { %v1951_v54 = vmul.f32 %v1935_v40, %v1935_v40  ;;  %v1952_v55 = vmul.f32 %v9721_v42, %v9721_v42  ;;  %v1953_v56 = vmul.f32 %v1929_v32, %v1921_v16  ;;  %v1954_v57 = vmul.f32 %v1930_v34, %v1922_v20 }
 0x3ad   : >> { %v1957_v58 = vmul.f32 %v1933_v38, %v1921_v16  ;;  %v1958_v59 = vmul.f32 %v1934_v39, %v1922_v20  ;;  %v1970_v60 = vadd.f32 %v1922_v20, %v1921_v16  ;;  %v1974_v61 = vadd.f32 %v1926_v27, %v1925_v26 }
 0x3ae   : >> { %v1961_v62 = vmul.f32 %v1929_v32, %v1925_v26  ;;  %v1962_v63 = vmul.f32 %v1930_v34, %v1926_v27  ;;  %v1965_v0 = vmul.f32 %v1933_v38, %v1925_v26  ;;  %v1978_v1 = vadd.f32 %v1938_v37, %v1937_v33 }
 0x3af   : >> { %vm2038_vm7 = vcmp.lt.s32.totalorder %v11575_v5, %v9694_v28  ;;  %v1966_v6 = vmul.f32 %v1934_v39, %v1926_v27  ;;  %v1982_v7 = vadd.f32 %v1942_v45, %v1941_v44  ;;  %v1986_v8 = vadd.f32 %v1930_v34, %v1929_v32 }
 0x3b0   : >> { %v1990_v9 = vadd.f32 %v1934_v39, %v1933_v38  ;;  %v1955_v10 = vmul.f32 %v1931_v35, %v1923_v21  ;;  %v1959_v11 = vmul.f32 %v1935_v40, %v1923_v21  ;;  %v1994_v12 = vadd.f32 %v1946_v49, %v1945_v48  ;;  %v2017_v38 = vld [vmem:[%s9650_s12 + $0x20] sm:$0xff]  ;;  %v2018_v39 = vld [vmem:[%s9650_s12 + $0x28] sm:$0xff]  ;;  %v2020_v48 = vld [vmem:[%s9650_s12 + $0x38] sm:$0xff] }
 0x3b1   : >> { %v1998_v13 = vadd.f32 %v1950_v53, %v1949_v52  ;;  %v1963_v14 = vmul.f32 %v1931_v35, %v1927_v30  ;;  %v1967_v15 = vmul.f32 %v1935_v40, %v1927_v30  ;;  %v1971_v16 = vadd.f32 %v1970_v60, %v1923_v21  ;;  %v4816_v49 = vld [vmem:[%s9650_s12 + $0x228] sm:$0xff]  ;;  %v2027_v60 = vld [vmem:[%s9655_s22 + $0x30] sm:$0xff]  ;;  %p4876_p8 = scmp.ne.s32.totalorder (%p1882_p7), %s11647_s10, 1 }
 0x3b2   : >> { %v1975_v17 = vadd.f32 %v1974_v61, %v1927_v30  ;;  %v1979_v18 = vadd.f32 %v1978_v1, %v1939_v41  ;;  %v2002_v19 = vadd.f32 %v1954_v57, %v1953_v56  ;;  %v2006_v20 = vadd.f32 %v1958_v59, %v1957_v58  ;;  %v2025_v56 = vld [vmem:[%s9655_s22 + $0x20] sm:$0xff]  ;;  %v2026_v59 = vld [vmem:[%s9655_s22 + $0x28] sm:$0xff]  ;;  %v2028_v61 = vld [vmem:[%s9655_s22 + $0x38] sm:$0xff] }
 0x3b3   : >> { %v2010_v22 = vadd.f32 %v1962_v63, %v1961_v62  ;;  %v1983_v23 = vadd.f32 %v1982_v7, %v1943_v46  ;;  %v1987_v24 = vadd.f32 %v1986_v8, %v1931_v35  ;;  %v1991_v26 = vadd.f32 %v1990_v9, %v1935_v40  ;;  %v2019_v40 = vld [vmem:[%s9650_s12 + $0x30] sm:$0xff]  ;;  %v2030_v62 = vld [vmem:[%s9667_s13 + $0x28] sm:$0xff]  ;;  %v2032_v9 = vld [vmem:[%s9667_s13 + $0x38] sm:$0xff] }
 0x3b4   : >> { %v2014_v27 = vadd.f32 %v1966_v6, %v1965_v0  ;;  %v1956_v29 = vmul.f32 %v9711_v36, %v9688_v25  ;;  %v1960_v21 = vmul.f32 %v9721_v42, %v9688_v25  ;;  %v1995_v30 = vadd.f32 %v1994_v12, %v1947_v50  ;;  %v2031_v8 = vld [vmem:[%s9667_s13 + $0x30] sm:$0xff] }
 0x3b5   : >> { %v1999_v32 = vadd.f32 %v1998_v13, %v1951_v54  ;;  %v1964_v33 = vmul.f32 %v9711_v36, %v9701_v31  ;;  %v1968_v34 = vmul.f32 %v9721_v42, %v9701_v31  ;;  %v9750_v35 = vadd.f32 %v1971_v16, %v9688_v25  ;;  %v4815_v25 = vld [vmem:[%s9650_s12 + $0x220] sm:$0xff]  ;;  %v4817_v54 = vld [vmem:[%s9650_s12 + $0x230] sm:$0xff] }
 0x3b6   : >> { %v9753_v37 = vadd.f32 %v1975_v17, %v9701_v31  ;;  %v9758_v41 = vadd.f32 %v1979_v18, %v1940_v43  ;;  %v2003_v44 = vadd.f32 %v2002_v19, %v1955_v10  ;;  %v2007_v45 = vadd.f32 %v2006_v20, %v1959_v11  ;;  %v4818_v43 = vld [vmem:[%s9650_s12 + $0x238] sm:$0xff] }
 0x3b7   : >> { %v2011_v46 = vadd.f32 %v2010_v22, %v1963_v14  ;;  %v1984_v31 = vadd.f32 %v1983_v23, %v1944_v47  ;;  %v1988_v50 = vadd.f32 %v1987_v24, %v9711_v36  ;;  %v1992_v52 = vadd.f32 %v1991_v26, %v9721_v42  ;;  %v2029_v42 = vld [vmem:[%s9667_s13 + $0x20] sm:$0xff] }
 0x3b8   : >> { %v2015_v53 = vadd.f32 %v2014_v27, %v1967_v15  ;;  %v1996_v57 = vadd.f32 %v1995_v30, %v9729_v51  ;;  %v2000_v58 = vadd.f32 %v1999_v32, %v1952_v55  ;;  %v2039_v47 = vsel %vm2035_vm4, %v2017_v38, 0.0 }
 0x3b9   : >> { %v2040_v36 = vsel %vm2036_vm5, %v2018_v39, 0.0  ;;  %v2041_v51 = vsel %vm2037_vm6, %v2019_v40, 0.0  ;;  %v9786_v55 = vsel %vm2038_vm7, %v2020_v48, 0.0  ;;  %v2043_v63 = vsel %vm2035_vm4, %v4815_v25, 0.0 }
 0x3ba   : >> { %v2044_v0 = vsel %vm2036_vm5, %v4816_v49, 0.0  ;;  %v9794_v1 = vadd.f32 %v2003_v44, %v1956_v29  ;;  %v9796_v6 = vadd.f32 %v2007_v45, %v1960_v21  ;;  %v9798_v7 = vadd.f32 %v2011_v46, %v1964_v33 }
 0x3bb   : >> { %v9805_v10 = vsel %vm2037_vm6, %v4817_v54, 0.0  ;;  %v9807_v11 = vadd.f32 %v2015_v53, %v1968_v34  ;;  %v9812_v12 = vsel %vm2038_vm7, %v4818_v43, 0.0  ;;  %v2047_v13 = vsel %vm2035_vm4, %v2025_v56, 0.0 }
 0x3bc   : >> { %v2048_v14 = vsel %vm2036_vm5, %v2026_v59, 0.0  ;;  %v9823_v15 = vsel %vm2037_vm6, %v2027_v60, 0.0  ;;  %v9828_v16 = vsel %vm2038_vm7, %v2028_v61, 0.0  ;;  %v2051_v17 = vsel %vm2035_vm4, %v2029_v42, 0.0 }
 0x3bd   : >> { %v2052_v18 = vsel %vm2036_vm5, %v2030_v62, 0.0  ;;  %v9839_v19 = vsel %vm2037_vm6, %v2031_v8, 0.0  ;;  %v9844_v20 = vsel %vm2038_vm7, %v2032_v9, 0.0  ;;  %v2055_v22 = vmul.f32 %v2039_v47, %v2039_v47 }
 0x3be   : >> { %v2056_v23 = vmul.f32 %v2040_v36, %v2040_v36  ;;  %v2057_v24 = vmul.f32 %v2041_v51, %v2041_v51  ;;  %v9848_v26 = vmul.f32 %v9786_v55, %v9786_v55  ;;  %v2059_v27 = vmul.f32 %v2043_v63, %v2043_v63 }
 0x3bf   : >> { %v2060_v29 = vmul.f32 %v2044_v0, %v2044_v0  ;;  %v2061_v21 = vmul.f32 %v9805_v10, %v9805_v10  ;;  %v9854_v30 = vmul.f32 %v9812_v12, %v9812_v12  ;;  %v2063_v32 = vmul.f32 %v2047_v13, %v2047_v13 }
 0x3c0   : >> { %v2064_v28 = vmul.f32 %v2048_v14, %v2048_v14  ;;  %v2065_v33 = vmul.f32 %v9823_v15, %v9823_v15  ;;  %v9860_v34 = vmul.f32 %v9828_v16, %v9828_v16  ;;  %v2067_v38 = vmul.f32 %v2051_v17, %v2051_v17 }
 0x3c1   : >> { %v2068_v39 = vmul.f32 %v2052_v18, %v2052_v18  ;;  %v2069_v40 = vmul.f32 %v9839_v19, %v9839_v19  ;;  %v9866_v44 = vmul.f32 %v9844_v20, %v9844_v20  ;;  %v2071_v45 = vmul.f32 %v2047_v13, %v2039_v47 }
 0x3c2   : >> { %v2087_v46 = vadd.f32 %v2039_v47, %v9750_v35  ;;  %v2072_v48 = vmul.f32 %v2048_v14, %v2040_v36  ;;  %v2073_v25 = vmul.f32 %v9823_v15, %v2041_v51  ;;  %v9872_v49 = vmul.f32 %v9828_v16, %v9786_v55 }
 0x3c3   : >> { %11576 = vst [vmem:[#allocation22_spill] sm:$0xff] %v9866_v44  ;;  %v2091_v53 = vadd.f32 %v2043_v63, %v9753_v37  ;;  %v2075_v54 = vmul.f32 %v2051_v17, %v2039_v47  ;;  %v2076_v43 = vmul.f32 %v2052_v18, %v2040_v36  ;;  %v2095_v56 = vadd.f32 %v2055_v22, %v9758_v41 }
 0x3c4   : >> { %11577 = vst [vmem:[#allocation23_spill] sm:$0xff] %v9872_v49  ;;  %v2099_v59 = vadd.f32 %v2059_v27, %v1984_v31  ;;  %v2088_v60 = vadd.f32 %v2087_v46, %v2040_v36  ;;  %v2103_v61 = vadd.f32 %v2047_v13, %v1988_v50  ;;  %v2107_v42 = vadd.f32 %v2051_v17, %v1992_v52 }
 0x3c5   : >> { %v2111_v62 = vadd.f32 %v2063_v32, %v1996_v57  ;;  %v2077_v35 = vmul.f32 %v9839_v19, %v2041_v51  ;;  %v9879_v8 = vmul.f32 %v9844_v20, %v9786_v55  ;;  %v2079_v9 = vmul.f32 %v2047_v13, %v2043_v63 }
 0x3c6   : >> { %v2115_v49 = vadd.f32 %v2067_v38, %v2000_v58  ;;  %v2080_v44 = vmul.f32 %v2048_v14, %v2044_v0  ;;  %v2081_v37 = vmul.f32 %v9823_v15, %v9805_v10  ;;  %v2083_v47 = vmul.f32 %v2051_v17, %v2043_v63 }
 0x3c7   : >> { %v2092_v41 = vadd.f32 %v2091_v53, %v2044_v0  ;;  %v9885_v31 = vmul.f32 %v9828_v16, %v9812_v12  ;;  %v2084_v50 = vmul.f32 %v2052_v18, %v2044_v0  ;;  %v2096_v52 = vadd.f32 %v2095_v56, %v2056_v23  ;;  %v2147_v56 = vld [vmem:[%s9667_s13 + $0x40] sm:$0xff] }
 0x3c8   : >> { %v2100_v57 = vadd.f32 %v2099_v59, %v2060_v29  ;;  %v2089_v36 = vadd.f32 %v2088_v60, %v2041_v51  ;;  %v2104_v22 = vadd.f32 %v2103_v61, %v2048_v14  ;;  %v2108_v27 = vadd.f32 %v2107_v42, %v2052_v18 }
 0x3c9   : >> { %v2112_v32 = vadd.f32 %v2111_v62, %v2064_v28  ;;  %v2116_v13 = vadd.f32 %v2115_v49, %v2068_v39  ;;  %v2119_v58 = vadd.f32 %v2071_v45, %v9794_v1  ;;  %v2123_v38 = vadd.f32 %v2075_v54, %v9796_v6  ;;  %v4819_v54 = vld [vmem:[%s9650_s12 + $0x240] sm:$0xff]  ;;  %v4822_v62 = vld [vmem:[%s9650_s12 + $0x258] sm:$0xff] }
 0x3ca   : >> { %v2127_v63 = vadd.f32 %v2079_v9, %v9798_v7  ;;  %v2085_v17 = vmul.f32 %v9839_v19, %v9805_v10  ;;  %v2086_v0 = vmul.f32 %v9844_v20, %v9812_v12  ;;  %v2093_v51 = vadd.f32 %v2092_v41, %v9805_v10  ;;  %v11578_v61 = vld [vmem:[#allocation22_spill] sm:$0xff]  ;;  %v2144_v9 = vld [vmem:[%s9655_s22 + $0x48] sm:$0xff] }
 0x3cb   : >> { %v2131_v14 = vadd.f32 %v2083_v47, %v9807_v11  ;;  %v2120_v18 = vadd.f32 %v2119_v58, %v2072_v48  ;;  %v2124_v23 = vadd.f32 %v2123_v38, %v2076_v43  ;;  %v2152_v28 = vstv %s2151_s23  ;;  %v2135_v48 = vld [vmem:[%s9650_s12 + $0x40] sm:$0xff]  ;;  %v2146_v47 = vld [vmem:[%s9655_s22 + $0x58] sm:$0xff] }
 0x3cc   : >> { %v2128_v29 = vadd.f32 %v2127_v63, %v2080_v44  ;;  %v2097_v1 = vadd.f32 %v2096_v52, %v2057_v24  ;;  %v2101_v6 = vadd.f32 %v2100_v57, %v2061_v21  ;;  %v2105_v7 = vadd.f32 %v2104_v22, %v9823_v15  ;;  %v2136_v21 = vld [vmem:[%s9650_s12 + $0x48] sm:$0xff]  ;;  %v2143_v43 = vld [vmem:[%s9655_s22 + $0x40] sm:$0xff]  ;;  %v2149_v22 = vld [vmem:[%s9667_s13 + $0x50] sm:$0xff] }
 0x3cd   : >> { %v2132_v39 = vadd.f32 %v2131_v14, %v2084_v50  ;;  %v9899_v45 = vadd.f32 %v2089_v36, %v9786_v55  ;;  %v2109_v46 = vadd.f32 %v2108_v27, %v9839_v19  ;;  %v2113_v10 = vadd.f32 %v2112_v32, %v2065_v33  ;;  %v2137_v19 = vld [vmem:[%s9650_s12 + $0x50] sm:$0xff]  ;;  %v2138_v33 = vld [vmem:[%s9650_s12 + $0x58] sm:$0xff]  ;;  %v2148_v36 = vld [vmem:[%s9667_s13 + $0x48] sm:$0xff] }
 0x3ce   : >> { %v2117_v49 = vadd.f32 %v2116_v13, %v2069_v40  ;;  %v2121_v11 = vadd.f32 %v2120_v18, %v2073_v25  ;;  %vm2153_vm8 = vcmp.lt.s32.totalorder %v11572_v2, %v2152_v28  ;;  %vm2154_vm9 = vcmp.lt.s32.totalorder %v11573_v3, %v2152_v28  ;;  %v2150_v27 = vld [vmem:[%s9667_s13 + $0x58] sm:$0xff] }
 0x3cf   : >> { %vm2155_vm10 = vcmp.lt.s32.totalorder %v11574_v4, %v2152_v28  ;;  %v2125_v15 = vadd.f32 %v2124_v23, %v2077_v35  ;;  %v2129_v24 = vadd.f32 %v2128_v29, %v2081_v37  ;;  %v2133_v55 = vadd.f32 %v2132_v39, %v2085_v17  ;;  %v2145_v37 = vld [vmem:[%s9655_s22 + $0x50] sm:$0xff] }
 0x3d0   : >> { %vm2156_vm11 = vcmp.lt.s32.totalorder %v11575_v5, %v2152_v28  ;;  %v2094_v40 = vadd.f32 %v2093_v51, %v9812_v12  ;;  %v2098_v44 = vadd.f32 %v2097_v1, %v9848_v26  ;;  %v2102_v25 = vadd.f32 %v2101_v6, %v9854_v30  ;;  %v4820_v12 = vld [vmem:[%s9650_s12 + $0x248] sm:$0xff]  ;;  %v4821_v26 = vld [vmem:[%s9650_s12 + $0x250] sm:$0xff] }
 0x3d1   : >> { %v9914_v53 = vadd.f32 %v2105_v7, %v9828_v16  ;;  %v2110_v59 = vadd.f32 %v2109_v46, %v9844_v20  ;;  %v2114_v60 = vadd.f32 %v2113_v10, %v9860_v34  ;;  %v2118_v42 = vadd.f32 %v2117_v49, %v11578_v61  ;;  %v11579_v16 = vld [vmem:[#allocation23_spill] sm:$0xff] }
 0x3d2   : >> { %v2157_v30 = vsel %vm2153_vm8, %v2135_v48, 0.0  ;;  %v9928_v35 = vadd.f32 %v2121_v11, %v11579_v16  ;;  %v2158_v20 = vsel %vm2154_vm9, %v2136_v21, 0.0  ;;  %v9937_v34 = vsel %vm2155_vm10, %v2137_v19, 0.0 }
 0x3d3   : >> { %v9941_v41 = vsel %vm2156_vm11, %v2138_v33, 0.0  ;;  %v9944_v50 = vadd.f32 %v2125_v15, %v9879_v8  ;;  %v9947_v52 = vadd.f32 %v2129_v24, %v9885_v31  ;;  %v9949_v57 = vadd.f32 %v2133_v55, %v2086_v0 }
 0x3d4   : >> { %v2161_v32 = vsel %vm2153_vm8, %v4819_v54, 0.0  ;;  %v2162_v13 = vsel %vm2154_vm9, %v4820_v12, 0.0  ;;  %v9960_v58 = vsel %vm2155_vm10, %v4821_v26, 0.0  ;;  %v9964_v8 = vsel %vm2156_vm11, %v4822_v62, 0.0 }
 0x3d5   : >> { %v2165_v31 = vsel %vm2153_vm8, %v2143_v43, 0.0  ;;  %v2166_v38 = vsel %vm2154_vm9, %v2144_v9, 0.0  ;;  %v9972_v63 = vsel %vm2155_vm10, %v2145_v37, 0.0  ;;  %v9976_v17 = vsel %vm2156_vm11, %v2146_v47, 0.0 }
 0x3d6   : >> { %v2169_v0 = vsel %vm2153_vm8, %v2147_v56, 0.0  ;;  %v2170_v51 = vsel %vm2154_vm9, %v2148_v36, 0.0  ;;  %v9984_v14 = vsel %vm2155_vm10, %v2149_v22, 0.0  ;;  %v9988_v18 = vsel %vm2156_vm11, %v2150_v27, 0.0 }
 0x3d7   : >> { %v2173_v23 = vmul.f32 %v2157_v30, %v2157_v30  ;;  %v2174_v29 = vmul.f32 %v2158_v20, %v2158_v20  ;;  %v2175_v1 = vmul.f32 %v9937_v34, %v9937_v34  ;;  %v9994_v6 = vmul.f32 %v9941_v41, %v9941_v41 }
 0x3d8   : >> { %v2177_v7 = vmul.f32 %v2161_v32, %v2161_v32  ;;  %v2178_v39 = vmul.f32 %v2162_v13, %v2162_v13  ;;  %v2179_v46 = vmul.f32 %v9960_v58, %v9960_v58  ;;  %v10000_v10 = vmul.f32 %v9964_v8, %v9964_v8 }
 0x3d9   : >> { %v2181_v28 = vmul.f32 %v2165_v31, %v2165_v31  ;;  %v2182_v49 = vmul.f32 %v2166_v38, %v2166_v38  ;;  %v2183_v11 = vmul.f32 %v9972_v63, %v9972_v63  ;;  %v10006_v48 = vmul.f32 %v9976_v17, %v9976_v17 }
 0x3da   : >> { %v2185_v15 = vmul.f32 %v2169_v0, %v2169_v0  ;;  %v2186_v24 = vmul.f32 %v2170_v51, %v2170_v51  ;;  %v2187_v55 = vmul.f32 %v9984_v14, %v9984_v14  ;;  %v10012_v21 = vmul.f32 %v9988_v18, %v9988_v18 }
 0x3db   : >> { %v2189_v19 = vmul.f32 %v2165_v31, %v2157_v30  ;;  %v2190_v33 = vmul.f32 %v2166_v38, %v2158_v20  ;;  %v2191_v54 = vmul.f32 %v9972_v63, %v9937_v34  ;;  %v10018_v43 = vmul.f32 %v9976_v17, %v9941_v41 }
 0x3dc   : >> { %11580 = vst [vmem:[#allocation22_spill] sm:$0xff] %v10012_v21  ;;  %v2205_v56 = vadd.f32 %v2157_v30, %v9899_v45  ;;  %v2193_v61 = vmul.f32 %v2169_v0, %v2157_v30  ;;  %v2209_v12 = vadd.f32 %v2161_v32, %v2094_v40  ;;  %v2213_v26 = vadd.f32 %v2173_v23, %v2098_v44 }
 0x3dd   : >> { %11581 = vst [vmem:[#allocation23_spill] sm:$0xff] %v10018_v43  ;;  %v2217_v62 = vadd.f32 %v2177_v7, %v2102_v25  ;;  %v2194_v16 = vmul.f32 %v2170_v51, %v2158_v20  ;;  %v2195_v9 = vmul.f32 %v9984_v14, %v9937_v34  ;;  %v10025_v37 = vmul.f32 %v9988_v18, %v9941_v41 }
 0x3de   : >> { %v2221_v47 = vadd.f32 %v2165_v31, %v9914_v53  ;;  %v2206_v36 = vadd.f32 %v2205_v56, %v2158_v20  ;;  %v2225_v22 = vadd.f32 %v2169_v0, %v2110_v59  ;;  %v2229_v27 = vadd.f32 %v2181_v28, %v2114_v60 }
 0x3df   : >> { %11582 = vst [vmem:[#allocation24_spill] sm:$0xff] %v10025_v37  ;;  %v2233_v43 = vadd.f32 %v2185_v15, %v2118_v42  ;;  %v2197_v45 = vmul.f32 %v2165_v31, %v2161_v32  ;;  %v2198_v30 = vmul.f32 %v2166_v38, %v2162_v13  ;;  %v2199_v40 = vmul.f32 %v9972_v63, %v9960_v58 }
 0x3e0   : >> { %v2201_v44 = vmul.f32 %v2169_v0, %v2161_v32  ;;  %v10032_v25 = vmul.f32 %v9976_v17, %v9964_v8  ;;  %v2210_v23 = vadd.f32 %v2209_v12, %v2162_v13  ;;  %v2214_v7 = vadd.f32 %v2213_v26, %v2174_v29 }
 0x3e1   : >> { %v2218_v37 = vadd.f32 %v2217_v62, %v2178_v39  ;;  %v2202_v21 = vmul.f32 %v2170_v51, %v2162_v13  ;;  %v2203_v53 = vmul.f32 %v9984_v14, %v9960_v58  ;;  %v2204_v59 = vmul.f32 %v9988_v18, %v9964_v8 }
 0x3e2   : >> { %v2222_v60 = vadd.f32 %v2221_v47, %v2166_v38  ;;  %v2207_v42 = vadd.f32 %v2206_v36, %v9937_v34  ;;  %v2226_v20 = vadd.f32 %v2225_v22, %v2170_v51  ;;  %v2230_v32 = vadd.f32 %v2229_v27, %v2182_v49  ;;  %v2262_v36 = vld [vmem:[%s9655_s22 + $0x68] sm:$0xff]  ;;  %v2263_v22 = vld [vmem:[%s9655_s22 + $0x70] sm:$0xff] }
 0x3e3   : >> { %v2234_v31 = vadd.f32 %v2233_v43, %v2186_v24  ;;  %v2237_v0 = vadd.f32 %v2189_v19, %v9928_v35  ;;  %v2241_v29 = vadd.f32 %v2193_v61, %v9944_v50  ;;  %v2245_v13 = vadd.f32 %v2197_v45, %v9947_v52  ;;  %v2253_v24 = vld [vmem:[%s9650_s12 + $0x60] sm:$0xff]  ;;  %v4824_v43 = vld [vmem:[%s9650_s12 + $0x268] sm:$0xff] }
 0x3e4   : >> { %v2249_v39 = vadd.f32 %v2201_v44, %v9949_v57  ;;  %v2211_v28 = vadd.f32 %v2210_v23, %v9960_v58  ;;  %v2215_v15 = vadd.f32 %v2214_v7, %v2175_v1  ;;  %v2219_v56 = vadd.f32 %v2218_v37, %v2179_v46  ;;  %v2255_v46 = vld [vmem:[%s9650_s12 + $0x70] sm:$0xff]  ;;  %v2261_v61 = vld [vmem:[%s9655_s22 + $0x60] sm:$0xff]  ;;  %v11584_v45 = vld [vmem:[#allocation23_spill] sm:$0xff] }
 0x3e5   : >> { %v2270_v38 = vstv %s2269_s9  ;;  %v2238_v12 = vadd.f32 %v2237_v0, %v2190_v33  ;;  %v2242_v26 = vadd.f32 %v2241_v29, %v2194_v16  ;;  %v2246_v34 = vadd.f32 %v2245_v13, %v2198_v30  ;;  %v11583_v37 = vld [vmem:[#allocation22_spill] sm:$0xff] }
 0x3e6   : >> { %v2250_v51 = vadd.f32 %v2249_v39, %v2202_v21  ;;  %v2223_v35 = vadd.f32 %v2222_v60, %v9972_v63  ;;  %v2227_v50 = vadd.f32 %v2226_v20, %v9984_v14  ;;  %v2231_v49 = vadd.f32 %v2230_v32, %v2183_v11  ;;  %v2254_v14 = vld [vmem:[%s9650_s12 + $0x68] sm:$0xff]  ;;  %v2256_v11 = vld [vmem:[%s9650_s12 + $0x78] sm:$0xff]  ;;  %v2267_v60 = vld [vmem:[%s9667_s13 + $0x70] sm:$0xff] }
 0x3e7   : >> { %v2235_v52 = vadd.f32 %v2234_v31, %v2187_v55  ;;  %vm2271_vm12 = vcmp.lt.s32.totalorder %v11572_v2, %v2270_v38  ;;  %vm2272_vm13 = vcmp.lt.s32.totalorder %v11573_v3, %v2270_v38  ;;  %vm2273_vm14 = vcmp.lt.s32.totalorder %v11574_v4, %v2270_v38 }
 0x3e8   : >> { %vm2274_vm15 = vcmp.lt.s32.totalorder %v11575_v5, %v2270_v38  ;;  %v2239_v57 = vadd.f32 %v2238_v12, %v2191_v54  ;;  %v2243_v58 = vadd.f32 %v2242_v26, %v2195_v9  ;;  %v2247_v1 = vadd.f32 %v2246_v34, %v2199_v40  ;;  %v4823_v54 = vld [vmem:[%s9650_s12 + $0x260] sm:$0xff]  ;;  %v11585_v40 = vld [vmem:[#allocation24_spill] sm:$0xff] }
 0x3e9   : >> { %v2251_v63 = vadd.f32 %v2250_v51, %v2203_v53  ;;  %v2208_v55 = vadd.f32 %v2207_v42, %v9941_v41  ;;  %v2212_v21 = vadd.f32 %v2211_v28, %v9964_v8  ;;  %v2216_v19 = vadd.f32 %v2215_v15, %v9994_v6  ;;  %v4825_v41 = vld [vmem:[%s9650_s12 + $0x270] sm:$0xff]  ;;  %v4826_v8 = vld [vmem:[%s9650_s12 + $0x278] sm:$0xff]  ;;  %v2265_v6 = vld [vmem:[%s9667_s13 + $0x60] sm:$0xff] }
 0x3ea   : >> { %v2220_v33 = vadd.f32 %v2219_v56, %v10000_v10  ;;  %v2224_v62 = vadd.f32 %v2223_v35, %v9976_v17  ;;  %v2228_v16 = vadd.f32 %v2227_v50, %v9988_v18  ;;  %v2232_v9 = vadd.f32 %v2231_v49, %v10006_v48  ;;  %v2264_v10 = vld [vmem:[%s9655_s22 + $0x78] sm:$0xff]  ;;  %v2266_v53 = vld [vmem:[%s9667_s13 + $0x68] sm:$0xff] }
 0x3eb   : >> { %v2236_v47 = vadd.f32 %v2235_v52, %v11583_v37  ;;  %v2275_v27 = vsel %vm2271_vm12, %v2253_v24, 0.0  ;;  %v2276_v17 = vsel %vm2272_vm13, %v2254_v14, 0.0  ;;  %v10078_v18 = vsel %vm2273_vm14, %v2255_v46, 0.0  ;;  %v2268_v42 = vld [vmem:[%s9667_s13 + $0x78] sm:$0xff] }
 0x3ec   : >> { %v10082_v48 = vsel %vm2274_vm15, %v2256_v11, 0.0  ;;  %v10085_v30 = vadd.f32 %v2239_v57, %v11584_v45  ;;  %v10088_v44 = vadd.f32 %v2243_v58, %v11585_v40  ;;  %v10091_v23 = vadd.f32 %v2247_v1, %v10032_v25 }
 0x3ed   : >> { %v10093_v7 = vadd.f32 %v2251_v63, %v2204_v59  ;;  %v2279_v20 = vsel %vm2271_vm12, %v4823_v54, 0.0  ;;  %v2280_v32 = vsel %vm2272_vm13, %v4824_v43, 0.0  ;;  %v2281_v31 = vsel %vm2273_vm14, %v4825_v41, 0.0 }
 0x3ee   : >> { %v10106_v0 = vsel %vm2274_vm15, %v4826_v8, 0.0  ;;  %v2283_v25 = vsel %vm2271_vm12, %v2261_v61, 0.0  ;;  %v2284_v59 = vsel %vm2272_vm13, %v2262_v36, 0.0  ;;  %v10114_v29 = vsel %vm2273_vm14, %v2263_v22, 0.0 }
 0x3ef   : >> { %v10118_v13 = vsel %vm2274_vm15, %v2264_v10, 0.0  ;;  %v2287_v39 = vsel %vm2271_vm12, %v2265_v6, 0.0  ;;  %v2288_v28 = vsel %vm2272_vm13, %v2266_v53, 0.0  ;;  %v2289_v15 = vsel %vm2273_vm14, %v2267_v60, 0.0 }
 0x3f0   : >> { %v10128_v56 = vsel %vm2274_vm15, %v2268_v42, 0.0  ;;  %v2291_v12 = vmul.f32 %v2275_v27, %v2275_v27  ;;  %v2292_v26 = vmul.f32 %v2276_v17, %v2276_v17  ;;  %v2293_v34 = vmul.f32 %v10078_v18, %v10078_v18 }
 0x3f1   : >> { %v10134_v51 = vmul.f32 %v10082_v48, %v10082_v48  ;;  %v2295_v35 = vmul.f32 %v2279_v20, %v2279_v20  ;;  %v2296_v50 = vmul.f32 %v2280_v32, %v2280_v32  ;;  %v2297_v49 = vmul.f32 %v2281_v31, %v2281_v31 }
 0x3f2   : >> { %v10138_v52 = vmul.f32 %v10106_v0, %v10106_v0  ;;  %v2299_v24 = vmul.f32 %v2283_v25, %v2283_v25  ;;  %v2300_v38 = vmul.f32 %v2284_v59, %v2284_v59  ;;  %v2301_v57 = vmul.f32 %v10114_v29, %v10114_v29 }
 0x3f3   : >> { %v10144_v58 = vmul.f32 %v10118_v13, %v10118_v13  ;;  %v2303_v1 = vmul.f32 %v2287_v39, %v2287_v39  ;;  %v2304_v63 = vmul.f32 %v2288_v28, %v2288_v28  ;;  %v2305_v14 = vmul.f32 %v2289_v15, %v2289_v15 }
 0x3f4   : >> { %v10148_v46 = vmul.f32 %v10128_v56, %v10128_v56  ;;  %v2307_v11 = vmul.f32 %v2283_v25, %v2275_v27  ;;  %v2308_v54 = vmul.f32 %v2284_v59, %v2276_v17  ;;  %v2309_v43 = vmul.f32 %v10114_v29, %v10078_v18 }
 0x3f5   : >> { %11586 = vst [vmem:[#allocation22_spill] sm:$0xff] %v10144_v58  ;;  %v10154_v61 = vmul.f32 %v10118_v13, %v10082_v48  ;;  %v2323_v37 = vadd.f32 %v2275_v27, %v2208_v55  ;;  %v2327_v41 = vadd.f32 %v2279_v20, %v2212_v21  ;;  %v2331_v8 = vadd.f32 %v2291_v12, %v2216_v19 }
 0x3f6   : >> { %11587 = vst [vmem:[#allocation23_spill] sm:$0xff] %v10148_v46  ;;  %v2335_v36 = vadd.f32 %v2295_v35, %v2220_v33  ;;  %v2311_v6 = vmul.f32 %v2287_v39, %v2275_v27  ;;  %v2339_v22 = vadd.f32 %v2283_v25, %v2224_v62  ;;  %v2343_v10 = vadd.f32 %v2287_v39, %v2228_v16 }
 0x3f7   : >> { %11588 = vst [vmem:[#allocation24_spill] sm:$0xff] %v10154_v61  ;;  %v2347_v45 = vadd.f32 %v2299_v24, %v2232_v9  ;;  %v2312_v40 = vmul.f32 %v2288_v28, %v2276_v17  ;;  %v2313_v53 = vmul.f32 %v2289_v15, %v10078_v18  ;;  %v10159_v60 = vmul.f32 %v10128_v56, %v10082_v48 }
 0x3f8   : >> { %v2351_v42 = vadd.f32 %v2303_v1, %v2236_v47  ;;  %v2324_v46 = vadd.f32 %v2323_v37, %v2276_v17  ;;  %v2328_v58 = vadd.f32 %v2327_v41, %v2280_v32  ;;  %v2332_v61 = vadd.f32 %v2331_v8, %v2292_v26 }
 0x3f9   : >> { %v2336_v55 = vadd.f32 %v2335_v36, %v2296_v50  ;;  %v2315_v21 = vmul.f32 %v2283_v25, %v2279_v20  ;;  %v2316_v19 = vmul.f32 %v2284_v59, %v2280_v32  ;;  %v2317_v33 = vmul.f32 %v10114_v29, %v2281_v31 }
 0x3fa   : >> { %v2319_v62 = vmul.f32 %v2287_v39, %v2279_v20  ;;  %v2318_v16 = vmul.f32 %v10118_v13, %v10106_v0  ;;  %v2340_v9 = vadd.f32 %v2339_v22, %v2284_v59  ;;  %v2344_v27 = vadd.f32 %v2343_v10, %v2288_v28  ;;  %v2383_v22 = vld [vmem:[%s9667_s13 + $0x80] sm:$0xff] }
 0x3fb   : >> { %v2348_v12 = vadd.f32 %v2347_v45, %v2300_v38  ;;  %v2320_v35 = vmul.f32 %v2288_v28, %v2280_v32  ;;  %v2321_v24 = vmul.f32 %v2289_v15, %v2281_v31  ;;  %v2322_v47 = vmul.f32 %v10128_v56, %v10106_v0 }
 0x3fc   : >> { %v2352_v17 = vadd.f32 %v2351_v42, %v2304_v63  ;;  %v2325_v26 = vadd.f32 %v2324_v46, %v10078_v18  ;;  %v2329_v25 = vadd.f32 %v2328_v58, %v2281_v31  ;;  %v2333_v50 = vadd.f32 %v2332_v61, %v2293_v34  ;;  %v2373_v58 = vld [vmem:[%s9650_s12 + $0x90] sm:$0xff] }
 0x3fd   : >> { %v2337_v1 = vadd.f32 %v2336_v55, %v2297_v49  ;;  %v2355_v20 = vadd.f32 %v2307_v11, %v10085_v30  ;;  %v2359_v39 = vadd.f32 %v2311_v6, %v10088_v44  ;;  %v2363_v59 = vadd.f32 %v2315_v21, %v10091_v23  ;;  %v2374_v11 = vld [vmem:[%s9650_s12 + $0x98] sm:$0xff]  ;;  %v4829_v6 = vld [vmem:[%s9650_s12 + $0x290] sm:$0xff]  ;;  %v11590_v10 = vld [vmem:[#allocation23_spill] sm:$0xff] }
 0x3fe   : >> { %v2367_v38 = vadd.f32 %v2319_v62, %v10093_v7  ;;  %v2341_v32 = vadd.f32 %v2340_v9, %v10114_v29  ;;  %v2345_v28 = vadd.f32 %v2344_v27, %v2289_v15  ;;  %v2349_v63 = vadd.f32 %v2348_v12, %v2301_v57  ;;  %v2371_v15 = vld [vmem:[%s9650_s12 + $0x80] sm:$0xff]  ;;  %v2372_v57 = vld [vmem:[%s9650_s12 + $0x88] sm:$0xff]  ;;  %v2381_v42 = vld [vmem:[%s9655_s22 + $0x90] sm:$0xff] }
 0x3ff   : >> { %v2388_v37 = vstv %s2387_s11  ;;  %v2356_v18 = vadd.f32 %v2355_v20, %v2308_v54  ;;  %v2360_v31 = vadd.f32 %v2359_v39, %v2312_v40  ;;  %v2364_v34 = vadd.f32 %v2363_v59, %v2316_v19  ;;  %v4827_v54 = vld [vmem:[%s9650_s12 + $0x280] sm:$0xff]  ;;  %v4830_v40 = vld [vmem:[%s9650_s12 + $0x298] sm:$0xff]  ;;  %v11591_v55 = vld [vmem:[#allocation24_spill] sm:$0xff] }
 0x400   : >> { %v2368_v49 = vadd.f32 %v2367_v38, %v2320_v35  ;;  %v10174_v30 = vadd.f32 %v2325_v26, %v10082_v48  ;;  %v2353_v44 = vadd.f32 %v2352_v17, %v2305_v14  ;;  %vm2389_vm0 = vcmp.lt.s32.totalorder %v11572_v2, %v2388_v37  ;;  %v2382_v62 = vld [vmem:[%s9655_s22 + $0x98] sm:$0xff]  ;;  %v2384_v9 = vld [vmem:[%s9667_s13 + $0x88] sm:$0xff]  ;;  %v2385_v27 = vld [vmem:[%s9667_s13 + $0x90] sm:$0xff] }
 0x401   : >> { %vm2390_vm1 = vcmp.lt.s32.totalorder %v11573_v3, %v2388_v37  ;;  %v2357_v23 = vadd.f32 %v2356_v18, %v2309_v43  ;;  %v2361_v7 = vadd.f32 %v2360_v31, %v2313_v53  ;;  %v2365_v29 = vadd.f32 %v2364_v34, %v2317_v33  ;;  %v2379_v43 = vld [vmem:[%s9655_s22 + $0x80] sm:$0xff]  ;;  %v2380_v53 = vld [vmem:[%s9655_s22 + $0x88] sm:$0xff] }
 0x402   : >> { %vm2391_vm2 = vcmp.lt.s32.totalorder %v11574_v4, %v2388_v37  ;;  %v10183_v48 = vadd.f32 %v2329_v25, %v10106_v0  ;;  %v10186_v14 = vadd.f32 %v2333_v50, %v10134_v51  ;;  %v2369_v46 = vadd.f32 %v2368_v49, %v2321_v24  ;;  %v11589_v0 = vld [vmem:[#allocation22_spill] sm:$0xff]  ;;  %v4828_v51 = vld [vmem:[%s9650_s12 + $0x288] sm:$0xff]  ;;  %v2386_v24 = vld [vmem:[%s9667_s13 + $0x98] sm:$0xff] }
 0x403   : >> { %vm2392_vm3 = vcmp.lt.s32.totalorder %v11575_v5, %v2388_v37  ;;  %v2338_v61 = vadd.f32 %v2337_v1, %v10138_v52  ;;  %v2342_v41 = vadd.f32 %v2341_v32, %v10118_v13  ;;  %v2346_v8 = vadd.f32 %v2345_v28, %v10128_v56 }
 0x404   : >> { %v2350_v36 = vadd.f32 %v2349_v63, %v11589_v0  ;;  %v2354_v45 = vadd.f32 %v2353_v44, %v11590_v10  ;;  %v2393_v52 = vsel %vm2389_vm0, %v2371_v15, 0.0  ;;  %v2394_v13 = vsel %vm2390_vm1, %v2372_v57, 0.0 }
 0x405   : >> { %v10209_v56 = vsel %vm2391_vm2, %v2373_v58, 0.0  ;;  %v10212_v21 = vadd.f32 %v2357_v23, %v11591_v55  ;;  %v10215_v19 = vadd.f32 %v2361_v7, %v10159_v60  ;;  %v10217_v33 = vadd.f32 %v2365_v29, %v2318_v16 }
 0x406   : >> { %v10224_v12 = vsel %vm2392_vm3, %v2374_v11, 0.0  ;;  %v10226_v35 = vadd.f32 %v2369_v46, %v2322_v47  ;;  %v2397_v17 = vsel %vm2389_vm0, %v4827_v54, 0.0  ;;  %v2398_v26 = vsel %vm2390_vm1, %v4828_v51, 0.0 }
 0x407   : >> { %v2399_v60 = vsel %vm2391_vm2, %v4829_v6, 0.0  ;;  %v10237_v16 = vsel %vm2392_vm3, %v4830_v40, 0.0  ;;  %v2401_v25 = vsel %vm2389_vm0, %v2379_v43, 0.0  ;;  %v2402_v47 = vsel %vm2390_vm1, %v2380_v53, 0.0 }
 0x408   : >> { %v2403_v50 = vsel %vm2391_vm2, %v2381_v42, 0.0  ;;  %v10247_v1 = vsel %vm2392_vm3, %v2382_v62, 0.0  ;;  %v2405_v20 = vsel %vm2389_vm0, %v2383_v22, 0.0  ;;  %v2406_v39 = vsel %vm2390_vm1, %v2384_v9, 0.0 }
 0x409   : >> { %v2407_v59 = vsel %vm2391_vm2, %v2385_v27, 0.0  ;;  %v10257_v38 = vsel %vm2392_vm3, %v2386_v24, 0.0  ;;  %v2409_v32 = vmul.f32 %v2393_v52, %v2393_v52  ;;  %v2410_v28 = vmul.f32 %v2394_v13, %v2394_v13 }
 0x40a   : >> { %v2411_v63 = vmul.f32 %v10209_v56, %v10209_v56  ;;  %v10263_v18 = vmul.f32 %v10224_v12, %v10224_v12  ;;  %v2413_v31 = vmul.f32 %v2397_v17, %v2397_v17  ;;  %v2414_v34 = vmul.f32 %v2398_v26, %v2398_v26 }
 0x40b   : >> { %v2415_v49 = vmul.f32 %v2399_v60, %v2399_v60  ;;  %v10267_v44 = vmul.f32 %v10237_v16, %v10237_v16  ;;  %v2417_v23 = vmul.f32 %v2401_v25, %v2401_v25  ;;  %v2418_v37 = vmul.f32 %v2402_v47, %v2402_v47 }
 0x40c   : >> { %11592 = vst [vmem:[#allocation22_spill] sm:$0xff] %v10263_v18  ;;  %v2419_v7 = vmul.f32 %v2403_v50, %v2403_v50  ;;  %v10271_v29 = vmul.f32 %v10247_v1, %v10247_v1  ;;  %v2421_v15 = vmul.f32 %v2405_v20, %v2405_v20  ;;  %v2422_v57 = vmul.f32 %v2406_v39, %v2406_v39 }
 0x40d   : >> { %11593 = vst [vmem:[#allocation23_spill] sm:$0xff] %v10267_v44  ;;  %v2423_v58 = vmul.f32 %v2407_v59, %v2407_v59  ;;  %v10275_v46 = vmul.f32 %v10257_v38, %v10257_v38  ;;  %v2425_v11 = vmul.f32 %v2401_v25, %v2393_v52  ;;  %v2426_v54 = vmul.f32 %v2402_v47, %v2394_v13 }
 0x40e   : >> { %11594 = vst [vmem:[#allocation24_spill] sm:$0xff] %v10271_v29  ;;  %v2427_v43 = vmul.f32 %v2403_v50, %v10209_v56  ;;  %v10280_v0 = vmul.f32 %v10247_v1, %v10224_v12  ;;  %v2429_v51 = vmul.f32 %v2405_v20, %v2393_v52  ;;  %v2430_v6 = vmul.f32 %v2406_v39, %v2394_v13 }
 0x40f   : >> { %11595 = vst [vmem:[#allocation25_spill] sm:$0xff] %v10275_v46  ;;  %v2431_v22 = vmul.f32 %v2407_v59, %v10209_v56  ;;  %v2441_v10 = vadd.f32 %v2393_v52, %v10174_v30  ;;  %v2445_v40 = vadd.f32 %v2397_v17, %v10183_v48  ;;  %v2449_v53 = vadd.f32 %v2409_v32, %v10186_v14 }
 0x410   : >> { %11596 = vst [vmem:[#allocation26_spill] sm:$0xff] %v10280_v0  ;;  %v2453_v42 = vadd.f32 %v2413_v31, %v2338_v61  ;;  %v2457_v55 = vadd.f32 %v2401_v25, %v2342_v41  ;;  %v2461_v62 = vadd.f32 %v2405_v20, %v2346_v8  ;;  %v2465_v9 = vadd.f32 %v2417_v23, %v2350_v36 }
 0x411   : >> { %v2469_v27 = vadd.f32 %v2421_v15, %v2354_v45  ;;  %v10288_v24 = vmul.f32 %v10257_v38, %v10224_v12  ;;  %v2442_v0 = vadd.f32 %v2441_v10, %v2394_v13  ;;  %v2446_v46 = vadd.f32 %v2445_v40, %v2398_v26 }
 0x412   : >> { %v2450_v29 = vadd.f32 %v2449_v53, %v2410_v28  ;;  %v2454_v44 = vadd.f32 %v2453_v42, %v2414_v34  ;;  %v2458_v18 = vadd.f32 %v2457_v55, %v2402_v47  ;;  %v2462_v30 = vadd.f32 %v2461_v62, %v2406_v39  ;;  %v4833_v53 = vld [vmem:[%s9650_s12 + $0x2b0] sm:$0xff]  ;;  %v4834_v42 = vld [vmem:[%s9650_s12 + $0x2b8] sm:$0xff]  ;;  %v2498_v55 = vld [vmem:[%s9655_s22 + $0xa8] sm:$0xff] }
 0x413   : >> { %v2466_v52 = vadd.f32 %v2465_v9, %v2418_v37  ;;  %v2433_v48 = vmul.f32 %v2401_v25, %v2397_v17  ;;  %v2434_v5 = vmul.f32 %v2402_v47, %v2398_v26  ;;  %v2435_v14 = vmul.f32 %v2403_v50, %v2399_v60  ;;  %v2491_v37 = vld [vmem:[%s9650_s12 + $0xb0] sm:$0xff]  ;;  %v11598_v15 = vld [vmem:[#allocation22_spill] sm:$0xff] }
 0x414   : >> { %v2437_v61 = vmul.f32 %v2405_v20, %v2397_v17  ;;  %v2436_v41 = vmul.f32 %v10247_v1, %v10237_v16  ;;  %v2443_v8 = vadd.f32 %v2442_v0, %v10209_v56  ;;  %v2447_v36 = vadd.f32 %v2446_v46, %v2399_v60  ;;  %v2497_v0 = vld [vmem:[%s9655_s22 + $0xa0] sm:$0xff] }
 0x415   : >> { %v2470_v45 = vadd.f32 %v2469_v27, %v2422_v57  ;;  %v2438_v32 = vmul.f32 %v2406_v39, %v2398_v26  ;;  %v2439_v13 = vmul.f32 %v2407_v59, %v2399_v60  ;;  %v2440_v28 = vmul.f32 %v10257_v38, %v10237_v16 }
 0x416   : >> { %v2451_v31 = vadd.f32 %v2450_v29, %v2411_v63  ;;  %v2455_v34 = vadd.f32 %v2454_v44, %v2415_v49  ;;  %v2459_v25 = vadd.f32 %v2458_v18, %v2403_v50  ;;  %v2463_v47 = vadd.f32 %v2462_v30, %v2407_v59  ;;  %v2490_v44 = vld [vmem:[%s9650_s12 + $0xa8] sm:$0xff]  ;;  %v4831_v29 = vld [vmem:[%s9650_s12 + $0x2a0] sm:$0xff]  ;;  %v11601_v10 = vld [vmem:[#allocation25_spill] sm:$0xff] }
 0x417   : >> { %v2467_v17 = vadd.f32 %v2466_v52, %v2419_v7  ;;  %v2473_v20 = vadd.f32 %v2425_v11, %v10212_v21  ;;  %v2477_v23 = vadd.f32 %v2429_v51, %v10215_v19  ;;  %v2481_v56 = vadd.f32 %v2433_v48, %v10217_v33  ;;  %v2489_v19 = vld [vmem:[%s9650_s12 + $0xa0] sm:$0xff]  ;;  %v11597_v33 = vld [vmem:[#allocation21_spill] sm:$0xff]  ;;  %v2499_v30 = vld [vmem:[%s9655_s22 + $0xb0] sm:$0xff] }
 0x418   : >> { %v2485_v26 = vadd.f32 %v2437_v61, %v10226_v35  ;;  %v10301_v60 = vadd.f32 %v2443_v8, %v10224_v12  ;;  %v10304_v39 = vadd.f32 %v2447_v36, %v10237_v16  ;;  %v2471_v63 = vadd.f32 %v2470_v45, %v2423_v58  ;;  %v2492_v7 = vld [vmem:[%s9650_s12 + $0xb8] sm:$0xff]  ;;  %v11599_v58 = vld [vmem:[#allocation23_spill] sm:$0xff]  ;;  %v2501_v51 = vld [vmem:[%s9667_s13 + $0xa0] sm:$0xff] }
 0x419   : >> { %v2506_v50 = vstv %s2505_s26  ;;  %v2474_v59 = vadd.f32 %v2473_v20, %v2426_v54  ;;  %v2478_v18 = vadd.f32 %v2477_v23, %v2430_v6  ;;  %v2482_v21 = vadd.f32 %v2481_v56, %v2434_v5  ;;  %v11600_v6 = vld [vmem:[#allocation24_spill] sm:$0xff]  ;;  %v2500_v52 = vld [vmem:[%s9655_s22 + $0xb8] sm:$0xff]  ;;  %v2502_v48 = vld [vmem:[%s9667_s13 + $0xa8] sm:$0xff] }
 0x41a   : >> { %v2486_v49 = vadd.f32 %v2485_v26, %v2438_v32  ;;  %vm2507_vm4 = vcmp.lt.s32.totalorder %v11572_v2, %v2506_v50  ;;  %vm2508_vm5 = vcmp.lt.s32.totalorder %v11573_v3, %v2506_v50  ;;  %vm2509_vm6 = vcmp.lt.s32.totalorder %v11574_v4, %v2506_v50  ;;  %v2503_v45 = vld [vmem:[%s9667_s13 + $0xb0] sm:$0xff]  ;;  %v2504_v32 = vld [vmem:[%s9667_s13 + $0xb8] sm:$0xff] }
 0x41b   : >> { %vm2510_vm7 = vcmp.lt.s32.totalorder %v11597_v33, %v2506_v50  ;;  %v2475_v12 = vadd.f32 %v2474_v59, %v2427_v43  ;;  %v2479_v35 = vadd.f32 %v2478_v18, %v2431_v22  ;;  %v2483_v16 = vadd.f32 %v2482_v21, %v2435_v14  ;;  %v4832_v43 = vld [vmem:[%s9650_s12 + $0x2a8] sm:$0xff] }
 0x41c   : >> { %v2487_v5 = vadd.f32 %v2486_v49, %v2439_v13  ;;  %v10316_v57 = vadd.f32 %v2451_v31, %v11598_v15  ;;  %v10319_v46 = vadd.f32 %v2455_v34, %v11599_v58  ;;  %v10322_v11 = vadd.f32 %v2459_v25, %v10247_v1 }
 0x41d   : >> { %v10325_v54 = vadd.f32 %v2463_v47, %v10257_v38  ;;  %v2468_v22 = vadd.f32 %v2467_v17, %v11600_v6  ;;  %v2472_v40 = vadd.f32 %v2471_v63, %v11601_v10  ;;  %v2511_v1 = vsel %vm2507_vm4, %v2489_v19, 0.0  ;;  %v11602_v38 = vld [vmem:[#allocation26_spill] sm:$0xff] }
 0x41e   : >> { %v2512_v62 = vsel %vm2508_vm5, %v2490_v44, 0.0  ;;  %v10340_v9 = vadd.f32 %v2475_v12, %v11602_v38  ;;  %v10343_v27 = vadd.f32 %v2479_v35, %v10288_v24  ;;  %v2513_v14 = vsel %vm2509_vm6, %v2491_v37, 0.0 }
 0x41f   : >> { %v10352_v61 = vsel %vm2510_vm7, %v2492_v7, 0.0  ;;  %v10354_v8 = vadd.f32 %v2483_v16, %v2436_v41  ;;  %v10356_v36 = vadd.f32 %v2487_v5, %v2440_v28  ;;  %v2515_v24 = vsel %vm2507_vm4, %v4831_v29, 0.0 }
 0x420   : >> { %v2516_v13 = vsel %vm2508_vm5, %v4832_v43, 0.0  ;;  %v2517_v31 = vsel %vm2509_vm6, %v4833_v53, 0.0  ;;  %v10368_v34 = vsel %vm2510_vm7, %v4834_v42, 0.0  ;;  %v2519_v41 = vsel %vm2507_vm4, %v2497_v0, 0.0 }
 0x421   : >> { %11603 = vst [vmem:[#allocation22_spill] sm:$0xff] %v10356_v36  ;;  %v2520_v28 = vsel %vm2508_vm5, %v2498_v55, 0.0  ;;  %v2521_v25 = vsel %vm2509_vm6, %v2499_v30, 0.0  ;;  %v10378_v47 = vsel %vm2510_vm7, %v2500_v52, 0.0  ;;  %v2523_v17 = vsel %vm2507_vm4, %v2501_v51, 0.0 }
 0x422   : >> { %v2524_v20 = vsel %vm2508_vm5, %v2502_v48, 0.0  ;;  %v2525_v23 = vsel %vm2509_vm6, %v2503_v45, 0.0  ;;  %v10388_v56 = vsel %vm2510_vm7, %v2504_v32, 0.0  ;;  %v2527_v26 = vmul.f32 %v2511_v1, %v2511_v1 }
 0x423   : >> { %v2528_v63 = vmul.f32 %v2512_v62, %v2512_v62  ;;  %v2529_v59 = vmul.f32 %v2513_v14, %v2513_v14  ;;  %v2530_v18 = vmul.f32 %v10352_v61, %v10352_v61  ;;  %v2531_v21 = vmul.f32 %v2515_v24, %v2515_v24 }
 0x424   : >> { %v2532_v49 = vmul.f32 %v2516_v13, %v2516_v13  ;;  %v2533_v19 = vmul.f32 %v2517_v31, %v2517_v31  ;;  %v2534_v44 = vmul.f32 %v10368_v34, %v10368_v34  ;;  %v2535_v12 = vmul.f32 %v2519_v41, %v2519_v41 }
 0x425   : >> { %v2536_v35 = vmul.f32 %v2520_v28, %v2520_v28  ;;  %v2537_v16 = vmul.f32 %v2521_v25, %v2521_v25  ;;  %v10396_v50 = vmul.f32 %v10378_v47, %v10378_v47  ;;  %v2539_v5 = vmul.f32 %v2523_v17, %v2523_v17 }
 0x426   : >> { %v2540_v37 = vmul.f32 %v2524_v20, %v2524_v20  ;;  %v2541_v7 = vmul.f32 %v2525_v23, %v2525_v23  ;;  %v10400_v29 = vmul.f32 %v10388_v56, %v10388_v56  ;;  %v2543_v15 = vmul.f32 %v2519_v41, %v2511_v1 }
 0x427   : >> { %11604 = vst [vmem:[#allocation23_spill] sm:$0xff] %v10396_v50  ;;  %v2544_v58 = vmul.f32 %v2520_v28, %v2512_v62  ;;  %v2545_v43 = vmul.f32 %v2521_v25, %v2513_v14  ;;  %v10404_v0 = vmul.f32 %v10378_v47, %v10352_v61  ;;  %v2547_v51 = vmul.f32 %v2523_v17, %v2511_v1 }
 0x428   : >> { %11605 = vst [vmem:[#allocation24_spill] sm:$0xff] %v10400_v29  ;;  %v2548_v6 = vmul.f32 %v2524_v20, %v2512_v62  ;;  %v2549_v10 = vmul.f32 %v2525_v23, %v2513_v14  ;;  %v10408_v53 = vmul.f32 %v10388_v56, %v10352_v61  ;;  %v2551_v42 = vmul.f32 %v2519_v41, %v2515_v24 }
 0x429   : >> { %11606 = vst [vmem:[#allocation25_spill] sm:$0xff] %v10404_v0  ;;  %v2552_v55 = vmul.f32 %v2520_v28, %v2516_v13  ;;  %v2559_v38 = vadd.f32 %v2511_v1, %v10301_v60  ;;  %v2563_v30 = vadd.f32 %v2515_v24, %v10304_v39  ;;  %v2567_v52 = vadd.f32 %v2527_v26, %v10316_v57 }
 0x42a   : >> { %11607 = vst [vmem:[#allocation26_spill] sm:$0xff] %v10408_v53  ;;  %v2571_v48 = vadd.f32 %v2531_v21, %v10319_v46  ;;  %v2575_v45 = vadd.f32 %v2519_v41, %v10322_v11  ;;  %v2579_v32 = vadd.f32 %v2523_v17, %v10325_v54  ;;  %v2583_v0 = vadd.f32 %v2535_v12, %v2468_v22  ;;  %v2608_v21 = vld [vmem:[%s9650_s12 + $0xc8] sm:$0xff] }
 0x42b   : >> { %v2587_v29 = vadd.f32 %v2539_v5, %v2472_v40  ;;  %v2560_v50 = vadd.f32 %v2559_v38, %v2512_v62  ;;  %v2564_v33 = vadd.f32 %v2563_v30, %v2516_v13  ;;  %v2568_v4 = vadd.f32 %v2567_v52, %v2528_v63  ;;  %v2615_v5 = vld [vmem:[%s9655_s22 + $0xc0] sm:$0xff]  ;;  %v2618_v38 = vld [vmem:[%s9655_s22 + $0xd8] sm:$0xff] }
 0x42c   : >> { %v2572_v53 = vadd.f32 %v2571_v48, %v2532_v49  ;;  %v2576_v3 = vadd.f32 %v2575_v45, %v2520_v28  ;;  %v2580_v2 = vadd.f32 %v2579_v32, %v2524_v20  ;;  %v2584_v60 = vadd.f32 %v2583_v0, %v2536_v35  ;;  %v11610_v49 = vld [vmem:[#allocation19_spill] sm:$0xff] }
 0x42d   : >> { %v2588_v1 = vadd.f32 %v2587_v29, %v2540_v37  ;;  %v2553_v39 = vmul.f32 %v2521_v25, %v2517_v31  ;;  %v2555_v36 = vmul.f32 %v2523_v17, %v2515_v24  ;;  %v2561_v57 = vadd.f32 %v2560_v50, %v2513_v14  ;;  %v4835_v50 = vld [vmem:[%s9650_s12 + $0x2c0] sm:$0xff] }
 0x42e   : >> { %v2565_v26 = vadd.f32 %v2564_v33, %v2517_v31  ;;  %v2554_v46 = vmul.f32 %v10378_v47, %v10368_v34  ;;  %v2569_v11 = vadd.f32 %v2568_v4, %v2529_v59  ;;  %v2573_v54 = vadd.f32 %v2572_v53, %v2533_v19  ;;  %v11612_v19 = vld [vmem:[#allocation21_spill] sm:$0xff]  ;;  %v2619_v37 = vld [vmem:[%s9667_s13 + $0xc0] sm:$0xff]  ;;  %v11613_v29 = vld [vmem:[#allocation23_spill] sm:$0xff] }
 0x42f   : >> { %v2577_v22 = vadd.f32 %v2576_v3, %v2521_v25  ;;  %v2556_v40 = vmul.f32 %v2524_v20, %v2516_v13  ;;  %v2557_v62 = vmul.f32 %v2525_v23, %v2517_v31  ;;  %v2558_v41 = vmul.f32 %v10388_v56, %v10368_v34 }
 0x430   : >> { %v2581_v28 = vadd.f32 %v2580_v2, %v2525_v23  ;;  %v10422_v63 = vadd.f32 %v2561_v57, %v10352_v61  ;;  %v10425_v14 = vadd.f32 %v2565_v26, %v10368_v34  ;;  %v2585_v33 = vadd.f32 %v2584_v60, %v2537_v16  ;;  %v11608_v2 = vld [vmem:[#allocation22_spill] sm:$0xff]  ;;  %v11615_v53 = vld [vmem:[#allocation25_spill] sm:$0xff]  ;;  %v2621_v57 = vld [vmem:[%s9667_s13 + $0xd0] sm:$0xff] }
 0x431   : >> { %v2589_v4 = vadd.f32 %v2588_v1, %v2541_v7  ;;  %v2591_v3 = vadd.f32 %v2543_v15, %v10340_v9  ;;  %v2595_v24 = vadd.f32 %v2547_v51, %v10343_v27  ;;  %v2599_v13 = vadd.f32 %v2551_v42, %v10354_v8  ;;  %v2607_v27 = vld [vmem:[%s9650_s12 + $0xc0] sm:$0xff]  ;;  %v2609_v8 = vld [vmem:[%s9650_s12 + $0xd0] sm:$0xff]  ;;  %v2622_v26 = vld [vmem:[%s9667_s13 + $0xd8] sm:$0xff] }
 0x432   : >> { %v2603_v31 = vadd.f32 %v2555_v36, %v11608_v2  ;;  %v10431_v25 = vadd.f32 %v2569_v11, %v2530_v18  ;;  %v10433_v61 = vadd.f32 %v2573_v54, %v2534_v44  ;;  %v10436_v34 = vadd.f32 %v2577_v22, %v10378_v47  ;;  %v2610_v36 = vld [vmem:[%s9650_s12 + $0xd8] sm:$0xff]  ;;  %v11609_v18 = vld [vmem:[#allocation18_spill] sm:$0xff]  ;;  %v11611_v47 = vld [vmem:[#allocation20_spill] sm:$0xff] }
 0x433   : >> { %v2624_v17 = vstv %s2623_s3  ;;  %v2592_v20 = vadd.f32 %v2591_v3, %v2544_v58  ;;  %v2596_v23 = vadd.f32 %v2595_v24, %v2548_v6  ;;  %v2600_v59 = vadd.f32 %v2599_v13, %v2552_v55  ;;  %v11614_v58 = vld [vmem:[#allocation24_spill] sm:$0xff]  ;;  %v4838_v6 = vld [vmem:[%s9650_s12 + $0x2d8] sm:$0xff]  ;;  %v11616_v45 = vld [vmem:[#allocation26_spill] sm:$0xff] }
 0x434   : >> { %v2604_v9 = vadd.f32 %v2603_v31, %v2556_v40  ;;  %vm2625_vm8 = vcmp.lt.s32.totalorder %v11609_v18, %v2624_v17  ;;  %vm2626_vm9 = vcmp.lt.s32.totalorder %v11610_v49, %v2624_v17  ;;  %vm2627_vm10 = vcmp.lt.s32.totalorder %v11611_v47, %v2624_v17  ;;  %v4837_v51 = vld [vmem:[%s9650_s12 + $0x2d0] sm:$0xff] }
 0x435   : >> { %vm2628_vm11 = vcmp.lt.s32.totalorder %v11612_v19, %v2624_v17  ;;  %v2593_v44 = vadd.f32 %v2592_v20, %v2545_v43  ;;  %v2597_v12 = vadd.f32 %v2596_v23, %v2549_v10  ;;  %v2601_v35 = vadd.f32 %v2600_v59, %v2553_v39  ;;  %v4836_v43 = vld [vmem:[%s9650_s12 + $0x2c8] sm:$0xff]  ;;  %v2617_v55 = vld [vmem:[%s9655_s22 + $0xd0] sm:$0xff] }
 0x436   : >> { %v2605_v16 = vadd.f32 %v2604_v9, %v2557_v62  ;;  %v10450_v7 = vadd.f32 %v2581_v28, %v10388_v56  ;;  %v10453_v15 = vadd.f32 %v2585_v33, %v11613_v29  ;;  %v10456_v0 = vadd.f32 %v2589_v4, %v11614_v58  ;;  %v2616_v56 = vld [vmem:[%s9655_s22 + $0xc8] sm:$0xff] }
 0x437   : >> { %v2629_v10 = vsel %vm2625_vm8, %v2607_v27, 0.0  ;;  %v10464_v42 = vadd.f32 %v2593_v44, %v11615_v53  ;;  %v2630_v30 = vsel %vm2626_vm9, %v2608_v21, 0.0  ;;  %v10473_v52 = vsel %vm2627_vm10, %v2609_v8, 0.0  ;;  %v2620_v39 = vld [vmem:[%s9667_s13 + $0xc8] sm:$0xff] }
 0x438   : >> { %v10477_v48 = vsel %vm2628_vm11, %v2610_v36, 0.0  ;;  %v10480_v32 = vadd.f32 %v2597_v12, %v11616_v45  ;;  %v10482_v60 = vadd.f32 %v2601_v35, %v2554_v46  ;;  %v10484_v1 = vadd.f32 %v2605_v16, %v2558_v41 }
 0x439   : >> { %v2633_v11 = vsel %vm2625_vm8, %v4835_v50, 0.0  ;;  %v10493_v54 = vsel %vm2626_vm9, %v4836_v43, 0.0  ;;  %v10497_v22 = vsel %vm2627_vm10, %v4837_v51, 0.0  ;;  %v10501_v46 = vsel %vm2628_vm11, %v4838_v6, 0.0 }
 0x43a   : >> { %v2637_v40 = vsel %vm2625_vm8, %v2615_v5, 0.0  ;;  %v2638_v62 = vsel %vm2626_vm9, %v2616_v56, 0.0  ;;  %v2639_v41 = vsel %vm2627_vm10, %v2617_v55, 0.0  ;;  %v10511_v28 = vsel %vm2628_vm11, %v2618_v38, 0.0 }
 0x43b   : >> { %v2641_v33 = vsel %vm2625_vm8, %v2619_v37, 0.0  ;;  %v2642_v4 = vsel %vm2626_vm9, %v2620_v39, 0.0  ;;  %v2643_v3 = vsel %vm2627_vm10, %v2621_v57, 0.0  ;;  %v10521_v24 = vsel %vm2628_vm11, %v2622_v26, 0.0 }
 0x43c   : >> { %v2645_v13 = vmul.f32 %v2629_v10, %v2629_v10  ;;  %v2646_v2 = vmul.f32 %v2630_v30, %v2630_v30  ;;  %v2647_v31 = vmul.f32 %v10473_v52, %v10473_v52  ;;  %v2648_v20 = vmul.f32 %v10477_v48, %v10477_v48 }
 0x43d   : >> { %v2649_v23 = vmul.f32 %v2633_v11, %v2633_v11  ;;  %v2650_v59 = vmul.f32 %v10493_v54, %v10493_v54  ;;  %v2651_v9 = vmul.f32 %v10497_v22, %v10497_v22  ;;  %v2652_v17 = vmul.f32 %v10501_v46, %v10501_v46 }
 0x43e   : >> { %v2653_v27 = vmul.f32 %v2637_v40, %v2637_v40  ;;  %v2654_v21 = vmul.f32 %v2638_v62, %v2638_v62  ;;  %v2655_v8 = vmul.f32 %v2639_v41, %v2639_v41  ;;  %v2656_v36 = vmul.f32 %v10511_v28, %v10511_v28 }
 0x43f   : >> { %v2657_v44 = vmul.f32 %v2641_v33, %v2641_v33  ;;  %v2658_v12 = vmul.f32 %v2642_v4, %v2642_v4  ;;  %v2659_v35 = vmul.f32 %v2643_v3, %v2643_v3  ;;  %v2660_v16 = vmul.f32 %v10521_v24, %v10521_v24 }
 0x440   : >> { %v2661_v50 = vmul.f32 %v2637_v40, %v2629_v10  ;;  %v2662_v5 = vmul.f32 %v2638_v62, %v2630_v30  ;;  %v10538_v37 = vmul.f32 %v2639_v41, %v10473_v52  ;;  %v10542_v29 = vmul.f32 %v10511_v28, %v10477_v48 }
 0x441   : >> { %v2665_v58 = vmul.f32 %v2641_v33, %v2629_v10  ;;  %v2666_v43 = vmul.f32 %v2642_v4, %v2630_v30  ;;  %v10545_v51 = vmul.f32 %v2643_v3, %v10473_v52  ;;  %v10549_v6 = vmul.f32 %v10521_v24, %v10477_v48 }
 0x442   : >> { %11617 = vst [vmem:[#allocation22_spill] sm:$0xff] %v10538_v37  ;;  %v2669_v53 = vmul.f32 %v2637_v40, %v2633_v11  ;;  %v2670_v56 = vmul.f32 %v2638_v62, %v10493_v54  ;;  %v2671_v55 = vmul.f32 %v2639_v41, %v10497_v22  ;;  %v10555_v38 = vmul.f32 %v10511_v28, %v10501_v46 }
 0x443   : >> { %11618 = vst [vmem:[#allocation23_spill] sm:$0xff] %v10542_v29  ;;  %v2673_v45 = vmul.f32 %v2641_v33, %v2633_v11  ;;  %v2677_v39 = vadd.f32 %v2629_v10, %v10422_v63  ;;  %v2681_v57 = vadd.f32 %v2633_v11, %v10425_v14  ;;  %v2685_v26 = vadd.f32 %v2645_v13, %v10431_v25 }
 0x444   : >> { %11619 = vst [vmem:[#allocation24_spill] sm:$0xff] %v10545_v51  ;;  %v2689_v29 = vadd.f32 %v2649_v23, %v10433_v61  ;;  %v2697_v51 = vadd.f32 %v2641_v33, %v10450_v7  ;;  %v2701_v37 = vadd.f32 %v2653_v27, %v10453_v15  ;;  %v2705_v19 = vadd.f32 %v2657_v44, %v10456_v0  ;;  %v2726_v23 = vld [vmem:[%s9650_s12 + $0xe8] sm:$0xff] }
 0x445   : >> { %11620 = vst [vmem:[#allocation25_spill] sm:$0xff] %v10549_v6  ;;  %v2693_v6 = vadd.f32 %v2637_v40, %v10436_v34  ;;  %v2678_v47 = vadd.f32 %v2677_v39, %v2630_v30  ;;  %v2686_v49 = vadd.f32 %v2685_v26, %v2646_v2  ;;  %v2674_v30 = vmul.f32 %v2642_v4, %v10493_v54  ;;  %v11623_v27 = vld [vmem:[#allocation19_spill] sm:$0xff] }
 0x446   : >> { %11621 = vst [vmem:[#allocation26_spill] sm:$0xff] %v10555_v38  ;;  %v2682_v38 = vadd.f32 %v2681_v57, %v10493_v54  ;;  %v2690_v18 = vadd.f32 %v2689_v29, %v2650_v59  ;;  %v2698_v14 = vadd.f32 %v2697_v51, %v2642_v4  ;;  %v2702_v10 = vadd.f32 %v2701_v37, %v2654_v21  ;;  %v4840_v59 = vld [vmem:[%s9650_s12 + $0x2e8] sm:$0xff]  ;;  %v11624_v21 = vld [vmem:[#allocation20_spill] sm:$0xff]  ;;  %v4842_v37 = vld [vmem:[%s9650_s12 + $0x2f8] sm:$0xff] }
 0x447   : >> { %v2694_v63 = vadd.f32 %v2693_v6, %v2638_v62  ;;  %v2706_v25 = vadd.f32 %v2705_v19, %v2658_v12  ;;  %v2679_v61 = vadd.f32 %v2678_v47, %v10473_v52  ;;  %v2687_v11 = vadd.f32 %v2686_v49, %v2647_v31  ;;  %v2734_v29 = vld [vmem:[%s9655_s22 + $0xe8] sm:$0xff]  ;;  %v2736_v51 = vld [vmem:[%s9655_s22 + $0xf8] sm:$0xff] }
 0x448   : >> { %v2683_v34 = vadd.f32 %v2682_v38, %v10497_v22  ;;  %v2691_v7 = vadd.f32 %v2690_v18, %v2651_v9  ;;  %v2699_v15 = vadd.f32 %v2698_v14, %v2643_v3  ;;  %v2703_v33 = vadd.f32 %v2702_v10, %v2655_v8  ;;  %v2733_v9 = vld [vmem:[%s9655_s22 + $0xe0] sm:$0xff]  ;;  %v11625_v8 = vld [vmem:[#allocation21_spill] sm:$0xff]  ;;  %v2738_v10 = vld [vmem:[%s9667_s13 + $0xe8] sm:$0xff] }
 0x449   : >> { %v2695_v40 = vadd.f32 %v2694_v63, %v2639_v41  ;;  %v2707_v0 = vadd.f32 %v2706_v25, %v2659_v35  ;;  %v2675_v13 = vmul.f32 %v2643_v3, %v10497_v22  ;;  %v2676_v62 = vmul.f32 %v10521_v24, %v10501_v46  ;;  %v2739_v25 = vld [vmem:[%s9667_s13 + $0xf0] sm:$0xff] }
 0x44a   : >> { %v10573_v19 = vadd.f32 %v2679_v61, %v10477_v48  ;;  %v10577_v47 = vadd.f32 %v2683_v34, %v10501_v46  ;;  %v10579_v18 = vadd.f32 %v2687_v11, %v2648_v20  ;;  %v10581_v49 = vadd.f32 %v2691_v7, %v2652_v17  ;;  %v11622_v17 = vld [vmem:[#allocation18_spill] sm:$0xff]  ;;  %v11628_v38 = vld [vmem:[#allocation23_spill] sm:$0xff]  ;;  %v2740_v61 = vld [vmem:[%s9667_s13 + $0xf8] sm:$0xff] }
 0x44b   : >> { %v10584_v52 = vadd.f32 %v2695_v40, %v10511_v28  ;;  %v2709_v54 = vadd.f32 %v2661_v50, %v10464_v42  ;;  %v2713_v48 = vadd.f32 %v2665_v58, %v10480_v32  ;;  %v2717_v22 = vadd.f32 %v2669_v53, %v10482_v60  ;;  %v2725_v28 = vld [vmem:[%s9650_s12 + $0xe0] sm:$0xff]  ;;  %v2727_v60 = vld [vmem:[%s9650_s12 + $0xf0] sm:$0xff] }
 0x44c   : >> { %v2721_v46 = vadd.f32 %v2673_v45, %v10484_v1  ;;  %v10591_v41 = vadd.f32 %v2699_v15, %v10521_v24  ;;  %v10593_v4 = vadd.f32 %v2703_v33, %v2656_v36  ;;  %v10595_v3 = vadd.f32 %v2707_v0, %v2660_v16  ;;  %v2728_v1 = vld [vmem:[%s9650_s12 + $0xf8] sm:$0xff]  ;;  %v4839_v24 = vld [vmem:[%s9650_s12 + $0x2e0] sm:$0xff]  ;;  %v11627_v12 = vld [vmem:[#allocation24_spill] sm:$0xff] }
 0x44d   : >> { %v2742_v2 = vstv %s2741_s8  ;;  %v2710_v31 = vadd.f32 %v2709_v54, %v2662_v5  ;;  %v2714_v42 = vadd.f32 %v2713_v48, %v2666_v43  ;;  %v2718_v20 = vadd.f32 %v2717_v22, %v2670_v56  ;;  %v11626_v36 = vld [vmem:[#allocation22_spill] sm:$0xff]  ;;  %v4841_v5 = vld [vmem:[%s9650_s12 + $0x2f0] sm:$0xff]  ;;  %v11629_v39 = vld [vmem:[#allocation25_spill] sm:$0xff] }
 0x44e   : >> { %v2722_v32 = vadd.f32 %v2721_v46, %v2674_v30  ;;  %vm2743_vm12 = vcmp.lt.s32.totalorder %v11622_v17, %v2742_v2  ;;  %vm2744_vm13 = vcmp.lt.s32.totalorder %v11623_v27, %v2742_v2  ;;  %vm2745_vm14 = vcmp.lt.s32.totalorder %v11624_v21, %v2742_v2  ;;  %v2737_v58 = vld [vmem:[%s9667_s13 + $0xe0] sm:$0xff]  ;;  %v2735_v43 = vld [vmem:[%s9655_s22 + $0xf0] sm:$0xff] }
 0x44f   : >> { %vm2746_vm15 = vcmp.lt.s32.totalorder %v11625_v8, %v2742_v2  ;;  %v2711_v44 = vadd.f32 %v2710_v31, %v11626_v36  ;;  %v2715_v35 = vadd.f32 %v2714_v42, %v11627_v12  ;;  %v2719_v16 = vadd.f32 %v2718_v20, %v2671_v55  ;;  %v11630_v26 = vld [vmem:[#allocation26_spill] sm:$0xff] }
 0x450   : >> { %v2723_v50 = vadd.f32 %v2722_v32, %v2675_v13  ;;  %v2747_v6 = vsel %vm2743_vm12, %v2725_v28, 0.0  ;;  %v2748_v53 = vsel %vm2744_vm13, %v2726_v23, 0.0  ;;  %v10622_v56 = vsel %vm2745_vm14, %v2727_v60, 0.0 }
 0x451   : >> { %v10626_v55 = vsel %vm2746_vm15, %v2728_v1, 0.0  ;;  %v10629_v45 = vadd.f32 %v2711_v44, %v11628_v38  ;;  %v10632_v57 = vadd.f32 %v2715_v35, %v11629_v39  ;;  %v10635_v63 = vadd.f32 %v2719_v16, %v11630_v26 }
 0x452   : >> { %v10637_v14 = vadd.f32 %v2723_v50, %v2676_v62  ;;  %v2751_v34 = vsel %vm2743_vm12, %v4839_v24, 0.0  ;;  %v2752_v11 = vsel %vm2744_vm13, %v4840_v59, 0.0  ;;  %v2753_v7 = vsel %vm2745_vm14, %v4841_v5, 0.0 }
 0x453   : >> { %v10650_v40 = vsel %vm2746_vm15, %v4842_v37, 0.0  ;;  %v2755_v15 = vsel %vm2743_vm12, %v2733_v9, 0.0  ;;  %v2756_v33 = vsel %vm2744_vm13, %v2734_v29, 0.0  ;;  %v2757_v0 = vsel %vm2745_vm14, %v2735_v43, 0.0 }
 0x454   : >> { %11631 = vst [vmem:[#allocation22_spill] sm:$0xff] %v10637_v14  ;;  %v10660_v30 = vsel %vm2746_vm15, %v2736_v51, 0.0  ;;  %v2759_v13 = vsel %vm2743_vm12, %v2737_v58, 0.0  ;;  %v2760_v62 = vsel %vm2744_vm13, %v2738_v10, 0.0  ;;  %v2761_v54 = vsel %vm2745_vm14, %v2739_v25, 0.0 }
 0x455   : >> { %v10670_v48 = vsel %vm2746_vm15, %v2740_v61, 0.0  ;;  %v2763_v22 = vmul.f32 %v2747_v6, %v2747_v6  ;;  %v2764_v46 = vmul.f32 %v2748_v53, %v2748_v53  ;;  %v2765_v28 = vmul.f32 %v10622_v56, %v10622_v56 }
 0x456   : >> { %v2766_v31 = vmul.f32 %v10626_v55, %v10626_v55  ;;  %v2767_v42 = vmul.f32 %v2751_v34, %v2751_v34  ;;  %v2768_v20 = vmul.f32 %v2752_v11, %v2752_v11  ;;  %v2769_v32 = vmul.f32 %v2753_v7, %v2753_v7 }
 0x457   : >> { %v2770_v23 = vmul.f32 %v10650_v40, %v10650_v40  ;;  %v2771_v60 = vmul.f32 %v2755_v15, %v2755_v15  ;;  %v2772_v1 = vmul.f32 %v2756_v33, %v2756_v33  ;;  %v2773_v24 = vmul.f32 %v2757_v0, %v2757_v0 }
 0x458   : >> { %v2774_v2 = vmul.f32 %v10660_v30, %v10660_v30  ;;  %v2775_v59 = vmul.f32 %v2759_v13, %v2759_v13  ;;  %v2776_v9 = vmul.f32 %v2760_v62, %v2760_v62  ;;  %v2777_v17 = vmul.f32 %v2761_v54, %v2761_v54 }
 0x459   : >> { %v2778_v27 = vmul.f32 %v10670_v48, %v10670_v48  ;;  %v2779_v21 = vmul.f32 %v2755_v15, %v2747_v6  ;;  %v2780_v8 = vmul.f32 %v2756_v33, %v2748_v53  ;;  %v10683_v36 = vmul.f32 %v2757_v0, %v10622_v56 }
 0x45a   : >> { %v10687_v44 = vmul.f32 %v10660_v30, %v10626_v55  ;;  %v2783_v12 = vmul.f32 %v2759_v13, %v2747_v6  ;;  %v2784_v35 = vmul.f32 %v2760_v62, %v2748_v53  ;;  %v10690_v16 = vmul.f32 %v2761_v54, %v10622_v56 }
 0x45b   : >> { %11632 = vst [vmem:[#allocation24_spill] sm:$0xff] %v10683_v36  ;;  %v10694_v50 = vmul.f32 %v10670_v48, %v10626_v55  ;;  %v2787_v5 = vmul.f32 %v2755_v15, %v2751_v34  ;;  %v2788_v37 = vmul.f32 %v2756_v33, %v2752_v11  ;;  %v10696_v29 = vmul.f32 %v2757_v0, %v2753_v7 }
 0x45c   : >> { %11633 = vst [vmem:[#allocation23_spill] sm:$0xff] %v10687_v44  ;;  %v10700_v58 = vmul.f32 %v10660_v30, %v10650_v40  ;;  %v2791_v43 = vmul.f32 %v2759_v13, %v2751_v34  ;;  %v2792_v51 = vmul.f32 %v2760_v62, %v2752_v11  ;;  %v2793_v38 = vmul.f32 %v2761_v54, %v2753_v7 }
 0x45d   : >> { %11634 = vst [vmem:[#allocation25_spill] sm:$0xff] %v10690_v16  ;;  %v10704_v39 = vmul.f32 %v10670_v48, %v10650_v40  ;;  %v2795_v26 = vadd.f32 %v2747_v6, %v10573_v19  ;;  %v2799_v10 = vadd.f32 %v2751_v34, %v10577_v47  ;;  %v2803_v25 = vadd.f32 %v2763_v22, %v10579_v18 }
 0x45e   : >> { %11635 = vst [vmem:[#allocation26_spill] sm:$0xff] %v10694_v50  ;;  %v2807_v61 = vadd.f32 %v2767_v42, %v10581_v49  ;;  %v2811_v50 = vadd.f32 %v2755_v15, %v10584_v52  ;;  %v2815_v44 = vadd.f32 %v2759_v13, %v10591_v41  ;;  %v2827_v42 = vadd.f32 %v2779_v21, %v10629_v45 }
 0x45f   : >> { %11636 = vst [vmem:[#allocation27_spill] sm:$0xff] %v10696_v29  ;;  %v2823_v29 = vadd.f32 %v2775_v59, %v10595_v3  ;;  %v2796_v16 = vadd.f32 %v2795_v26, %v2748_v53  ;;  %v2800_v36 = vadd.f32 %v2799_v10, %v2752_v11  ;;  %v2844_v3 = vld [vmem:[%s10717_s25] sm:$0xff] }
 0x460   : >> { %11637 = vst [vmem:[#allocation28_spill] sm:$0xff] %v10700_v58  ;;  %v2819_v58 = vadd.f32 %v2771_v60, %v10593_v4  ;;  %v2808_v14 = vadd.f32 %v2807_v61, %v2768_v20  ;;  %v2812_v19 = vadd.f32 %v2811_v50, %v2756_v33  ;;  %v2816_v6 = vadd.f32 %v2815_v44, %v2760_v62  ;;  %v4847_v33 = vld [vmem:[%s10717_s25 + $0x20] sm:$0xff]  ;;  %v4874_v61 = vld [vmem:[%s10717_s25 + $0xb0] sm:$0xff] }
 0x461   : >> { %11638 = vst [vmem:[#allocation29_spill] sm:$0xff] %v10704_v39  ;;  %v2804_v39 = vadd.f32 %v2803_v25, %v2764_v46  ;;  %v2824_v34 = vadd.f32 %v2823_v29, %v2776_v9  ;;  %v2797_v18 = vadd.f32 %v2796_v16, %v10622_v56  ;;  %v2801_v49 = vadd.f32 %v2800_v36, %v2753_v7  ;;  %v4844_v7 = vld [vmem:[%s10717_s25 + $0x10] sm:$0xff]  ;;  %v4859_v9 = vld [vmem:[%s10717_s25 + $0x60] sm:$0xff] }
 0x462   : >> { %v2820_v47 = vadd.f32 %v2819_v58, %v2772_v1  ;;  %v2809_v52 = vadd.f32 %v2808_v14, %v2769_v32  ;;  %v2813_v15 = vadd.f32 %v2812_v19, %v2757_v0  ;;  %v2817_v41 = vadd.f32 %v2816_v6, %v2761_v54  ;;  %v4850_v0 = vld [vmem:[%s10717_s25 + $0x30] sm:$0xff]  ;;  %v4853_v32 = vld [vmem:[%s10717_s25 + $0x40] sm:$0xff] }
 0x463   : >> { %v2805_v22 = vadd.f32 %v2804_v39, %v2765_v28  ;;  %v2825_v4 = vadd.f32 %v2824_v34, %v2777_v17  ;;  %v2798_v53 = vadd.f32 %v2797_v18, %v10626_v55  ;;  %v2802_v56 = vadd.f32 %v2801_v49, %v10650_v40  ;;  %v11643_v29 = vld [vmem:[#allocation23_spill] sm:$0xff]  ;;  %v4871_v25 = vld [vmem:[%s10717_s25 + $0xa0] sm:$0xff] }
 0x464   : >> { %v2821_v13 = vadd.f32 %v2820_v47, %v2773_v24  ;;  %v2810_v14 = vadd.f32 %v2809_v52, %v2770_v23  ;;  %v2814_v62 = vadd.f32 %v2813_v15, %v10660_v30  ;;  %v2818_v54 = vadd.f32 %v2817_v41, %v10670_v48  ;;  %v4856_v23 = vld [vmem:[%s10717_s25 + $0x50] sm:$0xff]  ;;  %v11641_v36 = vld [vmem:[#allocation25_spill] sm:$0xff] }
 0x465   : >> { %v2806_v11 = vadd.f32 %v2805_v22, %v2766_v31  ;;  %v2826_v28 = vadd.f32 %v2825_v4, %v2778_v27  ;;  %v2831_v55 = vadd.f32 %v2783_v12, %v10632_v57  ;;  %v2835_v40 = vadd.f32 %v2787_v5, %v10635_v63  ;;  %v11639_v31 = vld [vmem:[#allocation22_spill] sm:$0xff]  ;;  %v4862_v57 = vld [vmem:[%s10717_s25 + $0x70] sm:$0xff] }
 0x466   : >> { %v2822_v46 = vadd.f32 %v2821_v13, %v2774_v2  ;;  %v2839_v20 = vadd.f32 %v2791_v43, %v11639_v31  ;;  %v2845_v60 = vadd.f32 %v2844_v3, %v2798_v53  ;;  %v2850_v1 = vadd.f32 %v4844_v7, %v2802_v56  ;;  %v11640_v27 = vld [vmem:[#allocation24_spill] sm:$0xff]  ;;  %v11642_v12 = vld [vmem:[#allocation27_spill] sm:$0xff]  ;;  %v4865_v5 = vld [vmem:[%s10717_s25 + $0x80] sm:$0xff] }
 0x467   : >> { %v2855_v30 = vadd.f32 %v4847_v33, %v2806_v11  ;;  %v2860_v48 = vadd.f32 %v4850_v0, %v2810_v14  ;;  %v2828_v24 = vadd.f32 %v2827_v42, %v2780_v8  ;;  %v2832_v2 = vadd.f32 %v2831_v55, %v2784_v35  ;;  %v11644_v43 = vld [vmem:[#allocation26_spill] sm:$0xff]  ;;  %v11645_v39 = vld [vmem:[#allocation28_spill] sm:$0xff] }
 0x468   : >> { %v2836_v59 = vadd.f32 %v2835_v40, %v2788_v37  ;;  %v2840_v45 = vadd.f32 %v2839_v20, %v2792_v51  ;;  %2846 = vst [vmem:[%s10717_s25] sm:$0xff] %v2845_v60  ;;  %v2865_v63 = vadd.f32 %v4853_v32, %v2814_v62  ;;  %v2870_v17 = vadd.f32 %v4856_v23, %v2818_v54  ;;  %v4868_v37 = vld [vmem:[%s10717_s25 + $0x90] sm:$0xff]  ;;  %v11646_v10 = vld [vmem:[#allocation29_spill] sm:$0xff] }
 0x469   : >> { %v2829_v21 = vadd.f32 %v2828_v24, %v11640_v27  ;;  %v2833_v44 = vadd.f32 %v2832_v2, %v11641_v36  ;;  %4845 = vst [vmem:[%s10717_s25 + $0x10] sm:$0xff] %v2850_v1  ;;  %v2875_v16 = vadd.f32 %v4859_v9, %v2822_v46  ;;  %v2880_v50 = vadd.f32 %v4862_v57, %v2826_v28 }
 0x46a   : >> { %v2837_v8 = vadd.f32 %v2836_v59, %v11642_v12  ;;  %v2841_v35 = vadd.f32 %v2840_v45, %v2793_v38  ;;  %4848 = vst [vmem:[%s10717_s25 + $0x20] sm:$0xff] %v2855_v30 }
 0x46b   : >> { %v2830_v58 = vadd.f32 %v2829_v21, %v11643_v29  ;;  %v2834_v51 = vadd.f32 %v2833_v44, %v11644_v43  ;;  %4851 = vst [vmem:[%s10717_s25 + $0x30] sm:$0xff] %v2860_v48 }
 0x46c   : >> { %v2838_v26 = vadd.f32 %v2837_v8, %v11645_v39  ;;  %v2842_v38 = vadd.f32 %v2841_v35, %v11646_v10  ;;  %4854 = vst [vmem:[%s10717_s25 + $0x40] sm:$0xff] %v2865_v63 }
 0x46d   : >> { %4857 = vst [vmem:[%s10717_s25 + $0x50] sm:$0xff] %v2870_v17  ;;  %v2885_v19 = vadd.f32 %v4865_v5, %v2830_v58  ;;  %v2890_v6 = vadd.f32 %v4868_v37, %v2834_v51 }
 0x46e   : >> { %4860 = vst [vmem:[%s10717_s25 + $0x60] sm:$0xff] %v2875_v16  ;;  %v2895_v47 = vadd.f32 %v4871_v25, %v2838_v26  ;;  %v2900_v34 = vadd.f32 %v4874_v61, %v2842_v38 }
 0x46f   : >> { %4863 = vst [vmem:[%s10717_s25 + $0x70] sm:$0xff] %v2880_v50  ;;  %1884 = sbr.rel (!%p1882_p7) target bundleno = 926 (0x39e), region = 888 }
 0x470   : >> { %4866 = vst [vmem:[%s10717_s25 + $0x80] sm:$0xff] %v2885_v19 }
 0x471   : >> { %4869 = vst [vmem:[%s10717_s25 + $0x90] sm:$0xff] %v2890_v6 }
 0x472   : >> { %4872 = vst [vmem:[%s10717_s25 + $0xa0] sm:$0xff] %v2895_v47 }
 0x473   : >> { %4875 = vst [vmem:[%s10717_s25 + $0xb0] sm:$0xff] %v2900_v34 }
 0x474   : > { %2905 = sbr.rel (%p4876_p8) target bundleno = 1436 (0x59c), region = 329 }
 0x47a   : > { %v2948_v18 = vld [vmem:[#allocation2 + $0x60] sm:$0xff]  ;;  %v2941_v49 = vld [vmem:[#allocation2 + $0x50] sm:$0xff]  ;;  %v2949_v52 = vld [vmem:[#allocation2 + $0x68] sm:$0xff] }
 0x47b   : > { %v2934_v22 = vld [vmem:[#allocation2 + $0x40] sm:$0xff]  ;;  %2950 = vadd.xlane.f32.xlu2 %v2948_v18  ;;  %2943 = vadd.xlane.f32.xlu1 %v2941_v49  ;;  %v2942_v15 = vld [vmem:[#allocation2 + $0x58] sm:$0xff]  ;;  %v2935_v41 = vld [vmem:[#allocation2 + $0x48] sm:$0xff] }
 0x47c   : > { %2936 = vadd.xlane.f32.xlu0 %v2934_v22  ;;  %v2956_v13 = vld [vmem:[#allocation2 + $0x78] sm:$0xff]  ;;  %v2906_v4 = vld [vmem:[#allocation2] sm:$0xff]  ;;  %v2955_v3 = vld [vmem:[#allocation2 + $0x70] sm:$0xff] }
 0x47d   : > { %v2913_v53 = vld [vmem:[#allocation2 + $0x10] sm:$0xff]  ;;  %v2914_v56 = vld [vmem:[#allocation2 + $0x18] sm:$0xff]  ;;  %v2907_v11 = vld [vmem:[#allocation2 + $0x8] sm:$0xff] }
 0x47e   : > { %v2963_v14 = vld [vmem:[#allocation2 + $0x88] sm:$0xff]  ;;  %v2969_v7 = vld [vmem:[#allocation2 + $0x90] sm:$0xff]  ;;  %v2962_v33 = vld [vmem:[#allocation2 + $0x80] sm:$0xff] }
 0x47f   : > { %v2976_v0 = vld [vmem:[#allocation2 + $0xa0] sm:$0xff]  ;;  %v2977_v62 = vld [vmem:[#allocation2 + $0xa8] sm:$0xff]  ;;  %v2970_v54 = vld [vmem:[#allocation2 + $0x98] sm:$0xff] }
 0x480   : > { %v2984_v46 = vld [vmem:[#allocation2 + $0xb8] sm:$0xff]  ;;  %v2920_v28 = vld [vmem:[#allocation2 + $0x20] sm:$0xff]  ;;  %v2983_v42 = vld [vmem:[#allocation2 + $0xb0] sm:$0xff] }
 0x481   : > { %v2927_v55 = vld [vmem:[#allocation2 + $0x30] sm:$0xff]  ;;  %v2928_v40 = vld [vmem:[#allocation2 + $0x38] sm:$0xff]  ;;  %v2921_v31 = vld [vmem:[#allocation2 + $0x28] sm:$0xff] }
 0x483   : > { %2952 = vadd.xlane.f32.xlu2 %v2949_v52  ;;  %2945 = vadd.xlane.f32.xlu1 %v2942_v15 }
 0x484   : > { %2938 = vadd.xlane.f32.xlu0 %v2935_v41 }
 0x48b   : > { %2959 = vadd.xlane.f32.xlu1 %v2956_v13  ;;  %2908 = vadd.xlane.f32.xlu2 %v2906_v4 }
 0x48c   : > { %2957 = vadd.xlane.f32.xlu0 %v2955_v3 }
 0x493   : > { %2915 = vadd.xlane.f32.xlu1 %v2913_v53  ;;  %2917 = vadd.xlane.f32.xlu2 %v2914_v56 }
 0x494   : > { %2910 = vadd.xlane.f32.xlu0 %v2907_v11 }
 0x49b   : > { %2966 = vadd.xlane.f32.xlu1 %v2963_v14  ;;  %2971 = vadd.xlane.f32.xlu2 %v2969_v7 }
 0x49c   : > { %2964 = vadd.xlane.f32.xlu0 %v2962_v33 }
 0x4a3   : > { %2978 = vadd.xlane.f32.xlu1 %v2976_v0  ;;  %2980 = vadd.xlane.f32.xlu2 %v2977_v62 }
 0x4a4   : > { %2973 = vadd.xlane.f32.xlu0 %v2970_v54 }
 0x4ab   : > { %2987 = vadd.xlane.f32.xlu1 %v2984_v46  ;;  %2922 = vadd.xlane.f32.xlu2 %v2920_v28 }
 0x4ac   : > { %2985 = vadd.xlane.f32.xlu0 %v2983_v42 }
 0x4b3   : > { %2929 = vadd.xlane.f32.xlu1 %v2927_v55  ;;  %2931 = vadd.xlane.f32.xlu2 %v2928_v40 }
 0x4b4   : > { %2924 = vadd.xlane.f32.xlu0 %v2921_v31 }
 0x4ee   : > { %v2951_v20 = vpop.xlane.xlu2 %2950  ;;  %v10762_v32 = vpop.xlane.xlu1 %2943 }
 0x4ef   : > { %v10764_v23 = vpop.xlane.xlu0 %2936  ;;  %v3271_v17 = vmul.f32 %v10762_v32, %v10762_v32 }
 0x4f0   : > { %v3005_v60 = vmul.f32 %v10764_v23, %v10764_v23 }
 0x4f1   : > { %v3273_v12 = vmul.f32 0.00016666666, %v3271_v17 }
 0x4f2   : > { %v3007_v1 = vmul.f32 0.00016666666, %v3005_v60 }
 0x4f4   : > { %v3009_v30 = vsub.f32 %v2951_v20, %v3007_v1 }
 0x4f6   : > { %v10768_v48 = vmax.f32 %v3009_v30, 0.0  ;;  %v2953_v24 = vpop.xlane.xlu2 %2952  ;;  %v10770_v2 = vpop.xlane.xlu1 %2945 }
 0x4f7   : > { %v10772_v59 = vpop.xlane.xlu0 %2938  ;;  %v3272_v63 = vmul.f32 %v10770_v2, %v10770_v2 }
 0x4f8   : > { %v3013_v45 = vadd.f32 1e-08, %v10768_v48  ;;  %v3006_v9 = vmul.f32 %v10772_v59, %v10772_v59 }
 0x4f9   : > { %v3274_v36 = vmul.f32 0.00016666666, %v3272_v63 }
 0x4fa   : > { %6182 = vrcp.f32 %v3013_v45  ;;  %v3008_v57 = vmul.f32 0.00016666666, %v3006_v9  ;;  %v3024_v19 = vand.u32 2147483647, %v3013_v45  ;;  %v3026_v34 = vand.u32 2147483648, %v3013_v45 }
 0x4fb   : > { %vm3020_vm0 = vweird.f32 %v3013_v45 }
 0x4fc   : > { %v3010_v27 = vsub.f32 %v2953_v24, %v3008_v57  ;;  %vm10818_vm1 = vcmp.eq.f32.partialorder %v3024_v19, 8.507059e+37  ;;  %v3027_v3 = vor.u32 1.1754944e-38, %v3026_v34 }
 0x4fe   : > { %v10781_v21 = vmax.f32 %v3010_v27, 0.0  ;;  %v2960_v44 = vpop.xlane.xlu1 %2959  ;;  %v10783_v8 = vpop.xlane.xlu2 %2908 }
 0x4ff   : > { %v2958_v35 = vpop.xlane.xlu0 %2957  ;;  %v3276_v5 = vsub.f32 %v2960_v44, %v3274_v36  ;;  %v3311_v18 = vmul.f32 %v10762_v32, %v10783_v8  ;;  %v3045_v22 = vmul.f32 %v10764_v23, %v10783_v8 }
 0x500   : > { %v10785_v16 = vpop.eup %6182  ;;  %v10788_v50 = vadd.f32 1e-08, %v10781_v21  ;;  %v3275_v37 = vsub.f32 %v2958_v35, %v3273_v12 }
 0x501   : > { %v3016_v29 = vmul.f32 %v10785_v16, %v3013_v45  ;;  %v10794_v43 = vmax.f32 %v3276_v5, 0.0  ;;  %v3313_v53 = vmul.f32 0.00016666666, %v3311_v18  ;;  %vm3021_vm3 = vweird.f32 %v10785_v16 }
 0x502   : > { %6184 = vrcp.f32 %v10788_v50  ;;  %v10792_v58 = vmax.f32 %v3275_v37, 0.0  ;;  %vm3035_vm2 = vweird.f32 %v10788_v50  ;;  %v3047_v14 = vmul.f32 0.00016666666, %v3045_v22  ;;  %vm10830_vm4 = vmor %vm3020_vm0, %vm3021_vm3 }
 0x503   : > { %v3017_v39 = vsub.f32 1.0, %v3016_v29  ;;  %v10806_v61 = vadd.f32 1e-08, %v10794_v43  ;;  %v3039_v20 = vand.u32 2147483647, %v10788_v50  ;;  %v3041_v24 = vand.u32 2147483648, %v10788_v50 }
 0x504   : > { %v3279_v51 = vadd.f32 1e-08, %v10792_v58 }
 0x505   : > { %v3018_v49 = vmul.f32 %v10785_v16, %v3017_v39  ;;  %v3042_v18 = vor.u32 1.1754944e-38, %v3041_v24  ;;  %vm3040_vm11 = vcmp.eq.f32.partialorder %v3039_v20, 8.507059e+37  ;;  %vm3301_vm13 = vweird.f32 %v10806_v61 }
 0x506   : > { %6186 = vrcp.f32 %v3279_v51  ;;  %v10797_v26 = vpop.xlane.xlu1 %2915  ;;  %v10799_v10 = vpop.xlane.xlu2 %2917  ;;  %v3292_v28 = vand.u32 2147483648, %v3279_v51  ;;  %v3290_v55 = vand.u32 2147483647, %v3279_v51  ;;  %vm3286_vm6 = vweird.f32 %v3279_v51 }
 0x507   : > { %v10801_v38 = vpop.xlane.xlu0 %2910  ;;  %6188 = vrcp.f32 %v10806_v61  ;;  %v3019_v11 = vadd.f32 %v10785_v16, %v3018_v49  ;;  %v3157_v40 = vmul.f32 %v10764_v23, %v10797_v26  ;;  %v3305_v20 = vand.u32 2147483647, %v10806_v61 }
 0x508   : > { %v10803_v25 = vpop.eup %6184  ;;  %v3046_v47 = vmul.f32 %v10772_v59, %v10801_v38  ;;  %vm3291_vm9 = vcmp.eq.f32.partialorder %v3290_v55, 8.507059e+37  ;;  %v3293_v27 = vor.u32 1.1754944e-38, %v3292_v28 }
 0x509   : > { %v3031_v6 = vmul.f32 %v10803_v25, %v10788_v50  ;;  %v3023_v23 = vsel %vm10830_vm4, %v10785_v16, %v3019_v11  ;;  %vm3036_vm7 = vweird.f32 %v10803_v25  ;;  %v3159_v36 = vmul.f32 0.00016666666, %v3157_v40 }
 0x50a   : > { %v3048_v4 = vmul.f32 0.00016666666, %v3046_v47  ;;  %v10851_v12 = vsel %vm10818_vm1, %v3027_v3, %v3023_v23  ;;  %vm10857_vm10 = vmor %vm3035_vm2, %vm3036_vm7  ;;  %v3312_v50 = vmul.f32 %v10770_v2, %v10801_v38  ;;  %v2989_v3 = vmul.f32 %v10783_v8, %v10783_v8 }
 0x50b   : > { %v3032_v52 = vsub.f32 1.0, %v3031_v6  ;;  %v3424_v23 = vmul.f32 %v10770_v2, %v10799_v10  ;;  %vm3306_vm15 = vcmp.eq.f32.partialorder %v3305_v20, 8.507059e+37 }
 0x50c   : > { %v6187_v15 = vpop.eup %6186 }
 0x50d   : > { %v3282_v13 = vmul.f32 %v6187_v15, %v3279_v51  ;;  %v3033_v0 = vmul.f32 %v10803_v25, %v3032_v52  ;;  %vm3287_vm5 = vweird.f32 %v6187_v15  ;;  %v10836_v30 = vpop.eup %6188  ;;  %v3426_v5 = vmul.f32 0.00016666666, %v3424_v23 }
 0x50e   : > { %v2967_v56 = vpop.xlane.xlu1 %2966  ;;  %v2972_v7 = vpop.xlane.xlu2 %2971  ;;  %vm3288_vm8 = vmor %vm3286_vm6, %vm3287_vm5  ;;  %v3297_v44 = vmul.f32 %v10836_v30, %v10806_v61  ;;  %vm3302_vm12 = vweird.f32 %v10836_v30 }
 0x50f   : > { %v3283_v33 = vsub.f32 1.0, %v3282_v13  ;;  %v3050_v62 = vsub.f32 %v2967_v56, %v3048_v4  ;;  %v2965_v54 = vpop.xlane.xlu0 %2964  ;;  %v3315_v46 = vsub.f32 %v2972_v7, %v3313_v53  ;;  %v3034_v57 = vadd.f32 %v10803_v25, %v3033_v0  ;;  %vm3303_vm14 = vmor %vm3301_vm13, %vm3302_vm12 }
 0x510   : > { %v3049_v42 = vsub.f32 %v2965_v54, %v3047_v14  ;;  %v3298_v22 = vsub.f32 1.0, %v3297_v44  ;;  %v3314_v13 = vmul.f32 0.00016666666, %v3312_v50  ;;  %v3423_v4 = vmul.f32 %v10762_v32, %v10797_v26 }
 0x511   : > { %v3284_v31 = vmul.f32 %v6187_v15, %v3283_v33  ;;  %v10834_v1 = vmul.f32 %v3315_v46, %v3315_v46  ;;  %v10844_v45 = vmul.f32 %v3050_v62, %v3050_v62  ;;  %v3038_v19 = vsel %vm10857_vm10, %v10803_v25, %v3034_v57 }
 0x512   : > { %v3051_v9 = vmul.f32 %v3049_v42, %v3049_v42  ;;  %v3299_v53 = vmul.f32 %v10836_v30, %v3298_v22  ;;  %v3158_v7 = vmul.f32 %v10772_v59, %v10799_v10  ;;  %v3425_v32 = vmul.f32 0.00016666666, %v3423_v4 }
 0x513   : > { %v3285_v63 = vadd.f32 %v6187_v15, %v3284_v31  ;;  %v3319_v16 = vmul.f32 %v10834_v1, %v10792_v58  ;;  %v3054_v6 = vmul.f32 %v10844_v45, %v10781_v21  ;;  %v2991_v54 = vmul.f32 0.00016666666, %v2989_v3 }
 0x514   : > { %v3053_v17 = vmul.f32 %v3051_v9, %v10768_v48  ;;  %v3300_v46 = vadd.f32 %v10836_v30, %v3299_v53  ;;  %v3307_v59 = vand.u32 2147483648, %v10806_v61  ;;  %v3160_v55 = vmul.f32 0.00016666666, %v3158_v7 }
 0x515   : > { %v3289_v35 = vsel %vm3288_vm8, %v6187_v15, %v3285_v63  ;;  %v10875_v15 = vsel %vm3040_vm11, %v3042_v18, %v3038_v19  ;;  %v3059_v60 = vmul.f32 2.0, %v3051_v9  ;;  %v3325_v44 = vmul.f32 2.0, %v10834_v1 }
 0x516   : > { %v3055_v37 = vmul.f32 %v3053_v17, %v10851_v12  ;;  %v10862_v29 = vsel %vm3291_vm9, %v3293_v27, %v3289_v35  ;;  %v2979_v51 = vpop.xlane.xlu1 %2978  ;;  %v2981_v39 = vpop.xlane.xlu2 %2980  ;;  %v3056_v25 = vmul.f32 %v3054_v6, %v10875_v15  ;;  %v3304_v63 = vsel %vm3303_vm14, %v10836_v30, %v3300_v46 }
 0x517   : > { %v3161_v47 = vsub.f32 %v2979_v51, %v3159_v36  ;;  %v2974_v34 = vpop.xlane.xlu0 %2973  ;;  %v3321_v52 = vmul.f32 %v3319_v16, %v10862_v29  ;;  %v3162_v24 = vsub.f32 %v2981_v39, %v3160_v55  ;;  %v3308_v36 = vor.u32 1.1754944e-38, %v3307_v59 }
 0x518   : > { %v10872_v49 = vmul.f32 %v3055_v37, %v10851_v12  ;;  %v3316_v11 = vsub.f32 %v2974_v34, %v3314_v13  ;;  %v10894_v33 = vmul.f32 %v3056_v25, %v10875_v15  ;;  %v3061_v30 = vmul.f32 %v3059_v60, %v10851_v12 }
 0x519   : > { %v10878_v41 = vmul.f32 %v3161_v47, %v3161_v47  ;;  %v10887_v56 = vmul.f32 %v3321_v52, %v10862_v29  ;;  %v10926_v35 = vsel %vm3306_vm15, %v3308_v36, %v3304_v63  ;;  %v3164_v16 = vmul.f32 %v3162_v24, %v3162_v24 }
 0x51a   : > { %6190 = vrsqrt.f32 %v10872_v49  ;;  %v10900_v28 = vmul.f32 %v3316_v11, %v3316_v11  ;;  %v3327_v50 = vmul.f32 %v3325_v44, %v10862_v29  ;;  %v3060_v11 = vmul.f32 2.0, %v10844_v45 }
 0x51b   : > { %v3165_v14 = vmul.f32 %v10878_v41, %v10768_v48  ;;  %6192 = vrsqrt.f32 %v10887_v56  ;;  %v3166_v18 = vmul.f32 %v3164_v16, %v10781_v21  ;;  %v2990_v21 = vmul.f32 %v10801_v38, %v10801_v38 }
 0x51c   : > { %6194 = vrsqrt.f32 %v10894_v33  ;;  %v3320_v17 = vmul.f32 %v10900_v28, %v10794_v43  ;;  %v2998_v7 = vmul.f32 %v10799_v10, %v10799_v10  ;;  %vm3076_vm0 = vcmp.eq.f32.partialorder %v10872_v49, inf }
 0x51d   : > { %v3167_v8 = vmul.f32 %v3165_v14, %v10851_v12  ;;  %v2997_v14 = vmul.f32 %v10797_v26, %v10797_v26  ;;  %v3079_v23 = vand.u32 2147483648, %v10872_v49  ;;  %v3345_v63 = vand.u32 2147483648, %v10887_v56 }
 0x51e   : > { %v2923_v62 = vpop.xlane.xlu2 %2922  ;;  %v2988_v2 = vpop.xlane.xlu1 %2987  ;;  %v3322_v39 = vmul.f32 %v3320_v17, %v10926_v35  ;;  %v10974_v20 = vmul.f32 0.00016666666, %v2998_v7  ;;  %v3171_v44 = vmul.f32 2.0, %v10878_v41  ;;  %vm3342_vm1 = vcmp.eq.f32.partialorder %v10887_v56, inf }
 0x51f   : > { %v2986_v0 = vpop.xlane.xlu0 %2985  ;;  %v2993_v40 = vsub.f32 %v2923_v62, %v2991_v54  ;;  %v10908_v31 = vmul.f32 %v3167_v8, %v10851_v12  ;;  %v3428_v6 = vsub.f32 %v2988_v2, %v3426_v5  ;;  %v3168_v62 = vmul.f32 %v3166_v18, %v10875_v15 }
 0x520   : > { %v3427_v48 = vsub.f32 %v2986_v0, %v3425_v32  ;;  %v10902_v42 = vpop.eup %6190  ;;  %v10945_v13 = vmul.f32 %v3322_v39, %v10926_v35  ;;  %v2999_v46 = vmul.f32 0.00016666666, %v2997_v14  ;;  %v10994_v39 = vmul.f32 2.0, %v3164_v16 }
 0x521   : > { %v3070_v57 = vmul.f32 %v10902_v42, %v10872_v49  ;;  %v2995_v61 = vmax.f32 %v2993_v40, 0.0  ;;  %v10922_v9 = vpop.eup %6192  ;;  %6196 = vrsqrt.f32 %v10908_v31  ;;  %v3430_v53 = vmul.f32 %v3428_v6, %v3428_v6 }
 0x522   : > { %v10920_v27 = vmul.f32 %v3427_v48, %v3427_v48  ;;  %v10929_v37 = vpop.eup %6194  ;;  %v3336_v1 = vmul.f32 %v10922_v9, %v10887_v56  ;;  %6198 = vrsqrt.f32 %v10945_v13  ;;  %v2992_v48 = vmul.f32 0.00016666666, %v2990_v21 }
 0x523   : > { %v3071_v51 = vmul.f32 %v10902_v42, %v3070_v57  ;;  %v3063_v47 = vsub.f32 %v2995_v61, %v3061_v30  ;;  %v3082_v34 = vmul.f32 %v10929_v37, %v10894_v33  ;;  %v3329_v4 = vsub.f32 %v2995_v61, %v3327_v50 }
 0x524   : > { %v3431_v19 = vmul.f32 %v10920_v27, %v10792_v58  ;;  %v3337_v3 = vmul.f32 %v10922_v9, %v3336_v1  ;;  %v3432_v10 = vmul.f32 %v3430_v53, %v10794_v43  ;;  %v10972_v40 = vmul.f32 %v3060_v11, %v10875_v15 }
 0x525   : > { %v3072_v25 = vmul.f32 0.5, %v3071_v51  ;;  %v3065_v58 = vadd.f32 %v3063_v47, %v10872_v49  ;;  %v3083_v32 = vmul.f32 %v10929_v37, %v3082_v34  ;;  %v3331_v38 = vadd.f32 %v3329_v4, %v10887_v56 }
 0x526   : > { %v3433_v22 = vmul.f32 %v3431_v19, %v10862_v29  ;;  %v3338_v54 = vmul.f32 0.5, %v3337_v3  ;;  %v10979_v43 = vmul.f32 %v3168_v62, %v10875_v15  ;;  %v3434_v17 = vmul.f32 %v3432_v10, %v10926_v35  ;;  %v2930_v36 = vpop.xlane.xlu1 %2929 }
 0x527   : > { %v10942_v52 = vpop.eup %6196  ;;  %v3073_v45 = vsub.f32 1.5, %v3072_v25  ;;  %v10964_v26 = vmax.f32 %v3065_v58, 0.0  ;;  %v3084_v59 = vmul.f32 0.5, %v3083_v32  ;;  %v10981_v24 = vmax.f32 %v3331_v38, 0.0 }
 0x528   : > { %v3182_v0 = vmul.f32 %v10942_v52, %v10908_v31  ;;  %v10961_v8 = vmul.f32 %v3433_v22, %v10862_v29  ;;  %v3339_v57 = vsub.f32 1.5, %v3338_v54  ;;  %v10986_v61 = vpop.eup %6198  ;;  %v3437_v2 = vmul.f32 2.0, %v10920_v27  ;;  %v2925_v27 = vpop.xlane.xlu0 %2924 }
 0x529   : > { %v3074_v60 = vmul.f32 %v10902_v42, %v3073_v45  ;;  %v3326_v42 = vmul.f32 2.0, %v10900_v28  ;;  %v3085_v30 = vsub.f32 1.5, %v3084_v59  ;;  %v10996_v19 = vmul.f32 2.0, %v3430_v53 }
 0x52a   : > { %6200 = vrsqrt.f32 %v10961_v8  ;;  %v3183_v55 = vmul.f32 %v10942_v52, %v3182_v0  ;;  %v3001_v28 = vsub.f32 %v2930_v36, %v2999_v46  ;;  %v3340_v47 = vmul.f32 %v10922_v9, %v3339_v57 }
 0x52b   : > { %6202 = vrsqrt.f32 %v10964_v26  ;;  %v3075_v6 = vmul.f32 %v3074_v60, %v10872_v49  ;;  %v3191_v50 = vand.u32 2147483648, %v10908_v31  ;;  %v11006_v16 = vmul.f32 %v3434_v17, %v10926_v35 }
 0x52c   : > { %6204 = vrsqrt.f32 %v10981_v24  ;;  %v3184_v51 = vmul.f32 0.5, %v3183_v55  ;;  %v3348_v18 = vmul.f32 %v10986_v61, %v10945_v13  ;;  %v3173_v22 = vmul.f32 %v3171_v44, %v10851_v12 }
 0x52d   : > { %6206 = vrsqrt.f32 %v10979_v43  ;;  %v3003_v25 = vmax.f32 %v3001_v28, 0.0  ;;  %v3439_v58 = vmul.f32 %v3437_v2, %v10862_v29  ;;  %v11014_v4 = vmul.f32 %v10929_v37, %v3085_v30 }
 0x52e   : > { %v3185_v9 = vsub.f32 1.5, %v3184_v51  ;;  %v2994_v53 = vsub.f32 %v2925_v27, %v2992_v48  ;;  %v3077_v14 = vsel %vm3076_vm0, %v10872_v49, %v3075_v6  ;;  %vm3078_vm2 = vcmp.eq.f32.partialorder %v10872_v49, 0.0  ;;  %v2932_v51 = vpop.xlane.xlu2 %2931 }
 0x52f   : > { %v3175_v7 = vsub.f32 %v3003_v25, %v3173_v22  ;;  %v3441_v32 = vsub.f32 %v3003_v25, %v3439_v58  ;;  %6208 = vrsqrt.f32 %v11006_v16  ;;  %v3341_v62 = vmul.f32 %v3340_v47, %v10887_v56 }
 0x530   : > { %v10992_v5 = vpop.eup %6200  ;;  %v2996_v37 = vmax.f32 %v2994_v53, 0.0  ;;  %vm3344_vm3 = vcmp.eq.f32.partialorder %v10887_v56, 0.0  ;;  %vm3188_vm4 = vcmp.eq.f32.partialorder %v10908_v31, inf  ;;  %v3349_v45 = vmul.f32 %v10986_v61, %v3348_v18 }
 0x531   : > { %v6203_v1 = vpop.eup %6202  ;;  %v3448_v41 = vmul.f32 %v10992_v5, %v10961_v8  ;;  %v3177_v38 = vadd.f32 %v3175_v7, %v10908_v31  ;;  %v3443_v54 = vadd.f32 %v3441_v32, %v10961_v8  ;;  %v3186_v10 = vmul.f32 %v10942_v52, %v3185_v9 }
 0x532   : > { %v3094_v34 = vmul.f32 %v6203_v1, %v10964_v26  ;;  %v6205_v11 = vpop.eup %6204  ;;  %v3064_v59 = vsub.f32 %v2996_v37, %v10972_v40  ;;  %v3328_v17 = vmul.f32 %v3326_v42, %v10926_v35  ;;  %v3343_v52 = vsel %vm3342_vm1, %v10887_v56, %v3341_v62 }
 0x533   : > { %v3449_v21 = vmul.f32 %v10992_v5, %v3448_v41  ;;  %v3360_v29 = vmul.f32 %v6205_v11, %v10981_v24  ;;  %v11023_v0 = vpop.eup %6206  ;;  %v11033_v60 = vmax.f32 %v3177_v38, 0.0  ;;  %v11035_v57 = vmax.f32 %v3443_v54, 0.0 }
 0x534   : > { %v3095_v3 = vmul.f32 %v6203_v1, %v3094_v34  ;;  %v3194_v36 = vmul.f32 %v11023_v0, %v10979_v43  ;;  %v3066_v30 = vadd.f32 %v3064_v59, %v10894_v33  ;;  %v11044_v40 = vmul.f32 0.5, %v3349_v45 }
 0x535   : > { %v3361_v48 = vmul.f32 %v6205_v11, %v3360_v29  ;;  %v3450_v55 = vmul.f32 0.5, %v3449_v21  ;;  %6210 = vrsqrt.f32 %v11033_v60  ;;  %v3330_v6 = vsub.f32 %v2996_v37, %v3328_v17  ;;  %v11047_v41 = vpop.eup %6208 }
 0x536   : > { %v3096_v12 = vmul.f32 0.5, %v3095_v3  ;;  %v3187_v42 = vmul.f32 %v3186_v10, %v10908_v31  ;;  %6212 = vrsqrt.f32 %v11035_v57  ;;  %vm3190_vm5 = vcmp.eq.f32.partialorder %v10908_v31, 0.0 }
 0x537   : > { %v3362_v2 = vmul.f32 0.5, %v3361_v48  ;;  %v3451_v27 = vsub.f32 1.5, %v3450_v55  ;;  %vm3100_vm6 = vcmp.eq.f32.partialorder %v10964_v26, inf  ;;  %v3103_v47 = vand.u32 2147483648, %v10964_v26 }
 0x538   : > { %v3097_v46 = vsub.f32 1.5, %v3096_v12  ;;  %v3002_v34 = vsub.f32 %v2932_v51, %v10974_v20  ;;  %vm3102_vm7 = vcmp.eq.f32.partialorder %v10964_v26, 0.0  ;;  %v11058_v25 = vmax.f32 %v3066_v30, 0.0 }
 0x539   : > { %v11064_v58 = vsel %vm3078_vm2, %v3079_v23, %v3077_v14  ;;  %v3195_v9 = vmul.f32 %v11023_v0, %v3194_v36  ;;  %v3332_v53 = vadd.f32 %v3330_v6, %v10945_v13  ;;  %v3189_v20 = vsel %vm3188_vm4, %v10908_v31, %v3187_v42 }
 0x53a   : > { %v3098_v44 = vmul.f32 %v6203_v1, %v3097_v46  ;;  %v3363_v1 = vsub.f32 1.5, %v3362_v2  ;;  %v3351_v49 = vsub.f32 1.5, %v11044_v40  ;;  %v11084_v21 = vmax.f32 %v3002_v34, 0.0 }
 0x53b   : > { %v6211_v23 = vpop.eup %6210  ;;  %vm3366_vm8 = vcmp.eq.f32.partialorder %v10981_v24, inf  ;;  %vm3368_vm9 = vcmp.eq.f32.partialorder %v10981_v24, 0.0  ;;  %v3174_v29 = vmul.f32 %v10994_v39, %v10875_v15  ;;  %v11096_v37 = vmul.f32 0.5, %v3195_v9 }
 0x53c   : > { %v3099_v28 = vmul.f32 %v3098_v44, %v10964_v26  ;;  %v3364_v22 = vmul.f32 %v6205_v11, %v3363_v1  ;;  %v3452_v11 = vmul.f32 %v10992_v5, %v3451_v27  ;;  %v6213_v56 = vpop.eup %6212  ;;  %v3206_v7 = vmul.f32 %v6211_v23, %v11033_v60 }
 0x53d   : > { %v3472_v12 = vmul.f32 %v6213_v56, %v11035_v57  ;;  %v11092_v5 = vmax.f32 %v3332_v53, 0.0  ;;  %vm3454_vm10 = vcmp.eq.f32.partialorder %v10961_v8, inf  ;;  %v3457_v54 = vand.u32 2147483648, %v10961_v8 }
 0x53e   : > { %v3101_v18 = vsel %vm3100_vm6, %v10964_v26, %v3099_v28  ;;  %v11074_v26 = vsel %vm3344_vm3, %v3345_v63, %v3343_v52  ;;  %v3365_v14 = vmul.f32 %v3364_v22, %v10981_v24  ;;  %v3369_v63 = vand.u32 2147483648, %v10981_v24 }
 0x53f   : > { %v11067_v3 = vsel %vm3102_vm7, %v3103_v47, %v3101_v18  ;;  %v3207_v45 = vmul.f32 %v6211_v23, %v3206_v7  ;;  %v3453_v38 = vmul.f32 %v3452_v11, %v10961_v8  ;;  %v11111_v15 = vsel %vm3190_vm5, %v3191_v50, %v3189_v20 }
 0x540   : > { %6214 = vrcp.f32 %v11067_v3  ;;  %v3367_v32 = vsel %vm3366_vm8, %v10981_v24, %v3365_v14  ;;  %v3176_v24 = vsub.f32 %v11084_v21, %v3174_v29  ;;  %v3473_v46 = vmul.f32 %v6213_v56, %v3472_v12 }
 0x541   : > { %6216 = vrsqrt.f32 %v11058_v25  ;;  %v11099_v62 = vsel %vm3368_vm9, %v3369_v63, %v3367_v32  ;;  %v3208_v39 = vmul.f32 0.5, %v3207_v45  ;;  %vm3212_vm11 = vcmp.eq.f32.partialorder %v11033_v60, inf }
 0x542   : > { %6218 = vrcp.f32 %v11099_v62  ;;  %vm3214_vm12 = vcmp.eq.f32.partialorder %v11033_v60, 0.0  ;;  %v11120_v55 = vmul.f32 %v10996_v19, %v10926_v35  ;;  %v3215_v31 = vand.u32 2147483648, %v11033_v60 }
 0x543   : > { %6220 = vrsqrt.f32 %v11092_v5  ;;  %v3209_v17 = vsub.f32 1.5, %v3208_v39  ;;  %v3474_v50 = vmul.f32 0.5, %v3473_v46  ;;  %v11127_v44 = vsel %vm3454_vm10, %v10961_v8, %v3453_v38 }
 0x544   : > { %vm3478_vm13 = vcmp.eq.f32.partialorder %v11035_v57, inf  ;;  %v3178_v30 = vadd.f32 %v3176_v24, %v10979_v43  ;;  %vm3480_vm14 = vcmp.eq.f32.partialorder %v11035_v57, 0.0  ;;  %vm3122_vm15 = vweird.f32 %v11067_v3 }
 0x545   : > { %v3210_v51 = vmul.f32 %v6211_v23, %v3209_v17  ;;  %v3475_v52 = vsub.f32 1.5, %v3474_v50  ;;  %v3481_v42 = vand.u32 2147483648, %v11035_v57  ;;  %v3126_v53 = vand.u32 2147483647, %v11067_v3 }
 0x546   : > { %v11105_v10 = vpop.eup %6214  ;;  %v11135_v28 = vmax.f32 %v3178_v30, 0.0  ;;  %v3128_v14 = vand.u32 2147483648, %v11067_v3  ;;  %v3394_v29 = vand.u32 2147483648, %v11099_v62  ;;  %vm3388_vm3 = vweird.f32 %v11099_v62 }
 0x547   : > { %v6217_v48 = vpop.eup %6216  ;;  %v3118_v59 = vmul.f32 %v11105_v10, %v11067_v3  ;;  %vm3123_vm0 = vweird.f32 %v11105_v10  ;;  %v3211_v47 = vmul.f32 %v3210_v51, %v11033_v60  ;;  %v3476_v34 = vmul.f32 %v6213_v56, %v3475_v52 }
 0x548   : > { %v3106_v36 = vmul.f32 %v6217_v48, %v11058_v25  ;;  %v6219_v19 = vpop.eup %6218  ;;  %6222 = vrsqrt.f32 %v11135_v28  ;;  %vm11157_vm1 = vmor %vm3122_vm15, %vm3123_vm0  ;;  %v3392_v45 = vand.u32 2147483647, %v11099_v62  ;;  %v3129_v17 = vor.u32 1.1754944e-38, %v3128_v14 }
 0x549   : > { %v3119_v2 = vsub.f32 1.0, %v3118_v59  ;;  %v6221_v1 = vpop.eup %6220  ;;  %v3384_v27 = vmul.f32 %v6219_v19, %v11099_v62  ;;  %v3213_v23 = vsel %vm3212_vm11, %v11033_v60, %v3211_v47  ;;  %v3477_v11 = vmul.f32 %v3476_v34, %v11035_v57 }
 0x54a   : > { %v3107_v35 = vmul.f32 %v6217_v48, %v3106_v36  ;;  %v3372_v9 = vmul.f32 %v6221_v1, %v11092_v5  ;;  %v11151_v56 = vsel %vm3214_vm12, %v3215_v31, %v3213_v23  ;;  %vm3389_vm2 = vweird.f32 %v6219_v19 }
 0x54b   : > { %v3120_v6 = vmul.f32 %v11105_v10, %v3119_v2  ;;  %v3385_v20 = vsub.f32 1.0, %v3384_v27  ;;  %6224 = vrcp.f32 %v11151_v56  ;;  %v3479_v3 = vsel %vm3478_vm13, %v11035_v57, %v3477_v11  ;;  %vm3390_vm4 = vmor %vm3388_vm3, %vm3389_vm2 }
 0x54c   : > { %v3108_v22 = vmul.f32 0.5, %v3107_v35  ;;  %v3373_v7 = vmul.f32 %v6221_v1, %v3372_v9  ;;  %v11173_v24 = vsel %vm3480_vm14, %v3481_v42, %v3479_v3  ;;  %vm3112_vm5 = vcmp.eq.f32.partialorder %v11058_v25, inf }
 0x54d   : > { %v3121_v18 = vadd.f32 %v11105_v10, %v3120_v6  ;;  %v3386_v12 = vmul.f32 %v6219_v19, %v3385_v20  ;;  %6226 = vrcp.f32 %v11173_v24  ;;  %vm3114_vm6 = vcmp.eq.f32.partialorder %v11058_v25, 0.0 }
 0x54e   : > { %v3109_v63 = vsub.f32 1.5, %v3108_v22  ;;  %v3374_v46 = vmul.f32 0.5, %v3373_v7  ;;  %v11175_v59 = vpop.eup %6222  ;;  %vm3127_vm7 = vcmp.eq.f32.partialorder %v3126_v53, 8.507059e+37  ;;  %v3115_v31 = vand.u32 2147483648, %v11058_v25 }
 0x54f   : > { %v3125_v60 = vsel %vm11157_vm1, %v11105_v10, %v3121_v18  ;;  %v3387_v38 = vadd.f32 %v6219_v19, %v3386_v12  ;;  %v3395_v10 = vor.u32 1.1754944e-38, %v3394_v29  ;;  %vm3393_vm8 = vcmp.eq.f32.partialorder %v3392_v45, 8.507059e+37 }
 0x550   : > { %v3110_v39 = vmul.f32 %v6217_v48, %v3109_v63  ;;  %v3130_v57 = vsel %vm3127_vm7, %v3129_v17, %v3125_v60  ;;  %v3375_v50 = vsub.f32 1.5, %v3374_v46  ;;  %vm3378_vm9 = vcmp.eq.f32.partialorder %v11092_v5, inf }
 0x551   : > { %v3391_v62 = vsel %vm3390_vm4, %v6219_v19, %v3387_v38  ;;  %v6225_v36 = vpop.eup %6224  ;;  %v3218_v30 = vmul.f32 %v11175_v59, %v11135_v28  ;;  %v3442_v51 = vsub.f32 %v11084_v21, %v11120_v55  ;;  %vm3380_vm10 = vcmp.eq.f32.partialorder %v11092_v5, 0.0 }
 0x552   : > { %v3111_v48 = vmul.f32 %v3110_v39, %v11058_v25  ;;  %v3396_v2 = vsel %vm3393_vm8, %v3395_v10, %v3391_v62  ;;  %v3230_v52 = vmul.f32 %v6225_v36, %v11151_v56  ;;  %v3376_v19 = vmul.f32 %v6221_v1, %v3375_v50 }
 0x553   : > { %v3131_v6 = vmul.f32 %v3130_v57, %v11064_v58  ;;  %v3240_v42 = vand.u32 2147483648, %v11151_v56  ;;  %v3219_v47 = vmul.f32 %v11175_v59, %v3218_v30  ;;  %v6227_v21 = vpop.eup %6226  ;;  %v3397_v55 = vmul.f32 %v3396_v2, %v11074_v26 }
 0x554   : > { %v3113_v35 = vsel %vm3112_vm5, %v11058_v25, %v3111_v48  ;;  %v3231_v34 = vsub.f32 1.0, %v3230_v52  ;;  %v3381_v1 = vand.u32 2147483648, %v11092_v5  ;;  %vm3456_vm11 = vcmp.eq.f32.partialorder %v10961_v8, 0.0 }
 0x555   : > { %v11196_v27 = vsel %vm3114_vm6, %v3115_v31, %v3113_v35  ;;  %vm3234_vm12 = vweird.f32 %v11151_v56  ;;  %v3238_v58 = vand.u32 2147483647, %v11151_v56  ;;  %v3496_v25 = vmul.f32 %v6227_v21, %v11173_v24 }
 0x556   : > { %6228 = vrcp.f32 %v11196_v27  ;;  %v3444_v18 = vadd.f32 %v3442_v51, %v11006_v16  ;;  %v3232_v22 = vmul.f32 %v6225_v36, %v3231_v34  ;;  %vm3235_vm13 = vweird.f32 %v6225_v36 }
 0x557   : > { %v3377_v9 = vmul.f32 %v3376_v19, %v11092_v5  ;;  %v3220_v26 = vmul.f32 0.5, %v3219_v47  ;;  %v3147_v53 = vadd.f32 2e-08, %v3131_v6  ;;  %v3241_v20 = vor.u32 1.1754944e-38, %v3240_v42  ;;  %vm3236_vm14 = vmor %vm3234_vm12, %vm3235_vm13 }
 0x558   : > { %v3497_v23 = vsub.f32 1.0, %v3496_v25  ;;  %v3504_v11 = vand.u32 2147483647, %v11173_v24  ;;  %v3413_v14 = vadd.f32 2e-08, %v3397_v55  ;;  %v3233_v63 = vadd.f32 %v6225_v36, %v3232_v22 }
 0x559   : > { %v3506_v7 = vand.u32 2147483648, %v11173_v24  ;;  %v3379_v32 = vsel %vm3378_vm9, %v11092_v5, %v3377_v9  ;;  %vm3501_vm15 = vweird.f32 %v6227_v21  ;;  %v3221_v60 = vsub.f32 1.5, %v3220_v26 }
 0x55a   : > { %v3498_v12 = vmul.f32 %v6227_v21, %v3497_v23  ;;  %v11217_v29 = vsel %vm3380_vm10, %v3381_v1, %v3379_v32  ;;  %v3237_v3 = vsel %vm3236_vm14, %v6225_v36, %v3233_v63  ;;  %vm3239_vm0 = vcmp.eq.f32.partialorder %v3238_v58, 8.507059e+37 }
 0x55b   : > { %6230 = vrcp.f32 %v11217_v29  ;;  %v11222_v38 = vmax.f32 %v3444_v18, 0.0  ;;  %v3242_v39 = vsel %vm3239_vm0, %v3241_v20, %v3237_v3  ;;  %vm3500_vm1 = vweird.f32 %v11173_v24 }
 0x55c   : > { %v11219_v45 = vpop.eup %6228  ;;  %6232 = vlog2.f32 %v3147_v53  ;;  %v3499_v46 = vadd.f32 %v6227_v21, %v3498_v12  ;;  %v3197_v56 = vsub.f32 1.5, %v11096_v37  ;;  %v3243_v5 = vmul.f32 %v3242_v39, %v11111_v15  ;;  %vm3502_vm2 = vmor %vm3500_vm1, %vm3501_vm15 }
 0x55d   : > { %6234 = vlog2.f32 %v3413_v14  ;;  %v3507_v17 = vor.u32 1.1754944e-38, %v3506_v7  ;;  %vm3505_vm3 = vcmp.eq.f32.partialorder %v3504_v11, 8.507059e+37  ;;  %v3133_v10 = vmul.f32 %v11219_v45, %v11196_v27 }
 0x55e   : > { %v3503_v62 = vsel %vm3502_vm2, %v6227_v21, %v3499_v46  ;;  %v3222_v31 = vmul.f32 %v11175_v59, %v3221_v60  ;;  %v3458_v24 = vsel %vm3456_vm11, %v3457_v54, %v11127_v44  ;;  %v3259_v37 = vadd.f32 2e-08, %v3243_v5 }
 0x55f   : > { %v3508_v57 = vsel %vm3505_vm3, %v3507_v17, %v3503_v62  ;;  %6236 = vrsqrt.f32 %v11222_v38  ;;  %v3460_v15 = vmul.f32 %v11047_v41, %v11006_v16  ;;  %v3198_v59 = vmul.f32 %v11023_v0, %v3197_v56 }
 0x560   : > { %v3509_v48 = vmul.f32 %v3508_v57, %v3458_v24  ;;  %v3223_v50 = vmul.f32 %v3222_v31, %v11135_v28  ;;  %6238 = vlog2.f32 %v3259_v37  ;;  %v3134_v51 = vsub.f32 1.0, %v3133_v10 }
 0x561   : > { %v11240_v36 = vpop.eup %6230  ;;  %vm3224_vm4 = vcmp.eq.f32.partialorder %v11135_v28, inf  ;;  %v3227_v8 = vand.u32 2147483648, %v11135_v28  ;;  %v3087_v44 = vmul.f32 %v11014_v4, %v10894_v33  ;;  %v3352_v52 = vmul.f32 %v10986_v61, %v3351_v49 }
 0x562   : > { %v6233_v2 = vpop.eup %6232  ;;  %v3525_v30 = vadd.f32 2e-08, %v3509_v48  ;;  %v3225_v35 = vsel %vm3224_vm4, %v11135_v28, %v3223_v50  ;;  %vm3226_vm5 = vcmp.eq.f32.partialorder %v11135_v28, 0.0  ;;  %v3461_v0 = vmul.f32 %v11047_v41, %v3460_v15 }
 0x563   : > { %v6235_v54 = vpop.eup %6234  ;;  %v3399_v19 = vmul.f32 %v11240_v36, %v11217_v29  ;;  %v11255_v6 = vsel %vm3226_vm5, %v3227_v8, %v3225_v35  ;;  %vm3088_vm6 = vcmp.eq.f32.partialorder %v10894_v33, inf  ;;  %v3199_v4 = vmul.f32 %v3198_v59, %v10979_v43 }
 0x564   : > { %6240 = vlog2.f32 %v3525_v30  ;;  %v3150_v40 = vmul.f32 0.6931472, %v6233_v2  ;;  %v3091_v61 = vand.u32 2147483648, %v10894_v33  ;;  %v3416_v49 = vmul.f32 0.6931472, %v6235_v54 }
 0x565   : > { %v6237_v42 = vpop.eup %6236  ;;  %6242 = vrcp.f32 %v11255_v6  ;;  %v3135_v28 = vmul.f32 %v11219_v45, %v3134_v51  ;;  %v11264_v55 = vsel %vm3088_vm6, %v10894_v33, %v3087_v44  ;;  %vm3200_vm7 = vcmp.eq.f32.partialorder %v10979_v43, inf }
 0x566   : > { %v3484_v47 = vmul.f32 %v6237_v42, %v11222_v38  ;;  %v6239_v21 = vpop.eup %6238  ;;  %v3141_v34 = vand.u32 2147483647, %v11196_v27  ;;  %v3143_v1 = vand.u32 2147483648, %v11196_v27  ;;  %v11270_v58 = vmul.f32 %v3352_v52, %v10945_v13 }
 0x567   : > { %v11272_v25 = vmul.f32 0.5, %v3461_v0  ;;  %v3262_v18 = vmul.f32 0.6931472, %v6239_v21  ;;  %v3400_v22 = vsub.f32 1.0, %v3399_v19  ;;  %v11275_v9 = vsel %vm3200_vm7, %v10979_v43, %v3199_v4 }
 0x568   : > { %v3153_v26 = vmul.f32 0.4342945, %v3150_v40  ;;  %vm3137_vm8 = vweird.f32 %v11196_v27  ;;  %v3485_v53 = vmul.f32 %v6237_v42, %v3484_v47  ;;  %v3419_v23 = vmul.f32 0.4342945, %v3416_v49 }
 0x569   : > { %vm3539_vm9 = vcmask 7168   ;;  %v3265_v11 = vmul.f32 0.4342945, %v3262_v18  ;;  %v3136_v14 = vadd.f32 %v11219_v45, %v3135_v28  ;;  %vm3138_vm10 = vweird.f32 %v11219_v45 }
 0x56a   : > { %v6241_v20 = vpop.eup %6240  ;;  %vm11280_vm11 = vcmp.eq.f32.partialorder %v3141_v34, 8.507059e+37  ;;  %v3144_v12 = vor.u32 1.1754944e-38, %v3143_v1  ;;  %v3486_v60 = vmul.f32 0.5, %v3485_v53  ;;  %v3401_v39 = vmul.f32 %v11240_v36, %v3400_v22  ;;  %vm11291_vm15 = vmor %vm3137_vm8, %vm3138_vm10 }
 0x56b   : > { %v6243_v63 = vpop.eup %6242  ;;  %v3528_v7 = vmul.f32 0.6931472, %v6241_v20  ;;  %v3267_v3 = vmul.f32 20.0, %v3265_v11  ;;  %vm3403_vm12 = vweird.f32 %v11217_v29  ;;  %vm3090_vm13 = vcmp.eq.f32.partialorder %v10894_v33, 0.0 }
 0x56c   : > { %v3245_v46 = vmul.f32 %v6243_v63, %v11255_v6  ;;  %vm3354_vm14 = vcmp.eq.f32.partialorder %v10945_v13, inf  ;;  %v3155_v56 = vmul.f32 20.0, %v3153_v26  ;;  %v3407_v62 = vand.u32 2147483647, %v11217_v29 }
 0x56d   : > { %v3531_v5 = vmul.f32 0.4342945, %v3528_v7  ;;  %v3487_v10 = vsub.f32 1.5, %v3486_v60  ;;  %vm3202_vm0 = vcmp.eq.f32.partialorder %v10979_v43, 0.0  ;;  %v3421_v31 = vmul.f32 20.0, %v3419_v23 }
 0x56e   : > { %v3140_v24 = vsel %vm11291_vm15, %v11219_v45, %v3136_v14  ;;  %vm3404_vm1 = vweird.f32 %v11240_v36  ;;  %v3246_v37 = vsub.f32 1.0, %v3245_v46  ;;  %v3269_v57 = vadd.f32 %v3267_v3, %v3155_v56 }
 0x56f   : > { %v3533_v15 = vmul.f32 20.0, %v3531_v5  ;;  %v3255_v27 = vand.u32 2147483648, %v11255_v6  ;;  %v3488_v48 = vmul.f32 %v6237_v42, %v3487_v10  ;;  %v3402_v50 = vadd.f32 %v11240_v36, %v3401_v39  ;;  %vm11309_vm4 = vmor %vm3403_vm12, %vm3404_vm1 }
 0x570   : > { %v3247_v59 = vmul.f32 %v6243_v63, %v3246_v37  ;;  %vm3250_vm2 = vweird.f32 %v6243_v63  ;;  %v3253_v2 = vand.u32 2147483647, %v11255_v6  ;;  %v3409_v51 = vand.u32 2147483648, %v11217_v29 }
 0x571   : > { %v3535_v30 = vadd.f32 %v3533_v15, %v3421_v31  ;;  %v3489_v8 = vmul.f32 %v3488_v48, %v11222_v38  ;;  %vm3490_vm3 = vcmp.eq.f32.partialorder %v11222_v38, inf  ;;  %vm3249_vm5 = vweird.f32 %v11255_v6 }
 0x572   : > { %v3248_v54 = vadd.f32 %v6243_v63, %v3247_v59  ;;  %vm3492_vm6 = vcmp.eq.f32.partialorder %v11222_v38, 0.0  ;;  %v3493_v44 = vand.u32 2147483648, %v11222_v38  ;;  %v3145_v35 = vsel %vm11280_vm11, %v3144_v12, %v3140_v24  ;;  %vm3251_vm7 = vmor %vm3249_vm5, %vm3250_vm2 }
 0x573   : > { %v3537_v52 = vmax.f32 %v3269_v57, %v3535_v30  ;;  %v3256_v0 = vor.u32 1.1754944e-38, %v3255_v27  ;;  %v3491_v29 = vsel %vm3490_vm3, %v11222_v38, %v3489_v8  ;;  %v3406_v19 = vsel %vm11309_vm4, %v11240_v36, %v3402_v50 }
 0x574   : > { %v3252_v42 = vsel %vm3251_vm7, %v6243_v63, %v3248_v54  ;;  %vm3254_vm8 = vcmp.eq.f32.partialorder %v3253_v2, 8.507059e+37  ;;  %v3494_v4 = vsel %vm3492_vm6, %v3493_v44, %v3491_v29  ;;  %v3203_v6 = vand.u32 2147483648, %v10979_v43 }
 0x575   : > { %3540 = vst.msk [vmem:[%s9622_s30] sm:$0xff] %vm3539_vm9, %v3537_v52  ;;  %v3410_v40 = vor.u32 1.1754944e-38, %v3409_v51  ;;  %v3257_v49 = vsel %vm3254_vm8, %v3256_v0, %v3252_v42  ;;  %6244 = vrcp.f32 %v3494_v4  ;;  %v3092_v38 = vsel %vm3090_vm13, %v3091_v61, %v11264_v55 }
 0x576   : > { %v3355_v36 = vsel %vm3354_vm14, %v10945_v13, %v11270_v58  ;;  %v3463_v28 = vsub.f32 1.5, %v11272_v25  ;;  %vm3408_vm10 = vcmp.eq.f32.partialorder %v3407_v62, 8.507059e+37  ;;  %v3357_v47 = vand.u32 2147483648, %v10945_v13 }
 0x577   : > { %v3204_v21 = vsel %vm3202_vm0, %v3203_v6, %v11275_v9  ;;  %v3146_v34 = vmul.f32 %v3145_v35, %v3092_v38  ;;  %v3411_v1 = vsel %vm3408_vm10, %v3410_v40, %v3406_v19  ;;  %vm3356_vm11 = vcmp.eq.f32.partialorder %v10945_v13, 0.0 }
 0x578   : > { %v3258_v33 = vmul.f32 %v3257_v49, %v3204_v21  ;;  %v3358_v61 = vsel %vm3356_vm11, %v3357_v47, %v3355_v36  ;;  %v3464_v55 = vmul.f32 %v11047_v41, %v3463_v28  ;;  %v3521_v43 = vand.u32 2147483648, %v3494_v4 }
 0x579   : > { %v3412_v18 = vmul.f32 %v3411_v1, %v3358_v61  ;;  %v3148_v58 = vadd.f32 2e-08, %v3146_v34  ;;  %v3519_v11 = vand.u32 2147483647, %v3494_v4  ;;  %vm3466_vm13 = vcmp.eq.f32.partialorder %v11006_v16, inf }
 0x57a   : > { %v3260_v26 = vadd.f32 2e-08, %v3258_v33  ;;  %v3465_v53 = vmul.f32 %v3464_v55, %v11006_v16  ;;  %vm3515_vm14 = vweird.f32 %v3494_v4  ;;  %v3469_v14 = vand.u32 2147483648, %v11006_v16 }
 0x57b   : > { %v6245_v22 = vpop.eup %6244  ;;  %v3414_v20 = vadd.f32 2e-08, %v3412_v18  ;;  %6246 = vlog2.f32 %v3148_v58  ;;  %v3522_v63 = vor.u32 1.1754944e-38, %v3521_v43  ;;  %vm3468_vm0 = vcmp.eq.f32.partialorder %v11006_v16, 0.0 }
 0x57c   : > { %v3511_v25 = vmul.f32 %v6245_v22, %v3494_v4  ;;  %6248 = vlog2.f32 %v3260_v26  ;;  %vm3516_vm12 = vweird.f32 %v6245_v22  ;;  %v3467_v13 = vsel %vm3466_vm13, %v11006_v16, %v3465_v53 }
 0x57d   : > { %6250 = vlog2.f32 %v3414_v20  ;;  %vm3517_vm15 = vmor %vm3515_vm14, %vm3516_vm12  ;;  %vm3520_vm1 = vcmp.eq.f32.partialorder %v3519_v11, 8.507059e+37  ;;  %v3470_v12 = vsel %vm3468_vm0, %v3469_v14, %v3467_v13 }
 0x57e   : > { %v3512_v23 = vsub.f32 1.0, %v3511_v25 }
 0x580   : > { %v3513_v9 = vmul.f32 %v6245_v22, %v3512_v23 }
 0x581   : > { %v6247_v32 = vpop.eup %6246 }
 0x582   : > { %v3514_v41 = vadd.f32 %v6245_v22, %v3513_v9  ;;  %v6249_v3 = vpop.eup %6248  ;;  %v3152_v5 = vmul.f32 0.6931472, %v6247_v32 }
 0x583   : > { %v6251_v46 = vpop.eup %6250  ;;  %v3264_v17 = vmul.f32 0.6931472, %v6249_v3 }
 0x584   : > { %v3518_v7 = vsel %vm3517_vm15, %v6245_v22, %v3514_v41  ;;  %v3418_v62 = vmul.f32 0.6931472, %v6251_v46  ;;  %v3154_v10 = vmul.f32 0.4342945, %v3152_v5 }
 0x585   : > { %v3523_v60 = vsel %vm3520_vm1, %v3522_v63, %v3518_v7  ;;  %v3266_v31 = vmul.f32 0.4342945, %v3264_v17 }
 0x586   : > { %v3524_v39 = vmul.f32 %v3523_v60, %v3470_v12  ;;  %v3420_v24 = vmul.f32 0.4342945, %v3418_v62  ;;  %v3156_v57 = vmul.f32 20.0, %v3154_v10 }
 0x587   : > { %v3268_v16 = vmul.f32 20.0, %v3266_v31 }
 0x588   : > { %v3526_v56 = vadd.f32 2e-08, %v3524_v39  ;;  %v3422_v27 = vmul.f32 20.0, %v3420_v24 }
 0x589   : > { %v3270_v50 = vadd.f32 %v3268_v16, %v3156_v57 }
 0x58a   : > { %6252 = vlog2.f32 %v3526_v56 }
 0x590   : > { %v6253_v37 = vpop.eup %6252 }
 0x591   : > { %v3530_v15 = vmul.f32 0.6931472, %v6253_v37 }
 0x593   : > { %v3532_v48 = vmul.f32 0.4342945, %v3530_v15 }
 0x595   : > { %v3534_v59 = vmul.f32 20.0, %v3532_v48 }
 0x597   : > { %v3536_v2 = vadd.f32 %v3534_v59, %v3422_v27 }
 0x599   : > { %v3538_v30 = vmax.f32 %v3270_v50, %v3536_v2 }
 0x59b   : > { %3541 = vst.msk [vmem:[%s9622_s30 + $0x8] sm:$0xff] %vm3539_vm9, %v3538_v30 }
 0x59c PF: > { %3548 = sbr.rel (!%p7597_p9) target bundleno = 1485 (0x5cd), region = 333  ;;  %s11663_s2 = sld [smem:[#allocation11_spill]] (%p7597_p9) }
 0x59d   : > { %s11664_s6 = sld [smem:[#allocation32_spill]] (%p7597_p9) }
 0x5a2   : > { %s4878_s27 = sshll.u32 %s11663_s2, 1  ;;  %s4921_s20 = sshll.u32 %s11663_s2, 4 }
 0x5a3   : > { %s3550_s16 = ssub.s32 3, %s4878_s27  ;;  %s11355_s5 = scalar_lea.vmem %s11664_s6, %s4921_s20  }
 0x5a4   : > { %p3551_p11 = scmp.lt.s32.totalorder %s3550_s16, 2 }
 0x5a6   : > { %s11828_s16 = smov (!%p3551_p11, %s3550_s16), 2 }
 0x5a7   : > { %s4879_s7 = sshll.u32 %s11828_s16, 3 }
 0x5a8   : > { %p4882_p12 = scmp.eq.s32.totalorder %s4879_s7, 0 }
 0x5a9   : > { %s11361_s28 = sshrl.u32 (!%p4882_p12), %s11828_s16, 1 }
 0x5aa   : > { %3559 = sbr.rel (%p4882_p12) target bundleno = 1485 (0x5cd), region = 337  ;;  %p4883_p9 = scmp.le.s32.totalorder (!%p4882_p12), %s11361_s28, 0 }
 0x5af   : > { %4538 = sbr.rel (%p4883_p9) target bundleno = 1468 (0x5bc), region = 893  ;;  %s7470_s29 = smov (!%p4883_p9), %s11355_s5  }
 0x5b0   : > { %s7474_s4 = smov (!%p4883_p9), %s9622_s30   ;;  %s7478_s17 = smov (!%p4883_p9), 0  }
 0x5b1   : > { %s7482_s12 = smov (!%p4883_p9), 0  }
 0x5b4 LB: >> { %v3624_v51 = vld [vmem:[%s7476_s4] sm:$0xff]  ;;  %v3626_v8 = vld [vmem:[%s7476_s4 + $0x8] sm:$0xff]  ;;  %s3628_s22 = sadd.s32 1, %s7480_s17  ;;  %s3618_s12 = sadd.s32 1, %s7484_s12   ;;  %s7484_s12 = sphi %s7482_s12, %s3618_s12   ;;  %s7480_s17 = sphi %s7478_s17, %s7479_s17   ;;  %s7476_s4 = sphi %s7474_s4, %s3633_s4   ;;  %s7472_s29 = sphi %s7470_s29, %s3634_s29  }
 0x5b5   : >> { %3625 = vst [vmem:[%s7472_s29] sm:$0xff] %v3624_v51  ;;  %p3629_p10 = scmp.ge.s32.totalorder %s3628_s22, %s11361_s28  ;;  %p3617_p13 = scmp.ge.s32.totalorder %s3618_s12, %s11361_s28 }
 0x5b6   : >> { %3627 = vst [vmem:[%s7472_s29 + $0x8] sm:$0xff] %v3626_v8 }
 0x5b7   : >> { %s11830_s22 = smov (%p3629_p10, %s3628_s22), 0  ;;  %3620 = sbr.rel (!%p3617_p13) target bundleno = 1460 (0x5b4), region = 899 }
 0x5b8   : >> { %s4884_s13 = sshll.u32 %s11830_s22, 4  ;;  %s7479_s17 = smov %s11830_s22  }
 0x5b9   : >> { %s3633_s4 = scalar_lea.vmem %s9622_s30, %s4884_s13 [#allocation6]   ;;  %s3634_s29 = scalar_lea.vmem %s11355_s5, %s4884_s13  }
 0x5bc PF: > { %s11371_s0 = sand.u32 1, %s11828_s16   ;;  %s4922_s23 = sshll.u32 %s11361_s28, 4 }
 0x5bd   : > { %s3639_s9 = scalar_lea.vmem %s9622_s30, %s4922_s23 [#allocation6]   ;;  %s3641_s11 = scalar_lea.vmem %s11355_s5, %s4922_s23  }
 0x5be   : > { %p4889_p0 = scmp.le.s32.totalorder %s11371_s0, 0 }
 0x5bf   : > { %s7486_s26 = smov (!%p4889_p0), %s3641_s11   ;;  %s7490_s3 = smov (!%p4889_p0), %s3639_s9  }
 0x5c0   : > { %4552 = sbr.rel (%p4889_p0) target bundleno = 1485 (0x5cd), region = 904  ;;  %s7494_s8 = smov (!%p4889_p0), 0  }
 0x5c1   : > { %s7498_s25 = smov (!%p4889_p0), 0  }
 0x5c5 LB: >> { %v3651_v45 = vld [vmem:[%s7492_s3] sm:$0xff]  ;;  %s3653_s10 = sadd.s32 1, %s7496_s8  ;;  %s3645_s25 = sadd.s32 1, %s7500_s25   ;;  %s7500_s25 = sphi %s7498_s25, %s3645_s25   ;;  %s7496_s8 = sphi %s7494_s8, %s7495_s8   ;;  %s7492_s3 = sphi %s7490_s3, %s3658_s3   ;;  %s7488_s26 = sphi %s7486_s26, %s3659_s26  }
 0x5c6   : >> { %3652 = vst [vmem:[%s7488_s26] sm:$0xff] %v3651_v45  ;;  %p3654_p4 = scmp.ge.s32.totalorder %s3653_s10, %s11371_s0  ;;  %p3644_p2 = scmp.ge.s32.totalorder %s3645_s25, %s11371_s0 }
 0x5c8   : >> { %s11832_s10 = smov (%p3654_p4, %s3653_s10), 0  ;;  %3647 = sbr.rel (!%p3644_p2) target bundleno = 1477 (0x5c5), region = 910 }
 0x5c9   : >> { %s4890_s30 = sshll.u32 %s11832_s10, 3  ;;  %s7495_s8 = smov %s11832_s10  }
 0x5ca   : >> { %s3658_s3 = scalar_lea.vmem %s3639_s9, %s4890_s30 [#allocation6]   ;;  %s3659_s26 = scalar_lea.vmem %s3641_s11, %s4890_s30  }
 0x5cd PF: > { %s11665_s24 = sld [smem:[#allocation12_spill]]  ;;  %s11671_s14 = smov %s6892_s15 }
 0x5ce   : > { %s11666_s12 = sld [smem:[#allocation8_spill]]  ;;  %s11673_s16 = smov %s6904_s18 }
 0x5cf   : > { %s11667_s13 = sld [smem:[#allocation16_spill]]  ;;  %s11674_s17 = smov %s6908_s19 }
 0x5d0   : > { %s11668_s2 = sld [smem:[#allocation17_spill]] }
 0x5d1   : > { %s11669_s27 = sld [smem:[#allocation13_spill]] }
 0x5d2   : > { %s11670_s21 = sld [smem:[#allocation14_spill]] }
 0x5d3   : > { %s13_s20 = sadd.s32 1, %s11665_s24  }
 0x5d4   : > { %p10_p1 = scmp.ge.s32.totalorder %s13_s20, 6  }
 0x5d6   : > { %s11672_s15 = smov %s11668_s2  ;;  %12 = sbr.rel (!%p10_p1) target bundleno = 9 (0x9), region = 921 }
 0x5d7   : > { %s11675_s18 = smov %s11669_s27 }
 0x5d8   : > { %s11676_s19 = smov %s11670_s21 }

</bundles_post_ra>
